<compile_context>
chip_gen: v5e
topology: v5e:2x2
jax: 0.10.0
libtpu: 0.0.40
codegen_flags: <defaults>
</compile_context>

<pallas_src>
import functools

import jax
import jax.numpy as jnp
from jax import lax
from jax.experimental import pallas as pl
from jax.experimental.pallas import tpu as pltpu


HP = 128            # internally padded hidden size (one lane tile)
OP = 128            # padded logit lane width
VMEM_LIMIT = 48 * 1024 * 1024


def _sigmoid(x):
    return 1.0 / (1.0 + jnp.exp(-x))


# ----------------------------------------------------------------------------
# Kernel 1: hoisted input projection for BOTH directions of one LSTM layer.
#   y[t, b, :] = x[t, b, :] @ [W_ih_f | W_ih_b] + [b_f | b_b]
# ----------------------------------------------------------------------------
def _xproj_kernel(x_ref, w_ref, b_ref, y_ref):
    # x_ref: (TS, Bp, Din)   time-major input tile
    # w_ref: (Din, 8*Hp)     concatenated fwd|bwd input weights (gate-padded)
    # b_ref: (1, 8*Hp)       concatenated biases (b_ih + b_hh per direction)
    # y_ref: (TS, Bp, 8*Hp)  gate pre-activations for both directions
    ts, bp, din = x_ref.shape
    g2 = w_ref.shape[1]
    x2d = x_ref[...].reshape(ts * bp, din)
    y = jnp.dot(x2d, w_ref[...], preferred_element_type=jnp.float32) + b_ref[...]
    y_ref[...] = y.reshape(ts, bp, g2)


def lstm_input_projection(x_tm, w_cat, b_cat, *, ts=None):
    S, Bp, Din = x_tm.shape
    G2 = w_cat.shape[1]
    ts = min(S, 256) if ts is None else min(ts, S)
    return pl.pallas_call(
        _xproj_kernel,
        out_shape=jax.ShapeDtypeStruct((S, Bp, G2), jnp.float32),
        grid=(pl.cdiv(S, ts),),
        in_specs=[
            pl.BlockSpec((ts, Bp, Din), lambda i: (i, 0, 0)),
            pl.BlockSpec((Din, G2), lambda i: (0, 0)),
            pl.BlockSpec((1, G2), lambda i: (0, 0)),
        ],
        out_specs=pl.BlockSpec((ts, Bp, G2), lambda i: (i, 0, 0)),
        compiler_params=pltpu.CompilerParams(
            dimension_semantics=("parallel",),
            vmem_limit_bytes=VMEM_LIMIT,
        ),
    )(x_tm, w_cat, b_cat)


# ----------------------------------------------------------------------------
# Kernel 2: fused bidirectional recurrence (serial over time, tiled over batch).
# PyTorch gate order: i, f, g, o.  One (TB, 2Hp) x (2Hp, 8Hp) matmul per step
# (block-diagonal W_hh serves both directions); h/c live in the loop carry.
# ----------------------------------------------------------------------------
def _bilstm_recurrence_kernel(xproj_ref, whh_ref, out_ref):
    # xproj_ref: (S, TB, 8*Hp)  precomputed x @ W_ih + b for both directions
    # whh_ref:   (2*Hp, 8*Hp)   block-diagonal [[W_hh_f, 0], [0, W_hh_b]]
    # out_ref:   (S, TB, 2*Hp)  [h_fwd | h_bwd] per (original) timestep
    S, TB, _ = xproj_ref.shape
    Hp = whh_ref.shape[0] // 2
    G = 4 * Hp

    def gates_to_hc(g, c_prev):
        i = _sigmoid(g[:, 0 * Hp:1 * Hp])
        f = _sigmoid(g[:, 1 * Hp:2 * Hp])
        gg = jnp.tanh(g[:, 2 * Hp:3 * Hp])
        o = _sigmoid(g[:, 3 * Hp:4 * Hp])
        c = f * c_prev + i * gg
        h = o * jnp.tanh(c)
        return h, c

    def step(t, carry):
        h_cat, c_f, c_b = carry
        rec = jnp.dot(h_cat, whh_ref[...], preferred_element_type=jnp.float32)
        x_f = xproj_ref[t]             # (TB, 8Hp): fwd gates in first 4Hp lanes
        x_b = xproj_ref[S - 1 - t]     # bwd gates in last 4Hp lanes
        h_f, c_f = gates_to_hc(x_f[:, :G] + rec[:, :G], c_f)
        h_b, c_b = gates_to_hc(x_b[:, G:] + rec[:, G:], c_b)
        # lane-aligned (TB, Hp)=(8,128) stores; backward half at reversed time
        out_ref[t, :, 0:Hp] = h_f
        out_ref[S - 1 - t, :, Hp:2 * Hp] = h_b
        return jnp.concatenate([h_f, h_b], axis=-1), c_f, c_b

    h0 = jnp.zeros((TB, 2 * Hp), jnp.float32)
    c0 = jnp.zeros((TB, Hp), jnp.float32)
    carry = (h0, c0, c0)
    if S <= 64:
        # Full unroll: straight-line code, h/c stay in vregs across all steps.
        for t in range(S):
            carry = step(t, carry)
    else:
        lax.fori_loop(0, S, step, carry)


def bilstm_layer_recurrence(xproj, whh_cat, *, tb=None):
    S, Bp, G2 = xproj.shape
    Hp = whh_cat.shape[0] // 2
    tb = min(Bp, 8) if tb is None else min(tb, Bp)
    return pl.pallas_call(
        _bilstm_recurrence_kernel,
        out_shape=jax.ShapeDtypeStruct((S, Bp, 2 * Hp), jnp.float32),
        grid=(Bp // tb,),
        in_specs=[
            pl.BlockSpec((S, tb, G2), lambda b: (0, b, 0)),
            pl.BlockSpec((2 * Hp, G2), lambda b: (0, 0)),
        ],
        out_specs=pl.BlockSpec((S, tb, 2 * Hp), lambda b: (0, b, 0)),
        compiler_params=pltpu.CompilerParams(
            dimension_semantics=("parallel",),   # independent batch tiles
            vmem_limit_bytes=VMEM_LIMIT,
        ),
    )(xproj, whh_cat)


# ----------------------------------------------------------------------------
# Kernel 3: attention scores (MXU) + masked softmax over time + context
# (leading-axis accumulation) + final linear (lane-padded output).
# ----------------------------------------------------------------------------
def _attn_fc_kernel(out_ref, mask_ref, aw_ref, ab_ref, fw_ref, fb_ref, logit_ref):
    # out_ref:   (S, TB, 2*Hp)  bi-LSTM outputs, time-major
    # mask_ref:  (S, TB, 1)     (text != 0) as float
    # aw_ref:    (2*Hp, 128)    attention weight in column 0, zeros elsewhere
    # ab_ref:    (1, 1)         attention bias
    # fw_ref:    (2*Hp, OP)     fc weight (transposed, lane-padded)
    # fb_ref:    (1, OP)        fc bias (lane-padded)
    # logit_ref: (TB, OP)
    S, TB, H2 = out_ref.shape
    AC = aw_ref.shape[1]
    out = out_ref[...]                                                  # (S,TB,H2)
    # attention scores on the MXU; real score lives in column 0
    sc = jnp.dot(out.reshape(S * TB, H2), aw_ref[...],
                 preferred_element_type=jnp.float32).reshape(S, TB, AC)
    scores = sc[:, :, 0:1] + ab_ref[...]                                # (S,TB,1)
    scores = jnp.where(mask_ref[...] == 0.0, jnp.float32(-1e10), scores)
    m = jnp.max(scores, axis=0, keepdims=True)                          # (1,TB,1)
    e = jnp.exp(scores - m)
    w = e / jnp.sum(e, axis=0, keepdims=True)                           # softmax over seq
    # context: accumulate over leading (time) axis -> plain VPU adds
    ctx = jnp.sum(w * out, axis=0)                                      # (TB, 2Hp)
    # dropout(ctx) is identity at inference time
    logit_ref[...] = (
        jnp.dot(ctx, fw_ref[...], preferred_element_type=jnp.float32) + fb_ref[...]
    )


def attention_fc(out_tm, mask_tm, aw_p, ab, fw_p, fb_p, *, tb=None):
    S, Bp, H2 = out_tm.shape
    Op = fw_p.shape[1]
    tb = min(Bp, 8) if tb is None else min(tb, Bp)
    return pl.pallas_call(
        _attn_fc_kernel,
        out_shape=jax.ShapeDtypeStruct((Bp, Op), jnp.float32),
        grid=(Bp // tb,),
        in_specs=[
            pl.BlockSpec((S, tb, H2), lambda b: (0, b, 0)),
            pl.BlockSpec((S, tb, 1), lambda b: (0, b, 0)),
            pl.BlockSpec((H2, 128), lambda b: (0, 0)),
            pl.BlockSpec((1, 1), lambda b: (0, 0)),
            pl.BlockSpec((H2, Op), lambda b: (0, 0)),
            pl.BlockSpec((1, Op), lambda b: (0, 0)),
        ],
        out_specs=pl.BlockSpec((tb, Op), lambda b: (b, 0)),
        compiler_params=pltpu.CompilerParams(
            dimension_semantics=("parallel",),
            vmem_limit_bytes=VMEM_LIMIT,
        ),
    )(out_tm, mask_tm, aw_p, ab, fw_p, fb_p)


# ----------------------------------------------------------------------------
# Parameter init (deterministic, synthetic, logical PyTorch-shaped) and the
# padding/fusion into the lane-aligned kernel layout.
# ----------------------------------------------------------------------------
def init_params(key, vocab_size, embedding_dim, hidden_dim, output_dim,
                n_layers, pad_idx):
    keys = jax.random.split(key, 3 + n_layers)
    emb = 0.1 * jax.random.normal(keys[0], (vocab_size, embedding_dim), jnp.float32)
    emb = emb.at[pad_idx].set(0.0)   # padding_idx row is zero-initialized

    bound = 1.0 / float(hidden_dim) ** 0.5

    def u(k, shape):
        return jax.random.uniform(k, shape, jnp.float32, -bound, bound)

    layers = []
    for l in range(n_layers):
        din = embedding_dim if l == 0 else 2 * hidden_dim
        lk = jax.random.split(keys[3 + l], 6)
        layers.append({
            "w_ih_f": u(lk[0], (din, 4 * hidden_dim)),          # weight_ih.T
            "w_hh_f": u(lk[1], (hidden_dim, 4 * hidden_dim)),   # weight_hh.T
            "b_f":    u(lk[2], (1, 4 * hidden_dim)),            # b_ih + b_hh
            "w_ih_b": u(lk[3], (din, 4 * hidden_dim)),
            "w_hh_b": u(lk[4], (hidden_dim, 4 * hidden_dim)),
            "b_b":    u(lk[5], (1, 4 * hidden_dim)),
        })

    ak = jax.random.split(keys[1], 2)
    fk = jax.random.split(keys[2], 2)
    return {
        "embedding": emb,
        "lstm": layers,
        "attn_w": 0.1 * jax.random.normal(ak[0], (2 * hidden_dim,), jnp.float32),
        "attn_b": 0.1 * jax.random.normal(ak[1], (), jnp.float32),
        "fc_w": 0.1 * jax.random.normal(fk[0], (2 * hidden_dim, output_dim), jnp.float32),
        "fc_b": 0.1 * jax.random.normal(fk[1], (output_dim,), jnp.float32),
    }


def _pad_gate_cols(w, h, hp):
    """(..., 4h) -> (..., 4hp): each gate's h columns land at offset g*hp."""
    pads = [(0, 0)] * (w.ndim - 1)
    blocks = [jnp.pad(w[..., g * h:(g + 1) * h], pads + [(0, hp - h)])
              for g in range(4)]
    return jnp.concatenate(blocks, axis=-1)


def _pad_bidir_rows(w, h, hp):
    """(2h, C) -> (2hp, C): fwd rows -> [0:h], bwd rows -> [hp:hp+h]."""
    top = jnp.pad(w[:h], ((0, hp - h), (0, 0)))
    bot = jnp.pad(w[h:], ((0, hp - h), (0, 0)))
    return jnp.concatenate([top, bot], axis=0)


def prepare_params(params, hidden_dim, output_dim):
    """Pad / fuse logical parameters into the lane-aligned kernel layout.

    All padded weight/bias entries are zero, which keeps the extra hidden
    units exactly zero through the recurrence -> identical math.
    """
    H, Hp, Op = hidden_dim, HP, OP
    layers = []
    for l, lp in enumerate(params["lstm"]):
        w_ih_f, w_ih_b = lp["w_ih_f"], lp["w_ih_b"]
        if l > 0:   # deeper layers consume the padded (2*Hp) bidirectional output
            w_ih_f = _pad_bidir_rows(w_ih_f, H, Hp)
            w_ih_b = _pad_bidir_rows(w_ih_b, H, Hp)
        w_ih_f = _pad_gate_cols(w_ih_f, H, Hp)
        w_ih_b = _pad_gate_cols(w_ih_b, H, Hp)
        wih_cat = jnp.concatenate([w_ih_f, w_ih_b], axis=1)             # (Din, 8Hp)
        b_cat = jnp.concatenate([_pad_gate_cols(lp["b_f"], H, Hp),
                                 _pad_gate_cols(lp["b_b"], H, Hp)], axis=1)

        whh_f = _pad_gate_cols(jnp.pad(lp["w_hh_f"], ((0, Hp - H), (0, 0))), H, Hp)
        whh_b = _pad_gate_cols(jnp.pad(lp["w_hh_b"], ((0, Hp - H), (0, 0))), H, Hp)
        whh_cat = jnp.zeros((2 * Hp, 8 * Hp), jnp.float32)
        whh_cat = whh_cat.at[:Hp, :4 * Hp].set(whh_f)                   # block diag
        whh_cat = whh_cat.at[Hp:, 4 * Hp:].set(whh_b)
        layers.append({"wih_cat": wih_cat, "b_cat": b_cat, "whh_cat": whh_cat})

    aw = _pad_bidir_rows(params["attn_w"][:, None], H, Hp)              # (2Hp, 1)
    aw_p = jnp.pad(aw, ((0, 0), (0, 127)))                              # (2Hp, 128)
    ab = params["attn_b"].reshape(1, 1)

    fw_p = _pad_bidir_rows(params["fc_w"], H, Hp)                       # (2Hp, O)
    fw_p = jnp.pad(fw_p, ((0, 0), (0, Op - output_dim)))                # (2Hp, Op)
    fb_p = jnp.pad(params["fc_b"][None, :], ((0, 0), (0, Op - output_dim)))

    return {"embedding": params["embedding"], "lstm": layers,
            "aw_p": aw_p, "ab": ab, "fw_p": fw_p, "fb_p": fb_p}


# ----------------------------------------------------------------------------
# Full forward pass
# ----------------------------------------------------------------------------
def bilstm_attention_forward(text, kparams, output_dim):
    B, S = text.shape
    Bp = ((B + 7) // 8) * 8
    text_p = jnp.pad(text, ((0, Bp - B), (0, 0)))       # pad rows = token 0
    text_t = jnp.transpose(text_p, (1, 0))              # (S, Bp) time-major ids

    # Embedding lookup (gather) -- plain-JAX glue; already time-major, so no
    # activation transposes anywhere downstream.
    x = kparams["embedding"][text_t]                    # (S, Bp, E)

    for layer in kparams["lstm"]:
        xproj = lstm_input_projection(x, layer["wih_cat"], layer["b_cat"])
        x = bilstm_layer_recurrence(xproj, layer["whh_cat"])   # (S, Bp, 2*Hp)
        # inter-layer dropout is identity at inference

    mask = (text_t != 0).astype(jnp.float32)[:, :, None]       # (S, Bp, 1)
    logits_p = attention_fc(x, mask, kparams["aw_p"], kparams["ab"],
                            kparams["fw_p"], kparams["fb_p"])  # (Bp, OP)
    return logits_p[:B, :output_dim]


if __name__ == "__main__":
    VOCAB, EMB, HID, OUT, NLAYERS, PAD = 50, 16, 32, 2, 1, 0
    B, S = 2, 8

    key = jax.random.PRNGKey(0)
    pkey, tkey = jax.random.split(key)
    params = init_params(pkey, VOCAB, EMB, HID, OUT, NLAYERS, PAD)
    kparams = prepare_params(params, HID, OUT)

    text = jax.random.randint(tkey, (B, S), 1, VOCAB, dtype=jnp.int32)
    text = text.at[:, -2:].set(0)   # trailing padding tokens

    fwd = jax.jit(functools.partial(bilstm_attention_forward, output_dim=OUT))
    logits = fwd(text, kparams)
    jax.block_until_ready(logits)
    assert logits.shape == (B, OUT) and logits.dtype == jnp.float32
    print("KERNEL_OK")
</pallas_src>

<mosaic_0001>
module attributes {stable_mosaic.version = 11 : i64} {
  func.func @_xproj_kernel(%arg0: i32, %arg1: memref<8x8x16xf32, #tpu.memory_space<vmem>>, %arg2: memref<16x1024xf32, #tpu.memory_space<vmem>>, %arg3: memref<1x1024xf32, #tpu.memory_space<vmem>>, %arg4: memref<8x8x1024xf32, #tpu.memory_space<vmem>>) attributes {dimension_semantics = [#tpu.dimension_semantics<parallel>], iteration_bounds = array<i64: 1>, scalar_prefetch = 0 : i64, scratch_operands = 0 : i64, tpu.core_type = #tpu.core_type<tc>, window_params = [{transform_indices = @transform_0, window_bounds = array<i64: 8, 8, 16>}, {pipeline_mode = #tpu.pipeline_mode<synchronous>, transform_indices = @transform_1, window_bounds = array<i64: 16, 1024>}, {pipeline_mode = #tpu.pipeline_mode<synchronous>, transform_indices = @transform_2, window_bounds = array<i64: 1, 1024>}, {transform_indices = @transform_3, window_bounds = array<i64: 8, 8, 1024>}]} {
    %c0 = arith.constant 0 : index
    %c0_0 = arith.constant 0 : index
    %c0_1 = arith.constant 0 : index
    %0 = vector.load %arg1[%c0, %c0_0, %c0_1] : memref<8x8x16xf32, #tpu.memory_space<vmem>>, vector<8x8x16xf32>
    %1 = vector.shape_cast %0 : vector<8x8x16xf32> to vector<64x16xf32>
    %c0_2 = arith.constant 0 : index
    %c0_3 = arith.constant 0 : index
    %2 = vector.load %arg2[%c0_2, %c0_3] : memref<16x1024xf32, #tpu.memory_space<vmem>>, vector<16x1024xf32>
    %cst = arith.constant dense<0.000000e+00> : vector<64x1024xf32>
    %3 = tpu.matmul %1, %2, %cst {dimension_numbers = #tpu.dot_dimension_numbers<[1], [0], [0], [1], [0, 0, 1, 1], [], []>} : vector<64x16xf32>, vector<16x1024xf32>, vector<64x1024xf32> -> vector<64x1024xf32>
    %c0_4 = arith.constant 0 : index
    %c0_5 = arith.constant 0 : index
    %4 = vector.load %arg3[%c0_4, %c0_5] : memref<1x1024xf32, #tpu.memory_space<vmem>>, vector<1x1024xf32>
    %5 = vector.broadcast %4 : vector<1x1024xf32> to vector<64x1024xf32>
    %6 = arith.addf %3, %5 : vector<64x1024xf32>
    %7 = vector.shape_cast %6 : vector<64x1024xf32> to vector<8x8x1024xf32>
    %c0_6 = arith.constant 0 : index
    %c0_7 = arith.constant 0 : index
    %c0_8 = arith.constant 0 : index
    %8 = vector.load %arg4[%c0_6, %c0_7, %c0_8] : memref<8x8x1024xf32, #tpu.memory_space<vmem>>, vector<8x8x1024xf32>
    tpu.vector_store %arg4[%c0_6, %c0_7, %c0_8], %7 {strides = array<i32>} : memref<8x8x1024xf32, #tpu.memory_space<vmem>>, vector<8x8x1024xf32>,
    return
  }
  func.func @transform_0(%arg0: i32) -> (i32, i32, i32) {
    %c0_i32 = arith.constant 0 : i32
    %c0_i32_0 = arith.constant 0 : i32
    %c0_i32_1 = arith.constant 0 : i32
    return %arg0, %c0_i32, %c0_i32_0 : i32, i32, i32
  }
  func.func @transform_1(%arg0: i32) -> (i32, i32) {
    %c0_i32 = arith.constant 0 : i32
    %c0_i32_0 = arith.constant 0 : i32
    %c0_i32_1 = arith.constant 0 : i32
    return %c0_i32, %c0_i32_0 : i32, i32
  }
  func.func @transform_2(%arg0: i32) -> (i32, i32) {
    %c0_i32 = arith.constant 0 : i32
    %c0_i32_0 = arith.constant 0 : i32
    %c0_i32_1 = arith.constant 0 : i32
    return %c0_i32, %c0_i32_0 : i32, i32
  }
  func.func @transform_3(%arg0: i32) -> (i32, i32, i32) {
    %c0_i32 = arith.constant 0 : i32
    %c0_i32_0 = arith.constant 0 : i32
    %c0_i32_1 = arith.constant 0 : i32
    return %arg0, %c0_i32, %c0_i32_0 : i32, i32, i32
  }
}

module attributes {stable_mosaic.version = 11 : i64} {
  func.func @_bilstm_recurrence_kernel(%arg0: i32, %arg1: memref<8x8x1024xf32, #tpu.memory_space<vmem>>, %arg2: memref<256x1024xf32, #tpu.memory_space<vmem>>, %arg3: memref<8x8x256xf32, #tpu.memory_space<vmem>>) attributes {dimension_semantics = [#tpu.dimension_semantics<parallel>], iteration_bounds = array<i64: 1>, scalar_prefetch = 0 : i64, scratch_operands = 0 : i64, tpu.core_type = #tpu.core_type<tc>, window_params = [{transform_indices = @transform_0, window_bounds = array<i64: 8, 8, 1024>}, {pipeline_mode = #tpu.pipeline_mode<synchronous>, transform_indices = @transform_1, window_bounds = array<i64: 256, 1024>}, {transform_indices = @transform_2, window_bounds = array<i64: 8, 8, 256>}]} {
    %cst = arith.constant 0.000000e+00 : f32
    %0 = vector.broadcast %cst : f32 to vector<8x256xf32>
    %cst_0 = arith.constant 0.000000e+00 : f32
    %1 = vector.broadcast %cst_0 : f32 to vector<8x128xf32>
    %c0 = arith.constant 0 : index
    %c0_1 = arith.constant 0 : index
    %2 = vector.load %arg2[%c0, %c0_1] : memref<256x1024xf32, #tpu.memory_space<vmem>>, vector<256x1024xf32>
    %cst_2 = arith.constant dense<0.000000e+00> : vector<8x1024xf32>
    %3 = tpu.matmul %0, %2, %cst_2 {dimension_numbers = #tpu.dot_dimension_numbers<[1], [0], [0], [1], [0, 0, 1, 1], [], []>} : vector<8x256xf32>, vector<256x1024xf32>, vector<8x1024xf32> -> vector<8x1024xf32>
    %c0_3 = arith.constant 0 : index
    %c0_4 = arith.constant 0 : index
    %c0_5 = arith.constant 0 : index
    %4 = vector.load %arg1[%c0_3, %c0_4, %c0_5] : memref<8x8x1024xf32, #tpu.memory_space<vmem>>, vector<1x8x1024xf32>
    %5 = vector.shape_cast %4 : vector<1x8x1024xf32> to vector<8x1024xf32>
    %c7 = arith.constant 7 : index
    %c0_6 = arith.constant 0 : index
    %c0_7 = arith.constant 0 : index
    %6 = vector.load %arg1[%c7, %c0_6, %c0_7] : memref<8x8x1024xf32, #tpu.memory_space<vmem>>, vector<1x8x1024xf32>
    %7 = vector.shape_cast %6 : vector<1x8x1024xf32> to vector<8x1024xf32>
    %8 = vector.extract_strided_slice %5 {offsets = [0, 0], sizes = [8, 512], strides = [1, 1]} : vector<8x1024xf32> to vector<8x512xf32>
    %9 = vector.extract_strided_slice %3 {offsets = [0, 0], sizes = [8, 512], strides = [1, 1]} : vector<8x1024xf32> to vector<8x512xf32>
    %10 = arith.addf %8, %9 : vector<8x512xf32>
    %11 = vector.extract_strided_slice %10 {offsets = [0, 0], sizes = [8, 128], strides = [1, 1]} : vector<8x512xf32> to vector<8x128xf32>
    %cst_8 = arith.constant 0.000000e+00 : f32
    %12 = vector.broadcast %cst_8 : f32 to vector<8x128xf32>
    %13 = arith.subf %12, %11 : vector<8x128xf32>
    %14 = math.exp %13 : vector<8x128xf32>
    %cst_9 = arith.constant 1.000000e+00 : f32
    %15 = vector.broadcast %cst_9 : f32 to vector<8x128xf32>
    %16 = arith.addf %15, %14 : vector<8x128xf32>
    %cst_10 = arith.constant 1.000000e+00 : f32
    %17 = vector.broadcast %cst_10 : f32 to vector<8x128xf32>
    %18 = arith.divf %17, %16 : vector<8x128xf32>
    %19 = vector.extract_strided_slice %10 {offsets = [0, 128], sizes = [8, 128], strides = [1, 1]} : vector<8x512xf32> to vector<8x128xf32>
    %cst_11 = arith.constant 0.000000e+00 : f32
    %20 = vector.broadcast %cst_11 : f32 to vector<8x128xf32>
    %21 = arith.subf %20, %19 : vector<8x128xf32>
    %22 = math.exp %21 : vector<8x128xf32>
    %cst_12 = arith.constant 1.000000e+00 : f32
    %23 = vector.broadcast %cst_12 : f32 to vector<8x128xf32>
    %24 = arith.addf %23, %22 : vector<8x128xf32>
    %cst_13 = arith.constant 1.000000e+00 : f32
    %25 = vector.broadcast %cst_13 : f32 to vector<8x128xf32>
    %26 = arith.divf %25, %24 : vector<8x128xf32>
    %27 = vector.extract_strided_slice %10 {offsets = [0, 256], sizes = [8, 128], strides = [1, 1]} : vector<8x512xf32> to vector<8x128xf32>
    %28 = math.tanh %27 : vector<8x128xf32>
    %29 = vector.extract_strided_slice %10 {offsets = [0, 384], sizes = [8, 128], strides = [1, 1]} : vector<8x512xf32> to vector<8x128xf32>
    %cst_14 = arith.constant 0.000000e+00 : f32
    %30 = vector.broadcast %cst_14 : f32 to vector<8x128xf32>
    %31 = arith.subf %30, %29 : vector<8x128xf32>
    %32 = math.exp %31 : vector<8x128xf32>
    %cst_15 = arith.constant 1.000000e+00 : f32
    %33 = vector.broadcast %cst_15 : f32 to vector<8x128xf32>
    %34 = arith.addf %33, %32 : vector<8x128xf32>
    %cst_16 = arith.constant 1.000000e+00 : f32
    %35 = vector.broadcast %cst_16 : f32 to vector<8x128xf32>
    %36 = arith.divf %35, %34 : vector<8x128xf32>
    %37 = arith.mulf %26, %1 : vector<8x128xf32>
    %38 = arith.mulf %18, %28 : vector<8x128xf32>
    %39 = arith.addf %37, %38 : vector<8x128xf32>
    %40 = math.tanh %39 : vector<8x128xf32>
    %41 = arith.mulf %36, %40 : vector<8x128xf32>
    %42 = vector.extract_strided_slice %7 {offsets = [0, 512], sizes = [8, 512], strides = [1, 1]} : vector<8x1024xf32> to vector<8x512xf32>
    %43 = vector.extract_strided_slice %3 {offsets = [0, 512], sizes = [8, 512], strides = [1, 1]} : vector<8x1024xf32> to vector<8x512xf32>
    %44 = arith.addf %42, %43 : vector<8x512xf32>
    %45 = vector.extract_strided_slice %44 {offsets = [0, 0], sizes = [8, 128], strides = [1, 1]} : vector<8x512xf32> to vector<8x128xf32>
    %cst_17 = arith.constant 0.000000e+00 : f32
    %46 = vector.broadcast %cst_17 : f32 to vector<8x128xf32>
    %47 = arith.subf %46, %45 : vector<8x128xf32>
    %48 = math.exp %47 : vector<8x128xf32>
    %cst_18 = arith.constant 1.000000e+00 : f32
    %49 = vector.broadcast %cst_18 : f32 to vector<8x128xf32>
    %50 = arith.addf %49, %48 : vector<8x128xf32>
    %cst_19 = arith.constant 1.000000e+00 : f32
    %51 = vector.broadcast %cst_19 : f32 to vector<8x128xf32>
    %52 = arith.divf %51, %50 : vector<8x128xf32>
    %53 = vector.extract_strided_slice %44 {offsets = [0, 128], sizes = [8, 128], strides = [1, 1]} : vector<8x512xf32> to vector<8x128xf32>
    %cst_20 = arith.constant 0.000000e+00 : f32
    %54 = vector.broadcast %cst_20 : f32 to vector<8x128xf32>
    %55 = arith.subf %54, %53 : vector<8x128xf32>
    %56 = math.exp %55 : vector<8x128xf32>
    %cst_21 = arith.constant 1.000000e+00 : f32
    %57 = vector.broadcast %cst_21 : f32 to vector<8x128xf32>
    %58 = arith.addf %57, %56 : vector<8x128xf32>
    %cst_22 = arith.constant 1.000000e+00 : f32
    %59 = vector.broadcast %cst_22 : f32 to vector<8x128xf32>
    %60 = arith.divf %59, %58 : vector<8x128xf32>
    %61 = vector.extract_strided_slice %44 {offsets = [0, 256], sizes = [8, 128], strides = [1, 1]} : vector<8x512xf32> to vector<8x128xf32>
    %62 = math.tanh %61 : vector<8x128xf32>
    %63 = vector.extract_strided_slice %44 {offsets = [0, 384], sizes = [8, 128], strides = [1, 1]} : vector<8x512xf32> to vector<8x128xf32>
    %cst_23 = arith.constant 0.000000e+00 : f32
    %64 = vector.broadcast %cst_23 : f32 to vector<8x128xf32>
    %65 = arith.subf %64, %63 : vector<8x128xf32>
    %66 = math.exp %65 : vector<8x128xf32>
    %cst_24 = arith.constant 1.000000e+00 : f32
    %67 = vector.broadcast %cst_24 : f32 to vector<8x128xf32>
    %68 = arith.addf %67, %66 : vector<8x128xf32>
    %cst_25 = arith.constant 1.000000e+00 : f32
    %69 = vector.broadcast %cst_25 : f32 to vector<8x128xf32>
    %70 = arith.divf %69, %68 : vector<8x128xf32>
    %71 = arith.mulf %60, %1 : vector<8x128xf32>
    %72 = arith.mulf %52, %62 : vector<8x128xf32>
    %73 = arith.addf %71, %72 : vector<8x128xf32>
    %74 = math.tanh %73 : vector<8x128xf32>
    %75 = arith.mulf %70, %74 : vector<8x128xf32>
    %c0_26 = arith.constant 0 : index
    %c0_27 = arith.constant 0 : index
    %c0_28 = arith.constant 0 : index
    %76 = vector.load %arg3[%c0_26, %c0_27, %c0_28] : memref<8x8x256xf32, #tpu.memory_space<vmem>>, vector<1x8x128xf32>
    %77 = vector.shape_cast %76 : vector<1x8x128xf32> to vector<8x128xf32>
    %78 = vector.shape_cast %41 : vector<8x128xf32> to vector<1x8x128xf32>
    tpu.vector_store %arg3[%c0_26, %c0_27, %c0_28], %78 {strides = array<i32>} : memref<8x8x256xf32, #tpu.memory_space<vmem>>, vector<1x8x128xf32>,
    %c7_29 = arith.constant 7 : index
    %c0_30 = arith.constant 0 : index
    %c128 = arith.constant 128 : index
    %79 = vector.load %arg3[%c7_29, %c0_30, %c128] : memref<8x8x256xf32, #tpu.memory_space<vmem>>, vector<1x8x128xf32>
    %80 = vector.shape_cast %79 : vector<1x8x128xf32> to vector<8x128xf32>
    %81 = vector.shape_cast %75 : vector<8x128xf32> to vector<1x8x128xf32>
    tpu.vector_store %arg3[%c7_29, %c0_30, %c128], %81 {strides = array<i32>} : memref<8x8x256xf32, #tpu.memory_space<vmem>>, vector<1x8x128xf32>,
    %82 = tpu.concatenate %41, %75 in 1 : vector<8x128xf32>, vector<8x128xf32> -> vector<8x256xf32>
    %c0_31 = arith.constant 0 : index
    %c0_32 = arith.constant 0 : index
    %83 = vector.load %arg2[%c0_31, %c0_32] : memref<256x1024xf32, #tpu.memory_space<vmem>>, vector<256x1024xf32>
    %cst_33 = arith.constant dense<0.000000e+00> : vector<8x1024xf32>
    %84 = tpu.matmul %82, %83, %cst_33 {dimension_numbers = #tpu.dot_dimension_numbers<[1], [0], [0], [1], [0, 0, 1, 1], [], []>} : vector<8x256xf32>, vector<256x1024xf32>, vector<8x1024xf32> -> vector<8x1024xf32>
    %c1 = arith.constant 1 : index
    %c0_34 = arith.constant 0 : index
    %c0_35 = arith.constant 0 : index
    %85 = vector.load %arg1[%c1, %c0_34, %c0_35] : memref<8x8x1024xf32, #tpu.memory_space<vmem>>, vector<1x8x1024xf32>
    %86 = vector.shape_cast %85 : vector<1x8x1024xf32> to vector<8x1024xf32>
    %c6 = arith.constant 6 : index
    %c0_36 = arith.constant 0 : index
    %c0_37 = arith.constant 0 : index
    %87 = vector.load %arg1[%c6, %c0_36, %c0_37] : memref<8x8x1024xf32, #tpu.memory_space<vmem>>, vector<1x8x1024xf32>
    %88 = vector.shape_cast %87 : vector<1x8x1024xf32> to vector<8x1024xf32>
    %89 = vector.extract_strided_slice %86 {offsets = [0, 0], sizes = [8, 512], strides = [1, 1]} : vector<8x1024xf32> to vector<8x512xf32>
    %90 = vector.extract_strided_slice %84 {offsets = [0, 0], sizes = [8, 512], strides = [1, 1]} : vector<8x1024xf32> to vector<8x512xf32>
    %91 = arith.addf %89, %90 : vector<8x512xf32>
    %92 = vector.extract_strided_slice %91 {offsets = [0, 0], sizes = [8, 128], strides = [1, 1]} : vector<8x512xf32> to vector<8x128xf32>
    %cst_38 = arith.constant 0.000000e+00 : f32
    %93 = vector.broadcast %cst_38 : f32 to vector<8x128xf32>
    %94 = arith.subf %93, %92 : vector<8x128xf32>
    %95 = math.exp %94 : vector<8x128xf32>
    %cst_39 = arith.constant 1.000000e+00 : f32
    %96 = vector.broadcast %cst_39 : f32 to vector<8x128xf32>
    %97 = arith.addf %96, %95 : vector<8x128xf32>
    %cst_40 = arith.constant 1.000000e+00 : f32
    %98 = vector.broadcast %cst_40 : f32 to vector<8x128xf32>
    %99 = arith.divf %98, %97 : vector<8x128xf32>
    %100 = vector.extract_strided_slice %91 {offsets = [0, 128], sizes = [8, 128], strides = [1, 1]} : vector<8x512xf32> to vector<8x128xf32>
    %cst_41 = arith.constant 0.000000e+00 : f32
    %101 = vector.broadcast %cst_41 : f32 to vector<8x128xf32>
    %102 = arith.subf %101, %100 : vector<8x128xf32>
    %103 = math.exp %102 : vector<8x128xf32>
    %cst_42 = arith.constant 1.000000e+00 : f32
    %104 = vector.broadcast %cst_42 : f32 to vector<8x128xf32>
    %105 = arith.addf %104, %103 : vector<8x128xf32>
    %cst_43 = arith.constant 1.000000e+00 : f32
    %106 = vector.broadcast %cst_43 : f32 to vector<8x128xf32>
    %107 = arith.divf %106, %105 : vector<8x128xf32>
    %108 = vector.extract_strided_slice %91 {offsets = [0, 256], sizes = [8, 128], strides = [1, 1]} : vector<8x512xf32> to vector<8x128xf32>
    %109 = math.tanh %108 : vector<8x128xf32>
    %110 = vector.extract_strided_slice %91 {offsets = [0, 384], sizes = [8, 128], strides = [1, 1]} : vector<8x512xf32> to vector<8x128xf32>
    %cst_44 = arith.constant 0.000000e+00 : f32
    %111 = vector.broadcast %cst_44 : f32 to vector<8x128xf32>
    %112 = arith.subf %111, %110 : vector<8x128xf32>
    %113 = math.exp %112 : vector<8x128xf32>
    %cst_45 = arith.constant 1.000000e+00 : f32
    %114 = vector.broadcast %cst_45 : f32 to vector<8x128xf32>
    %115 = arith.addf %114, %113 : vector<8x128xf32>
    %cst_46 = arith.constant 1.000000e+00 : f32
    %116 = vector.broadcast %cst_46 : f32 to vector<8x128xf32>
    %117 = arith.divf %116, %115 : vector<8x128xf32>
    %118 = arith.mulf %107, %39 : vector<8x128xf32>
    %119 = arith.mulf %99, %109 : vector<8x128xf32>
    %120 = arith.addf %118, %119 : vector<8x128xf32>
    %121 = math.tanh %120 : vector<8x128xf32>
    %122 = arith.mulf %117, %121 : vector<8x128xf32>
    %123 = vector.extract_strided_slice %88 {offsets = [0, 512], sizes = [8, 512], strides = [1, 1]} : vector<8x1024xf32> to vector<8x512xf32>
    %124 = vector.extract_strided_slice %84 {offsets = [0, 512], sizes = [8, 512], strides = [1, 1]} : vector<8x1024xf32> to vector<8x512xf32>
    %125 = arith.addf %123, %124 : vector<8x512xf32>
    %126 = vector.extract_strided_slice %125 {offsets = [0, 0], sizes = [8, 128], strides = [1, 1]} : vector<8x512xf32> to vector<8x128xf32>
    %cst_47 = arith.constant 0.000000e+00 : f32
    %127 = vector.broadcast %cst_47 : f32 to vector<8x128xf32>
    %128 = arith.subf %127, %126 : vector<8x128xf32>
    %129 = math.exp %128 : vector<8x128xf32>
    %cst_48 = arith.constant 1.000000e+00 : f32
    %130 = vector.broadcast %cst_48 : f32 to vector<8x128xf32>
    %131 = arith.addf %130, %129 : vector<8x128xf32>
    %cst_49 = arith.constant 1.000000e+00 : f32
    %132 = vector.broadcast %cst_49 : f32 to vector<8x128xf32>
    %133 = arith.divf %132, %131 : vector<8x128xf32>
    %134 = vector.extract_strided_slice %125 {offsets = [0, 128], sizes = [8, 128], strides = [1, 1]} : vector<8x512xf32> to vector<8x128xf32>
    %cst_50 = arith.constant 0.000000e+00 : f32
    %135 = vector.broadcast %cst_50 : f32 to vector<8x128xf32>
    %136 = arith.subf %135, %134 : vector<8x128xf32>
    %137 = math.exp %136 : vector<8x128xf32>
    %cst_51 = arith.constant 1.000000e+00 : f32
    %138 = vector.broadcast %cst_51 : f32 to vector<8x128xf32>
    %139 = arith.addf %138, %137 : vector<8x128xf32>
    %cst_52 = arith.constant 1.000000e+00 : f32
    %140 = vector.broadcast %cst_52 : f32 to vector<8x128xf32>
    %141 = arith.divf %140, %139 : vector<8x128xf32>
    %142 = vector.extract_strided_slice %125 {offsets = [0, 256], sizes = [8, 128], strides = [1, 1]} : vector<8x512xf32> to vector<8x128xf32>
    %143 = math.tanh %142 : vector<8x128xf32>
    %144 = vector.extract_strided_slice %125 {offsets = [0, 384], sizes = [8, 128], strides = [1, 1]} : vector<8x512xf32> to vector<8x128xf32>
    %cst_53 = arith.constant 0.000000e+00 : f32
    %145 = vector.broadcast %cst_53 : f32 to vector<8x128xf32>
    %146 = arith.subf %145, %144 : vector<8x128xf32>
    %147 = math.exp %146 : vector<8x128xf32>
    %cst_54 = arith.constant 1.000000e+00 : f32
    %148 = vector.broadcast %cst_54 : f32 to vector<8x128xf32>
    %149 = arith.addf %148, %147 : vector<8x128xf32>
    %cst_55 = arith.constant 1.000000e+00 : f32
    %150 = vector.broadcast %cst_55 : f32 to vector<8x128xf32>
    %151 = arith.divf %150, %149 : vector<8x128xf32>
    %152 = arith.mulf %141, %73 : vector<8x128xf32>
    %153 = arith.mulf %133, %143 : vector<8x128xf32>
    %154 = arith.addf %152, %153 : vector<8x128xf32>
    %155 = math.tanh %154 : vector<8x128xf32>
    %156 = arith.mulf %151, %155 : vector<8x128xf32>
    %c1_56 = arith.constant 1 : index
    %c0_57 = arith.constant 0 : index
    %c0_58 = arith.constant 0 : index
    %157 = vector.load %arg3[%c1_56, %c0_57, %c0_58] : memref<8x8x256xf32, #tpu.memory_space<vmem>>, vector<1x8x128xf32>
    %158 = vector.shape_cast %157 : vector<1x8x128xf32> to vector<8x128xf32>
    %159 = vector.shape_cast %122 : vector<8x128xf32> to vector<1x8x128xf32>
    tpu.vector_store %arg3[%c1_56, %c0_57, %c0_58], %159 {strides = array<i32>} : memref<8x8x256xf32, #tpu.memory_space<vmem>>, vector<1x8x128xf32>,
    %c6_59 = arith.constant 6 : index
    %c0_60 = arith.constant 0 : index
    %c128_61 = arith.constant 128 : index
    %160 = vector.load %arg3[%c6_59, %c0_60, %c128_61] : memref<8x8x256xf32, #tpu.memory_space<vmem>>, vector<1x8x128xf32>
    %161 = vector.shape_cast %160 : vector<1x8x128xf32> to vector<8x128xf32>
    %162 = vector.shape_cast %156 : vector<8x128xf32> to vector<1x8x128xf32>
    tpu.vector_store %arg3[%c6_59, %c0_60, %c128_61], %162 {strides = array<i32>} : memref<8x8x256xf32, #tpu.memory_space<vmem>>, vector<1x8x128xf32>,
    %163 = tpu.concatenate %122, %156 in 1 : vector<8x128xf32>, vector<8x128xf32> -> vector<8x256xf32>
    %c0_62 = arith.constant 0 : index
    %c0_63 = arith.constant 0 : index
    %164 = vector.load %arg2[%c0_62, %c0_63] : memref<256x1024xf32, #tpu.memory_space<vmem>>, vector<256x1024xf32>
    %cst_64 = arith.constant dense<0.000000e+00> : vector<8x1024xf32>
    %165 = tpu.matmul %163, %164, %cst_64 {dimension_numbers = #tpu.dot_dimension_numbers<[1], [0], [0], [1], [0, 0, 1, 1], [], []>} : vector<8x256xf32>, vector<256x1024xf32>, vector<8x1024xf32> -> vector<8x1024xf32>
    %c2 = arith.constant 2 : index
    %c0_65 = arith.constant 0 : index
    %c0_66 = arith.constant 0 : index
    %166 = vector.load %arg1[%c2, %c0_65, %c0_66] : memref<8x8x1024xf32, #tpu.memory_space<vmem>>, vector<1x8x1024xf32>
    %167 = vector.shape_cast %166 : vector<1x8x1024xf32> to vector<8x1024xf32>
    %c5 = arith.constant 5 : index
    %c0_67 = arith.constant 0 : index
    %c0_68 = arith.constant 0 : index
    %168 = vector.load %arg1[%c5, %c0_67, %c0_68] : memref<8x8x1024xf32, #tpu.memory_space<vmem>>, vector<1x8x1024xf32>
    %169 = vector.shape_cast %168 : vector<1x8x1024xf32> to vector<8x1024xf32>
    %170 = vector.extract_strided_slice %167 {offsets = [0, 0], sizes = [8, 512], strides = [1, 1]} : vector<8x1024xf32> to vector<8x512xf32>
    %171 = vector.extract_strided_slice %165 {offsets = [0, 0], sizes = [8, 512], strides = [1, 1]} : vector<8x1024xf32> to vector<8x512xf32>
    %172 = arith.addf %170, %171 : vector<8x512xf32>
    %173 = vector.extract_strided_slice %172 {offsets = [0, 0], sizes = [8, 128], strides = [1, 1]} : vector<8x512xf32> to vector<8x128xf32>
    %cst_69 = arith.constant 0.000000e+00 : f32
    %174 = vector.broadcast %cst_69 : f32 to vector<8x128xf32>
    %175 = arith.subf %174, %173 : vector<8x128xf32>
    %176 = math.exp %175 : vector<8x128xf32>
    %cst_70 = arith.constant 1.000000e+00 : f32
    %177 = vector.broadcast %cst_70 : f32 to vector<8x128xf32>
    %178 = arith.addf %177, %176 : vector<8x128xf32>
    %cst_71 = arith.constant 1.000000e+00 : f32
    %179 = vector.broadcast %cst_71 : f32 to vector<8x128xf32>
    %180 = arith.divf %179, %178 : vector<8x128xf32>
    %181 = vector.extract_strided_slice %172 {offsets = [0, 128], sizes = [8, 128], strides = [1, 1]} : vector<8x512xf32> to vector<8x128xf32>
    %cst_72 = arith.constant 0.000000e+00 : f32
    %182 = vector.broadcast %cst_72 : f32 to vector<8x128xf32>
    %183 = arith.subf %182, %181 : vector<8x128xf32>
    %184 = math.exp %183 : vector<8x128xf32>
    %cst_73 = arith.constant 1.000000e+00 : f32
    %185 = vector.broadcast %cst_73 : f32 to vector<8x128xf32>
    %186 = arith.addf %185, %184 : vector<8x128xf32>
    %cst_74 = arith.constant 1.000000e+00 : f32
    %187 = vector.broadcast %cst_74 : f32 to vector<8x128xf32>
    %188 = arith.divf %187, %186 : vector<8x128xf32>
    %189 = vector.extract_strided_slice %172 {offsets = [0, 256], sizes = [8, 128], strides = [1, 1]} : vector<8x512xf32> to vector<8x128xf32>
    %190 = math.tanh %189 : vector<8x128xf32>
    %191 = vector.extract_strided_slice %172 {offsets = [0, 384], sizes = [8, 128], strides = [1, 1]} : vector<8x512xf32> to vector<8x128xf32>
    %cst_75 = arith.constant 0.000000e+00 : f32
    %192 = vector.broadcast %cst_75 : f32 to vector<8x128xf32>
    %193 = arith.subf %192, %191 : vector<8x128xf32>
    %194 = math.exp %193 : vector<8x128xf32>
    %cst_76 = arith.constant 1.000000e+00 : f32
    %195 = vector.broadcast %cst_76 : f32 to vector<8x128xf32>
    %196 = arith.addf %195, %194 : vector<8x128xf32>
    %cst_77 = arith.constant 1.000000e+00 : f32
    %197 = vector.broadcast %cst_77 : f32 to vector<8x128xf32>
    %198 = arith.divf %197, %196 : vector<8x128xf32>
    %199 = arith.mulf %188, %120 : vector<8x128xf32>
    %200 = arith.mulf %180, %190 : vector<8x128xf32>
    %201 = arith.addf %199, %200 : vector<8x128xf32>
    %202 = math.tanh %201 : vector<8x128xf32>
    %203 = arith.mulf %198, %202 : vector<8x128xf32>
    %204 = vector.extract_strided_slice %169 {offsets = [0, 512], sizes = [8, 512], strides = [1, 1]} : vector<8x1024xf32> to vector<8x512xf32>
    %205 = vector.extract_strided_slice %165 {offsets = [0, 512], sizes = [8, 512], strides = [1, 1]} : vector<8x1024xf32> to vector<8x512xf32>
    %206 = arith.addf %204, %205 : vector<8x512xf32>
    %207 = vector.extract_strided_slice %206 {offsets = [0, 0], sizes = [8, 128], strides = [1, 1]} : vector<8x512xf32> to vector<8x128xf32>
    %cst_78 = arith.constant 0.000000e+00 : f32
    %208 = vector.broadcast %cst_78 : f32 to vector<8x128xf32>
    %209 = arith.subf %208, %207 : vector<8x128xf32>
    %210 = math.exp %209 : vector<8x128xf32>
    %cst_79 = arith.constant 1.000000e+00 : f32
    %211 = vector.broadcast %cst_79 : f32 to vector<8x128xf32>
    %212 = arith.addf %211, %210 : vector<8x128xf32>
    %cst_80 = arith.constant 1.000000e+00 : f32
    %213 = vector.broadcast %cst_80 : f32 to vector<8x128xf32>
    %214 = arith.divf %213, %212 : vector<8x128xf32>
    %215 = vector.extract_strided_slice %206 {offsets = [0, 128], sizes = [8, 128], strides = [1, 1]} : vector<8x512xf32> to vector<8x128xf32>
    %cst_81 = arith.constant 0.000000e+00 : f32
    %216 = vector.broadcast %cst_81 : f32 to vector<8x128xf32>
    %217 = arith.subf %216, %215 : vector<8x128xf32>
    %218 = math.exp %217 : vector<8x128xf32>
    %cst_82 = arith.constant 1.000000e+00 : f32
    %219 = vector.broadcast %cst_82 : f32 to vector<8x128xf32>
    %220 = arith.addf %219, %218 : vector<8x128xf32>
    %cst_83 = arith.constant 1.000000e+00 : f32
    %221 = vector.broadcast %cst_83 : f32 to vector<8x128xf32>
    %222 = arith.divf %221, %220 : vector<8x128xf32>
    %223 = vector.extract_strided_slice %206 {offsets = [0, 256], sizes = [8, 128], strides = [1, 1]} : vector<8x512xf32> to vector<8x128xf32>
    %224 = math.tanh %223 : vector<8x128xf32>
    %225 = vector.extract_strided_slice %206 {offsets = [0, 384], sizes = [8, 128], strides = [1, 1]} : vector<8x512xf32> to vector<8x128xf32>
    %cst_84 = arith.constant 0.000000e+00 : f32
    %226 = vector.broadcast %cst_84 : f32 to vector<8x128xf32>
    %227 = arith.subf %226, %225 : vector<8x128xf32>
    %228 = math.exp %227 : vector<8x128xf32>
    %cst_85 = arith.constant 1.000000e+00 : f32
    %229 = vector.broadcast %cst_85 : f32 to vector<8x128xf32>
    %230 = arith.addf %229, %228 : vector<8x128xf32>
    %cst_86 = arith.constant 1.000000e+00 : f32
    %231 = vector.broadcast %cst_86 : f32 to vector<8x128xf32>
    %232 = arith.divf %231, %230 : vector<8x128xf32>
    %233 = arith.mulf %222, %154 : vector<8x128xf32>
    %234 = arith.mulf %214, %224 : vector<8x128xf32>
    %235 = arith.addf %233, %234 : vector<8x128xf32>
    %236 = math.tanh %235 : vector<8x128xf32>
    %237 = arith.mulf %232, %236 : vector<8x128xf32>
    %c2_87 = arith.constant 2 : index
    %c0_88 = arith.constant 0 : index
    %c0_89 = arith.constant 0 : index
    %238 = vector.load %arg3[%c2_87, %c0_88, %c0_89] : memref<8x8x256xf32, #tpu.memory_space<vmem>>, vector<1x8x128xf32>
    %239 = vector.shape_cast %238 : vector<1x8x128xf32> to vector<8x128xf32>
    %240 = vector.shape_cast %203 : vector<8x128xf32> to vector<1x8x128xf32>
    tpu.vector_store %arg3[%c2_87, %c0_88, %c0_89], %240 {strides = array<i32>} : memref<8x8x256xf32, #tpu.memory_space<vmem>>, vector<1x8x128xf32>,
    %c5_90 = arith.constant 5 : index
    %c0_91 = arith.constant 0 : index
    %c128_92 = arith.constant 128 : index
    %241 = vector.load %arg3[%c5_90, %c0_91, %c128_92] : memref<8x8x256xf32, #tpu.memory_space<vmem>>, vector<1x8x128xf32>
    %242 = vector.shape_cast %241 : vector<1x8x128xf32> to vector<8x128xf32>
    %243 = vector.shape_cast %237 : vector<8x128xf32> to vector<1x8x128xf32>
    tpu.vector_store %arg3[%c5_90, %c0_91, %c128_92], %243 {strides = array<i32>} : memref<8x8x256xf32, #tpu.memory_space<vmem>>, vector<1x8x128xf32>,
    %244 = tpu.concatenate %203, %237 in 1 : vector<8x128xf32>, vector<8x128xf32> -> vector<8x256xf32>
    %c0_93 = arith.constant 0 : index
    %c0_94 = arith.constant 0 : index
    %245 = vector.load %arg2[%c0_93, %c0_94] : memref<256x1024xf32, #tpu.memory_space<vmem>>, vector<256x1024xf32>
    %cst_95 = arith.constant dense<0.000000e+00> : vector<8x1024xf32>
    %246 = tpu.matmul %244, %245, %cst_95 {dimension_numbers = #tpu.dot_dimension_numbers<[1], [0], [0], [1], [0, 0, 1, 1], [], []>} : vector<8x256xf32>, vector<256x1024xf32>, vector<8x1024xf32> -> vector<8x1024xf32>
    %c3 = arith.constant 3 : index
    %c0_96 = arith.constant 0 : index
    %c0_97 = arith.constant 0 : index
    %247 = vector.load %arg1[%c3, %c0_96, %c0_97] : memref<8x8x1024xf32, #tpu.memory_space<vmem>>, vector<1x8x1024xf32>
    %248 = vector.shape_cast %247 : vector<1x8x1024xf32> to vector<8x1024xf32>
    %c4 = arith.constant 4 : index
    %c0_98 = arith.constant 0 : index
    %c0_99 = arith.constant 0 : index
    %249 = vector.load %arg1[%c4, %c0_98, %c0_99] : memref<8x8x1024xf32, #tpu.memory_space<vmem>>, vector<1x8x1024xf32>
    %250 = vector.shape_cast %249 : vector<1x8x1024xf32> to vector<8x1024xf32>
    %251 = vector.extract_strided_slice %248 {offsets = [0, 0], sizes = [8, 512], strides = [1, 1]} : vector<8x1024xf32> to vector<8x512xf32>
    %252 = vector.extract_strided_slice %246 {offsets = [0, 0], sizes = [8, 512], strides = [1, 1]} : vector<8x1024xf32> to vector<8x512xf32>
    %253 = arith.addf %251, %252 : vector<8x512xf32>
    %254 = vector.extract_strided_slice %253 {offsets = [0, 0], sizes = [8, 128], strides = [1, 1]} : vector<8x512xf32> to vector<8x128xf32>
    %cst_100 = arith.constant 0.000000e+00 : f32
    %255 = vector.broadcast %cst_100 : f32 to vector<8x128xf32>
    %256 = arith.subf %255, %254 : vector<8x128xf32>
    %257 = math.exp %256 : vector<8x128xf32>
    %cst_101 = arith.constant 1.000000e+00 : f32
    %258 = vector.broadcast %cst_101 : f32 to vector<8x128xf32>
    %259 = arith.addf %258, %257 : vector<8x128xf32>
    %cst_102 = arith.constant 1.000000e+00 : f32
    %260 = vector.broadcast %cst_102 : f32 to vector<8x128xf32>
    %261 = arith.divf %260, %259 : vector<8x128xf32>
    %262 = vector.extract_strided_slice %253 {offsets = [0, 128], sizes = [8, 128], strides = [1, 1]} : vector<8x512xf32> to vector<8x128xf32>
    %cst_103 = arith.constant 0.000000e+00 : f32
    %263 = vector.broadcast %cst_103 : f32 to vector<8x128xf32>
    %264 = arith.subf %263, %262 : vector<8x128xf32>
    %265 = math.exp %264 : vector<8x128xf32>
    %cst_104 = arith.constant 1.000000e+00 : f32
    %266 = vector.broadcast %cst_104 : f32 to vector<8x128xf32>
    %267 = arith.addf %266, %265 : vector<8x128xf32>
    %cst_105 = arith.constant 1.000000e+00 : f32
    %268 = vector.broadcast %cst_105 : f32 to vector<8x128xf32>
    %269 = arith.divf %268, %267 : vector<8x128xf32>
    %270 = vector.extract_strided_slice %253 {offsets = [0, 256], sizes = [8, 128], strides = [1, 1]} : vector<8x512xf32> to vector<8x128xf32>
    %271 = math.tanh %270 : vector<8x128xf32>
    %272 = vector.extract_strided_slice %253 {offsets = [0, 384], sizes = [8, 128], strides = [1, 1]} : vector<8x512xf32> to vector<8x128xf32>
    %cst_106 = arith.constant 0.000000e+00 : f32
    %273 = vector.broadcast %cst_106 : f32 to vector<8x128xf32>
    %274 = arith.subf %273, %272 : vector<8x128xf32>
    %275 = math.exp %274 : vector<8x128xf32>
    %cst_107 = arith.constant 1.000000e+00 : f32
    %276 = vector.broadcast %cst_107 : f32 to vector<8x128xf32>
    %277 = arith.addf %276, %275 : vector<8x128xf32>
    %cst_108 = arith.constant 1.000000e+00 : f32
    %278 = vector.broadcast %cst_108 : f32 to vector<8x128xf32>
    %279 = arith.divf %278, %277 : vector<8x128xf32>
    %280 = arith.mulf %269, %201 : vector<8x128xf32>
    %281 = arith.mulf %261, %271 : vector<8x128xf32>
    %282 = arith.addf %280, %281 : vector<8x128xf32>
    %283 = math.tanh %282 : vector<8x128xf32>
    %284 = arith.mulf %279, %283 : vector<8x128xf32>
    %285 = vector.extract_strided_slice %250 {offsets = [0, 512], sizes = [8, 512], strides = [1, 1]} : vector<8x1024xf32> to vector<8x512xf32>
    %286 = vector.extract_strided_slice %246 {offsets = [0, 512], sizes = [8, 512], strides = [1, 1]} : vector<8x1024xf32> to vector<8x512xf32>
    %287 = arith.addf %285, %286 : vector<8x512xf32>
    %288 = vector.extract_strided_slice %287 {offsets = [0, 0], sizes = [8, 128], strides = [1, 1]} : vector<8x512xf32> to vector<8x128xf32>
    %cst_109 = arith.constant 0.000000e+00 : f32
    %289 = vector.broadcast %cst_109 : f32 to vector<8x128xf32>
    %290 = arith.subf %289, %288 : vector<8x128xf32>
    %291 = math.exp %290 : vector<8x128xf32>
    %cst_110 = arith.constant 1.000000e+00 : f32
    %292 = vector.broadcast %cst_110 : f32 to vector<8x128xf32>
    %293 = arith.addf %292, %291 : vector<8x128xf32>
    %cst_111 = arith.constant 1.000000e+00 : f32
    %294 = vector.broadcast %cst_111 : f32 to vector<8x128xf32>
    %295 = arith.divf %294, %293 : vector<8x128xf32>
    %296 = vector.extract_strided_slice %287 {offsets = [0, 128], sizes = [8, 128], strides = [1, 1]} : vector<8x512xf32> to vector<8x128xf32>
    %cst_112 = arith.constant 0.000000e+00 : f32
    %297 = vector.broadcast %cst_112 : f32 to vector<8x128xf32>
    %298 = arith.subf %297, %296 : vector<8x128xf32>
    %299 = math.exp %298 : vector<8x128xf32>
    %cst_113 = arith.constant 1.000000e+00 : f32
    %300 = vector.broadcast %cst_113 : f32 to vector<8x128xf32>
    %301 = arith.addf %300, %299 : vector<8x128xf32>
    %cst_114 = arith.constant 1.000000e+00 : f32
    %302 = vector.broadcast %cst_114 : f32 to vector<8x128xf32>
    %303 = arith.divf %302, %301 : vector<8x128xf32>
    %304 = vector.extract_strided_slice %287 {offsets = [0, 256], sizes = [8, 128], strides = [1, 1]} : vector<8x512xf32> to vector<8x128xf32>
    %305 = math.tanh %304 : vector<8x128xf32>
    %306 = vector.extract_strided_slice %287 {offsets = [0, 384], sizes = [8, 128], strides = [1, 1]} : vector<8x512xf32> to vector<8x128xf32>
    %cst_115 = arith.constant 0.000000e+00 : f32
    %307 = vector.broadcast %cst_115 : f32 to vector<8x128xf32>
    %308 = arith.subf %307, %306 : vector<8x128xf32>
    %309 = math.exp %308 : vector<8x128xf32>
    %cst_116 = arith.constant 1.000000e+00 : f32
    %310 = vector.broadcast %cst_116 : f32 to vector<8x128xf32>
    %311 = arith.addf %310, %309 : vector<8x128xf32>
    %cst_117 = arith.constant 1.000000e+00 : f32
    %312 = vector.broadcast %cst_117 : f32 to vector<8x128xf32>
    %313 = arith.divf %312, %311 : vector<8x128xf32>
    %314 = arith.mulf %303, %235 : vector<8x128xf32>
    %315 = arith.mulf %295, %305 : vector<8x128xf32>
    %316 = arith.addf %314, %315 : vector<8x128xf32>
    %317 = math.tanh %316 : vector<8x128xf32>
    %318 = arith.mulf %313, %317 : vector<8x128xf32>
    %c3_118 = arith.constant 3 : index
    %c0_119 = arith.constant 0 : index
    %c0_120 = arith.constant 0 : index
    %319 = vector.load %arg3[%c3_118, %c0_119, %c0_120] : memref<8x8x256xf32, #tpu.memory_space<vmem>>, vector<1x8x128xf32>
    %320 = vector.shape_cast %319 : vector<1x8x128xf32> to vector<8x128xf32>
    %321 = vector.shape_cast %284 : vector<8x128xf32> to vector<1x8x128xf32>
    tpu.vector_store %arg3[%c3_118, %c0_119, %c0_120], %321 {strides = array<i32>} : memref<8x8x256xf32, #tpu.memory_space<vmem>>, vector<1x8x128xf32>,
    %c4_121 = arith.constant 4 : index
    %c0_122 = arith.constant 0 : index
    %c128_123 = arith.constant 128 : index
    %322 = vector.load %arg3[%c4_121, %c0_122, %c128_123] : memref<8x8x256xf32, #tpu.memory_space<vmem>>, vector<1x8x128xf32>
    %323 = vector.shape_cast %322 : vector<1x8x128xf32> to vector<8x128xf32>
    %324 = vector.shape_cast %318 : vector<8x128xf32> to vector<1x8x128xf32>
    tpu.vector_store %arg3[%c4_121, %c0_122, %c128_123], %324 {strides = array<i32>} : memref<8x8x256xf32, #tpu.memory_space<vmem>>, vector<1x8x128xf32>,
    %325 = tpu.concatenate %284, %318 in 1 : vector<8x128xf32>, vector<8x128xf32> -> vector<8x256xf32>
    %c0_124 = arith.constant 0 : index
    %c0_125 = arith.constant 0 : index
    %326 = vector.load %arg2[%c0_124, %c0_125] : memref<256x1024xf32, #tpu.memory_space<vmem>>, vector<256x1024xf32>
    %cst_126 = arith.constant dense<0.000000e+00> : vector<8x1024xf32>
    %327 = tpu.matmul %325, %326, %cst_126 {dimension_numbers = #tpu.dot_dimension_numbers<[1], [0], [0], [1], [0, 0, 1, 1], [], []>} : vector<8x256xf32>, vector<256x1024xf32>, vector<8x1024xf32> -> vector<8x1024xf32>
    %c4_127 = arith.constant 4 : index
    %c0_128 = arith.constant 0 : index
    %c0_129 = arith.constant 0 : index
    %328 = vector.load %arg1[%c4_127, %c0_128, %c0_129] : memref<8x8x1024xf32, #tpu.memory_space<vmem>>, vector<1x8x1024xf32>
    %329 = vector.shape_cast %328 : vector<1x8x1024xf32> to vector<8x1024xf32>
    %c3_130 = arith.constant 3 : index
    %c0_131 = arith.constant 0 : index
    %c0_132 = arith.constant 0 : index
    %330 = vector.load %arg1[%c3_130, %c0_131, %c0_132] : memref<8x8x1024xf32, #tpu.memory_space<vmem>>, vector<1x8x1024xf32>
    %331 = vector.shape_cast %330 : vector<1x8x1024xf32> to vector<8x1024xf32>
    %332 = vector.extract_strided_slice %329 {offsets = [0, 0], sizes = [8, 512], strides = [1, 1]} : vector<8x1024xf32> to vector<8x512xf32>
    %333 = vector.extract_strided_slice %327 {offsets = [0, 0], sizes = [8, 512], strides = [1, 1]} : vector<8x1024xf32> to vector<8x512xf32>
    %334 = arith.addf %332, %333 : vector<8x512xf32>
    %335 = vector.extract_strided_slice %334 {offsets = [0, 0], sizes = [8, 128], strides = [1, 1]} : vector<8x512xf32> to vector<8x128xf32>
    %cst_133 = arith.constant 0.000000e+00 : f32
    %336 = vector.broadcast %cst_133 : f32 to vector<8x128xf32>
    %337 = arith.subf %336, %335 : vector<8x128xf32>
    %338 = math.exp %337 : vector<8x128xf32>
    %cst_134 = arith.constant 1.000000e+00 : f32
    %339 = vector.broadcast %cst_134 : f32 to vector<8x128xf32>
    %340 = arith.addf %339, %338 : vector<8x128xf32>
    %cst_135 = arith.constant 1.000000e+00 : f32
    %341 = vector.broadcast %cst_135 : f32 to vector<8x128xf32>
    %342 = arith.divf %341, %340 : vector<8x128xf32>
    %343 = vector.extract_strided_slice %334 {offsets = [0, 128], sizes = [8, 128], strides = [1, 1]} : vector<8x512xf32> to vector<8x128xf32>
    %cst_136 = arith.constant 0.000000e+00 : f32
    %344 = vector.broadcast %cst_136 : f32 to vector<8x128xf32>
    %345 = arith.subf %344, %343 : vector<8x128xf32>
    %346 = math.exp %345 : vector<8x128xf32>
    %cst_137 = arith.constant 1.000000e+00 : f32
    %347 = vector.broadcast %cst_137 : f32 to vector<8x128xf32>
    %348 = arith.addf %347, %346 : vector<8x128xf32>
    %cst_138 = arith.constant 1.000000e+00 : f32
    %349 = vector.broadcast %cst_138 : f32 to vector<8x128xf32>
    %350 = arith.divf %349, %348 : vector<8x128xf32>
    %351 = vector.extract_strided_slice %334 {offsets = [0, 256], sizes = [8, 128], strides = [1, 1]} : vector<8x512xf32> to vector<8x128xf32>
    %352 = math.tanh %351 : vector<8x128xf32>
    %353 = vector.extract_strided_slice %334 {offsets = [0, 384], sizes = [8, 128], strides = [1, 1]} : vector<8x512xf32> to vector<8x128xf32>
    %cst_139 = arith.constant 0.000000e+00 : f32
    %354 = vector.broadcast %cst_139 : f32 to vector<8x128xf32>
    %355 = arith.subf %354, %353 : vector<8x128xf32>
    %356 = math.exp %355 : vector<8x128xf32>
    %cst_140 = arith.constant 1.000000e+00 : f32
    %357 = vector.broadcast %cst_140 : f32 to vector<8x128xf32>
    %358 = arith.addf %357, %356 : vector<8x128xf32>
    %cst_141 = arith.constant 1.000000e+00 : f32
    %359 = vector.broadcast %cst_141 : f32 to vector<8x128xf32>
    %360 = arith.divf %359, %358 : vector<8x128xf32>
    %361 = arith.mulf %350, %282 : vector<8x128xf32>
    %362 = arith.mulf %342, %352 : vector<8x128xf32>
    %363 = arith.addf %361, %362 : vector<8x128xf32>
    %364 = math.tanh %363 : vector<8x128xf32>
    %365 = arith.mulf %360, %364 : vector<8x128xf32>
    %366 = vector.extract_strided_slice %331 {offsets = [0, 512], sizes = [8, 512], strides = [1, 1]} : vector<8x1024xf32> to vector<8x512xf32>
    %367 = vector.extract_strided_slice %327 {offsets = [0, 512], sizes = [8, 512], strides = [1, 1]} : vector<8x1024xf32> to vector<8x512xf32>
    %368 = arith.addf %366, %367 : vector<8x512xf32>
    %369 = vector.extract_strided_slice %368 {offsets = [0, 0], sizes = [8, 128], strides = [1, 1]} : vector<8x512xf32> to vector<8x128xf32>
    %cst_142 = arith.constant 0.000000e+00 : f32
    %370 = vector.broadcast %cst_142 : f32 to vector<8x128xf32>
    %371 = arith.subf %370, %369 : vector<8x128xf32>
    %372 = math.exp %371 : vector<8x128xf32>
    %cst_143 = arith.constant 1.000000e+00 : f32
    %373 = vector.broadcast %cst_143 : f32 to vector<8x128xf32>
    %374 = arith.addf %373, %372 : vector<8x128xf32>
    %cst_144 = arith.constant 1.000000e+00 : f32
    %375 = vector.broadcast %cst_144 : f32 to vector<8x128xf32>
    %376 = arith.divf %375, %374 : vector<8x128xf32>
    %377 = vector.extract_strided_slice %368 {offsets = [0, 128], sizes = [8, 128], strides = [1, 1]} : vector<8x512xf32> to vector<8x128xf32>
    %cst_145 = arith.constant 0.000000e+00 : f32
    %378 = vector.broadcast %cst_145 : f32 to vector<8x128xf32>
    %379 = arith.subf %378, %377 : vector<8x128xf32>
    %380 = math.exp %379 : vector<8x128xf32>
    %cst_146 = arith.constant 1.000000e+00 : f32
    %381 = vector.broadcast %cst_146 : f32 to vector<8x128xf32>
    %382 = arith.addf %381, %380 : vector<8x128xf32>
    %cst_147 = arith.constant 1.000000e+00 : f32
    %383 = vector.broadcast %cst_147 : f32 to vector<8x128xf32>
    %384 = arith.divf %383, %382 : vector<8x128xf32>
    %385 = vector.extract_strided_slice %368 {offsets = [0, 256], sizes = [8, 128], strides = [1, 1]} : vector<8x512xf32> to vector<8x128xf32>
    %386 = math.tanh %385 : vector<8x128xf32>
    %387 = vector.extract_strided_slice %368 {offsets = [0, 384], sizes = [8, 128], strides = [1, 1]} : vector<8x512xf32> to vector<8x128xf32>
    %cst_148 = arith.constant 0.000000e+00 : f32
    %388 = vector.broadcast %cst_148 : f32 to vector<8x128xf32>
    %389 = arith.subf %388, %387 : vector<8x128xf32>
    %390 = math.exp %389 : vector<8x128xf32>
    %cst_149 = arith.constant 1.000000e+00 : f32
    %391 = vector.broadcast %cst_149 : f32 to vector<8x128xf32>
    %392 = arith.addf %391, %390 : vector<8x128xf32>
    %cst_150 = arith.constant 1.000000e+00 : f32
    %393 = vector.broadcast %cst_150 : f32 to vector<8x128xf32>
    %394 = arith.divf %393, %392 : vector<8x128xf32>
    %395 = arith.mulf %384, %316 : vector<8x128xf32>
    %396 = arith.mulf %376, %386 : vector<8x128xf32>
    %397 = arith.addf %395, %396 : vector<8x128xf32>
    %398 = math.tanh %397 : vector<8x128xf32>
    %399 = arith.mulf %394, %398 : vector<8x128xf32>
    %c4_151 = arith.constant 4 : index
    %c0_152 = arith.constant 0 : index
    %c0_153 = arith.constant 0 : index
    %400 = vector.load %arg3[%c4_151, %c0_152, %c0_153] : memref<8x8x256xf32, #tpu.memory_space<vmem>>, vector<1x8x128xf32>
    %401 = vector.shape_cast %400 : vector<1x8x128xf32> to vector<8x128xf32>
    %402 = vector.shape_cast %365 : vector<8x128xf32> to vector<1x8x128xf32>
    tpu.vector_store %arg3[%c4_151, %c0_152, %c0_153], %402 {strides = array<i32>} : memref<8x8x256xf32, #tpu.memory_space<vmem>>, vector<1x8x128xf32>,
    %c3_154 = arith.constant 3 : index
    %c0_155 = arith.constant 0 : index
    %c128_156 = arith.constant 128 : index
    %403 = vector.load %arg3[%c3_154, %c0_155, %c128_156] : memref<8x8x256xf32, #tpu.memory_space<vmem>>, vector<1x8x128xf32>
    %404 = vector.shape_cast %403 : vector<1x8x128xf32> to vector<8x128xf32>
    %405 = vector.shape_cast %399 : vector<8x128xf32> to vector<1x8x128xf32>
    tpu.vector_store %arg3[%c3_154, %c0_155, %c128_156], %405 {strides = array<i32>} : memref<8x8x256xf32, #tpu.memory_space<vmem>>, vector<1x8x128xf32>,
    %406 = tpu.concatenate %365, %399 in 1 : vector<8x128xf32>, vector<8x128xf32> -> vector<8x256xf32>
    %c0_157 = arith.constant 0 : index
    %c0_158 = arith.constant 0 : index
    %407 = vector.load %arg2[%c0_157, %c0_158] : memref<256x1024xf32, #tpu.memory_space<vmem>>, vector<256x1024xf32>
    %cst_159 = arith.constant dense<0.000000e+00> : vector<8x1024xf32>
    %408 = tpu.matmul %406, %407, %cst_159 {dimension_numbers = #tpu.dot_dimension_numbers<[1], [0], [0], [1], [0, 0, 1, 1], [], []>} : vector<8x256xf32>, vector<256x1024xf32>, vector<8x1024xf32> -> vector<8x1024xf32>
    %c5_160 = arith.constant 5 : index
    %c0_161 = arith.constant 0 : index
    %c0_162 = arith.constant 0 : index
    %409 = vector.load %arg1[%c5_160, %c0_161, %c0_162] : memref<8x8x1024xf32, #tpu.memory_space<vmem>>, vector<1x8x1024xf32>
    %410 = vector.shape_cast %409 : vector<1x8x1024xf32> to vector<8x1024xf32>
    %c2_163 = arith.constant 2 : index
    %c0_164 = arith.constant 0 : index
    %c0_165 = arith.constant 0 : index
    %411 = vector.load %arg1[%c2_163, %c0_164, %c0_165] : memref<8x8x1024xf32, #tpu.memory_space<vmem>>, vector<1x8x1024xf32>
    %412 = vector.shape_cast %411 : vector<1x8x1024xf32> to vector<8x1024xf32>
    %413 = vector.extract_strided_slice %410 {offsets = [0, 0], sizes = [8, 512], strides = [1, 1]} : vector<8x1024xf32> to vector<8x512xf32>
    %414 = vector.extract_strided_slice %408 {offsets = [0, 0], sizes = [8, 512], strides = [1, 1]} : vector<8x1024xf32> to vector<8x512xf32>
    %415 = arith.addf %413, %414 : vector<8x512xf32>
    %416 = vector.extract_strided_slice %415 {offsets = [0, 0], sizes = [8, 128], strides = [1, 1]} : vector<8x512xf32> to vector<8x128xf32>
    %cst_166 = arith.constant 0.000000e+00 : f32
    %417 = vector.broadcast %cst_166 : f32 to vector<8x128xf32>
    %418 = arith.subf %417, %416 : vector<8x128xf32>
    %419 = math.exp %418 : vector<8x128xf32>
    %cst_167 = arith.constant 1.000000e+00 : f32
    %420 = vector.broadcast %cst_167 : f32 to vector<8x128xf32>
    %421 = arith.addf %420, %419 : vector<8x128xf32>
    %cst_168 = arith.constant 1.000000e+00 : f32
    %422 = vector.broadcast %cst_168 : f32 to vector<8x128xf32>
    %423 = arith.divf %422, %421 : vector<8x128xf32>
    %424 = vector.extract_strided_slice %415 {offsets = [0, 128], sizes = [8, 128], strides = [1, 1]} : vector<8x512xf32> to vector<8x128xf32>
    %cst_169 = arith.constant 0.000000e+00 : f32
    %425 = vector.broadcast %cst_169 : f32 to vector<8x128xf32>
    %426 = arith.subf %425, %424 : vector<8x128xf32>
    %427 = math.exp %426 : vector<8x128xf32>
    %cst_170 = arith.constant 1.000000e+00 : f32
    %428 = vector.broadcast %cst_170 : f32 to vector<8x128xf32>
    %429 = arith.addf %428, %427 : vector<8x128xf32>
    %cst_171 = arith.constant 1.000000e+00 : f32
    %430 = vector.broadcast %cst_171 : f32 to vector<8x128xf32>
    %431 = arith.divf %430, %429 : vector<8x128xf32>
    %432 = vector.extract_strided_slice %415 {offsets = [0, 256], sizes = [8, 128], strides = [1, 1]} : vector<8x512xf32> to vector<8x128xf32>
    %433 = math.tanh %432 : vector<8x128xf32>
    %434 = vector.extract_strided_slice %415 {offsets = [0, 384], sizes = [8, 128], strides = [1, 1]} : vector<8x512xf32> to vector<8x128xf32>
    %cst_172 = arith.constant 0.000000e+00 : f32
    %435 = vector.broadcast %cst_172 : f32 to vector<8x128xf32>
    %436 = arith.subf %435, %434 : vector<8x128xf32>
    %437 = math.exp %436 : vector<8x128xf32>
    %cst_173 = arith.constant 1.000000e+00 : f32
    %438 = vector.broadcast %cst_173 : f32 to vector<8x128xf32>
    %439 = arith.addf %438, %437 : vector<8x128xf32>
    %cst_174 = arith.constant 1.000000e+00 : f32
    %440 = vector.broadcast %cst_174 : f32 to vector<8x128xf32>
    %441 = arith.divf %440, %439 : vector<8x128xf32>
    %442 = arith.mulf %431, %363 : vector<8x128xf32>
    %443 = arith.mulf %423, %433 : vector<8x128xf32>
    %444 = arith.addf %442, %443 : vector<8x128xf32>
    %445 = math.tanh %444 : vector<8x128xf32>
    %446 = arith.mulf %441, %445 : vector<8x128xf32>
    %447 = vector.extract_strided_slice %412 {offsets = [0, 512], sizes = [8, 512], strides = [1, 1]} : vector<8x1024xf32> to vector<8x512xf32>
    %448 = vector.extract_strided_slice %408 {offsets = [0, 512], sizes = [8, 512], strides = [1, 1]} : vector<8x1024xf32> to vector<8x512xf32>
    %449 = arith.addf %447, %448 : vector<8x512xf32>
    %450 = vector.extract_strided_slice %449 {offsets = [0, 0], sizes = [8, 128], strides = [1, 1]} : vector<8x512xf32> to vector<8x128xf32>
    %cst_175 = arith.constant 0.000000e+00 : f32
    %451 = vector.broadcast %cst_175 : f32 to vector<8x128xf32>
    %452 = arith.subf %451, %450 : vector<8x128xf32>
    %453 = math.exp %452 : vector<8x128xf32>
    %cst_176 = arith.constant 1.000000e+00 : f32
    %454 = vector.broadcast %cst_176 : f32 to vector<8x128xf32>
    %455 = arith.addf %454, %453 : vector<8x128xf32>
    %cst_177 = arith.constant 1.000000e+00 : f32
    %456 = vector.broadcast %cst_177 : f32 to vector<8x128xf32>
    %457 = arith.divf %456, %455 : vector<8x128xf32>
    %458 = vector.extract_strided_slice %449 {offsets = [0, 128], sizes = [8, 128], strides = [1, 1]} : vector<8x512xf32> to vector<8x128xf32>
    %cst_178 = arith.constant 0.000000e+00 : f32
    %459 = vector.broadcast %cst_178 : f32 to vector<8x128xf32>
    %460 = arith.subf %459, %458 : vector<8x128xf32>
    %461 = math.exp %460 : vector<8x128xf32>
    %cst_179 = arith.constant 1.000000e+00 : f32
    %462 = vector.broadcast %cst_179 : f32 to vector<8x128xf32>
    %463 = arith.addf %462, %461 : vector<8x128xf32>
    %cst_180 = arith.constant 1.000000e+00 : f32
    %464 = vector.broadcast %cst_180 : f32 to vector<8x128xf32>
    %465 = arith.divf %464, %463 : vector<8x128xf32>
    %466 = vector.extract_strided_slice %449 {offsets = [0, 256], sizes = [8, 128], strides = [1, 1]} : vector<8x512xf32> to vector<8x128xf32>
    %467 = math.tanh %466 : vector<8x128xf32>
    %468 = vector.extract_strided_slice %449 {offsets = [0, 384], sizes = [8, 128], strides = [1, 1]} : vector<8x512xf32> to vector<8x128xf32>
    %cst_181 = arith.constant 0.000000e+00 : f32
    %469 = vector.broadcast %cst_181 : f32 to vector<8x128xf32>
    %470 = arith.subf %469, %468 : vector<8x128xf32>
    %471 = math.exp %470 : vector<8x128xf32>
    %cst_182 = arith.constant 1.000000e+00 : f32
    %472 = vector.broadcast %cst_182 : f32 to vector<8x128xf32>
    %473 = arith.addf %472, %471 : vector<8x128xf32>
    %cst_183 = arith.constant 1.000000e+00 : f32
    %474 = vector.broadcast %cst_183 : f32 to vector<8x128xf32>
    %475 = arith.divf %474, %473 : vector<8x128xf32>
    %476 = arith.mulf %465, %397 : vector<8x128xf32>
    %477 = arith.mulf %457, %467 : vector<8x128xf32>
    %478 = arith.addf %476, %477 : vector<8x128xf32>
    %479 = math.tanh %478 : vector<8x128xf32>
    %480 = arith.mulf %475, %479 : vector<8x128xf32>
    %c5_184 = arith.constant 5 : index
    %c0_185 = arith.constant 0 : index
    %c0_186 = arith.constant 0 : index
    %481 = vector.load %arg3[%c5_184, %c0_185, %c0_186] : memref<8x8x256xf32, #tpu.memory_space<vmem>>, vector<1x8x128xf32>
    %482 = vector.shape_cast %481 : vector<1x8x128xf32> to vector<8x128xf32>
    %483 = vector.shape_cast %446 : vector<8x128xf32> to vector<1x8x128xf32>
    tpu.vector_store %arg3[%c5_184, %c0_185, %c0_186], %483 {strides = array<i32>} : memref<8x8x256xf32, #tpu.memory_space<vmem>>, vector<1x8x128xf32>,
    %c2_187 = arith.constant 2 : index
    %c0_188 = arith.constant 0 : index
    %c128_189 = arith.constant 128 : index
    %484 = vector.load %arg3[%c2_187, %c0_188, %c128_189] : memref<8x8x256xf32, #tpu.memory_space<vmem>>, vector<1x8x128xf32>
    %485 = vector.shape_cast %484 : vector<1x8x128xf32> to vector<8x128xf32>
    %486 = vector.shape_cast %480 : vector<8x128xf32> to vector<1x8x128xf32>
    tpu.vector_store %arg3[%c2_187, %c0_188, %c128_189], %486 {strides = array<i32>} : memref<8x8x256xf32, #tpu.memory_space<vmem>>, vector<1x8x128xf32>,
    %487 = tpu.concatenate %446, %480 in 1 : vector<8x128xf32>, vector<8x128xf32> -> vector<8x256xf32>
    %c0_190 = arith.constant 0 : index
    %c0_191 = arith.constant 0 : index
    %488 = vector.load %arg2[%c0_190, %c0_191] : memref<256x1024xf32, #tpu.memory_space<vmem>>, vector<256x1024xf32>
    %cst_192 = arith.constant dense<0.000000e+00> : vector<8x1024xf32>
    %489 = tpu.matmul %487, %488, %cst_192 {dimension_numbers = #tpu.dot_dimension_numbers<[1], [0], [0], [1], [0, 0, 1, 1], [], []>} : vector<8x256xf32>, vector<256x1024xf32>, vector<8x1024xf32> -> vector<8x1024xf32>
    %c6_193 = arith.constant 6 : index
    %c0_194 = arith.constant 0 : index
    %c0_195 = arith.constant 0 : index
    %490 = vector.load %arg1[%c6_193, %c0_194, %c0_195] : memref<8x8x1024xf32, #tpu.memory_space<vmem>>, vector<1x8x1024xf32>
    %491 = vector.shape_cast %490 : vector<1x8x1024xf32> to vector<8x1024xf32>
    %c1_196 = arith.constant 1 : index
    %c0_197 = arith.constant 0 : index
    %c0_198 = arith.constant 0 : index
    %492 = vector.load %arg1[%c1_196, %c0_197, %c0_198] : memref<8x8x1024xf32, #tpu.memory_space<vmem>>, vector<1x8x1024xf32>
    %493 = vector.shape_cast %492 : vector<1x8x1024xf32> to vector<8x1024xf32>
    %494 = vector.extract_strided_slice %491 {offsets = [0, 0], sizes = [8, 512], strides = [1, 1]} : vector<8x1024xf32> to vector<8x512xf32>
    %495 = vector.extract_strided_slice %489 {offsets = [0, 0], sizes = [8, 512], strides = [1, 1]} : vector<8x1024xf32> to vector<8x512xf32>
    %496 = arith.addf %494, %495 : vector<8x512xf32>
    %497 = vector.extract_strided_slice %496 {offsets = [0, 0], sizes = [8, 128], strides = [1, 1]} : vector<8x512xf32> to vector<8x128xf32>
    %cst_199 = arith.constant 0.000000e+00 : f32
    %498 = vector.broadcast %cst_199 : f32 to vector<8x128xf32>
    %499 = arith.subf %498, %497 : vector<8x128xf32>
    %500 = math.exp %499 : vector<8x128xf32>
    %cst_200 = arith.constant 1.000000e+00 : f32
    %501 = vector.broadcast %cst_200 : f32 to vector<8x128xf32>
    %502 = arith.addf %501, %500 : vector<8x128xf32>
    %cst_201 = arith.constant 1.000000e+00 : f32
    %503 = vector.broadcast %cst_201 : f32 to vector<8x128xf32>
    %504 = arith.divf %503, %502 : vector<8x128xf32>
    %505 = vector.extract_strided_slice %496 {offsets = [0, 128], sizes = [8, 128], strides = [1, 1]} : vector<8x512xf32> to vector<8x128xf32>
    %cst_202 = arith.constant 0.000000e+00 : f32
    %506 = vector.broadcast %cst_202 : f32 to vector<8x128xf32>
    %507 = arith.subf %506, %505 : vector<8x128xf32>
    %508 = math.exp %507 : vector<8x128xf32>
    %cst_203 = arith.constant 1.000000e+00 : f32
    %509 = vector.broadcast %cst_203 : f32 to vector<8x128xf32>
    %510 = arith.addf %509, %508 : vector<8x128xf32>
    %cst_204 = arith.constant 1.000000e+00 : f32
    %511 = vector.broadcast %cst_204 : f32 to vector<8x128xf32>
    %512 = arith.divf %511, %510 : vector<8x128xf32>
    %513 = vector.extract_strided_slice %496 {offsets = [0, 256], sizes = [8, 128], strides = [1, 1]} : vector<8x512xf32> to vector<8x128xf32>
    %514 = math.tanh %513 : vector<8x128xf32>
    %515 = vector.extract_strided_slice %496 {offsets = [0, 384], sizes = [8, 128], strides = [1, 1]} : vector<8x512xf32> to vector<8x128xf32>
    %cst_205 = arith.constant 0.000000e+00 : f32
    %516 = vector.broadcast %cst_205 : f32 to vector<8x128xf32>
    %517 = arith.subf %516, %515 : vector<8x128xf32>
    %518 = math.exp %517 : vector<8x128xf32>
    %cst_206 = arith.constant 1.000000e+00 : f32
    %519 = vector.broadcast %cst_206 : f32 to vector<8x128xf32>
    %520 = arith.addf %519, %518 : vector<8x128xf32>
    %cst_207 = arith.constant 1.000000e+00 : f32
    %521 = vector.broadcast %cst_207 : f32 to vector<8x128xf32>
    %522 = arith.divf %521, %520 : vector<8x128xf32>
    %523 = arith.mulf %512, %444 : vector<8x128xf32>
    %524 = arith.mulf %504, %514 : vector<8x128xf32>
    %525 = arith.addf %523, %524 : vector<8x128xf32>
    %526 = math.tanh %525 : vector<8x128xf32>
    %527 = arith.mulf %522, %526 : vector<8x128xf32>
    %528 = vector.extract_strided_slice %493 {offsets = [0, 512], sizes = [8, 512], strides = [1, 1]} : vector<8x1024xf32> to vector<8x512xf32>
    %529 = vector.extract_strided_slice %489 {offsets = [0, 512], sizes = [8, 512], strides = [1, 1]} : vector<8x1024xf32> to vector<8x512xf32>
    %530 = arith.addf %528, %529 : vector<8x512xf32>
    %531 = vector.extract_strided_slice %530 {offsets = [0, 0], sizes = [8, 128], strides = [1, 1]} : vector<8x512xf32> to vector<8x128xf32>
    %cst_208 = arith.constant 0.000000e+00 : f32
    %532 = vector.broadcast %cst_208 : f32 to vector<8x128xf32>
    %533 = arith.subf %532, %531 : vector<8x128xf32>
    %534 = math.exp %533 : vector<8x128xf32>
    %cst_209 = arith.constant 1.000000e+00 : f32
    %535 = vector.broadcast %cst_209 : f32 to vector<8x128xf32>
    %536 = arith.addf %535, %534 : vector<8x128xf32>
    %cst_210 = arith.constant 1.000000e+00 : f32
    %537 = vector.broadcast %cst_210 : f32 to vector<8x128xf32>
    %538 = arith.divf %537, %536 : vector<8x128xf32>
    %539 = vector.extract_strided_slice %530 {offsets = [0, 128], sizes = [8, 128], strides = [1, 1]} : vector<8x512xf32> to vector<8x128xf32>
    %cst_211 = arith.constant 0.000000e+00 : f32
    %540 = vector.broadcast %cst_211 : f32 to vector<8x128xf32>
    %541 = arith.subf %540, %539 : vector<8x128xf32>
    %542 = math.exp %541 : vector<8x128xf32>
    %cst_212 = arith.constant 1.000000e+00 : f32
    %543 = vector.broadcast %cst_212 : f32 to vector<8x128xf32>
    %544 = arith.addf %543, %542 : vector<8x128xf32>
    %cst_213 = arith.constant 1.000000e+00 : f32
    %545 = vector.broadcast %cst_213 : f32 to vector<8x128xf32>
    %546 = arith.divf %545, %544 : vector<8x128xf32>
    %547 = vector.extract_strided_slice %530 {offsets = [0, 256], sizes = [8, 128], strides = [1, 1]} : vector<8x512xf32> to vector<8x128xf32>
    %548 = math.tanh %547 : vector<8x128xf32>
    %549 = vector.extract_strided_slice %530 {offsets = [0, 384], sizes = [8, 128], strides = [1, 1]} : vector<8x512xf32> to vector<8x128xf32>
    %cst_214 = arith.constant 0.000000e+00 : f32
    %550 = vector.broadcast %cst_214 : f32 to vector<8x128xf32>
    %551 = arith.subf %550, %549 : vector<8x128xf32>
    %552 = math.exp %551 : vector<8x128xf32>
    %cst_215 = arith.constant 1.000000e+00 : f32
    %553 = vector.broadcast %cst_215 : f32 to vector<8x128xf32>
    %554 = arith.addf %553, %552 : vector<8x128xf32>
    %cst_216 = arith.constant 1.000000e+00 : f32
    %555 = vector.broadcast %cst_216 : f32 to vector<8x128xf32>
    %556 = arith.divf %555, %554 : vector<8x128xf32>
    %557 = arith.mulf %546, %478 : vector<8x128xf32>
    %558 = arith.mulf %538, %548 : vector<8x128xf32>
    %559 = arith.addf %557, %558 : vector<8x128xf32>
    %560 = math.tanh %559 : vector<8x128xf32>
    %561 = arith.mulf %556, %560 : vector<8x128xf32>
    %c6_217 = arith.constant 6 : index
    %c0_218 = arith.constant 0 : index
    %c0_219 = arith.constant 0 : index
    %562 = vector.load %arg3[%c6_217, %c0_218, %c0_219] : memref<8x8x256xf32, #tpu.memory_space<vmem>>, vector<1x8x128xf32>
    %563 = vector.shape_cast %562 : vector<1x8x128xf32> to vector<8x128xf32>
    %564 = vector.shape_cast %527 : vector<8x128xf32> to vector<1x8x128xf32>
    tpu.vector_store %arg3[%c6_217, %c0_218, %c0_219], %564 {strides = array<i32>} : memref<8x8x256xf32, #tpu.memory_space<vmem>>, vector<1x8x128xf32>,
    %c1_220 = arith.constant 1 : index
    %c0_221 = arith.constant 0 : index
    %c128_222 = arith.constant 128 : index
    %565 = vector.load %arg3[%c1_220, %c0_221, %c128_222] : memref<8x8x256xf32, #tpu.memory_space<vmem>>, vector<1x8x128xf32>
    %566 = vector.shape_cast %565 : vector<1x8x128xf32> to vector<8x128xf32>
    %567 = vector.shape_cast %561 : vector<8x128xf32> to vector<1x8x128xf32>
    tpu.vector_store %arg3[%c1_220, %c0_221, %c128_222], %567 {strides = array<i32>} : memref<8x8x256xf32, #tpu.memory_space<vmem>>, vector<1x8x128xf32>,
    %568 = tpu.concatenate %527, %561 in 1 : vector<8x128xf32>, vector<8x128xf32> -> vector<8x256xf32>
    %c0_223 = arith.constant 0 : index
    %c0_224 = arith.constant 0 : index
    %569 = vector.load %arg2[%c0_223, %c0_224] : memref<256x1024xf32, #tpu.memory_space<vmem>>, vector<256x1024xf32>
    %cst_225 = arith.constant dense<0.000000e+00> : vector<8x1024xf32>
    %570 = tpu.matmul %568, %569, %cst_225 {dimension_numbers = #tpu.dot_dimension_numbers<[1], [0], [0], [1], [0, 0, 1, 1], [], []>} : vector<8x256xf32>, vector<256x1024xf32>, vector<8x1024xf32> -> vector<8x1024xf32>
    %c7_226 = arith.constant 7 : index
    %c0_227 = arith.constant 0 : index
    %c0_228 = arith.constant 0 : index
    %571 = vector.load %arg1[%c7_226, %c0_227, %c0_228] : memref<8x8x1024xf32, #tpu.memory_space<vmem>>, vector<1x8x1024xf32>
    %572 = vector.shape_cast %571 : vector<1x8x1024xf32> to vector<8x1024xf32>
    %c0_229 = arith.constant 0 : index
    %c0_230 = arith.constant 0 : index
    %c0_231 = arith.constant 0 : index
    %573 = vector.load %arg1[%c0_229, %c0_230, %c0_231] : memref<8x8x1024xf32, #tpu.memory_space<vmem>>, vector<1x8x1024xf32>
    %574 = vector.shape_cast %573 : vector<1x8x1024xf32> to vector<8x1024xf32>
    %575 = vector.extract_strided_slice %572 {offsets = [0, 0], sizes = [8, 512], strides = [1, 1]} : vector<8x1024xf32> to vector<8x512xf32>
    %576 = vector.extract_strided_slice %570 {offsets = [0, 0], sizes = [8, 512], strides = [1, 1]} : vector<8x1024xf32> to vector<8x512xf32>
    %577 = arith.addf %575, %576 : vector<8x512xf32>
    %578 = vector.extract_strided_slice %577 {offsets = [0, 0], sizes = [8, 128], strides = [1, 1]} : vector<8x512xf32> to vector<8x128xf32>
    %cst_232 = arith.constant 0.000000e+00 : f32
    %579 = vector.broadcast %cst_232 : f32 to vector<8x128xf32>
    %580 = arith.subf %579, %578 : vector<8x128xf32>
    %581 = math.exp %580 : vector<8x128xf32>
    %cst_233 = arith.constant 1.000000e+00 : f32
    %582 = vector.broadcast %cst_233 : f32 to vector<8x128xf32>
    %583 = arith.addf %582, %581 : vector<8x128xf32>
    %cst_234 = arith.constant 1.000000e+00 : f32
    %584 = vector.broadcast %cst_234 : f32 to vector<8x128xf32>
    %585 = arith.divf %584, %583 : vector<8x128xf32>
    %586 = vector.extract_strided_slice %577 {offsets = [0, 128], sizes = [8, 128], strides = [1, 1]} : vector<8x512xf32> to vector<8x128xf32>
    %cst_235 = arith.constant 0.000000e+00 : f32
    %587 = vector.broadcast %cst_235 : f32 to vector<8x128xf32>
    %588 = arith.subf %587, %586 : vector<8x128xf32>
    %589 = math.exp %588 : vector<8x128xf32>
    %cst_236 = arith.constant 1.000000e+00 : f32
    %590 = vector.broadcast %cst_236 : f32 to vector<8x128xf32>
    %591 = arith.addf %590, %589 : vector<8x128xf32>
    %cst_237 = arith.constant 1.000000e+00 : f32
    %592 = vector.broadcast %cst_237 : f32 to vector<8x128xf32>
    %593 = arith.divf %592, %591 : vector<8x128xf32>
    %594 = vector.extract_strided_slice %577 {offsets = [0, 256], sizes = [8, 128], strides = [1, 1]} : vector<8x512xf32> to vector<8x128xf32>
    %595 = math.tanh %594 : vector<8x128xf32>
    %596 = vector.extract_strided_slice %577 {offsets = [0, 384], sizes = [8, 128], strides = [1, 1]} : vector<8x512xf32> to vector<8x128xf32>
    %cst_238 = arith.constant 0.000000e+00 : f32
    %597 = vector.broadcast %cst_238 : f32 to vector<8x128xf32>
    %598 = arith.subf %597, %596 : vector<8x128xf32>
    %599 = math.exp %598 : vector<8x128xf32>
    %cst_239 = arith.constant 1.000000e+00 : f32
    %600 = vector.broadcast %cst_239 : f32 to vector<8x128xf32>
    %601 = arith.addf %600, %599 : vector<8x128xf32>
    %cst_240 = arith.constant 1.000000e+00 : f32
    %602 = vector.broadcast %cst_240 : f32 to vector<8x128xf32>
    %603 = arith.divf %602, %601 : vector<8x128xf32>
    %604 = arith.mulf %593, %525 : vector<8x128xf32>
    %605 = arith.mulf %585, %595 : vector<8x128xf32>
    %606 = arith.addf %604, %605 : vector<8x128xf32>
    %607 = math.tanh %606 : vector<8x128xf32>
    %608 = arith.mulf %603, %607 : vector<8x128xf32>
    %609 = vector.extract_strided_slice %574 {offsets = [0, 512], sizes = [8, 512], strides = [1, 1]} : vector<8x1024xf32> to vector<8x512xf32>
    %610 = vector.extract_strided_slice %570 {offsets = [0, 512], sizes = [8, 512], strides = [1, 1]} : vector<8x1024xf32> to vector<8x512xf32>
    %611 = arith.addf %609, %610 : vector<8x512xf32>
    %612 = vector.extract_strided_slice %611 {offsets = [0, 0], sizes = [8, 128], strides = [1, 1]} : vector<8x512xf32> to vector<8x128xf32>
    %cst_241 = arith.constant 0.000000e+00 : f32
    %613 = vector.broadcast %cst_241 : f32 to vector<8x128xf32>
    %614 = arith.subf %613, %612 : vector<8x128xf32>
    %615 = math.exp %614 : vector<8x128xf32>
    %cst_242 = arith.constant 1.000000e+00 : f32
    %616 = vector.broadcast %cst_242 : f32 to vector<8x128xf32>
    %617 = arith.addf %616, %615 : vector<8x128xf32>
    %cst_243 = arith.constant 1.000000e+00 : f32
    %618 = vector.broadcast %cst_243 : f32 to vector<8x128xf32>
    %619 = arith.divf %618, %617 : vector<8x128xf32>
    %620 = vector.extract_strided_slice %611 {offsets = [0, 128], sizes = [8, 128], strides = [1, 1]} : vector<8x512xf32> to vector<8x128xf32>
    %cst_244 = arith.constant 0.000000e+00 : f32
    %621 = vector.broadcast %cst_244 : f32 to vector<8x128xf32>
    %622 = arith.subf %621, %620 : vector<8x128xf32>
    %623 = math.exp %622 : vector<8x128xf32>
    %cst_245 = arith.constant 1.000000e+00 : f32
    %624 = vector.broadcast %cst_245 : f32 to vector<8x128xf32>
    %625 = arith.addf %624, %623 : vector<8x128xf32>
    %cst_246 = arith.constant 1.000000e+00 : f32
    %626 = vector.broadcast %cst_246 : f32 to vector<8x128xf32>
    %627 = arith.divf %626, %625 : vector<8x128xf32>
    %628 = vector.extract_strided_slice %611 {offsets = [0, 256], sizes = [8, 128], strides = [1, 1]} : vector<8x512xf32> to vector<8x128xf32>
    %629 = math.tanh %628 : vector<8x128xf32>
    %630 = vector.extract_strided_slice %611 {offsets = [0, 384], sizes = [8, 128], strides = [1, 1]} : vector<8x512xf32> to vector<8x128xf32>
    %cst_247 = arith.constant 0.000000e+00 : f32
    %631 = vector.broadcast %cst_247 : f32 to vector<8x128xf32>
    %632 = arith.subf %631, %630 : vector<8x128xf32>
    %633 = math.exp %632 : vector<8x128xf32>
    %cst_248 = arith.constant 1.000000e+00 : f32
    %634 = vector.broadcast %cst_248 : f32 to vector<8x128xf32>
    %635 = arith.addf %634, %633 : vector<8x128xf32>
    %cst_249 = arith.constant 1.000000e+00 : f32
    %636 = vector.broadcast %cst_249 : f32 to vector<8x128xf32>
    %637 = arith.divf %636, %635 : vector<8x128xf32>
    %638 = arith.mulf %627, %559 : vector<8x128xf32>
    %639 = arith.mulf %619, %629 : vector<8x128xf32>
    %640 = arith.addf %638, %639 : vector<8x128xf32>
    %641 = math.tanh %640 : vector<8x128xf32>
    %642 = arith.mulf %637, %641 : vector<8x128xf32>
    %c7_250 = arith.constant 7 : index
    %c0_251 = arith.constant 0 : index
    %c0_252 = arith.constant 0 : index
    %643 = vector.load %arg3[%c7_250, %c0_251, %c0_252] : memref<8x8x256xf32, #tpu.memory_space<vmem>>, vector<1x8x128xf32>
    %644 = vector.shape_cast %643 : vector<1x8x128xf32> to vector<8x128xf32>
    %645 = vector.shape_cast %608 : vector<8x128xf32> to vector<1x8x128xf32>
    tpu.vector_store %arg3[%c7_250, %c0_251, %c0_252], %645 {strides = array<i32>} : memref<8x8x256xf32, #tpu.memory_space<vmem>>, vector<1x8x128xf32>,
    %c0_253 = arith.constant 0 : index
    %c0_254 = arith.constant 0 : index
    %c128_255 = arith.constant 128 : index
    %646 = vector.load %arg3[%c0_253, %c0_254, %c128_255] : memref<8x8x256xf32, #tpu.memory_space<vmem>>, vector<1x8x128xf32>
    %647 = vector.shape_cast %646 : vector<1x8x128xf32> to vector<8x128xf32>
    %648 = vector.shape_cast %642 : vector<8x128xf32> to vector<1x8x128xf32>
    tpu.vector_store %arg3[%c0_253, %c0_254, %c128_255], %648 {strides = array<i32>} : memref<8x8x256xf32, #tpu.memory_space<vmem>>, vector<1x8x128xf32>,
    return
  }
  func.func @transform_0(%arg0: i32) -> (i32, i32, i32) {
    %c0_i32 = arith.constant 0 : i32
    %c0_i32_0 = arith.constant 0 : i32
    %c0_i32_1 = arith.constant 0 : i32
    return %c0_i32, %arg0, %c0_i32_0 : i32, i32, i32
  }
  func.func @transform_1(%arg0: i32) -> (i32, i32) {
    %c0_i32 = arith.constant 0 : i32
    %c0_i32_0 = arith.constant 0 : i32
    %c0_i32_1 = arith.constant 0 : i32
    return %c0_i32, %c0_i32_0 : i32, i32
  }
  func.func @transform_2(%arg0: i32) -> (i32, i32, i32) {
    %c0_i32 = arith.constant 0 : i32
    %c0_i32_0 = arith.constant 0 : i32
    %c0_i32_1 = arith.constant 0 : i32
    return %c0_i32, %arg0, %c0_i32_0 : i32, i32, i32
  }
}

module attributes {stable_mosaic.version = 11 : i64} {
  func.func @_attn_fc_kernel(%arg0: i32, %arg1: memref<8x8x256xf32, #tpu.memory_space<vmem>>, %arg2: memref<8x8x1xf32, #tpu.memory_space<vmem>>, %arg3: memref<256x128xf32, #tpu.memory_space<vmem>>, %arg4: memref<1x1xf32, #tpu.memory_space<vmem>>, %arg5: memref<256x128xf32, #tpu.memory_space<vmem>>, %arg6: memref<1x128xf32, #tpu.memory_space<vmem>>, %arg7: memref<8x128xf32, #tpu.memory_space<vmem>>) attributes {dimension_semantics = [#tpu.dimension_semantics<parallel>], iteration_bounds = array<i64: 1>, scalar_prefetch = 0 : i64, scratch_operands = 0 : i64, tpu.core_type = #tpu.core_type<tc>, window_params = [{transform_indices = @transform_0, window_bounds = array<i64: 8, 8, 256>}, {transform_indices = @transform_1, window_bounds = array<i64: 8, 8, 1>}, {pipeline_mode = #tpu.pipeline_mode<synchronous>, transform_indices = @transform_2, window_bounds = array<i64: 256, 128>}, {pipeline_mode = #tpu.pipeline_mode<synchronous>, transform_indices = @transform_3, window_bounds = array<i64: 1, 1>}, {pipeline_mode = #tpu.pipeline_mode<synchronous>, transform_indices = @transform_4, window_bounds = array<i64: 256, 128>}, {pipeline_mode = #tpu.pipeline_mode<synchronous>, transform_indices = @transform_5, window_bounds = array<i64: 1, 128>}, {transform_indices = @transform_6, window_bounds = array<i64: 8, 128>}]} {
    %c0 = arith.constant 0 : index
    %c0_0 = arith.constant 0 : index
    %c0_1 = arith.constant 0 : index
    %0 = vector.load %arg1[%c0, %c0_0, %c0_1] : memref<8x8x256xf32, #tpu.memory_space<vmem>>, vector<8x8x256xf32>
    %1 = vector.shape_cast %0 : vector<8x8x256xf32> to vector<64x256xf32>
    %c0_2 = arith.constant 0 : index
    %c0_3 = arith.constant 0 : index
    %2 = vector.load %arg3[%c0_2, %c0_3] : memref<256x128xf32, #tpu.memory_space<vmem>>, vector<256x128xf32>
    %cst = arith.constant dense<0.000000e+00> : vector<64x128xf32>
    %3 = tpu.matmul %1, %2, %cst {dimension_numbers = #tpu.dot_dimension_numbers<[1], [0], [0], [1], [0, 0, 1, 1], [], []>} : vector<64x256xf32>, vector<256x128xf32>, vector<64x128xf32> -> vector<64x128xf32>
    %4 = vector.shape_cast %3 : vector<64x128xf32> to vector<8x8x128xf32>
    %5 = vector.extract_strided_slice %4 {offsets = [0, 0, 0], sizes = [8, 8, 1], strides = [1, 1, 1]} : vector<8x8x128xf32> to vector<8x8x1xf32>
    %c0_4 = arith.constant 0 : index
    %c0_5 = arith.constant 0 : index
    %6 = vector.load %arg4[%c0_4, %c0_5] : memref<1x1xf32, #tpu.memory_space<vmem>>, vector<1x1xf32>
    %7 = vector.shape_cast %6 : vector<1x1xf32> to vector<1x1x1xf32>
    %8 = vector.broadcast %7 : vector<1x1x1xf32> to vector<8x8x1xf32>
    %9 = arith.addf %5, %8 : vector<8x8x1xf32>
    %c0_6 = arith.constant 0 : index
    %c0_7 = arith.constant 0 : index
    %c0_8 = arith.constant 0 : index
    %10 = vector.load %arg2[%c0_6, %c0_7, %c0_8] : memref<8x8x1xf32, #tpu.memory_space<vmem>>, vector<8x8x1xf32>
    %cst_9 = arith.constant 0.000000e+00 : f32
    %11 = vector.broadcast %cst_9 : f32 to vector<8x8x1xf32>
    %12 = arith.cmpf oeq, %10, %11 : vector<8x8x1xf32>
    %cst_10 = arith.constant -1.000000e+10 : f32
    %13 = vector.broadcast %cst_10 : f32 to vector<8x8x1xf32>
    %14 = arith.select %12, %13, %9 : vector<8x8x1xi1>, vector<8x8x1xf32>
    %cst_11 = arith.constant dense<0xFF800000> : vector<8x1xf32>
    %15 = vector.multi_reduction <maximumf>, %14, %cst_11 [0] : vector<8x8x1xf32> to vector<8x1xf32>
    %16 = vector.shape_cast %15 : vector<8x1xf32> to vector<1x8x1xf32>
    %17 = vector.broadcast %16 : vector<1x8x1xf32> to vector<8x8x1xf32>
    %18 = arith.subf %14, %17 : vector<8x8x1xf32>
    %19 = math.exp %18 : vector<8x8x1xf32>
    %cst_12 = arith.constant dense<0.000000e+00> : vector<8x1xf32>
    %20 = vector.multi_reduction <add>, %19, %cst_12 [0] : vector<8x8x1xf32> to vector<8x1xf32>
    %21 = vector.shape_cast %20 : vector<8x1xf32> to vector<1x8x1xf32>
    %22 = vector.broadcast %21 : vector<1x8x1xf32> to vector<8x8x1xf32>
    %23 = arith.divf %19, %22 : vector<8x8x1xf32>
    %24 = vector.broadcast %23 : vector<8x8x1xf32> to vector<8x8x256xf32>
    %25 = arith.mulf %24, %0 : vector<8x8x256xf32>
    %cst_13 = arith.constant dense<0.000000e+00> : vector<8x256xf32>
    %26 = vector.multi_reduction <add>, %25, %cst_13 [0] : vector<8x8x256xf32> to vector<8x256xf32>
    %c0_14 = arith.constant 0 : index
    %c0_15 = arith.constant 0 : index
    %27 = vector.load %arg5[%c0_14, %c0_15] : memref<256x128xf32, #tpu.memory_space<vmem>>, vector<256x128xf32>
    %cst_16 = arith.constant dense<0.000000e+00> : vector<8x128xf32>
    %28 = tpu.matmul %26, %27, %cst_16 {dimension_numbers = #tpu.dot_dimension_numbers<[1], [0], [0], [1], [0, 0, 1, 1], [], []>} : vector<8x256xf32>, vector<256x128xf32>, vector<8x128xf32> -> vector<8x128xf32>
    %c0_17 = arith.constant 0 : index
    %c0_18 = arith.constant 0 : index
    %29 = vector.load %arg6[%c0_17, %c0_18] : memref<1x128xf32, #tpu.memory_space<vmem>>, vector<1x128xf32>
    %30 = vector.broadcast %29 : vector<1x128xf32> to vector<8x128xf32>
    %31 = arith.addf %28, %30 : vector<8x128xf32>
    %c0_19 = arith.constant 0 : index
    %c0_20 = arith.constant 0 : index
    %32 = vector.load %arg7[%c0_19, %c0_20] : memref<8x128xf32, #tpu.memory_space<vmem>>, vector<8x128xf32>
    tpu.vector_store %arg7[%c0_19, %c0_20], %31 {strides = array<i32>} : memref<8x128xf32, #tpu.memory_space<vmem>>, vector<8x128xf32>,
    return
  }
  func.func @transform_0(%arg0: i32) -> (i32, i32, i32) {
    %c0_i32 = arith.constant 0 : i32
    %c0_i32_0 = arith.constant 0 : i32
    %c0_i32_1 = arith.constant 0 : i32
    return %c0_i32, %arg0, %c0_i32_0 : i32, i32, i32
  }
  func.func @transform_1(%arg0: i32) -> (i32, i32, i32) {
    %c0_i32 = arith.constant 0 : i32
    %c0_i32_0 = arith.constant 0 : i32
    %c0_i32_1 = arith.constant 0 : i32
    return %c0_i32, %arg0, %c0_i32_0 : i32, i32, i32
  }
  func.func @transform_2(%arg0: i32) -> (i32, i32) {
    %c0_i32 = arith.constant 0 : i32
    %c0_i32_0 = arith.constant 0 : i32
    %c0_i32_1 = arith.constant 0 : i32
    return %c0_i32, %c0_i32_0 : i32, i32
  }
  func.func @transform_3(%arg0: i32) -> (i32, i32) {
    %c0_i32 = arith.constant 0 : i32
    %c0_i32_0 = arith.constant 0 : i32
    %c0_i32_1 = arith.constant 0 : i32
    return %c0_i32, %c0_i32_0 : i32, i32
  }
  func.func @transform_4(%arg0: i32) -> (i32, i32) {
    %c0_i32 = arith.constant 0 : i32
    %c0_i32_0 = arith.constant 0 : i32
    %c0_i32_1 = arith.constant 0 : i32
    return %c0_i32, %c0_i32_0 : i32, i32
  }
  func.func @transform_5(%arg0: i32) -> (i32, i32) {
    %c0_i32 = arith.constant 0 : i32
    %c0_i32_0 = arith.constant 0 : i32
    %c0_i32_1 = arith.constant 0 : i32
    return %c0_i32, %c0_i32_0 : i32, i32
  }
  func.func @transform_6(%arg0: i32) -> (i32, i32) {
    %c0_i32 = arith.constant 0 : i32
    %c0_i32_0 = arith.constant 0 : i32
    return %arg0, %c0_i32 : i32, i32
  }
}

</mosaic_0001>

<bundles_post_ra>
// kernel: bilstm_attention_forward.5
= control target key start
LH: loop header
LB: loop body
LE: loop exit
PB: predicated region body
PF: predicated region fallthrough
CT: control target
= control target key end

     0   :  { %vm191_vm5 = vcmask 7168   ;;  %s832_s2 = inlined_call_operand.vmem [shape: f32[256,128], index: 2, kind: input, shape index: {}]   ;;  %s833_s0 = inlined_call_operand.vmem [shape: f32[8,8,256], index: 0, kind: input, shape index: {}]   ;;  %s834_s3 = inlined_call_operand.<no memory space> [shape: f32[1,1], index: 3, kind: input, shape index: {}]   ;;  %s835_s1 = inlined_call_operand.vmem [shape: f32[8,8,1], index: 1, kind: input, shape index: {}]   ;;  %s836_s5 = inlined_call_operand.vmem [shape: f32[1,128], index: 5, kind: input, shape index: {}]   ;;  %s837_s4 = inlined_call_operand.vmem [shape: f32[256,128], index: 4, kind: input, shape index: {}]   ;;  %s838_s6 = inlined_call_operand.vmem [shape: f32[8,128], index: 6, kind: output, shape index: {}]  }
   0x1   :  { %v56_v0 = vld [vmem:[%s832_s2 + $0x78] sm:$0xff]  ;;  %v55_v2 = vld [vmem:[%s832_s2 + $0x70] sm:$0xff]  ;;  %v54_v4 = vld [vmem:[%s832_s2 + $0x68] sm:$0xff]  ;;  %v11_v48 = vstv %s834_s3 }
   0x2   :  { %v72_v1 = vld [vmem:[%s832_s2 + $0xf8] sm:$0xff]  ;;  %73 = vmatpush.msra.mxu0 %v56_v0  ;;  %v71_v3 = vld [vmem:[%s832_s2 + $0xf0] sm:$0xff]  ;;  %v70_v5 = vld [vmem:[%s832_s2 + $0xe8] sm:$0xff]  ;;  %12 = vst [vmem:[#allocation2] sm:$0x1] %v11_v48 }
   0x3   :  { %114 = vmatpush.msra.mxu1 %v72_v1  ;;  %v53_v6 = vld [vmem:[%s832_s2 + $0x60] sm:$0xff]  ;;  %v52_v8 = vld [vmem:[%s832_s2 + $0x58] sm:$0xff]  ;;  %v51_v10 = vld [vmem:[%s832_s2 + $0x50] sm:$0xff] }
   0x4   :  { %74 = vmatpush.msra.mxu0 %v55_v2  ;;  %v69_v7 = vld [vmem:[%s832_s2 + $0xe0] sm:$0xff]  ;;  %v68_v9 = vld [vmem:[%s832_s2 + $0xd8] sm:$0xff]  ;;  %v67_v11 = vld [vmem:[%s832_s2 + $0xd0] sm:$0xff] }
   0x5   :  { %115 = vmatpush.msra.mxu1 %v71_v3  ;;  %v50_v12 = vld [vmem:[%s832_s2 + $0x48] sm:$0xff]  ;;  %v49_v14 = vld [vmem:[%s832_s2 + $0x40] sm:$0xff]  ;;  %v48_v16 = vld [vmem:[%s832_s2 + $0x38] sm:$0xff] }
   0x6   :  { %75 = vmatpush.msra.mxu0 %v54_v4  ;;  %v66_v13 = vld [vmem:[%s832_s2 + $0xc8] sm:$0xff]  ;;  %v65_v15 = vld [vmem:[%s832_s2 + $0xc0] sm:$0xff]  ;;  %v64_v17 = vld [vmem:[%s832_s2 + $0xb8] sm:$0xff] }
   0x7   :  { %116 = vmatpush.msra.mxu1 %v70_v5  ;;  %v47_v18 = vld [vmem:[%s832_s2 + $0x30] sm:$0xff]  ;;  %v46_v20 = vld [vmem:[%s832_s2 + $0x28] sm:$0xff]  ;;  %v45_v22 = vld [vmem:[%s832_s2 + $0x20] sm:$0xff]  ;;  %v443_v5 = vmov 0  }
   0x8   :  { %76 = vmatpush.msra.mxu0 %v53_v6  ;;  %v63_v19 = vld [vmem:[%s832_s2 + $0xb0] sm:$0xff]  ;;  %v62_v21 = vld [vmem:[%s832_s2 + $0xa8] sm:$0xff]  ;;  %v61_v23 = vld [vmem:[%s832_s2 + $0xa0] sm:$0xff]  ;;  %422 = vset.pattern.permute.xlu2 %v443_v5 }
   0x9   :  { %117 = vmatpush.msra.mxu1 %v69_v7  ;;  %v44_v24 = vld [vmem:[%s832_s2 + $0x18] sm:$0xff]  ;;  %v43_v26 = vld [vmem:[%s832_s2 + $0x10] sm:$0xff]  ;;  %v42_v28 = vld [vmem:[%s832_s2 + $0x8] sm:$0xff]  ;;  %421 = vset.pattern.permute.xlu1 %v443_v5 }
   0xa   :  { %77 = vmatpush.msra.mxu0 %v52_v8  ;;  %v60_v25 = vld [vmem:[%s832_s2 + $0x98] sm:$0xff]  ;;  %v59_v27 = vld [vmem:[%s832_s2 + $0x90] sm:$0xff]  ;;  %v58_v29 = vld [vmem:[%s832_s2 + $0x88] sm:$0xff]  ;;  %420 = vset.pattern.permute.xlu0 %v443_v5 }
   0xb   :  { %118 = vmatpush.msra.mxu1 %v68_v9  ;;  %v41_v30 = vld [vmem:[%s832_s2] sm:$0xff]  ;;  %v583_v33 = vld [vmem:[%s833_s0 + $0x8] sm:$0xff]  ;;  %v590_v34 = vld [vmem:[%s833_s0 + $0x10] sm:$0xff] }
   0xc   :  { %78 = vmatpush.msra.mxu0 %v51_v10  ;;  %v57_v31 = vld [vmem:[%s832_s2 + $0x80] sm:$0xff]  ;;  %v595_v35 = vld [vmem:[%s833_s0 + $0x18] sm:$0xff]  ;;  %v607_v37 = vld [vmem:[%s833_s0 + $0x28] sm:$0xff] }
   0xd   :  { %119 = vmatpush.msra.mxu1 %v67_v11  ;;  %v578_v32 = vld [vmem:[%s833_s0] sm:$0xff]  ;;  %v614_v38 = vld [vmem:[%s833_s0 + $0x30] sm:$0xff]  ;;  %v619_v39 = vld [vmem:[%s833_s0 + $0x38] sm:$0xff] }
   0xe   :  { %79 = vmatpush.msra.mxu0 %v50_v12  ;;  %v602_v36 = vld [vmem:[%s833_s0 + $0x20] sm:$0xff]  ;;  %v631_v41 = vld [vmem:[%s833_s0 + $0x48] sm:$0xff]  ;;  %v638_v42 = vld [vmem:[%s833_s0 + $0x50] sm:$0xff] }
   0xf   :  { %120 = vmatpush.msra.mxu1 %v66_v13  ;;  %v626_v40 = vld [vmem:[%s833_s0 + $0x40] sm:$0xff]  ;;  %v643_v43 = vld [vmem:[%s833_s0 + $0x58] sm:$0xff]  ;;  %v655_v45 = vld [vmem:[%s833_s0 + $0x68] sm:$0xff] }
  0x10   :  { %80 = vmatpush.msra.mxu0 %v49_v14  ;;  %v650_v44 = vld [vmem:[%s833_s0 + $0x60] sm:$0xff]  ;;  %v662_v46 = vld [vmem:[%s833_s0 + $0x70] sm:$0xff]  ;;  %v667_v47 = vld [vmem:[%s833_s0 + $0x78] sm:$0xff] }
  0x11   :  { %121 = vmatpush.msra.mxu1 %v65_v15  ;;  %v423_v0 = vld [vmem:[#allocation2] ss:$0 sm:$0xff]  ;;  %v172_v3 = vld [vmem:[%s835_s1 + $0x28] sm:$0xff]  ;;  %v173_v12 = vld [vmem:[%s835_s1 + $0x30] sm:$0xff] }
  0x12   :  { %81 = vmatpush.msra.mxu0 %v48_v16  ;;  %v168_v7 = vld [vmem:[%s835_s1 + $0x8] sm:$0xff]  ;;  %v171_v10 = vld [vmem:[%s835_s1 + $0x20] sm:$0xff]  ;;  %vm180_vm0 = vcmp.eq.f32.partialorder %v172_v3, 0.0  ;;  %v169_v15 = vld [vmem:[%s835_s1 + $0x10] sm:$0xff]  ;;  %vm181_vm3 = vcmp.eq.f32.partialorder %v173_v12, 0.0 }
  0x13   :  { %122 = vmatpush.msra.mxu1 %v64_v17  ;;  %v167_v13 = vld [vmem:[%s835_s1] sm:$0xff]  ;;  %v170_v16 = vld [vmem:[%s835_s1 + $0x18] sm:$0xff]  ;;  %vm176_vm1 = vcmp.eq.f32.partialorder %v168_v7, 0.0  ;;  %vm179_vm2 = vcmp.eq.f32.partialorder %v171_v10, 0.0  ;;  %vm177_vm6 = vcmp.eq.f32.partialorder %v169_v15, 0.0 }
  0x14   :  { %82 = vmatpush.msra.mxu0 %v47_v18  ;;  %vm175_vm4 = vcmp.eq.f32.partialorder %v167_v13, 0.0  ;;  %vm178_vm7 = vcmp.eq.f32.partialorder %v170_v16, 0.0 }
  0x15   :  { %123 = vmatpush.msra.mxu1 %v63_v19 }
  0x16   :  { %83 = vmatpush.msra.mxu0 %v46_v20 }
  0x17   :  { %124 = vmatpush.msra.mxu1 %v62_v21 }
  0x18   :  { %84 = vmatpush.msra.mxu0 %v45_v22 }
  0x19   :  { %125 = vmatpush.msra.mxu1 %v61_v23  ;;  %v174_v23 = vld [vmem:[%s835_s1 + $0x38] sm:$0xff] }
  0x1a   :  { %85 = vmatpush.msra.mxu0 %v44_v24  ;;  %vm182_vm8 = vcmp.eq.f32.partialorder %v174_v23, 0.0 }
  0x1b   :  { %126 = vmatpush.msra.mxu1 %v60_v25 }
  0x1c   :  { %86 = vmatpush.msra.mxu0 %v43_v26 }
  0x1d   :  { %127 = vmatpush.msra.mxu1 %v59_v27 }
  0x1e   :  { %87 = vmatpush.msra.mxu0 %v42_v28 }
  0x1f   :  { %128 = vmatpush.msra.mxu1 %v58_v29 }
  0x20   :  { %88 = vmatpush.msra.mxu0 %v41_v30 }
  0x21   :  { %129 = vmatpush.msra.mxu1 %v57_v31  ;;  %89 = vmatmul.f32.vlgmr.msra.gmra.mxu0 %v578_v32 }
  0x22   :  { %130 = vmatmul.f32.vlgmr.msra.gmra.mxu1 %v583_v33 }
  0x29   :  { %92 = vmatmul.f32.gmra.mxu0 %v590_v34 }
  0x2a   :  { %133 = vmatmul.f32.gmra.mxu1 %v595_v35 }
  0x31   :  { %95 = vmatmul.f32.gmra.mxu0 %v602_v36 }
  0x32   :  { %136 = vmatmul.f32.gmra.mxu1 %v607_v37 }
  0x39   :  { %98 = vmatmul.f32.gmra.mxu0 %v614_v38 }
  0x3a   :  { %139 = vmatmul.f32.gmra.mxu1 %v619_v39 }
  0x41   :  { %101 = vmatmul.f32.gmra.mxu0 %v626_v40 }
  0x42   :  { %142 = vmatmul.f32.gmra.mxu1 %v631_v41 }
  0x49   :  { %104 = vmatmul.f32.gmra.mxu0 %v638_v42 }
  0x4a   :  { %145 = vmatmul.f32.gmra.mxu1 %v643_v43 }
  0x51   :  { %107 = vmatmul.f32.gmra.mxu0 %v650_v44 }
  0x52   :  { %148 = vmatmul.f32.gmra.mxu1 %v655_v45 }
  0x59   :  { %110 = vmatmul.f32.gmra.mxu0 %v662_v46 }
  0x5a   :  { %151 = vmatmul.f32.gmra.mxu1 %v667_v47 }
  0x9e   :  { %v90_v49 = vpop.f32.mrf.mxu0 }
  0x9f   :  { %v131_v50 = vpop.f32.mrf.mxu1 }
  0xa0   :  { %v132_v6 = vadd.f32 %v131_v50, %v90_v49 }
  0xa2   :  { %v159_v19 = vadd.f32 %v423_v0, %v132_v6 }
  0xa4   :  { %v183_v31 = vsel %vm175_vm4, -1e+10, %v159_v19 }
  0xa6   :  { %v93_v51 = vpop.f32.mrf.mxu0 }
  0xa7   :  { %v134_v52 = vpop.f32.mrf.mxu1 }
  0xa8   :  { %v135_v1 = vadd.f32 %v134_v52, %v93_v51 }
  0xaa   :  { %v160_v14 = vadd.f32 %v423_v0, %v135_v1 }
  0xac   :  { %v184_v26 = vsel %vm176_vm1, -1e+10, %v160_v14 }
  0xad   :  { %v193_v51 = vsel %vm191_vm5, %v184_v26, -inf }
  0xae   :  { %v96_v53 = vpop.f32.mrf.mxu0 }
  0xaf   :  { %v137_v54 = vpop.f32.mrf.mxu1 }
  0xb0   :  { %v138_v8 = vadd.f32 %v137_v54, %v96_v53 }
  0xb2   :  { %v161_v20 = vadd.f32 %v423_v0, %v138_v8 }
  0xb4   :  { %v185_v48 = vsel %vm177_vm6, -1e+10, %v161_v20 }
  0xb6   :  { %v99_v55 = vpop.f32.mrf.mxu0 }
  0xb7   :  { %v140_v56 = vpop.f32.mrf.mxu1 }
  0xb8   :  { %v141_v9 = vadd.f32 %v140_v56, %v99_v55  ;;  %v192_v56 = vsel %vm191_vm5, %v183_v31, -inf }
  0xba   :  { %v162_v21 = vadd.f32 %v423_v0, %v141_v9 }
  0xbc   :  { %v186_v49 = vsel %vm178_vm7, -1e+10, %v162_v21 }
  0xbe   :  { %v102_v57 = vpop.f32.mrf.mxu0 }
  0xbf   :  { %v143_v58 = vpop.f32.mrf.mxu1 }
  0xc0   :  { %v144_v2 = vadd.f32 %v143_v58, %v102_v57  ;;  %v194_v57 = vsel %vm191_vm5, %v185_v48, -inf  ;;  %v195_v58 = vsel %vm191_vm5, %v186_v49, -inf }
  0xc2   :  { %v163_v17 = vadd.f32 %v423_v0, %v144_v2 }
  0xc4   :  { %v187_v27 = vsel %vm179_vm2, -1e+10, %v163_v17 }
  0xc5   :  { %v196_v52 = vsel %vm191_vm5, %v187_v27, -inf }
  0xc6   :  { %v105_v59 = vpop.f32.mrf.mxu0 }
  0xc7   :  { %v146_v60 = vpop.f32.mrf.mxu1 }
  0xc8   :  { %v147_v61 = vadd.f32 %v146_v60, %v105_v59  ;;  %v197_v60 = vmax.f32 %v192_v56, %v196_v52 }
  0xca   :  { %v164_v11 = vadd.f32 %v423_v0, %v147_v61 }
  0xcc   :  { %v188_v22 = vsel %vm180_vm0, -1e+10, %v164_v11 }
  0xcd   :  { %v198_v30 = vsel %vm191_vm5, %v188_v22, -inf }
  0xce   :  { %v108_v62 = vpop.f32.mrf.mxu0  ;;  %v199_v54 = vmax.f32 %v193_v51, %v198_v30 }
  0xcf   :  { %v149_v63 = vpop.f32.mrf.mxu1 }
  0xd0   :  { %v150_v4 = vadd.f32 %v149_v63, %v108_v62  ;;  %v204_v63 = vmax.f32 %v197_v60, %v199_v54 }
  0xd2   :  { %v165_v18 = vadd.f32 %v423_v0, %v150_v4 }
  0xd4   :  { %v189_v28 = vsel %vm181_vm3, -1e+10, %v165_v18 }
  0xd5   :  { %v200_v53 = vsel %vm191_vm5, %v189_v28, -inf }
  0xd6   :  { %v111_v24 = vpop.f32.mrf.mxu0  ;;  %v201_v61 = vmax.f32 %v194_v57, %v200_v53 }
  0xd7   :  { %v152_v25 = vpop.f32.mrf.mxu1 }
  0xd8   :  { %v153_v29 = vadd.f32 %v152_v25, %v111_v24 }
  0xda   :  { %v166_v50 = vadd.f32 %v423_v0, %v153_v29 }
  0xdc   :  { %v190_v55 = vsel %vm182_vm8, -1e+10, %v166_v50 }
  0xdd   :  { %v202_v59 = vsel %vm191_vm5, %v190_v55, -inf }
  0xde   :  { %v203_v62 = vmax.f32 %v195_v58, %v202_v59 }
  0xe0   :  { %v205_v0 = vmax.f32 %v201_v61, %v203_v62 }
  0xe2   :  { %v206_v1 = vmax.f32 %v204_v63, %v205_v0 }
  0xe4   :  { %v207_v2 = vsub.f32 %v183_v31, %v206_v1  ;;  %v208_v3 = vsub.f32 %v184_v26, %v206_v1  ;;  %v209_v4 = vsub.f32 %v185_v48, %v206_v1  ;;  %v210_v5 = vsub.f32 %v186_v49, %v206_v1 }
  0xe5   :  { %v211_v6 = vsub.f32 %v187_v27, %v206_v1  ;;  %v212_v10 = vsub.f32 %v188_v22, %v206_v1  ;;  %v213_v12 = vsub.f32 %v189_v28, %v206_v1  ;;  %v214_v14 = vsub.f32 %v190_v55, %v206_v1 }
  0xe6   :  { %v215_v7 = vmul.f32 1.442695, %v207_v2  ;;  %v217_v8 = vmul.f32 1.442695, %v208_v3  ;;  %v219_v9 = vmul.f32 1.442695, %v209_v4 }
  0xe7   :  { %v221_v11 = vmul.f32 1.442695, %v210_v5  ;;  %v223_v13 = vmul.f32 1.442695, %v211_v6  ;;  %v225_v15 = vmul.f32 1.442695, %v212_v10 }
  0xe8   :  { %425 = vpow2.f32 %v215_v7  ;;  %v227_v16 = vmul.f32 1.442695, %v213_v12  ;;  %v229_v19 = vmul.f32 1.442695, %v214_v14  ;;  %v369_v12 = vld [vmem:[%s837_s4 + $0xf8] sm:$0xff]  ;;  %v368_v14 = vld [vmem:[%s837_s4 + $0xf0] sm:$0xff] }
  0xe9   :  { %427 = vpow2.f32 %v217_v8  ;;  %394 = vmatpush.msra.mxu3 %v369_v12 }
  0xea   :  { %429 = vpow2.f32 %v219_v9 }
  0xeb   :  { %431 = vpow2.f32 %v221_v11  ;;  %v353_v11 = vld [vmem:[%s837_s4 + $0x78] sm:$0xff]  ;;  %395 = vmatpush.msra.mxu3 %v368_v14 }
  0xec   :  { %433 = vpow2.f32 %v223_v13  ;;  %v352_v13 = vld [vmem:[%s837_s4 + $0x70] sm:$0xff]  ;;  %374 = vmatpush.msra.mxu2 %v353_v11 }
  0xed   :  { %435 = vpow2.f32 %v225_v15  ;;  %v351_v15 = vld [vmem:[%s837_s4 + $0x68] sm:$0xff] }
  0xee   :  { %v426_v17 = vpop.eup %425  ;;  %437 = vpow2.f32 %v227_v16  ;;  %v367_v16 = vld [vmem:[%s837_s4 + $0xe8] sm:$0xff]  ;;  %375 = vmatpush.msra.mxu2 %v352_v13 }
  0xef   :  { %v428_v18 = vpop.eup %427  ;;  %v231_v20 = vsel %vm191_vm5, %v426_v17, 0.0  ;;  %439 = vpow2.f32 %v229_v19  ;;  %396 = vmatpush.msra.mxu3 %v367_v16  ;;  %v349_v19 = vld [vmem:[%s837_s4 + $0x58] sm:$0xff] }
  0xf0   :  { %v430_v21 = vpop.eup %429  ;;  %v232_v22 = vsel %vm191_vm5, %v428_v18, 0.0  ;;  %376 = vmatpush.msra.mxu2 %v351_v15 }
  0xf1   :  { %v432_v23 = vpop.eup %431  ;;  %v233_v24 = vadd.f32 %v232_v22, %v231_v20  ;;  %v234_v25 = vsel %vm191_vm5, %v430_v21, 0.0  ;;  %v365_v20 = vld [vmem:[%s837_s4 + $0xd8] sm:$0xff]  ;;  %v364_v22 = vld [vmem:[%s837_s4 + $0xd0] sm:$0xff] }
  0xf2   :  { %v434_v26 = vpop.eup %433  ;;  %v236_v28 = vsel %vm191_vm5, %v432_v23, 0.0 }
  0xf3   :  { %v235_v27 = vadd.f32 %v234_v25, %v233_v24  ;;  %v436_v29 = vpop.eup %435  ;;  %v238_v31 = vsel %vm191_vm5, %v434_v26, 0.0  ;;  %v363_v24 = vld [vmem:[%s837_s4 + $0xc8] sm:$0xff]  ;;  %v346_v25 = vld [vmem:[%s837_s4 + $0x40] sm:$0xff] }
  0xf4   :  { %v438_v48 = vpop.eup %437  ;;  %v240_v50 = vsel %vm191_vm5, %v436_v29, 0.0 }
  0xf5   :  { %v237_v30 = vadd.f32 %v236_v28, %v235_v27  ;;  %v440_v51 = vpop.eup %439  ;;  %v242_v53 = vsel %vm191_vm5, %v438_v48, 0.0  ;;  %v345_v27 = vld [vmem:[%s837_s4 + $0x38] sm:$0xff] }
  0xf6   :  { %v244_v55 = vsel %vm191_vm5, %v440_v51, 0.0  ;;  %v361_v28 = vld [vmem:[%s837_s4 + $0xb8] sm:$0xff] }
  0xf7   :  { %v239_v49 = vadd.f32 %v238_v31, %v237_v30  ;;  %v360_v30 = vld [vmem:[%s837_s4 + $0xb0] sm:$0xff]  ;;  %v343_v31 = vld [vmem:[%s837_s4 + $0x28] sm:$0xff] }
  0xf9   :  { %v241_v52 = vadd.f32 %v240_v50, %v239_v49  ;;  %v342_v49 = vld [vmem:[%s837_s4 + $0x20] sm:$0xff] }
  0xfa   :  { %v358_v50 = vld [vmem:[%s837_s4 + $0xa0] sm:$0xff] }
  0xfb   :  { %v243_v54 = vadd.f32 %v242_v53, %v241_v52  ;;  %v357_v52 = vld [vmem:[%s837_s4 + $0x98] sm:$0xff]  ;;  %v340_v53 = vld [vmem:[%s837_s4 + $0x10] sm:$0xff] }
  0xfd   :  { %v245_v56 = vadd.f32 %v244_v55, %v243_v54  ;;  %v356_v54 = vld [vmem:[%s837_s4 + $0x90] sm:$0xff]  ;;  %v339_v55 = vld [vmem:[%s837_s4 + $0x8] sm:$0xff] }
  0xff   :  { %441 = vrcp.f32 %v245_v56  ;;  %v257_v60 = vand.u32 2147483648, %v245_v56  ;;  %v255_v62 = vand.u32 2147483647, %v245_v56  ;;  %vm251_vm10 = vweird.f32 %v245_v56 }
 0x101   :  { %v258_v0 = vor.u32 1.1754944e-38, %v257_v60  ;;  %vm256_vm12 = vcmp.eq.f32.partialorder %v255_v62, 8.507059e+37 }
 0x105   :  { %v442_v57 = vpop.eup %441 }
 0x106   :  { %v247_v58 = vmul.f32 %v442_v57, %v245_v56  ;;  %vm252_vm9 = vweird.f32 %v442_v57  ;;  %v355_v56 = vld [vmem:[%s837_s4 + $0x88] sm:$0xff] }
 0x107   :  { %vm253_vm11 = vmor %vm251_vm10, %vm252_vm9 }
 0x108   :  { %v248_v59 = vsub.f32 1.0, %v247_v58  ;;  %v354_v58 = vld [vmem:[%s837_s4 + $0x80] sm:$0xff] }
 0x10a   :  { %v249_v61 = vmul.f32 %v442_v57, %v248_v59 }
 0x10c   :  { %v250_v63 = vadd.f32 %v442_v57, %v249_v61 }
 0x10e   :  { %v254_v1 = vsel %vm253_vm11, %v442_v57, %v250_v63  ;;  %v338_v57 = vld [vmem:[%s837_s4] sm:$0xff] }
 0x10f   :  { %v259_v2 = vsel %vm256_vm12, %v258_v0, %v254_v1 }
 0x110   :  { %v264_v3 = vmul.f32 %v434_v26, %v259_v2  ;;  %v262_v4 = vmul.f32 %v430_v21, %v259_v2  ;;  %v260_v5 = vmul.f32 %v426_v17, %v259_v2  ;;  %v265_v6 = vmul.f32 %v436_v29, %v259_v2  ;;  %v350_v17 = vld [vmem:[%s837_s4 + $0x60] sm:$0xff]  ;;  %v348_v21 = vld [vmem:[%s837_s4 + $0x50] sm:$0xff] }
 0x111   :  { %v263_v7 = vmul.f32 %v432_v23, %v259_v2  ;;  %v261_v8 = vmul.f32 %v428_v18, %v259_v2  ;;  %v267_v9 = vmul.f32 %v440_v51, %v259_v2  ;;  %v266_v10 = vmul.f32 %v438_v48, %v259_v2  ;;  %v366_v18 = vld [vmem:[%s837_s4 + $0xe0] sm:$0xff]  ;;  %377 = vmatpush.msra.mxu2 %v350_v17  ;;  %v347_v23 = vld [vmem:[%s837_s4 + $0x48] sm:$0xff]  ;;  %v344_v29 = vld [vmem:[%s837_s4 + $0x30] sm:$0xff] }
 0x112   :  { %290 = vperm.xlu2 %422, %v264_v3   ;;  %280 = vperm.xlu1 %421, %v262_v4   ;;  %v362_v26 = vld [vmem:[%s837_s4 + $0xc0] sm:$0xff]  ;;  %v359_v48 = vld [vmem:[%s837_s4 + $0xa8] sm:$0xff]  ;;  %v341_v51 = vld [vmem:[%s837_s4 + $0x18] sm:$0xff] }
 0x113   :  { %270 = vperm.xlu0 %420, %v260_v5   ;;  %397 = vmatpush.msra.mxu3 %v366_v18 }
 0x114   :  { %378 = vmatpush.msra.mxu2 %v349_v19 }
 0x115   :  { %398 = vmatpush.msra.mxu3 %v365_v20 }
 0x116   :  { %379 = vmatpush.msra.mxu2 %v348_v21 }
 0x117   :  { %399 = vmatpush.msra.mxu3 %v364_v22 }
 0x118   :  { %380 = vmatpush.msra.mxu2 %v347_v23 }
 0x119   :  { %400 = vmatpush.msra.mxu3 %v363_v24 }
 0x11a   :  { %295 = vperm.xlu2 %422, %v265_v6   ;;  %285 = vperm.xlu1 %421, %v263_v7  }
 0x11b   :  { %275 = vperm.xlu0 %420, %v261_v8   ;;  %381 = vmatpush.msra.mxu2 %v346_v25 }
 0x11c   :  { %401 = vmatpush.msra.mxu3 %v362_v26 }
 0x11d   :  { %382 = vmatpush.msra.mxu2 %v345_v27 }
 0x11e   :  { %402 = vmatpush.msra.mxu3 %v361_v28 }
 0x11f   :  { %383 = vmatpush.msra.mxu2 %v344_v29 }
 0x120   :  { %403 = vmatpush.msra.mxu3 %v360_v30 }
 0x121   :  { %384 = vmatpush.msra.mxu2 %v343_v31 }
 0x122   :  { %305 = vperm.xlu1 %421, %v267_v9   ;;  %404 = vmatpush.msra.mxu3 %v359_v48 }
 0x123   :  { %300 = vperm.xlu0 %420, %v266_v10   ;;  %385 = vmatpush.msra.mxu2 %v342_v49 }
 0x124   :  { %405 = vmatpush.msra.mxu3 %v358_v50 }
 0x125   :  { %386 = vmatpush.msra.mxu2 %v341_v51 }
 0x126   :  { %406 = vmatpush.msra.mxu3 %v357_v52 }
 0x127   :  { %387 = vmatpush.msra.mxu2 %v340_v53 }
 0x128   :  { %407 = vmatpush.msra.mxu3 %v356_v54 }
 0x129   :  { %388 = vmatpush.msra.mxu2 %v339_v55 }
 0x12a   :  { %408 = vmatpush.msra.mxu3 %v355_v56 }
 0x12b   :  { %389 = vmatpush.msra.mxu2 %v338_v57 }
 0x12c   :  { %409 = vmatpush.msra.mxu3 %v354_v58 }
 0x16c   :  { %v291_v61 = vpop.permute.xlu2 %290 }
 0x174   :  { %v296_v12 = vpop.permute.xlu2 %295 }
 0x184   :  { %v281_v59 = vpop.permute.xlu1 %280 }
 0x185   :  { %v271_v60 = vpop.permute.xlu0 %270  ;;  %v312_v4 = vmul.f32 %v281_v59, %v602_v36  ;;  %v313_v5 = vmul.f32 %v281_v59, %v607_v37  ;;  %v318_v36 = vmul.f32 %v296_v12, %v638_v42  ;;  %v319_v37 = vmul.f32 %v296_v12, %v643_v43  ;;  %v424_v42 = vld [vmem:[%s836_s5] ss:$0 sm:$0xff] }
 0x186   :  { %v308_v0 = vmul.f32 %v271_v60, %v578_v32  ;;  %v309_v1 = vmul.f32 %v271_v60, %v583_v33  ;;  %v316_v32 = vmul.f32 %v291_v61, %v626_v40  ;;  %v317_v33 = vmul.f32 %v291_v61, %v631_v41 }
 0x18c   :  { %v286_v62 = vpop.permute.xlu1 %285 }
 0x18d   :  { %v276_v63 = vpop.permute.xlu0 %275  ;;  %v314_v8 = vmul.f32 %v286_v62, %v614_v38  ;;  %v315_v9 = vmul.f32 %v286_v62, %v619_v39 }
 0x18e   :  { %v310_v2 = vmul.f32 %v276_v63, %v590_v34  ;;  %v311_v3 = vmul.f32 %v276_v63, %v595_v35 }
 0x190   :  { %v324_v6 = vadd.f32 %v310_v2, %v308_v0  ;;  %v331_v7 = vadd.f32 %v311_v3, %v309_v1 }
 0x192   :  { %v325_v10 = vadd.f32 %v324_v6, %v312_v4  ;;  %v332_v11 = vadd.f32 %v331_v7, %v313_v5 }
 0x194   :  { %v326_v34 = vadd.f32 %v325_v10, %v314_v8  ;;  %v333_v13 = vadd.f32 %v332_v11, %v315_v9  ;;  %v306_v16 = vpop.permute.xlu1 %305 }
 0x195   :  { %v301_v35 = vpop.permute.xlu0 %300  ;;  %v322_v40 = vmul.f32 %v306_v16, %v662_v46  ;;  %v323_v41 = vmul.f32 %v306_v16, %v667_v47 }
 0x196   :  { %v327_v14 = vadd.f32 %v326_v34, %v316_v32  ;;  %v334_v15 = vadd.f32 %v333_v13, %v317_v33  ;;  %v320_v39 = vmul.f32 %v301_v35, %v650_v44  ;;  %v321_v18 = vmul.f32 %v301_v35, %v655_v45 }
 0x198   :  { %v328_v38 = vadd.f32 %v327_v14, %v318_v36  ;;  %v335_v17 = vadd.f32 %v334_v15, %v319_v37 }
 0x19a   :  { %v329_v19 = vadd.f32 %v328_v38, %v320_v39  ;;  %v336_v20 = vadd.f32 %v335_v17, %v321_v18 }
 0x19c   :  { %v330_v21 = vadd.f32 %v329_v19, %v322_v40  ;;  %v337_v22 = vadd.f32 %v336_v20, %v323_v41 }
 0x19e   :  { %390 = vmatmul.f32.vlgmr.msra.gmra.mxu2 %v330_v21  ;;  %410 = vmatmul.f32.vlgmr.msra.gmra.mxu3 %v337_v22 }
 0x221   :  { %v391_v43 = vpop.f32.mrf.mxu2  ;;  %v411_v24 = vpop.f32.mrf.mxu3 }
 0x222   :  { %v392_v23 = vadd.f32 %v424_v42, %v391_v43 }
 0x224   :  { %v412_v44 = vadd.f32 %v411_v24, %v392_v23 }
 0x226   :  { %414 = vst [vmem:[%s838_s6] sm:$0xff] %v412_v44 }

// kernel: bilstm_attention_forward.3
= control target key start
LH: loop header
LB: loop body
LE: loop exit
PB: predicated region body
PF: predicated region fallthrough
CT: control target
= control target key end

     0   :  { %vm56_vm0 = vcmask 130048   ;;  %s992_s1 = inlined_call_operand.vmem [shape: f32[16,1024], index: 1, kind: input, shape index: {}]   ;;  %s993_s0 = inlined_call_operand.vmem [shape: f32[8,8,16], index: 0, kind: input, shape index: {}]   ;;  %s994_s2 = inlined_call_operand.vmem [shape: f32[1,1024], index: 2, kind: input, shape index: {}]   ;;  %s995_s3 = inlined_call_operand.vmem [shape: f32[8,8,1024], index: 3, kind: output, shape index: {}]  }
   0x1   :  { %v32_v0 = vld [vmem:[%s992_s1 + $0x50] sm:$0xff]  ;;  %v33_v1 = vld [vmem:[%s992_s1 + $0x58] sm:$0xff]  ;;  %v576_v4 = vld [vmem:[%s993_s0] sm:$0xff] }
   0x2   :  { %v24_v2 = vld [vmem:[%s992_s1 + $0x10] sm:$0xff]  ;;  %177 = vmatpush.msra.mxu2 %v32_v0  ;;  %218 = vmatpush.msra.mxu3 %v33_v1  ;;  %v25_v3 = vld [vmem:[%s992_s1 + $0x18] sm:$0xff]  ;;  %v30_v7 = vld [vmem:[%s992_s1 + $0x40] sm:$0xff] }
   0x3   :  { %v36_v5 = vld [vmem:[%s992_s1 + $0x70] sm:$0xff]  ;;  %v37_v6 = vld [vmem:[%s992_s1 + $0x78] sm:$0xff]  ;;  %v31_v8 = vld [vmem:[%s992_s1 + $0x48] sm:$0xff]  ;;  %95 = vmatpush.msra.mxu0 %v30_v7 }
   0x4   :  { %178 = vmatpush.msra.mxu2 %v24_v2  ;;  %219 = vmatpush.msra.mxu3 %v25_v3  ;;  %v22_v9 = vld [vmem:[%s992_s1] sm:$0xff]  ;;  %v23_v10 = vld [vmem:[%s992_s1 + $0x8] sm:$0xff]  ;;  %v28_v11 = vld [vmem:[%s992_s1 + $0x30] sm:$0xff] }
   0x5   :  { %493 = vmatmul.msk.f32.vlgmr.msra.gmra.mxu2 %vm56_vm0, %v576_v4  ;;  %501 = vmatmul.msk.f32.vlgmr.msra.gmra.mxu3 %vm56_vm0, %v576_v4  ;;  %v29_v12 = vld [vmem:[%s992_s1 + $0x38] sm:$0xff]  ;;  %v34_v13 = vld [vmem:[%s992_s1 + $0x60] sm:$0xff]  ;;  %v35_v14 = vld [vmem:[%s992_s1 + $0x68] sm:$0xff] }
   0x6   :  { %341 = vmatpush.msrb.mxu2 %v36_v5  ;;  %382 = vmatpush.msrb.mxu3 %v37_v6  ;;  %v15_v15 = vld [vmem:[%s993_s0 + $0x8] sm:$0xff]  ;;  %v26_v16 = vld [vmem:[%s992_s1 + $0x20] sm:$0xff]  ;;  %v16_v18 = vld [vmem:[%s993_s0 + $0x10] sm:$0xff] }
   0x7   :  { %136 = vmatpush.msra.mxu1 %v31_v8  ;;  %96 = vmatpush.msra.mxu0 %v22_v9  ;;  %v27_v17 = vld [vmem:[%s992_s1 + $0x28] sm:$0xff]  ;;  %v17_v19 = vld [vmem:[%s993_s0 + $0x18] sm:$0xff]  ;;  %v18_v20 = vld [vmem:[%s993_s0 + $0x20] sm:$0xff] }
   0x8   :  { %342 = vmatpush.msrb.mxu2 %v28_v11  ;;  %383 = vmatpush.msrb.mxu3 %v29_v12  ;;  %v19_v21 = vld [vmem:[%s993_s0 + $0x28] sm:$0xff]  ;;  %v20_v22 = vld [vmem:[%s993_s0 + $0x30] sm:$0xff]  ;;  %v21_v23 = vld [vmem:[%s993_s0 + $0x38] sm:$0xff] }
   0x9   :  { %137 = vmatpush.msra.mxu1 %v23_v10  ;;  %477 = vmatmul.msk.f32.vlgmr.msra.gmra.mxu0 %vm56_vm0, %v576_v4  ;;  %v708_v24 = vld [vmem:[%s994_s2] sm:$0xff] }
   0xa   :  { %485 = vmatmul.msk.f32.vlgmr.msra.gmra.mxu1 %vm56_vm0, %v576_v4  ;;  %259 = vmatpush.msrb.mxu0 %v34_v13  ;;  %v713_v25 = vperm.slane %v708_v24, 0  ;;  %v716_v26 = vperm.slane %v708_v24, 1  ;;  %v719_v27 = vperm.slane %v708_v24, 2  ;;  %v722_v28 = vperm.slane %v708_v24, 3 }
   0xb   :  { %300 = vmatpush.msrb.mxu1 %v35_v14 }
   0xc   :  { %260 = vmatpush.msrb.mxu0 %v26_v16 }
   0xd   :  { %494 = vmatmul.msk.f32.gmra.mxu2 %vm56_vm0, %v15_v15  ;;  %502 = vmatmul.msk.f32.gmra.mxu3 %vm56_vm0, %v15_v15 }
   0xe   :  { %301 = vmatpush.msrb.mxu1 %v27_v17 }
  0x11   :  { %478 = vmatmul.msk.f32.gmra.mxu0 %vm56_vm0, %v15_v15 }
  0x12   :  { %486 = vmatmul.msk.f32.gmra.mxu1 %vm56_vm0, %v15_v15 }
  0x15   :  { %495 = vmatmul.msk.f32.gmra.mxu2 %vm56_vm0, %v16_v18  ;;  %503 = vmatmul.msk.f32.gmra.mxu3 %vm56_vm0, %v16_v18 }
  0x19   :  { %479 = vmatmul.msk.f32.gmra.mxu0 %vm56_vm0, %v16_v18 }
  0x1a   :  { %487 = vmatmul.msk.f32.gmra.mxu1 %vm56_vm0, %v16_v18 }
  0x1d   :  { %496 = vmatmul.msk.f32.gmra.mxu2 %vm56_vm0, %v17_v19  ;;  %504 = vmatmul.msk.f32.gmra.mxu3 %vm56_vm0, %v17_v19 }
  0x21   :  { %480 = vmatmul.msk.f32.gmra.mxu0 %vm56_vm0, %v17_v19 }
  0x22   :  { %488 = vmatmul.msk.f32.gmra.mxu1 %vm56_vm0, %v17_v19 }
  0x25   :  { %497 = vmatmul.msk.f32.gmra.mxu2 %vm56_vm0, %v18_v20  ;;  %505 = vmatmul.msk.f32.gmra.mxu3 %vm56_vm0, %v18_v20 }
  0x29   :  { %481 = vmatmul.msk.f32.gmra.mxu0 %vm56_vm0, %v18_v20 }
  0x2a   :  { %489 = vmatmul.msk.f32.gmra.mxu1 %vm56_vm0, %v18_v20 }
  0x2d   :  { %498 = vmatmul.msk.f32.gmra.mxu2 %vm56_vm0, %v19_v21  ;;  %506 = vmatmul.msk.f32.gmra.mxu3 %vm56_vm0, %v19_v21 }
  0x31   :  { %482 = vmatmul.msk.f32.gmra.mxu0 %vm56_vm0, %v19_v21 }
  0x32   :  { %490 = vmatmul.msk.f32.gmra.mxu1 %vm56_vm0, %v19_v21 }
  0x35   :  { %499 = vmatmul.msk.f32.gmra.mxu2 %vm56_vm0, %v20_v22  ;;  %507 = vmatmul.msk.f32.gmra.mxu3 %vm56_vm0, %v20_v22 }
  0x39   :  { %483 = vmatmul.msk.f32.gmra.mxu0 %vm56_vm0, %v20_v22 }
  0x3a   :  { %491 = vmatmul.msk.f32.gmra.mxu1 %vm56_vm0, %v20_v22 }
  0x3d   :  { %500 = vmatmul.msk.f32.gmra.mxu2 %vm56_vm0, %v21_v23  ;;  %508 = vmatmul.msk.f32.gmra.mxu3 %vm56_vm0, %v21_v23 }
  0x41   :  { %484 = vmatmul.msk.f32.gmra.mxu0 %vm56_vm0, %v21_v23 }
  0x42   :  { %492 = vmatmul.msk.f32.gmra.mxu1 %vm56_vm0, %v21_v23 }
  0x45   :  { %525 = vmatmul.msk.f32.vlgmr.msrb.gmra.mxu2 %vm56_vm0, %v576_v4  ;;  %533 = vmatmul.msk.f32.vlgmr.msrb.gmra.mxu3 %vm56_vm0, %v576_v4 }
  0x49   :  { %509 = vmatmul.msk.f32.vlgmr.msrb.gmra.mxu0 %vm56_vm0, %v576_v4 }
  0x4a   :  { %517 = vmatmul.msk.f32.vlgmr.msrb.gmra.mxu1 %vm56_vm0, %v576_v4 }
  0x4d   :  { %526 = vmatmul.msk.f32.gmra.mxu2 %vm56_vm0, %v15_v15  ;;  %534 = vmatmul.msk.f32.gmra.mxu3 %vm56_vm0, %v15_v15 }
  0x51   :  { %510 = vmatmul.msk.f32.gmra.mxu0 %vm56_vm0, %v15_v15 }
  0x52   :  { %518 = vmatmul.msk.f32.gmra.mxu1 %vm56_vm0, %v15_v15 }
  0x55   :  { %527 = vmatmul.msk.f32.gmra.mxu2 %vm56_vm0, %v16_v18  ;;  %535 = vmatmul.msk.f32.gmra.mxu3 %vm56_vm0, %v16_v18 }
  0x59   :  { %511 = vmatmul.msk.f32.gmra.mxu0 %vm56_vm0, %v16_v18 }
  0x5a   :  { %519 = vmatmul.msk.f32.gmra.mxu1 %vm56_vm0, %v16_v18 }
  0x5d   :  { %528 = vmatmul.msk.f32.gmra.mxu2 %vm56_vm0, %v17_v19  ;;  %536 = vmatmul.msk.f32.gmra.mxu3 %vm56_vm0, %v17_v19 }
  0x61   :  { %512 = vmatmul.msk.f32.gmra.mxu0 %vm56_vm0, %v17_v19 }
  0x62   :  { %520 = vmatmul.msk.f32.gmra.mxu1 %vm56_vm0, %v17_v19 }
  0x65   :  { %529 = vmatmul.msk.f32.gmra.mxu2 %vm56_vm0, %v18_v20  ;;  %537 = vmatmul.msk.f32.gmra.mxu3 %vm56_vm0, %v18_v20 }
  0x69   :  { %513 = vmatmul.msk.f32.gmra.mxu0 %vm56_vm0, %v18_v20 }
  0x6a   :  { %521 = vmatmul.msk.f32.gmra.mxu1 %vm56_vm0, %v18_v20 }
  0x6d   :  { %530 = vmatmul.msk.f32.gmra.mxu2 %vm56_vm0, %v19_v21  ;;  %538 = vmatmul.msk.f32.gmra.mxu3 %vm56_vm0, %v19_v21 }
  0x71   :  { %514 = vmatmul.msk.f32.gmra.mxu0 %vm56_vm0, %v19_v21 }
  0x72   :  { %522 = vmatmul.msk.f32.gmra.mxu1 %vm56_vm0, %v19_v21 }
  0x75   :  { %531 = vmatmul.msk.f32.gmra.mxu2 %vm56_vm0, %v20_v22  ;;  %539 = vmatmul.msk.f32.gmra.mxu3 %vm56_vm0, %v20_v22 }
  0x79   :  { %515 = vmatmul.msk.f32.gmra.mxu0 %vm56_vm0, %v20_v22 }
  0x7a   :  { %523 = vmatmul.msk.f32.gmra.mxu1 %vm56_vm0, %v20_v22 }
  0x7d   :  { %532 = vmatmul.msk.f32.gmra.mxu2 %vm56_vm0, %v21_v23  ;;  %540 = vmatmul.msk.f32.gmra.mxu3 %vm56_vm0, %v21_v23 }
  0x81   :  { %516 = vmatmul.msk.f32.gmra.mxu0 %vm56_vm0, %v21_v23 }
  0x82   :  { %524 = vmatmul.msk.f32.gmra.mxu1 %vm56_vm0, %v21_v23 }
  0x86   :  { %v98_v29 = vpop.f32.mrf.mxu0 }
  0x87   :  { %v139_v30 = vpop.f32.mrf.mxu1  ;;  %v99_v31 = vadd.f32 %v98_v29, %v713_v25 }
  0x88   :  { %v140_v32 = vadd.f32 %v139_v30, %v716_v26  ;;  %v180_v33 = vpop.f32.mrf.mxu2  ;;  %v221_v34 = vpop.f32.mrf.mxu3 }
  0x89   :  { %v181_v35 = vadd.f32 %v180_v33, %v719_v27  ;;  %v222_v36 = vadd.f32 %v221_v34, %v722_v28  ;;  %409 = vst [vmem:[%s995_s3] sm:$0xff] %v99_v31 }
  0x8a   :  { %410 = vst [vmem:[%s995_s3 + $0x8] sm:$0xff] %v140_v32 }
  0x8b   :  { %411 = vst [vmem:[%s995_s3 + $0x10] sm:$0xff] %v181_v35 }
  0x8c   :  { %412 = vst [vmem:[%s995_s3 + $0x18] sm:$0xff] %v222_v36 }
  0x8e   :  { %v101_v37 = vpop.f32.mrf.mxu0 }
  0x8f   :  { %v142_v38 = vpop.f32.mrf.mxu1  ;;  %v102_v39 = vadd.f32 %v101_v37, %v713_v25 }
  0x90   :  { %v143_v40 = vadd.f32 %v142_v38, %v716_v26  ;;  %v183_v41 = vpop.f32.mrf.mxu2  ;;  %v224_v42 = vpop.f32.mrf.mxu3 }
  0x91   :  { %v184_v43 = vadd.f32 %v183_v41, %v719_v27  ;;  %v225_v44 = vadd.f32 %v224_v42, %v722_v28  ;;  %417 = vst [vmem:[%s995_s3 + $0x40] sm:$0xff] %v102_v39 }
  0x92   :  { %418 = vst [vmem:[%s995_s3 + $0x48] sm:$0xff] %v143_v40 }
  0x93   :  { %419 = vst [vmem:[%s995_s3 + $0x50] sm:$0xff] %v184_v43 }
  0x94   :  { %420 = vst [vmem:[%s995_s3 + $0x58] sm:$0xff] %v225_v44 }
  0x96   :  { %v104_v45 = vpop.f32.mrf.mxu0 }
  0x97   :  { %v145_v46 = vpop.f32.mrf.mxu1  ;;  %v105_v47 = vadd.f32 %v104_v45, %v713_v25 }
  0x98   :  { %v146_v48 = vadd.f32 %v145_v46, %v716_v26  ;;  %v186_v49 = vpop.f32.mrf.mxu2  ;;  %v227_v50 = vpop.f32.mrf.mxu3 }
  0x99   :  { %v187_v51 = vadd.f32 %v186_v49, %v719_v27  ;;  %v228_v52 = vadd.f32 %v227_v50, %v722_v28  ;;  %425 = vst [vmem:[%s995_s3 + $0x80] sm:$0xff] %v105_v47 }
  0x9a   :  { %426 = vst [vmem:[%s995_s3 + $0x88] sm:$0xff] %v146_v48 }
  0x9b   :  { %427 = vst [vmem:[%s995_s3 + $0x90] sm:$0xff] %v187_v51 }
  0x9c   :  { %428 = vst [vmem:[%s995_s3 + $0x98] sm:$0xff] %v228_v52 }
  0x9e   :  { %v107_v53 = vpop.f32.mrf.mxu0 }
  0x9f   :  { %v148_v54 = vpop.f32.mrf.mxu1  ;;  %v108_v55 = vadd.f32 %v107_v53, %v713_v25 }
  0xa0   :  { %v149_v56 = vadd.f32 %v148_v54, %v716_v26  ;;  %v189_v57 = vpop.f32.mrf.mxu2  ;;  %v230_v58 = vpop.f32.mrf.mxu3 }
  0xa1   :  { %v190_v59 = vadd.f32 %v189_v57, %v719_v27  ;;  %v231_v60 = vadd.f32 %v230_v58, %v722_v28  ;;  %433 = vst [vmem:[%s995_s3 + $0xc0] sm:$0xff] %v108_v55 }
  0xa2   :  { %434 = vst [vmem:[%s995_s3 + $0xc8] sm:$0xff] %v149_v56 }
  0xa3   :  { %435 = vst [vmem:[%s995_s3 + $0xd0] sm:$0xff] %v190_v59 }
  0xa4   :  { %436 = vst [vmem:[%s995_s3 + $0xd8] sm:$0xff] %v231_v60 }
  0xa6   :  { %v110_v61 = vpop.f32.mrf.mxu0 }
  0xa7   :  { %v151_v62 = vpop.f32.mrf.mxu1  ;;  %v111_v63 = vadd.f32 %v110_v61, %v713_v25 }
  0xa8   :  { %v152_v0 = vadd.f32 %v151_v62, %v716_v26  ;;  %v192_v1 = vpop.f32.mrf.mxu2  ;;  %v233_v2 = vpop.f32.mrf.mxu3 }
  0xa9   :  { %v193_v3 = vadd.f32 %v192_v1, %v719_v27  ;;  %v234_v4 = vadd.f32 %v233_v2, %v722_v28  ;;  %441 = vst [vmem:[%s995_s3 + $0x100] sm:$0xff] %v111_v63 }
  0xaa   :  { %442 = vst [vmem:[%s995_s3 + $0x108] sm:$0xff] %v152_v0 }
  0xab   :  { %443 = vst [vmem:[%s995_s3 + $0x110] sm:$0xff] %v193_v3 }
  0xac   :  { %444 = vst [vmem:[%s995_s3 + $0x118] sm:$0xff] %v234_v4 }
  0xae   :  { %v113_v5 = vpop.f32.mrf.mxu0 }
  0xaf   :  { %v154_v6 = vpop.f32.mrf.mxu1  ;;  %v114_v7 = vadd.f32 %v113_v5, %v713_v25 }
  0xb0   :  { %v155_v8 = vadd.f32 %v154_v6, %v716_v26  ;;  %v195_v9 = vpop.f32.mrf.mxu2  ;;  %v236_v10 = vpop.f32.mrf.mxu3 }
  0xb1   :  { %v196_v11 = vadd.f32 %v195_v9, %v719_v27  ;;  %v237_v12 = vadd.f32 %v236_v10, %v722_v28  ;;  %449 = vst [vmem:[%s995_s3 + $0x140] sm:$0xff] %v114_v7 }
  0xb2   :  { %450 = vst [vmem:[%s995_s3 + $0x148] sm:$0xff] %v155_v8 }
  0xb3   :  { %451 = vst [vmem:[%s995_s3 + $0x150] sm:$0xff] %v196_v11 }
  0xb4   :  { %452 = vst [vmem:[%s995_s3 + $0x158] sm:$0xff] %v237_v12 }
  0xb6   :  { %v116_v13 = vpop.f32.mrf.mxu0 }
  0xb7   :  { %v157_v14 = vpop.f32.mrf.mxu1  ;;  %v117_v15 = vadd.f32 %v116_v13, %v713_v25 }
  0xb8   :  { %v158_v16 = vadd.f32 %v157_v14, %v716_v26  ;;  %v198_v17 = vpop.f32.mrf.mxu2  ;;  %v239_v18 = vpop.f32.mrf.mxu3 }
  0xb9   :  { %v199_v19 = vadd.f32 %v198_v17, %v719_v27  ;;  %v240_v20 = vadd.f32 %v239_v18, %v722_v28  ;;  %457 = vst [vmem:[%s995_s3 + $0x180] sm:$0xff] %v117_v15 }
  0xba   :  { %458 = vst [vmem:[%s995_s3 + $0x188] sm:$0xff] %v158_v16 }
  0xbb   :  { %459 = vst [vmem:[%s995_s3 + $0x190] sm:$0xff] %v199_v19 }
  0xbc   :  { %460 = vst [vmem:[%s995_s3 + $0x198] sm:$0xff] %v240_v20 }
  0xbe   :  { %v119_v21 = vpop.f32.mrf.mxu0 }
  0xbf   :  { %v160_v22 = vpop.f32.mrf.mxu1  ;;  %v120_v23 = vadd.f32 %v119_v21, %v713_v25  ;;  %v850_v25 = vperm.slane %v708_v24, 4 }
  0xc0   :  { %v161_v29 = vadd.f32 %v160_v22, %v716_v26  ;;  %v201_v30 = vpop.f32.mrf.mxu2  ;;  %v242_v31 = vpop.f32.mrf.mxu3  ;;  %v853_v26 = vperm.slane %v708_v24, 5 }
  0xc1   :  { %v202_v32 = vadd.f32 %v201_v30, %v719_v27  ;;  %v243_v33 = vadd.f32 %v242_v31, %v722_v28  ;;  %465 = vst [vmem:[%s995_s3 + $0x1c0] sm:$0xff] %v120_v23  ;;  %v859_v27 = vperm.slane %v708_v24, 6  ;;  %v862_v28 = vperm.slane %v708_v24, 7 }
  0xc2   :  { %466 = vst [vmem:[%s995_s3 + $0x1c8] sm:$0xff] %v161_v29 }
  0xc3   :  { %467 = vst [vmem:[%s995_s3 + $0x1d0] sm:$0xff] %v202_v32 }
  0xc4   :  { %468 = vst [vmem:[%s995_s3 + $0x1d8] sm:$0xff] %v243_v33 }
  0xc6   :  { %v262_v34 = vpop.f32.mrf.mxu0 }
  0xc7   :  { %v303_v35 = vpop.f32.mrf.mxu1  ;;  %v263_v36 = vadd.f32 %v262_v34, %v850_v25 }
  0xc8   :  { %v304_v37 = vadd.f32 %v303_v35, %v853_v26  ;;  %v344_v38 = vpop.f32.mrf.mxu2  ;;  %v385_v39 = vpop.f32.mrf.mxu3 }
  0xc9   :  { %v345_v40 = vadd.f32 %v344_v38, %v859_v27  ;;  %v386_v41 = vadd.f32 %v385_v39, %v862_v28  ;;  %413 = vst [vmem:[%s995_s3 + $0x20] sm:$0xff] %v263_v36 }
  0xca   :  { %414 = vst [vmem:[%s995_s3 + $0x28] sm:$0xff] %v304_v37 }
  0xcb   :  { %415 = vst [vmem:[%s995_s3 + $0x30] sm:$0xff] %v345_v40 }
  0xcc   :  { %416 = vst [vmem:[%s995_s3 + $0x38] sm:$0xff] %v386_v41 }
  0xce   :  { %v265_v24 = vpop.f32.mrf.mxu0 }
  0xcf   :  { %v306_v42 = vpop.f32.mrf.mxu1  ;;  %v266_v43 = vadd.f32 %v265_v24, %v850_v25 }
  0xd0   :  { %v307_v44 = vadd.f32 %v306_v42, %v853_v26  ;;  %v347_v45 = vpop.f32.mrf.mxu2  ;;  %v388_v46 = vpop.f32.mrf.mxu3 }
  0xd1   :  { %v348_v47 = vadd.f32 %v347_v45, %v859_v27  ;;  %v389_v48 = vadd.f32 %v388_v46, %v862_v28  ;;  %421 = vst [vmem:[%s995_s3 + $0x60] sm:$0xff] %v266_v43 }
  0xd2   :  { %422 = vst [vmem:[%s995_s3 + $0x68] sm:$0xff] %v307_v44 }
  0xd3   :  { %423 = vst [vmem:[%s995_s3 + $0x70] sm:$0xff] %v348_v47 }
  0xd4   :  { %424 = vst [vmem:[%s995_s3 + $0x78] sm:$0xff] %v389_v48 }
  0xd6   :  { %v268_v49 = vpop.f32.mrf.mxu0 }
  0xd7   :  { %v309_v50 = vpop.f32.mrf.mxu1  ;;  %v269_v51 = vadd.f32 %v268_v49, %v850_v25 }
  0xd8   :  { %v310_v52 = vadd.f32 %v309_v50, %v853_v26  ;;  %v350_v53 = vpop.f32.mrf.mxu2  ;;  %v391_v54 = vpop.f32.mrf.mxu3 }
  0xd9   :  { %v351_v55 = vadd.f32 %v350_v53, %v859_v27  ;;  %v392_v56 = vadd.f32 %v391_v54, %v862_v28  ;;  %429 = vst [vmem:[%s995_s3 + $0xa0] sm:$0xff] %v269_v51 }
  0xda   :  { %430 = vst [vmem:[%s995_s3 + $0xa8] sm:$0xff] %v310_v52 }
  0xdb   :  { %431 = vst [vmem:[%s995_s3 + $0xb0] sm:$0xff] %v351_v55 }
  0xdc   :  { %432 = vst [vmem:[%s995_s3 + $0xb8] sm:$0xff] %v392_v56 }
  0xde   :  { %v271_v57 = vpop.f32.mrf.mxu0 }
  0xdf   :  { %v312_v58 = vpop.f32.mrf.mxu1  ;;  %v272_v59 = vadd.f32 %v271_v57, %v850_v25 }
  0xe0   :  { %v313_v60 = vadd.f32 %v312_v58, %v853_v26  ;;  %v353_v61 = vpop.f32.mrf.mxu2  ;;  %v394_v62 = vpop.f32.mrf.mxu3 }
  0xe1   :  { %v354_v63 = vadd.f32 %v353_v61, %v859_v27  ;;  %v395_v0 = vadd.f32 %v394_v62, %v862_v28  ;;  %437 = vst [vmem:[%s995_s3 + $0xe0] sm:$0xff] %v272_v59 }
  0xe2   :  { %438 = vst [vmem:[%s995_s3 + $0xe8] sm:$0xff] %v313_v60 }
  0xe3   :  { %439 = vst [vmem:[%s995_s3 + $0xf0] sm:$0xff] %v354_v63 }
  0xe4   :  { %440 = vst [vmem:[%s995_s3 + $0xf8] sm:$0xff] %v395_v0 }
  0xe6   :  { %v274_v1 = vpop.f32.mrf.mxu0 }
  0xe7   :  { %v315_v2 = vpop.f32.mrf.mxu1  ;;  %v275_v3 = vadd.f32 %v274_v1, %v850_v25 }
  0xe8   :  { %v316_v4 = vadd.f32 %v315_v2, %v853_v26  ;;  %v356_v5 = vpop.f32.mrf.mxu2  ;;  %v397_v6 = vpop.f32.mrf.mxu3 }
  0xe9   :  { %v357_v7 = vadd.f32 %v356_v5, %v859_v27  ;;  %v398_v8 = vadd.f32 %v397_v6, %v862_v28  ;;  %445 = vst [vmem:[%s995_s3 + $0x120] sm:$0xff] %v275_v3 }
  0xea   :  { %446 = vst [vmem:[%s995_s3 + $0x128] sm:$0xff] %v316_v4 }
  0xeb   :  { %447 = vst [vmem:[%s995_s3 + $0x130] sm:$0xff] %v357_v7 }
  0xec   :  { %448 = vst [vmem:[%s995_s3 + $0x138] sm:$0xff] %v398_v8 }
  0xee   :  { %v277_v9 = vpop.f32.mrf.mxu0 }
  0xef   :  { %v318_v10 = vpop.f32.mrf.mxu1  ;;  %v278_v11 = vadd.f32 %v277_v9, %v850_v25 }
  0xf0   :  { %v319_v12 = vadd.f32 %v318_v10, %v853_v26  ;;  %v359_v13 = vpop.f32.mrf.mxu2  ;;  %v400_v14 = vpop.f32.mrf.mxu3 }
  0xf1   :  { %v360_v15 = vadd.f32 %v359_v13, %v859_v27  ;;  %v401_v16 = vadd.f32 %v400_v14, %v862_v28  ;;  %453 = vst [vmem:[%s995_s3 + $0x160] sm:$0xff] %v278_v11 }
  0xf2   :  { %454 = vst [vmem:[%s995_s3 + $0x168] sm:$0xff] %v319_v12 }
  0xf3   :  { %455 = vst [vmem:[%s995_s3 + $0x170] sm:$0xff] %v360_v15 }
  0xf4   :  { %456 = vst [vmem:[%s995_s3 + $0x178] sm:$0xff] %v401_v16 }
  0xf6   :  { %v280_v17 = vpop.f32.mrf.mxu0 }
  0xf7   :  { %v321_v18 = vpop.f32.mrf.mxu1  ;;  %v281_v19 = vadd.f32 %v280_v17, %v850_v25 }
  0xf8   :  { %v322_v20 = vadd.f32 %v321_v18, %v853_v26  ;;  %v362_v21 = vpop.f32.mrf.mxu2  ;;  %v403_v22 = vpop.f32.mrf.mxu3 }
  0xf9   :  { %v363_v23 = vadd.f32 %v362_v21, %v859_v27  ;;  %v404_v29 = vadd.f32 %v403_v22, %v862_v28  ;;  %461 = vst [vmem:[%s995_s3 + $0x1a0] sm:$0xff] %v281_v19 }
  0xfa   :  { %462 = vst [vmem:[%s995_s3 + $0x1a8] sm:$0xff] %v322_v20 }
  0xfb   :  { %463 = vst [vmem:[%s995_s3 + $0x1b0] sm:$0xff] %v363_v23 }
  0xfc   :  { %464 = vst [vmem:[%s995_s3 + $0x1b8] sm:$0xff] %v404_v29 }
  0xfe   :  { %v283_v30 = vpop.f32.mrf.mxu0 }
  0xff   :  { %v324_v31 = vpop.f32.mrf.mxu1  ;;  %v284_v32 = vadd.f32 %v283_v30, %v850_v25 }
 0x100   :  { %v325_v33 = vadd.f32 %v324_v31, %v853_v26  ;;  %v365_v34 = vpop.f32.mrf.mxu2  ;;  %v406_v35 = vpop.f32.mrf.mxu3 }
 0x101   :  { %v366_v36 = vadd.f32 %v365_v34, %v859_v27  ;;  %v407_v37 = vadd.f32 %v406_v35, %v862_v28  ;;  %469 = vst [vmem:[%s995_s3 + $0x1e0] sm:$0xff] %v284_v32 }
 0x102   :  { %470 = vst [vmem:[%s995_s3 + $0x1e8] sm:$0xff] %v325_v33 }
 0x103   :  { %471 = vst [vmem:[%s995_s3 + $0x1f0] sm:$0xff] %v366_v36 }
 0x104   :  { %472 = vst [vmem:[%s995_s3 + $0x1f8] sm:$0xff] %v407_v37 }

// kernel: bilstm_attention_forward.4
= control target key start
LH: loop header
LB: loop body
LE: loop exit
PB: predicated region body
PF: predicated region fallthrough
CT: control target
= control target key end

     0   :  { %7 = vsyncpa [#allocation3], 0  ;;  %s6166_s12 = smov [#allocation2]   ;;  %s6167_s14 = smov 1024   ;;  %s7451_s0 = inlined_call_operand.vmem [shape: f32[8,8,1024], index: 0, kind: input, shape index: {}]   ;;  %s7452_s1 = inlined_call_operand.hbm [shape: f32[256,1024], index: 1, kind: input, shape index: {}]   ;;  %s7453_s2 = inlined_call_operand.vmem [shape: f32[8,8,256], index: 2, kind: output, shape index: {}]  }
   0x1   :  { %s14_s11 = sshll.u32 %s7452_s1, 4  ;;  %s16_s13 = sshll.u32 %s6166_s12, 4  ;;  %s15_s11 = int_to_ptr.hbm [resolvable:$true] %s14_s11  ;;  %s17_s13 = int_to_ptr.vmem [resolvable:$true] %s16_s13 }
   0x2   :  { %s6168_s15 = smov 64  }
   0x3   :  { %22 = dma.hbm_to_vmem [thread:$0]  %s15_s11, 32768, %s17_s13, [#allocation3], %s6167_s14, %s6167_s14, %s6168_s15  }
   0x4   :  { %6164 = dma.done.wait [#allocation3], 32768  }
   0x5   :  { %6165 = vsyncadd [#allocation3], 4294934528  ;;  %v148_v0 = vld [vmem:[#allocation2 + $0x3c8] sm:$0xff]  ;;  %v147_v6 = vld [vmem:[#allocation2 + $0x3c0] sm:$0xff] }
   0x6   :  { %v276_v1 = vld [vmem:[#allocation2 + $0x7c8] sm:$0xff]  ;;  %323 = vmatpush.msra.mxu2 %v148_v0  ;;  %v275_v7 = vld [vmem:[#allocation2 + $0x7c0] sm:$0xff]  ;;  %283 = vmatpush.msra.mxu0 %v147_v6  ;;  %v150_v60 = vld [vmem:[#allocation2 + $0x3d8] sm:$0xff] }
   0x7   :  { %v140_v2 = vld [vmem:[#allocation2 + $0x388] sm:$0xff]  ;;  %343 = vmatpush.msra.mxu3 %v276_v1  ;;  %v139_v8 = vld [vmem:[#allocation2 + $0x380] sm:$0xff]  ;;  %303 = vmatpush.msra.mxu1 %v275_v7  ;;  %v278_v61 = vld [vmem:[#allocation2 + $0x7d8] sm:$0xff] }
   0x8   :  { %v268_v3 = vld [vmem:[#allocation2 + $0x788] sm:$0xff]  ;;  %324 = vmatpush.msra.mxu2 %v140_v2  ;;  %v267_v9 = vld [vmem:[#allocation2 + $0x780] sm:$0xff]  ;;  %284 = vmatpush.msra.mxu0 %v139_v8  ;;  %v142_v0 = vld [vmem:[#allocation2 + $0x398] sm:$0xff] }
   0x9   :  { %v132_v4 = vld [vmem:[#allocation2 + $0x348] sm:$0xff]  ;;  %344 = vmatpush.msra.mxu3 %v268_v3  ;;  %v131_v12 = vld [vmem:[#allocation2 + $0x340] sm:$0xff]  ;;  %304 = vmatpush.msra.mxu1 %v267_v9  ;;  %v270_v1 = vld [vmem:[#allocation2 + $0x798] sm:$0xff] }
   0xa   :  { %v260_v5 = vld [vmem:[#allocation2 + $0x748] sm:$0xff]  ;;  %325 = vmatpush.msra.mxu2 %v132_v4  ;;  %v259_v13 = vld [vmem:[#allocation2 + $0x740] sm:$0xff]  ;;  %285 = vmatpush.msra.mxu0 %v131_v12  ;;  %v134_v4 = vld [vmem:[#allocation2 + $0x358] sm:$0xff] }
   0xb   :  { %v124_v10 = vld [vmem:[#allocation2 + $0x308] sm:$0xff]  ;;  %345 = vmatpush.msra.mxu3 %v260_v5  ;;  %v123_v16 = vld [vmem:[#allocation2 + $0x300] sm:$0xff]  ;;  %305 = vmatpush.msra.mxu1 %v259_v13  ;;  %v262_v5 = vld [vmem:[#allocation2 + $0x758] sm:$0xff] }
   0xc   :  { %v252_v11 = vld [vmem:[#allocation2 + $0x708] sm:$0xff]  ;;  %326 = vmatpush.msra.mxu2 %v124_v10  ;;  %v251_v17 = vld [vmem:[#allocation2 + $0x700] sm:$0xff]  ;;  %286 = vmatpush.msra.mxu0 %v123_v16  ;;  %v6214_v6 = vld [vmem:[#allocation2 + $0x3d0] sm:$0xff] }
   0xd   :  { %v116_v14 = vld [vmem:[#allocation2 + $0x2c8] sm:$0xff]  ;;  %346 = vmatpush.msra.mxu3 %v252_v11  ;;  %v6188_v20 = vld [vmem:[#allocation2 + $0x2c0] sm:$0xff]  ;;  %306 = vmatpush.msra.mxu1 %v251_v17  ;;  %v277_v7 = vld [vmem:[#allocation2 + $0x7d0] sm:$0xff] }
   0xe   :  { %v244_v15 = vld [vmem:[#allocation2 + $0x6c8] sm:$0xff]  ;;  %327 = vmatpush.msra.mxu2 %v116_v14  ;;  %v243_v21 = vld [vmem:[#allocation2 + $0x6c0] sm:$0xff]  ;;  %287 = vmatpush.msra.mxu0 %v6188_v20  ;;  %v126_v8 = vld [vmem:[#allocation2 + $0x318] sm:$0xff] }
   0xf   :  { %v108_v18 = vld [vmem:[#allocation2 + $0x288] sm:$0xff]  ;;  %347 = vmatpush.msra.mxu3 %v244_v15  ;;  %v6190_v24 = vld [vmem:[#allocation2 + $0x280] sm:$0xff]  ;;  %307 = vmatpush.msra.mxu1 %v243_v21  ;;  %v254_v9 = vld [vmem:[#allocation2 + $0x718] sm:$0xff] }
  0x10   :  { %v236_v19 = vld [vmem:[#allocation2 + $0x688] sm:$0xff]  ;;  %328 = vmatpush.msra.mxu2 %v108_v18  ;;  %v235_v25 = vld [vmem:[#allocation2 + $0x680] sm:$0xff]  ;;  %288 = vmatpush.msra.mxu0 %v6190_v24  ;;  %v6217_v10 = vld [vmem:[#allocation2 + $0x390] sm:$0xff] }
  0x11   :  { %v100_v22 = vld [vmem:[#allocation2 + $0x248] sm:$0xff]  ;;  %348 = vmatpush.msra.mxu3 %v236_v19  ;;  %v99_v28 = vld [vmem:[#allocation2 + $0x240] sm:$0xff]  ;;  %308 = vmatpush.msra.mxu1 %v235_v25  ;;  %v269_v11 = vld [vmem:[#allocation2 + $0x790] sm:$0xff] }
  0x12   :  { %v228_v23 = vld [vmem:[#allocation2 + $0x648] sm:$0xff]  ;;  %329 = vmatpush.msra.mxu2 %v100_v22  ;;  %v227_v29 = vld [vmem:[#allocation2 + $0x640] sm:$0xff]  ;;  %289 = vmatpush.msra.mxu0 %v99_v28  ;;  %v118_v12 = vld [vmem:[#allocation2 + $0x2d8] sm:$0xff] }
  0x13   :  { %v92_v26 = vld [vmem:[#allocation2 + $0x208] sm:$0xff]  ;;  %349 = vmatpush.msra.mxu3 %v228_v23  ;;  %v91_v32 = vld [vmem:[#allocation2 + $0x200] sm:$0xff]  ;;  %309 = vmatpush.msra.mxu1 %v227_v29  ;;  %v246_v13 = vld [vmem:[#allocation2 + $0x6d8] sm:$0xff] }
  0x14   :  { %v220_v27 = vld [vmem:[#allocation2 + $0x608] sm:$0xff]  ;;  %330 = vmatpush.msra.mxu2 %v92_v26  ;;  %v219_v33 = vld [vmem:[#allocation2 + $0x600] sm:$0xff]  ;;  %290 = vmatpush.msra.mxu0 %v91_v32  ;;  %v133_v14 = vld [vmem:[#allocation2 + $0x350] sm:$0xff] }
  0x15   :  { %v84_v30 = vld [vmem:[#allocation2 + $0x1c8] sm:$0xff]  ;;  %350 = vmatpush.msra.mxu3 %v220_v27  ;;  %v6194_v36 = vld [vmem:[#allocation2 + $0x1c0] sm:$0xff]  ;;  %310 = vmatpush.msra.mxu1 %v219_v33  ;;  %v261_v15 = vld [vmem:[#allocation2 + $0x750] sm:$0xff] }
  0x16   :  { %v212_v31 = vld [vmem:[#allocation2 + $0x5c8] sm:$0xff]  ;;  %331 = vmatpush.msra.mxu2 %v84_v30  ;;  %v211_v37 = vld [vmem:[#allocation2 + $0x5c0] sm:$0xff]  ;;  %291 = vmatpush.msra.mxu0 %v6194_v36  ;;  %v110_v16 = vld [vmem:[#allocation2 + $0x298] sm:$0xff] }
  0x17   :  { %v76_v34 = vld [vmem:[#allocation2 + $0x188] sm:$0xff]  ;;  %351 = vmatpush.msra.mxu3 %v212_v31  ;;  %v6196_v40 = vld [vmem:[#allocation2 + $0x180] sm:$0xff]  ;;  %311 = vmatpush.msra.mxu1 %v211_v37  ;;  %v238_v17 = vld [vmem:[#allocation2 + $0x698] sm:$0xff] }
  0x18   :  { %v204_v35 = vld [vmem:[#allocation2 + $0x588] sm:$0xff]  ;;  %332 = vmatpush.msra.mxu2 %v76_v34  ;;  %v203_v41 = vld [vmem:[#allocation2 + $0x580] sm:$0xff]  ;;  %292 = vmatpush.msra.mxu0 %v6196_v40  ;;  %v125_v18 = vld [vmem:[#allocation2 + $0x310] sm:$0xff] }
  0x19   :  { %v68_v38 = vld [vmem:[#allocation2 + $0x148] sm:$0xff]  ;;  %352 = vmatpush.msra.mxu3 %v204_v35  ;;  %v6199_v44 = vld [vmem:[#allocation2 + $0x140] sm:$0xff]  ;;  %312 = vmatpush.msra.mxu1 %v203_v41  ;;  %v253_v19 = vld [vmem:[#allocation2 + $0x710] sm:$0xff] }
  0x1a   :  { %v196_v39 = vld [vmem:[#allocation2 + $0x548] sm:$0xff]  ;;  %333 = vmatpush.msra.mxu2 %v68_v38  ;;  %v195_v45 = vld [vmem:[#allocation2 + $0x540] sm:$0xff]  ;;  %293 = vmatpush.msra.mxu0 %v6199_v44  ;;  %v102_v21 = vld [vmem:[#allocation2 + $0x258] sm:$0xff] }
  0x1b   :  { %v60_v42 = vld [vmem:[#allocation2 + $0x108] sm:$0xff]  ;;  %353 = vmatpush.msra.mxu3 %v196_v39  ;;  %v6202_v48 = vld [vmem:[#allocation2 + $0x100] sm:$0xff]  ;;  %313 = vmatpush.msra.mxu1 %v195_v45  ;;  %v230_v22 = vld [vmem:[#allocation2 + $0x658] sm:$0xff]  ;;  %v6169_v39 = vmov 0.0  }
  0x1c   :  { %v188_v43 = vld [vmem:[#allocation2 + $0x508] sm:$0xff]  ;;  %334 = vmatpush.msra.mxu2 %v60_v42  ;;  %v187_v49 = vld [vmem:[#allocation2 + $0x500] sm:$0xff]  ;;  %294 = vmatpush.msra.mxu0 %v6202_v48  ;;  %v117_v23 = vld [vmem:[#allocation2 + $0x2d0] sm:$0xff] }
  0x1d   :  { %v52_v46 = vld [vmem:[#allocation2 + $0xc8] sm:$0xff]  ;;  %354 = vmatpush.msra.mxu3 %v188_v43  ;;  %v6205_v52 = vld [vmem:[#allocation2 + $0xc0] sm:$0xff]  ;;  %314 = vmatpush.msra.mxu1 %v187_v49  ;;  %v245_v25 = vld [vmem:[#allocation2 + $0x6d0] sm:$0xff] }
  0x1e   :  { %v180_v47 = vld [vmem:[#allocation2 + $0x4c8] sm:$0xff]  ;;  %335 = vmatpush.msra.mxu2 %v52_v46  ;;  %v179_v53 = vld [vmem:[#allocation2 + $0x4c0] sm:$0xff]  ;;  %295 = vmatpush.msra.mxu0 %v6205_v52  ;;  %v94_v26 = vld [vmem:[#allocation2 + $0x218] sm:$0xff] }
  0x1f   :  { %v44_v50 = vld [vmem:[#allocation2 + $0x88] sm:$0xff]  ;;  %355 = vmatpush.msra.mxu3 %v180_v47  ;;  %v43_v56 = vld [vmem:[#allocation2 + $0x80] sm:$0xff]  ;;  %315 = vmatpush.msra.mxu1 %v179_v53  ;;  %v222_v27 = vld [vmem:[#allocation2 + $0x618] sm:$0xff] }
  0x20   :  { %v172_v51 = vld [vmem:[#allocation2 + $0x488] sm:$0xff]  ;;  %336 = vmatpush.msra.mxu2 %v44_v50  ;;  %v171_v57 = vld [vmem:[#allocation2 + $0x480] sm:$0xff]  ;;  %296 = vmatpush.msra.mxu0 %v43_v56  ;;  %v109_v28 = vld [vmem:[#allocation2 + $0x290] sm:$0xff] }
  0x21   :  { %v36_v54 = vld [vmem:[#allocation2 + $0x48] sm:$0xff]  ;;  %356 = vmatpush.msra.mxu3 %v172_v51  ;;  %316 = vmatpush.msra.mxu1 %v171_v57  ;;  %v6209_v62 = vld [vmem:[#allocation2 + $0x40] sm:$0xff]  ;;  %v237_v29 = vld [vmem:[#allocation2 + $0x690] sm:$0xff] }
  0x22   :  { %v164_v55 = vld [vmem:[#allocation2 + $0x448] sm:$0xff]  ;;  %337 = vmatpush.msra.mxu2 %v36_v54  ;;  %v163_v63 = vld [vmem:[#allocation2 + $0x440] sm:$0xff]  ;;  %297 = vmatpush.msra.mxu0 %v6209_v62  ;;  %v86_v30 = vld [vmem:[#allocation2 + $0x1d8] sm:$0xff] }
  0x23   :  { %v28_v58 = vld [vmem:[#allocation2 + $0x8] sm:$0xff]  ;;  %357 = vmatpush.msra.mxu3 %v164_v55  ;;  %v6211_v2 = vld [vmem:[#allocation2] sm:$0xff]  ;;  %317 = vmatpush.msra.mxu1 %v163_v63  ;;  %v214_v31 = vld [vmem:[#allocation2 + $0x5d8] sm:$0xff] }
  0x24   :  { %v156_v59 = vld [vmem:[#allocation2 + $0x408] sm:$0xff]  ;;  %338 = vmatpush.msra.mxu2 %v28_v58  ;;  %v155_v3 = vld [vmem:[#allocation2 + $0x400] sm:$0xff]  ;;  %298 = vmatpush.msra.mxu0 %v6211_v2  ;;  %v6221_v32 = vld [vmem:[#allocation2 + $0x250] sm:$0xff] }
  0x25   :  { %358 = vmatpush.msra.mxu3 %v156_v59  ;;  %318 = vmatpush.msra.mxu1 %v155_v3  ;;  %v229_v33 = vld [vmem:[#allocation2 + $0x650] sm:$0xff]  ;;  %v78_v34 = vld [vmem:[#allocation2 + $0x198] sm:$0xff] }
  0x26   :  { %403 = vmatpush.msrb.mxu2 %v150_v60  ;;  %363 = vmatpush.msrb.mxu0 %v6214_v6  ;;  %v206_v35 = vld [vmem:[#allocation2 + $0x598] sm:$0xff]  ;;  %v6224_v37 = vld [vmem:[#allocation2 + $0x210] sm:$0xff] }
  0x27   :  { %423 = vmatpush.msrb.mxu3 %v278_v61  ;;  %383 = vmatpush.msrb.mxu1 %v277_v7  ;;  %v221_v38 = vld [vmem:[#allocation2 + $0x610] sm:$0xff]  ;;  %v70_v41 = vld [vmem:[#allocation2 + $0x158] sm:$0xff]  ;;  %v152_v7 = vld [vmem:[#allocation2 + $0x3e8] sm:$0xff] }
  0x28   :  { %404 = vmatpush.msrb.mxu2 %v142_v0  ;;  %364 = vmatpush.msrb.mxu0 %v6217_v10  ;;  %v198_v42 = vld [vmem:[#allocation2 + $0x558] sm:$0xff]  ;;  %v6228_v43 = vld [vmem:[#allocation2 + $0x1d0] sm:$0xff] }
  0x29   :  { %424 = vmatpush.msrb.mxu3 %v270_v1  ;;  %384 = vmatpush.msrb.mxu1 %v269_v11  ;;  %v213_v45 = vld [vmem:[#allocation2 + $0x5d0] sm:$0xff]  ;;  %v6231_v46 = vld [vmem:[#allocation2 + $0x118] sm:$0xff] }
  0x2a   :  { %405 = vmatpush.msrb.mxu2 %v134_v4  ;;  %365 = vmatpush.msrb.mxu0 %v133_v14  ;;  %v190_v47 = vld [vmem:[#allocation2 + $0x518] sm:$0xff]  ;;  %v6233_v49 = vld [vmem:[#allocation2 + $0x190] sm:$0xff] }
  0x2b   :  { %425 = vmatpush.msrb.mxu3 %v262_v5  ;;  %385 = vmatpush.msrb.mxu1 %v261_v15  ;;  %v205_v50 = vld [vmem:[#allocation2 + $0x590] sm:$0xff]  ;;  %v6237_v51 = vld [vmem:[#allocation2 + $0xd8] sm:$0xff] }
  0x2c   :  { %406 = vmatpush.msrb.mxu2 %v126_v8  ;;  %366 = vmatpush.msrb.mxu0 %v125_v18  ;;  %v182_v53 = vld [vmem:[#allocation2 + $0x4d8] sm:$0xff]  ;;  %v6240_v54 = vld [vmem:[#allocation2 + $0x150] sm:$0xff]  ;;  %v280_v8 = vld [vmem:[#allocation2 + $0x7e8] sm:$0xff] }
  0x2d   :  { %426 = vmatpush.msrb.mxu3 %v254_v9  ;;  %386 = vmatpush.msrb.mxu1 %v253_v19  ;;  %v197_v55 = vld [vmem:[#allocation2 + $0x550] sm:$0xff]  ;;  %v6244_v56 = vld [vmem:[#allocation2 + $0x98] sm:$0xff]  ;;  %v6271_v18 = vld [vmem:[#allocation2 + $0x3e0] sm:$0xff] }
  0x2e   :  { %407 = vmatpush.msrb.mxu2 %v118_v12  ;;  %367 = vmatpush.msrb.mxu0 %v117_v23  ;;  %v174_v57 = vld [vmem:[#allocation2 + $0x498] sm:$0xff]  ;;  %v6247_v58 = vld [vmem:[#allocation2 + $0x110] sm:$0xff]  ;;  %v144_v12 = vld [vmem:[#allocation2 + $0x3a8] sm:$0xff] }
  0x2f   :  { %427 = vmatpush.msrb.mxu3 %v246_v13  ;;  %387 = vmatpush.msrb.mxu1 %v245_v25  ;;  %v189_v59 = vld [vmem:[#allocation2 + $0x510] sm:$0xff]  ;;  %v6250_v60 = vld [vmem:[#allocation2 + $0x58] sm:$0xff]  ;;  %v272_v13 = vld [vmem:[#allocation2 + $0x7a8] sm:$0xff] }
  0x30   :  { %408 = vmatpush.msrb.mxu2 %v110_v16  ;;  %368 = vmatpush.msrb.mxu0 %v109_v28  ;;  %v166_v61 = vld [vmem:[#allocation2 + $0x458] sm:$0xff]  ;;  %v6253_v63 = vld [vmem:[#allocation2 + $0xd0] sm:$0xff]  ;;  %v136_v16 = vld [vmem:[#allocation2 + $0x368] sm:$0xff] }
  0x31   :  { %428 = vmatpush.msrb.mxu3 %v238_v17  ;;  %388 = vmatpush.msrb.mxu1 %v237_v29  ;;  %v181_v0 = vld [vmem:[#allocation2 + $0x4d0] sm:$0xff]  ;;  %v6256_v1 = vld [vmem:[#allocation2 + $0x18] sm:$0xff]  ;;  %v264_v17 = vld [vmem:[#allocation2 + $0x768] sm:$0xff] }
  0x32   :  { %409 = vmatpush.msrb.mxu2 %v102_v21  ;;  %369 = vmatpush.msrb.mxu0 %v6221_v32  ;;  %v158_v3 = vld [vmem:[#allocation2 + $0x418] sm:$0xff]  ;;  %v6259_v4 = vld [vmem:[#allocation2 + $0x90] sm:$0xff]  ;;  %v279_v19 = vld [vmem:[#allocation2 + $0x7e0] sm:$0xff] }
  0x33   :  { %429 = vmatpush.msrb.mxu3 %v230_v22  ;;  %389 = vmatpush.msrb.mxu1 %v229_v33  ;;  %v173_v5 = vld [vmem:[#allocation2 + $0x490] sm:$0xff]  ;;  %v128_v21 = vld [vmem:[#allocation2 + $0x328] sm:$0xff]  ;;  %v6274_v23 = vld [vmem:[#allocation2 + $0x3a0] sm:$0xff] }
  0x34   :  { %410 = vmatpush.msrb.mxu2 %v94_v26  ;;  %359 = vmatmul.f32.vlgmr.msra.gmra.mxu3 %v6169_v39  ;;  %v6264_v9 = vld [vmem:[#allocation2 + $0x50] sm:$0xff]  ;;  %v256_v22 = vld [vmem:[#allocation2 + $0x728] sm:$0xff]  ;;  %v271_v25 = vld [vmem:[#allocation2 + $0x7a0] sm:$0xff] }
  0x35   :  { %430 = vmatpush.msrb.mxu3 %v222_v27  ;;  %339 = vmatmul.f32.vlgmr.msra.gmra.mxu2 %v6169_v39  ;;  %v165_v11 = vld [vmem:[#allocation2 + $0x450] sm:$0xff]  ;;  %v120_v26 = vld [vmem:[#allocation2 + $0x2e8] sm:$0xff]  ;;  %v6277_v28 = vld [vmem:[#allocation2 + $0x360] sm:$0xff] }
  0x36   :  { %411 = vmatpush.msrb.mxu2 %v86_v30  ;;  %370 = vmatpush.msrb.mxu0 %v6224_v37  ;;  %v6268_v14 = vld [vmem:[#allocation2 + $0x10] sm:$0xff]  ;;  %v248_v27 = vld [vmem:[#allocation2 + $0x6e8] sm:$0xff]  ;;  %v263_v29 = vld [vmem:[#allocation2 + $0x760] sm:$0xff] }
  0x37   :  { %431 = vmatpush.msrb.mxu3 %v214_v31  ;;  %390 = vmatpush.msrb.mxu1 %v221_v38  ;;  %v157_v15 = vld [vmem:[#allocation2 + $0x410] sm:$0xff]  ;;  %v112_v30 = vld [vmem:[#allocation2 + $0x2a8] sm:$0xff]  ;;  %v6280_v33 = vld [vmem:[#allocation2 + $0x320] sm:$0xff] }
  0x38   :  { %412 = vmatpush.msrb.mxu2 %v78_v34  ;;  %371 = vmatpush.msrb.mxu0 %v6228_v43  ;;  %v240_v31 = vld [vmem:[#allocation2 + $0x6a8] sm:$0xff]  ;;  %v255_v34 = vld [vmem:[#allocation2 + $0x720] sm:$0xff] }
  0x39   :  { %432 = vmatpush.msrb.mxu3 %v206_v35  ;;  %391 = vmatpush.msrb.mxu1 %v213_v45  ;;  %v104_v35 = vld [vmem:[#allocation2 + $0x268] sm:$0xff] }
  0x3a   :  { %413 = vmatpush.msrb.mxu2 %v70_v41  ;;  %372 = vmatpush.msrb.mxu0 %v6233_v49  ;;  %v232_v38 = vld [vmem:[#allocation2 + $0x668] sm:$0xff]  ;;  %v6283_v41 = vld [vmem:[#allocation2 + $0x2e0] sm:$0xff] }
  0x3b   :  { %433 = vmatpush.msrb.mxu3 %v198_v42  ;;  %392 = vmatpush.msrb.mxu1 %v205_v50  ;;  %v247_v42 = vld [vmem:[#allocation2 + $0x6e0] sm:$0xff]  ;;  %v96_v45 = vld [vmem:[#allocation2 + $0x228] sm:$0xff] }
  0x3c   :  { %414 = vmatpush.msrb.mxu2 %v6231_v46  ;;  %299 = vmatmul.f32.vlgmr.msra.gmra.mxu0 %v6169_v39  ;;  %v6286_v50 = vld [vmem:[#allocation2 + $0x2a0] sm:$0xff] }
  0x3d   :  { %434 = vmatpush.msrb.mxu3 %v190_v47  ;;  %319 = vmatmul.f32.vlgmr.msra.gmra.mxu1 %v6169_v39  ;;  %v224_v47 = vld [vmem:[#allocation2 + $0x628] sm:$0xff] }
  0x3e   :  { %415 = vmatpush.msrb.mxu2 %v6237_v51  ;;  %373 = vmatpush.msrb.mxu0 %v6240_v54 }
  0x3f   :  { %435 = vmatpush.msrb.mxu3 %v182_v53  ;;  %393 = vmatpush.msrb.mxu1 %v197_v55  ;;  %v239_v53 = vld [vmem:[#allocation2 + $0x6a0] sm:$0xff]  ;;  %v88_v55 = vld [vmem:[#allocation2 + $0x1e8] sm:$0xff] }
  0x40   :  { %416 = vmatpush.msrb.mxu2 %v6244_v56  ;;  %374 = vmatpush.msrb.mxu0 %v6247_v58 }
  0x41   :  { %436 = vmatpush.msrb.mxu3 %v174_v57  ;;  %394 = vmatpush.msrb.mxu1 %v189_v59  ;;  %v216_v57 = vld [vmem:[#allocation2 + $0x5e8] sm:$0xff]  ;;  %v6290_v59 = vld [vmem:[#allocation2 + $0x260] sm:$0xff] }
  0x42   :  { %417 = vmatpush.msrb.mxu2 %v6250_v60  ;;  %375 = vmatpush.msrb.mxu0 %v6253_v63 }
  0x43   :  { %437 = vmatpush.msrb.mxu3 %v166_v61  ;;  %395 = vmatpush.msrb.mxu1 %v181_v0  ;;  %v231_v61 = vld [vmem:[#allocation2 + $0x660] sm:$0xff]  ;;  %v80_v0 = vld [vmem:[#allocation2 + $0x1a8] sm:$0xff] }
  0x44   :  { %418 = vmatpush.msrb.mxu2 %v6256_v1  ;;  %376 = vmatpush.msrb.mxu0 %v6259_v4 }
  0x45   :  { %438 = vmatpush.msrb.mxu3 %v158_v3  ;;  %396 = vmatpush.msrb.mxu1 %v173_v5  ;;  %v208_v3 = vld [vmem:[#allocation2 + $0x5a8] sm:$0xff]  ;;  %v6294_v5 = vld [vmem:[#allocation2 + $0x220] sm:$0xff] }
  0x46   :  { %419 = vmatmul.f32.vlgmr.msrb.gmra.mxu2 %v6169_v39  ;;  %439 = vmatmul.f32.vlgmr.msrb.gmra.mxu3 %v6169_v39 }
  0x47   :  { %483 = vmatpush.msra.mxu2 %v152_v7  ;;  %503 = vmatpush.msra.mxu3 %v280_v8  ;;  %v223_v7 = vld [vmem:[#allocation2 + $0x620] sm:$0xff]  ;;  %v72_v8 = vld [vmem:[#allocation2 + $0x168] sm:$0xff] }
  0x48   :  { %377 = vmatpush.msrb.mxu0 %v6264_v9  ;;  %397 = vmatpush.msrb.mxu1 %v165_v11  ;;  %v200_v11 = vld [vmem:[#allocation2 + $0x568] sm:$0xff] }
  0x49   :  { %484 = vmatpush.msra.mxu2 %v144_v12  ;;  %504 = vmatpush.msra.mxu3 %v272_v13  ;;  %v6297_v12 = vld [vmem:[#allocation2 + $0x1e0] sm:$0xff] }
  0x4a   :  { %378 = vmatpush.msrb.mxu0 %v6268_v14  ;;  %398 = vmatpush.msrb.mxu1 %v157_v15  ;;  %v215_v13 = vld [vmem:[#allocation2 + $0x5e0] sm:$0xff]  ;;  %v64_v15 = vld [vmem:[#allocation2 + $0x128] sm:$0xff] }
  0x4b   :  { %485 = vmatpush.msra.mxu2 %v136_v16  ;;  %505 = vmatpush.msra.mxu3 %v264_v17  ;;  %v192_v16 = vld [vmem:[#allocation2 + $0x528] sm:$0xff]  ;;  %v6300_v17 = vld [vmem:[#allocation2 + $0x1a0] sm:$0xff] }
  0x4c   :  { %443 = vmatpush.msra.mxu0 %v6271_v18  ;;  %463 = vmatpush.msra.mxu1 %v279_v19  ;;  %v207_v19 = vld [vmem:[#allocation2 + $0x5a0] sm:$0xff] }
  0x4d   :  { %486 = vmatpush.msra.mxu2 %v128_v21  ;;  %506 = vmatpush.msra.mxu3 %v256_v22  ;;  %v56_v21 = vld [vmem:[#allocation2 + $0xe8] sm:$0xff] }
  0x4e   :  { %444 = vmatpush.msra.mxu0 %v6274_v23  ;;  %464 = vmatpush.msra.mxu1 %v271_v25  ;;  %v184_v22 = vld [vmem:[#allocation2 + $0x4e8] sm:$0xff]  ;;  %v6303_v25 = vld [vmem:[#allocation2 + $0x160] sm:$0xff] }
  0x4f   :  { %487 = vmatpush.msra.mxu2 %v120_v26  ;;  %507 = vmatpush.msra.mxu3 %v248_v27  ;;  %v199_v26 = vld [vmem:[#allocation2 + $0x560] sm:$0xff]  ;;  %v48_v27 = vld [vmem:[#allocation2 + $0xa8] sm:$0xff] }
  0x50   :  { %445 = vmatpush.msra.mxu0 %v6277_v28  ;;  %465 = vmatpush.msra.mxu1 %v263_v29  ;;  %v176_v29 = vld [vmem:[#allocation2 + $0x4a8] sm:$0xff] }
  0x51   :  { %488 = vmatpush.msra.mxu2 %v112_v30  ;;  %508 = vmatpush.msra.mxu3 %v240_v31  ;;  %v63_v30 = vld [vmem:[#allocation2 + $0x120] sm:$0xff] }
  0x52   :  { %446 = vmatpush.msra.mxu0 %v6280_v33  ;;  %466 = vmatpush.msra.mxu1 %v255_v34  ;;  %v191_v31 = vld [vmem:[#allocation2 + $0x520] sm:$0xff]  ;;  %v40_v34 = vld [vmem:[#allocation2 + $0x68] sm:$0xff] }
  0x53   :  { %489 = vmatpush.msra.mxu2 %v104_v35  ;;  %509 = vmatpush.msra.mxu3 %v232_v38  ;;  %v168_v35 = vld [vmem:[#allocation2 + $0x468] sm:$0xff]  ;;  %v55_v38 = vld [vmem:[#allocation2 + $0xe0] sm:$0xff] }
  0x54   :  { %447 = vmatpush.msra.mxu0 %v6283_v41  ;;  %467 = vmatpush.msra.mxu1 %v247_v42  ;;  %v183_v42 = vld [vmem:[#allocation2 + $0x4e0] sm:$0xff] }
  0x55   :  { %490 = vmatpush.msra.mxu2 %v96_v45  ;;  %510 = vmatpush.msra.mxu3 %v224_v47  ;;  %v32_v45 = vld [vmem:[#allocation2 + $0x28] sm:$0xff] }
  0x56   :  { %448 = vmatpush.msra.mxu0 %v6286_v50  ;;  %468 = vmatpush.msra.mxu1 %v239_v53  ;;  %v160_v47 = vld [vmem:[#allocation2 + $0x428] sm:$0xff]  ;;  %v47_v53 = vld [vmem:[#allocation2 + $0xa0] sm:$0xff] }
  0x57   :  { %379 = vmatmul.f32.vlgmr.msrb.gmra.mxu0 %v6169_v39  ;;  %399 = vmatmul.f32.vlgmr.msrb.gmra.mxu1 %v6169_v39 }
  0x58   :  { %491 = vmatpush.msra.mxu2 %v88_v55  ;;  %511 = vmatpush.msra.mxu3 %v216_v57  ;;  %v175_v55 = vld [vmem:[#allocation2 + $0x4a0] sm:$0xff]  ;;  %v154_v57 = vld [vmem:[#allocation2 + $0x3f8] sm:$0xff] }
  0x59   :  { %449 = vmatpush.msra.mxu0 %v6290_v59  ;;  %469 = vmatpush.msra.mxu1 %v231_v61  ;;  %v282_v61 = vld [vmem:[#allocation2 + $0x7f8] sm:$0xff] }
  0x5a   :  { %492 = vmatpush.msra.mxu2 %v80_v0  ;;  %512 = vmatpush.msra.mxu3 %v208_v3  ;;  %v39_v0 = vld [vmem:[#allocation2 + $0x60] sm:$0xff] }
  0x5b   :  { %450 = vmatpush.msra.mxu0 %v6294_v5  ;;  %470 = vmatpush.msra.mxu1 %v223_v7  ;;  %v167_v3 = vld [vmem:[#allocation2 + $0x460] sm:$0xff]  ;;  %v146_v7 = vld [vmem:[#allocation2 + $0x3b8] sm:$0xff] }
  0x5c   :  { %493 = vmatpush.msra.mxu2 %v72_v8  ;;  %513 = vmatpush.msra.mxu3 %v200_v11  ;;  %v274_v8 = vld [vmem:[#allocation2 + $0x7b8] sm:$0xff]  ;;  %v31_v11 = vld [vmem:[#allocation2 + $0x20] sm:$0xff] }
  0x5d   :  { %451 = vmatpush.msra.mxu0 %v6297_v12  ;;  %471 = vmatpush.msra.mxu1 %v215_v13  ;;  %v159_v13 = vld [vmem:[#allocation2 + $0x420] sm:$0xff] }
  0x5e   :  { %494 = vmatpush.msra.mxu2 %v64_v15  ;;  %514 = vmatpush.msra.mxu3 %v192_v16  ;;  %v138_v15 = vld [vmem:[#allocation2 + $0x378] sm:$0xff] }
  0x5f   :  { %452 = vmatpush.msra.mxu0 %v6300_v17  ;;  %472 = vmatpush.msra.mxu1 %v207_v19  ;;  %v266_v16 = vld [vmem:[#allocation2 + $0x778] sm:$0xff]  ;;  %v153_v19 = vld [vmem:[#allocation2 + $0x3f0] sm:$0xff] }
  0x60   :  { %495 = vmatpush.msra.mxu2 %v56_v21  ;;  %515 = vmatpush.msra.mxu3 %v184_v22  ;;  %v281_v21 = vld [vmem:[#allocation2 + $0x7f0] sm:$0xff]  ;;  %v130_v22 = vld [vmem:[#allocation2 + $0x338] sm:$0xff] }
  0x61   :  { %453 = vmatpush.msra.mxu0 %v6303_v25  ;;  %473 = vmatpush.msra.mxu1 %v199_v26  ;;  %v258_v26 = vld [vmem:[#allocation2 + $0x738] sm:$0xff] }
  0x62   :  { %496 = vmatpush.msra.mxu2 %v48_v27  ;;  %516 = vmatpush.msra.mxu3 %v176_v29  ;;  %v145_v27 = vld [vmem:[#allocation2 + $0x3b0] sm:$0xff] }
  0x63   :  { %454 = vmatpush.msra.mxu0 %v63_v30  ;;  %474 = vmatpush.msra.mxu1 %v191_v31  ;;  %v273_v29 = vld [vmem:[#allocation2 + $0x7b0] sm:$0xff]  ;;  %v122_v30 = vld [vmem:[#allocation2 + $0x2f8] sm:$0xff] }
  0x64   :  { %497 = vmatpush.msra.mxu2 %v40_v34  ;;  %517 = vmatpush.msra.mxu3 %v168_v35  ;;  %v250_v31 = vld [vmem:[#allocation2 + $0x6f8] sm:$0xff]  ;;  %v137_v34 = vld [vmem:[#allocation2 + $0x370] sm:$0xff] }
  0x65   :  { %455 = vmatpush.msra.mxu0 %v55_v38  ;;  %475 = vmatpush.msra.mxu1 %v183_v42  ;;  %v265_v35 = vld [vmem:[#allocation2 + $0x770] sm:$0xff]  ;;  %v114_v38 = vld [vmem:[#allocation2 + $0x2b8] sm:$0xff] }
  0x66   :  { %498 = vmatpush.msra.mxu2 %v32_v45  ;;  %518 = vmatpush.msra.mxu3 %v160_v47  ;;  %v242_v42 = vld [vmem:[#allocation2 + $0x6b8] sm:$0xff]  ;;  %v129_v45 = vld [vmem:[#allocation2 + $0x330] sm:$0xff] }
  0x67   :  { %456 = vmatpush.msra.mxu0 %v47_v53  ;;  %476 = vmatpush.msra.mxu1 %v175_v55  ;;  %v257_v47 = vld [vmem:[#allocation2 + $0x730] sm:$0xff]  ;;  %v106_v53 = vld [vmem:[#allocation2 + $0x278] sm:$0xff] }
  0x68   :  { %563 = vmatpush.msrb.mxu2 %v154_v57  ;;  %583 = vmatpush.msrb.mxu3 %v282_v61  ;;  %v234_v55 = vld [vmem:[#allocation2 + $0x678] sm:$0xff]  ;;  %v121_v57 = vld [vmem:[#allocation2 + $0x2f0] sm:$0xff] }
  0x69   :  { %457 = vmatpush.msra.mxu0 %v39_v0  ;;  %477 = vmatpush.msra.mxu1 %v167_v3  ;;  %v249_v61 = vld [vmem:[#allocation2 + $0x6f0] sm:$0xff]  ;;  %v98_v0 = vld [vmem:[#allocation2 + $0x238] sm:$0xff] }
  0x6a   :  { %564 = vmatpush.msrb.mxu2 %v146_v7  ;;  %584 = vmatpush.msrb.mxu3 %v274_v8  ;;  %v226_v3 = vld [vmem:[#allocation2 + $0x638] sm:$0xff]  ;;  %v113_v7 = vld [vmem:[#allocation2 + $0x2b0] sm:$0xff] }
  0x6b   :  { %458 = vmatpush.msra.mxu0 %v31_v11  ;;  %478 = vmatpush.msra.mxu1 %v159_v13  ;;  %v241_v8 = vld [vmem:[#allocation2 + $0x6b0] sm:$0xff]  ;;  %v90_v11 = vld [vmem:[#allocation2 + $0x1f8] sm:$0xff] }
  0x6c   :  { %565 = vmatpush.msrb.mxu2 %v138_v15  ;;  %585 = vmatpush.msrb.mxu3 %v266_v16  ;;  %v218_v13 = vld [vmem:[#allocation2 + $0x5f8] sm:$0xff]  ;;  %v105_v15 = vld [vmem:[#allocation2 + $0x270] sm:$0xff] }
  0x6d   :  { %523 = vmatpush.msrb.mxu0 %v153_v19  ;;  %543 = vmatpush.msrb.mxu1 %v281_v21  ;;  %v233_v16 = vld [vmem:[#allocation2 + $0x670] sm:$0xff]  ;;  %v82_v19 = vld [vmem:[#allocation2 + $0x1b8] sm:$0xff] }
  0x6e   :  { %566 = vmatpush.msrb.mxu2 %v130_v22  ;;  %586 = vmatpush.msrb.mxu3 %v258_v26  ;;  %v210_v21 = vld [vmem:[#allocation2 + $0x5b8] sm:$0xff]  ;;  %v97_v22 = vld [vmem:[#allocation2 + $0x230] sm:$0xff] }
  0x6f   :  { %499 = vmatmul.f32.vlgmr.msra.gmra.mxu2 %v6169_v39  ;;  %519 = vmatmul.f32.vlgmr.msra.gmra.mxu3 %v6169_v39  ;;  %v225_v26 = vld [vmem:[#allocation2 + $0x630] sm:$0xff] }
  0x70   :  { %524 = vmatpush.msrb.mxu0 %v145_v27  ;;  %544 = vmatpush.msrb.mxu1 %v273_v29  ;;  %v74_v27 = vld [vmem:[#allocation2 + $0x178] sm:$0xff] }
  0x71   :  { %567 = vmatpush.msrb.mxu2 %v122_v30  ;;  %587 = vmatpush.msrb.mxu3 %v250_v31  ;;  %v202_v29 = vld [vmem:[#allocation2 + $0x578] sm:$0xff]  ;;  %v89_v30 = vld [vmem:[#allocation2 + $0x1f0] sm:$0xff] }
  0x72   :  { %525 = vmatpush.msrb.mxu0 %v137_v34  ;;  %545 = vmatpush.msrb.mxu1 %v265_v35  ;;  %v217_v31 = vld [vmem:[#allocation2 + $0x5f0] sm:$0xff]  ;;  %v66_v34 = vld [vmem:[#allocation2 + $0x138] sm:$0xff] }
  0x73   :  { %568 = vmatpush.msrb.mxu2 %v114_v38  ;;  %588 = vmatpush.msrb.mxu3 %v242_v42  ;;  %v194_v35 = vld [vmem:[#allocation2 + $0x538] sm:$0xff]  ;;  %v81_v38 = vld [vmem:[#allocation2 + $0x1b0] sm:$0xff] }
  0x74   :  { %526 = vmatpush.msrb.mxu0 %v129_v45  ;;  %546 = vmatpush.msrb.mxu1 %v257_v47  ;;  %v209_v42 = vld [vmem:[#allocation2 + $0x5b0] sm:$0xff]  ;;  %v58_v45 = vld [vmem:[#allocation2 + $0xf8] sm:$0xff] }
  0x75   :  { %569 = vmatpush.msrb.mxu2 %v106_v53  ;;  %589 = vmatpush.msrb.mxu3 %v234_v55  ;;  %v186_v47 = vld [vmem:[#allocation2 + $0x4f8] sm:$0xff]  ;;  %v73_v53 = vld [vmem:[#allocation2 + $0x170] sm:$0xff] }
  0x76   :  { %459 = vmatmul.f32.vlgmr.msra.gmra.mxu0 %v6169_v39  ;;  %479 = vmatmul.f32.vlgmr.msra.gmra.mxu1 %v6169_v39  ;;  %v201_v55 = vld [vmem:[#allocation2 + $0x570] sm:$0xff] }
  0x77   :  { %527 = vmatpush.msrb.mxu0 %v121_v57  ;;  %547 = vmatpush.msrb.mxu1 %v249_v61  ;;  %v50_v57 = vld [vmem:[#allocation2 + $0xb8] sm:$0xff] }
  0x78   :  { %570 = vmatpush.msrb.mxu2 %v98_v0  ;;  %590 = vmatpush.msrb.mxu3 %v226_v3  ;;  %v178_v61 = vld [vmem:[#allocation2 + $0x4b8] sm:$0xff]  ;;  %v65_v0 = vld [vmem:[#allocation2 + $0x130] sm:$0xff] }
  0x79   :  { %528 = vmatpush.msrb.mxu0 %v113_v7  ;;  %548 = vmatpush.msrb.mxu1 %v241_v8  ;;  %v193_v3 = vld [vmem:[#allocation2 + $0x530] sm:$0xff]  ;;  %v42_v7 = vld [vmem:[#allocation2 + $0x78] sm:$0xff] }
  0x7a   :  { %571 = vmatpush.msrb.mxu2 %v90_v11  ;;  %591 = vmatpush.msrb.mxu3 %v218_v13  ;;  %v170_v8 = vld [vmem:[#allocation2 + $0x478] sm:$0xff]  ;;  %v57_v11 = vld [vmem:[#allocation2 + $0xf0] sm:$0xff] }
  0x7b   :  { %529 = vmatpush.msrb.mxu0 %v105_v15  ;;  %549 = vmatpush.msrb.mxu1 %v233_v16  ;;  %v185_v13 = vld [vmem:[#allocation2 + $0x4f0] sm:$0xff]  ;;  %v34_v15 = vld [vmem:[#allocation2 + $0x38] sm:$0xff] }
  0x7c   :  { %572 = vmatpush.msrb.mxu2 %v82_v19  ;;  %592 = vmatpush.msrb.mxu3 %v210_v21  ;;  %v162_v16 = vld [vmem:[#allocation2 + $0x438] sm:$0xff]  ;;  %v49_v19 = vld [vmem:[#allocation2 + $0xb0] sm:$0xff] }
  0x7d   :  { %530 = vmatpush.msrb.mxu0 %v97_v22  ;;  %550 = vmatpush.msrb.mxu1 %v225_v26  ;;  %v177_v21 = vld [vmem:[#allocation2 + $0x4b0] sm:$0xff] }
  0x7e   :  { %573 = vmatpush.msrb.mxu2 %v74_v27  ;;  %593 = vmatpush.msrb.mxu3 %v202_v29  ;;  %v41_v22 = vld [vmem:[#allocation2 + $0x70] sm:$0xff]  ;;  %v870_v27 = vld [vmem:[#allocation2 + $0x3c8] sm:$0xff] }
  0x7f   :  { %531 = vmatpush.msrb.mxu0 %v89_v30  ;;  %551 = vmatpush.msrb.mxu1 %v217_v31  ;;  %v169_v26 = vld [vmem:[#allocation2 + $0x470] sm:$0xff]  ;;  %v869_v31 = vld [vmem:[#allocation2 + $0x3c0] sm:$0xff] }
  0x80   :  { %574 = vmatpush.msrb.mxu2 %v66_v34  ;;  %594 = vmatpush.msrb.mxu3 %v194_v35  ;;  %v33_v29 = vld [vmem:[#allocation2 + $0x30] sm:$0xff]  ;;  %v862_v34 = vld [vmem:[#allocation2 + $0x388] sm:$0xff]  ;;  %v861_v35 = vld [vmem:[#allocation2 + $0x380] sm:$0xff] }
  0x81   :  { %532 = vmatpush.msrb.mxu0 %v81_v38  ;;  %552 = vmatpush.msrb.mxu1 %v209_v42  ;;  %v161_v30 = vld [vmem:[#allocation2 + $0x430] sm:$0xff]  ;;  %v854_v38 = vld [vmem:[#allocation2 + $0x348] sm:$0xff] }
  0x82   :  { %575 = vmatpush.msrb.mxu2 %v58_v45  ;;  %595 = vmatpush.msrb.mxu3 %v186_v47  ;;  %v846_v42 = vld [vmem:[#allocation2 + $0x308] sm:$0xff]  ;;  %v6136_v47 = vld [vmem:[#allocation2 + $0x340] sm:$0xff] }
  0x83   :  { %533 = vmatpush.msrb.mxu0 %v73_v53  ;;  %553 = vmatpush.msrb.mxu1 %v201_v55  ;;  %v838_v45 = vld [vmem:[#allocation2 + $0x2c8] sm:$0xff]  ;;  %v6137_v55 = vld [vmem:[#allocation2 + $0x300] sm:$0xff] }
  0x84   :  { %576 = vmatpush.msrb.mxu2 %v50_v57  ;;  %596 = vmatpush.msrb.mxu3 %v178_v61  ;;  %v830_v53 = vld [vmem:[#allocation2 + $0x288] sm:$0xff]  ;;  %v813_v61 = vld [vmem:[#allocation2 + $0x200] sm:$0xff] }
  0x85   :  { %534 = vmatpush.msrb.mxu0 %v65_v0  ;;  %554 = vmatpush.msrb.mxu1 %v193_v3  ;;  %v822_v57 = vld [vmem:[#allocation2 + $0x248] sm:$0xff] }
  0x86   :  { %577 = vmatpush.msrb.mxu2 %v42_v7  ;;  %597 = vmatpush.msrb.mxu3 %v170_v8  ;;  %v814_v0 = vld [vmem:[#allocation2 + $0x208] sm:$0xff] }
  0x87   :  { %535 = vmatpush.msrb.mxu0 %v57_v11  ;;  %555 = vmatpush.msrb.mxu1 %v185_v13  ;;  %v806_v3 = vld [vmem:[#allocation2 + $0x1c8] sm:$0xff]  ;;  %v765_v11 = vld [vmem:[#allocation2 + $0x80] sm:$0xff] }
  0x88   :  { %578 = vmatpush.msrb.mxu2 %v34_v15  ;;  %598 = vmatpush.msrb.mxu3 %v162_v16  ;;  %v798_v7 = vld [vmem:[#allocation2 + $0x188] sm:$0xff]  ;;  %v856_v15 = vld [vmem:[#allocation2 + $0x358] sm:$0xff] }
  0x89   :  { %536 = vmatpush.msrb.mxu0 %v49_v19  ;;  %556 = vmatpush.msrb.mxu1 %v177_v21  ;;  %v774_v8 = vld [vmem:[#allocation2 + $0xc8] sm:$0xff] }
  0x8a   :  { %579 = vmatmul.f32.vlgmr.msrb.gmra.mxu2 %v6169_v39  ;;  %599 = vmatmul.f32.vlgmr.msrb.gmra.mxu3 %v6169_v39  ;;  %v766_v13 = vld [vmem:[#allocation2 + $0x88] sm:$0xff] }
  0x8b   :  { %537 = vmatpush.msrb.mxu0 %v41_v22  ;;  %557 = vmatpush.msrb.mxu1 %v169_v26  ;;  %v847_v26 = vld [vmem:[#allocation2 + $0x310] sm:$0xff] }
  0x8c   :  { %1045 = vmatpush.msra.mxu2 %v870_v27 }
  0x8d   :  { %538 = vmatpush.msrb.mxu0 %v33_v29  ;;  %558 = vmatpush.msrb.mxu1 %v161_v30  ;;  %v839_v30 = vld [vmem:[#allocation2 + $0x2d0] sm:$0xff] }
  0x8e   :  { %539 = vmatmul.f32.vlgmr.msrb.gmra.mxu0 %v6169_v39  ;;  %559 = vmatmul.f32.vlgmr.msrb.gmra.mxu1 %v6169_v39  ;;  %v821_v39 = vld [vmem:[#allocation2 + $0x240] sm:$0xff] }
  0x8f   :  { %1005 = vmatpush.msra.mxu0 %v869_v31  ;;  %1046 = vmatpush.msra.mxu2 %v862_v34  ;;  %v840_v31 = vld [vmem:[#allocation2 + $0x2d8] sm:$0xff] }
  0x91   :  { %1006 = vmatpush.msra.mxu0 %v861_v35  ;;  %1047 = vmatpush.msra.mxu2 %v854_v38  ;;  %v831_v38 = vld [vmem:[#allocation2 + $0x290] sm:$0xff] }
  0x93   :  { %1007 = vmatpush.msra.mxu0 %v6136_v47  ;;  %1048 = vmatpush.msra.mxu2 %v846_v42  ;;  %v832_v42 = vld [vmem:[#allocation2 + $0x298] sm:$0xff] }
  0x95   :  { %1008 = vmatpush.msra.mxu0 %v6137_v55  ;;  %1049 = vmatpush.msra.mxu2 %v838_v45 }
  0x97   :  { %1009 = vmatpush.msra.mxu0 %v6188_v20  ;;  %1050 = vmatpush.msra.mxu2 %v830_v53  ;;  %v790_v20 = vld [vmem:[#allocation2 + $0x148] sm:$0xff]  ;;  %v824_v53 = vld [vmem:[#allocation2 + $0x258] sm:$0xff] }
  0x99   :  { %1010 = vmatpush.msra.mxu0 %v6190_v24  ;;  %1051 = vmatpush.msra.mxu2 %v822_v57  ;;  %v782_v24 = vld [vmem:[#allocation2 + $0x108] sm:$0xff]  ;;  %v808_v57 = vld [vmem:[#allocation2 + $0x1d8] sm:$0xff] }
  0x9b   :  { %1011 = vmatpush.msra.mxu0 %v821_v39  ;;  %1052 = vmatpush.msra.mxu2 %v814_v0  ;;  %v816_v39 = vld [vmem:[#allocation2 + $0x218] sm:$0xff] }
  0x9d   :  { %1012 = vmatpush.msra.mxu0 %v813_v61  ;;  %1053 = vmatpush.msra.mxu2 %v806_v3  ;;  %v800_v61 = vld [vmem:[#allocation2 + $0x198] sm:$0xff] }
  0x9e   :  { %v792_v3 = vld [vmem:[#allocation2 + $0x158] sm:$0xff] }
  0x9f   :  { %1013 = vmatpush.msra.mxu0 %v6194_v36  ;;  %1054 = vmatpush.msra.mxu2 %v798_v7  ;;  %v758_v36 = vld [vmem:[#allocation2 + $0x48] sm:$0xff] }
  0xa1   :  { %1014 = vmatpush.msra.mxu0 %v6196_v40  ;;  %1055 = vmatpush.msra.mxu2 %v790_v20  ;;  %v750_v40 = vld [vmem:[#allocation2 + $0x8] sm:$0xff] }
  0xa3   :  { %1015 = vmatpush.msra.mxu0 %v6199_v44  ;;  %1056 = vmatpush.msra.mxu2 %v782_v24  ;;  %v872_v44 = vld [vmem:[#allocation2 + $0x3d8] sm:$0xff] }
  0xa5   :  { %1016 = vmatpush.msra.mxu0 %v6202_v48  ;;  %1057 = vmatpush.msra.mxu2 %v774_v8  ;;  %v864_v48 = vld [vmem:[#allocation2 + $0x398] sm:$0xff] }
  0xa6   :  { %v606_v8 = vld [vmem:[%s7451_s0 + $0x18] sm:$0xff] }
  0xa7   :  { %1017 = vmatpush.msra.mxu0 %v6205_v52  ;;  %1058 = vmatpush.msra.mxu2 %v766_v13  ;;  %v855_v52 = vld [vmem:[#allocation2 + $0x350] sm:$0xff]  ;;  %v997_v13 = vld [vmem:[#allocation2 + $0x7c0] sm:$0xff] }
  0xa8   :  { %1025 = vmatpush.msra.mxu1 %v997_v13 }
  0xa9   :  { %1018 = vmatpush.msra.mxu0 %v765_v11  ;;  %1059 = vmatpush.msra.mxu2 %v758_v36  ;;  %v998_v36 = vld [vmem:[#allocation2 + $0x7c8] sm:$0xff] }
  0xaa   :  { %1065 = vmatpush.msra.mxu3 %v998_v36  ;;  %v933_v36 = vld [vmem:[#allocation2 + $0x5c0] sm:$0xff] }
  0xab   :  { %1019 = vmatpush.msra.mxu0 %v6209_v62  ;;  %1060 = vmatpush.msra.mxu2 %v750_v40  ;;  %v604_v62 = vld [vmem:[%s7451_s0 + $0x8] sm:$0xff] }
  0xad   :  { %1020 = vmatpush.msra.mxu0 %v6211_v2  ;;  %1125 = vmatpush.msrb.mxu2 %v872_v44 }
  0xaf   :  { %1085 = vmatpush.msrb.mxu0 %v6214_v6  ;;  %1126 = vmatpush.msrb.mxu2 %v864_v48  ;;  %v603_v6 = vld [vmem:[%s7451_s0] sm:$0xff] }
  0xb1   :  { %1086 = vmatpush.msrb.mxu0 %v6217_v10  ;;  %1127 = vmatpush.msrb.mxu2 %v856_v15  ;;  %v848_v10 = vld [vmem:[#allocation2 + $0x318] sm:$0xff] }
  0xb3   :  { %1087 = vmatpush.msrb.mxu0 %v855_v52  ;;  %1128 = vmatpush.msrb.mxu2 %v848_v10 }
  0xb5   :  { %1088 = vmatpush.msrb.mxu0 %v847_v26  ;;  %1129 = vmatpush.msrb.mxu2 %v840_v31 }
  0xb7   :  { %v360_v19 = vpop.f32.mrf.mxu3  ;;  %1089 = vmatpush.msrb.mxu0 %v839_v30  ;;  %1130 = vmatpush.msrb.mxu2 %v832_v42  ;;  %v974_v42 = vld [vmem:[#allocation2 + $0x708] sm:$0xff] }
  0xb8   :  { %v340_v16 = vpop.f32.mrf.mxu2 }
  0xb9   :  { %v300_v2 = vpop.f32.mrf.mxu0  ;;  %v361_v22 = vadd.f32 %v360_v19, %v340_v16  ;;  %1090 = vmatpush.msrb.mxu0 %v831_v38  ;;  %1131 = vmatpush.msrb.mxu2 %v824_v53  ;;  %v989_v16 = vld [vmem:[#allocation2 + $0x780] sm:$0xff]  ;;  %v990_v19 = vld [vmem:[#allocation2 + $0x788] sm:$0xff] }
  0xba   :  { %v320_v21 = vpop.f32.mrf.mxu1  ;;  %1026 = vmatpush.msra.mxu1 %v989_v16  ;;  %1066 = vmatpush.msra.mxu3 %v990_v19  ;;  %v973_v38 = vld [vmem:[#allocation2 + $0x700] sm:$0xff]  ;;  %v966_v53 = vld [vmem:[#allocation2 + $0x6c8] sm:$0xff] }
  0xbb   :  { %v321_v27 = vadd.f32 %v320_v21, %v300_v2  ;;  %v613_v29 = vadd.f32 %v604_v62, %v361_v22  ;;  %1091 = vmatpush.msrb.mxu0 %v6221_v32  ;;  %1132 = vmatpush.msrb.mxu2 %v816_v39  ;;  %v982_v22 = vld [vmem:[#allocation2 + $0x748] sm:$0xff]  ;;  %v901_v19 = vld [vmem:[#allocation2 + $0x4c0] sm:$0xff] }
  0xbc   :  { %1067 = vmatpush.msra.mxu3 %v982_v22  ;;  %v866_v21 = vld [vmem:[#allocation2 + $0x3a8] sm:$0xff]  ;;  %v885_v22 = vld [vmem:[#allocation2 + $0x440] sm:$0xff] }
  0xbd   :  { %v612_v34 = vadd.f32 %v603_v6, %v321_v27  ;;  %v635_v35 = vsub.f32 0.0, %v613_v29  ;;  %1092 = vmatpush.msrb.mxu0 %v6224_v37  ;;  %1133 = vmatpush.msrb.mxu2 %v808_v57  ;;  %v981_v6 = vld [vmem:[#allocation2 + $0x740] sm:$0xff] }
  0xbe   :  { %1027 = vmatpush.msra.mxu1 %v981_v6  ;;  %1068 = vmatpush.msra.mxu3 %v974_v42  ;;  %v6138_v6 = vld [vmem:[#allocation2 + $0x3e8] sm:$0xff]  ;;  %v877_v27 = vld [vmem:[#allocation2 + $0x400] sm:$0xff] }
  0xbf   :  { %v616_v45 = vsub.f32 0.0, %v612_v34  ;;  %v636_v47 = vmul.f32 1.442695, %v635_v35  ;;  %1093 = vmatpush.msrb.mxu0 %v6228_v43  ;;  %1134 = vmatpush.msrb.mxu2 %v800_v61  ;;  %v957_v61 = vld [vmem:[#allocation2 + $0x680] sm:$0xff]  ;;  %v5807_v34 = vld [vmem:[%s7451_s0 + $0x1e8] sm:$0xff] }
  0xc0   :  { %1028 = vmatpush.msra.mxu1 %v973_v38  ;;  %1069 = vmatpush.msra.mxu3 %v966_v53  ;;  %v5806_v42 = vld [vmem:[%s7451_s0 + $0x1e0] sm:$0xff] }
  0xc1   :  { %v617_v55 = vmul.f32 1.442695, %v616_v45  ;;  %5880 = vpow2.f32 %v636_v47  ;;  %1094 = vmatpush.msrb.mxu0 %v6233_v49  ;;  %1135 = vmatpush.msrb.mxu2 %v792_v3  ;;  %v965_v47 = vld [vmem:[#allocation2 + $0x6c0] sm:$0xff] }
  0xc2   :  { %1029 = vmatpush.msra.mxu1 %v965_v47  ;;  %v842_v47 = vld [vmem:[#allocation2 + $0x2e8] sm:$0xff] }
  0xc3   :  { %5882 = vpow2.f32 %v617_v55  ;;  %1095 = vmatpush.msrb.mxu0 %v6240_v54  ;;  %1136 = vmatpush.msrb.mxu2 %v6231_v46 }
  0xc4   :  { %1030 = vmatpush.msra.mxu1 %v957_v61  ;;  %v834_v61 = vld [vmem:[#allocation2 + $0x2a8] sm:$0xff] }
  0xc5   :  { %1096 = vmatpush.msrb.mxu0 %v6247_v58  ;;  %1137 = vmatpush.msrb.mxu2 %v6237_v51 }
  0xc7   :  { %v5881_v0 = vpop.eup %5880  ;;  %1097 = vmatpush.msrb.mxu0 %v6253_v63  ;;  %1138 = vmatpush.msrb.mxu2 %v6244_v56 }
  0xc8   :  { %v638_v20 = vadd.f32 1.0, %v5881_v0  ;;  %v958_v0 = vld [vmem:[#allocation2 + $0x688] sm:$0xff] }
  0xc9   :  { %v5883_v7 = vpop.eup %5882  ;;  %v420_v32 = vpop.f32.mrf.mxu2  ;;  %1098 = vmatpush.msrb.mxu0 %v6259_v4  ;;  %1139 = vmatpush.msrb.mxu2 %v6250_v60 }
  0xca   :  { %v440_v24 = vpop.f32.mrf.mxu3  ;;  %v6340_v37 = vadd.f32 1.0, %v5883_v7  ;;  %5884 = vrcp.f32 %v638_v20  ;;  %vm644_vm0 = vweird.f32 %v638_v20  ;;  %v650_v56 = vand.u32 2147483648, %v638_v20  ;;  %1070 = vmatpush.msra.mxu3 %v958_v0 }
  0xcb   :  { %v441_v43 = vadd.f32 %v440_v24, %v420_v32  ;;  %1099 = vmatpush.msrb.mxu0 %v6264_v9  ;;  %1140 = vmatpush.msrb.mxu2 %v6256_v1  ;;  %v605_v9 = vld [vmem:[%s7451_s0 + $0x10] sm:$0xff]  ;;  %v648_v60 = vand.u32 2147483647, %v638_v20  ;;  %v950_v32 = vld [vmem:[#allocation2 + $0x648] sm:$0xff] }
  0xcc   :  { %5886 = vrcp.f32 %v6340_v37  ;;  %v631_v15 = vand.u32 2147483648, %v6340_v37  ;;  %vm625_vm2 = vweird.f32 %v6340_v37  ;;  %v629_v1 = vand.u32 2147483647, %v6340_v37  ;;  %1071 = vmatpush.msra.mxu3 %v950_v32  ;;  %v983_v32 = vld [vmem:[#allocation2 + $0x750] sm:$0xff] }
  0xcd   :  { %v615_v49 = vadd.f32 %v606_v8, %v441_v43  ;;  %1100 = vmatpush.msrb.mxu0 %v6268_v14  ;;  %vm6366_vm5 = vcmp.eq.f32.partialorder %v648_v60, 8.507059e+37  ;;  %v651_v29 = vor.u32 1.1754944e-38, %v650_v56  ;;  %v942_v43 = vld [vmem:[#allocation2 + $0x608] sm:$0xff]  ;;  %v909_v60 = vld [vmem:[#allocation2 + $0x500] sm:$0xff] }
  0xce   :  { %v632_v35 = vor.u32 1.1754944e-38, %v631_v15  ;;  %vm630_vm7 = vcmp.eq.f32.partialorder %v629_v1, 8.507059e+37  ;;  %1072 = vmatpush.msra.mxu3 %v942_v43  ;;  %v976_v43 = vld [vmem:[#allocation2 + $0x718] sm:$0xff] }
  0xcf   :  { %v655_v11 = vsub.f32 0.0, %v615_v49 }
  0xd0   :  { %v5885_v58 = vpop.eup %5884 }
  0xd1   :  { %v656_v54 = vmul.f32 1.442695, %v655_v11  ;;  %v640_v40 = vmul.f32 %v5885_v58, %v638_v20  ;;  %vm645_vm1 = vweird.f32 %v5885_v58  ;;  %v949_v20 = vld [vmem:[#allocation2 + $0x640] sm:$0xff] }
  0xd2   :  { %v5887_v46 = vpop.eup %5886  ;;  %vm6362_vm4 = vmor %vm644_vm0, %vm645_vm1  ;;  %1031 = vmatpush.msra.mxu1 %v949_v20  ;;  %v826_v20 = vld [vmem:[#allocation2 + $0x268] sm:$0xff] }
  0xd3   :  { %5888 = vpow2.f32 %v656_v54  ;;  %v621_v51 = vmul.f32 %v5887_v46, %v6340_v37  ;;  %v641_v63 = vsub.f32 1.0, %v640_v40  ;;  %vm626_vm3 = vweird.f32 %v5887_v46  ;;  %v941_v37 = vld [vmem:[#allocation2 + $0x600] sm:$0xff]  ;;  %v934_v54 = vld [vmem:[#allocation2 + $0x5c8] sm:$0xff] }
  0xd4   :  { %v380_v4 = vpop.f32.mrf.mxu0  ;;  %v400_v44 = vpop.f32.mrf.mxu1  ;;  %vm6373_vm6 = vmor %vm625_vm2, %vm626_vm3  ;;  %1032 = vmatpush.msra.mxu1 %v941_v37  ;;  %1073 = vmatpush.msra.mxu3 %v934_v54  ;;  %v925_v40 = vld [vmem:[#allocation2 + $0x580] sm:$0xff]  ;;  %v818_v37 = vld [vmem:[#allocation2 + $0x228] sm:$0xff] }
  0xd5   :  { %v622_v48 = vsub.f32 1.0, %v621_v51  ;;  %v401_v52 = vadd.f32 %v400_v44, %v380_v4  ;;  %v642_v62 = vmul.f32 %v5885_v58, %v641_v63  ;;  %v926_v51 = vld [vmem:[#allocation2 + $0x588] sm:$0xff]  ;;  %v917_v4 = vld [vmem:[#allocation2 + $0x540] sm:$0xff]  ;;  %v959_v54 = vld [vmem:[#allocation2 + $0x690] sm:$0xff] }
  0xd6   :  { %1033 = vmatpush.msra.mxu1 %v933_v36  ;;  %1074 = vmatpush.msra.mxu3 %v926_v51  ;;  %v918_v44 = vld [vmem:[#allocation2 + $0x548] sm:$0xff] }
  0xd7   :  { %v614_v14 = vadd.f32 %v605_v9, %v401_v52  ;;  %v623_v2 = vmul.f32 %v5887_v46, %v622_v48  ;;  %v643_v10 = vadd.f32 %v5885_v58, %v642_v62  ;;  %v910_v48 = vld [vmem:[#allocation2 + $0x508] sm:$0xff] }
  0xd8   :  { %1034 = vmatpush.msra.mxu1 %v925_v40  ;;  %1075 = vmatpush.msra.mxu3 %v918_v44  ;;  %v902_v62 = vld [vmem:[#allocation2 + $0x4c8] sm:$0xff]  ;;  %v951_v40 = vld [vmem:[#allocation2 + $0x650] sm:$0xff]  ;;  %v944_v44 = vld [vmem:[#allocation2 + $0x618] sm:$0xff] }
  0xd9   :  { %v5889_v26 = vpop.eup %5888  ;;  %v624_v31 = vadd.f32 %v5887_v46, %v623_v2  ;;  %5890 = vtanh.f32 %v614_v14  ;;  %v647_v45 = vsel %vm6362_vm4, %v5885_v58, %v643_v10  ;;  %v893_v14 = vld [vmem:[#allocation2 + $0x480] sm:$0xff]  ;;  %v894_v2 = vld [vmem:[#allocation2 + $0x488] sm:$0xff] }
  0xda   :  { %v658_v30 = vadd.f32 1.0, %v5889_v26  ;;  %v652_v39 = vsel %vm6366_vm5, %v651_v29, %v647_v45  ;;  %1035 = vmatpush.msra.mxu1 %v917_v4  ;;  %1076 = vmatpush.msra.mxu3 %v910_v48  ;;  %v886_v26 = vld [vmem:[#allocation2 + $0x448] sm:$0xff]  ;;  %v935_v48 = vld [vmem:[#allocation2 + $0x5d0] sm:$0xff] }
  0xdb   :  { %v628_v55 = vsel %vm6373_vm6, %v5887_v46, %v624_v31  ;;  %v674_v3 = vmul.f32 0.0, %v652_v39  ;;  %v858_v10 = vld [vmem:[#allocation2 + $0x368] sm:$0xff]  ;;  %v1000_v39 = vld [vmem:[#allocation2 + $0x7d8] sm:$0xff] }
  0xdc   :  { %5892 = vrcp.f32 %v658_v30  ;;  %v633_v57 = vsel %vm630_vm7, %v632_v35, %v628_v55  ;;  %v670_v13 = vand.u32 2147483648, %v658_v30  ;;  %vm664_vm8 = vweird.f32 %v658_v30  ;;  %1036 = vmatpush.msra.mxu1 %v909_v60  ;;  %1077 = vmatpush.msra.mxu3 %v902_v62  ;;  %v878_v29 = vld [vmem:[#allocation2 + $0x408] sm:$0xff]  ;;  %v999_v55 = vld [vmem:[#allocation2 + $0x7d0] sm:$0xff]  ;;  %v6139_v60 = vld [vmem:[#allocation2 + $0x120] sm:$0xff] }
  0xdd   :  { %v668_v46 = vand.u32 2147483647, %v658_v30  ;;  %v850_v35 = vld [vmem:[#allocation2 + $0x328] sm:$0xff]  ;;  %v761_v62 = vld [vmem:[#allocation2 + $0x60] sm:$0xff] }
  0xde   :  { %v671_v56 = vor.u32 1.1754944e-38, %v670_v13  ;;  %1037 = vmatpush.msra.mxu1 %v901_v19  ;;  %1078 = vmatpush.msra.mxu3 %v894_v2  ;;  %v968_v13 = vld [vmem:[#allocation2 + $0x6d8] sm:$0xff]  ;;  %v802_v36 = vld [vmem:[#allocation2 + $0x1a8] sm:$0xff]  ;;  %v919_v2 = vld [vmem:[#allocation2 + $0x550] sm:$0xff] }
  0xdf   :  { %v5891_v7 = vpop.eup %5890  ;;  %vm669_vm11 = vcmp.eq.f32.partialorder %v668_v46, 8.507059e+37  ;;  %v928_v19 = vld [vmem:[#allocation2 + $0x598] sm:$0xff] }
  0xe0   :  { %v675_v24 = vmul.f32 %v5891_v7, %v633_v57  ;;  %1038 = vmatpush.msra.mxu1 %v893_v14  ;;  %1079 = vmatpush.msra.mxu3 %v886_v26  ;;  %v762_v14 = vld [vmem:[#allocation2 + $0x68] sm:$0xff] }
  0xe1   :  { %v754_v26 = vld [vmem:[#allocation2 + $0x28] sm:$0xff] }
  0xe2   :  { %v5893_v8 = vpop.eup %5892  ;;  %v6383_v11 = vadd.f32 %v675_v24, %v674_v3  ;;  %1039 = vmatpush.msra.mxu1 %v885_v22  ;;  %1080 = vmatpush.msra.mxu3 %v878_v29  ;;  %v992_v3 = vld [vmem:[#allocation2 + $0x798] sm:$0xff]  ;;  %v753_v22 = vld [vmem:[#allocation2 + $0x20] sm:$0xff] }
  0xe3   :  { %v660_v49 = vmul.f32 %v5893_v8, %v658_v30  ;;  %vm665_vm9 = vweird.f32 %v5893_v8  ;;  %v984_v24 = vld [vmem:[#allocation2 + $0x758] sm:$0xff] }
  0xe4   :  { %5894 = vtanh.f32 %v6383_v11  ;;  %vm666_vm10 = vmor %vm664_vm8, %vm665_vm9  ;;  %1040 = vmatpush.msra.mxu1 %v877_v27  ;;  %1145 = vmatpush.msrb.mxu3 %v1000_v39 }
  0xe5   :  { %v661_v58 = vsub.f32 1.0, %v660_v49  ;;  %v810_v49 = vld [vmem:[#allocation2 + $0x1e8] sm:$0xff] }
  0xe6   :  { %1105 = vmatpush.msrb.mxu1 %v999_v55  ;;  %1146 = vmatpush.msrb.mxu3 %v992_v3  ;;  %v868_v55 = vld [vmem:[#allocation2 + $0x3b8] sm:$0xff] }
  0xe7   :  { %v662_v63 = vmul.f32 %v5893_v8, %v661_v58  ;;  %v794_v58 = vld [vmem:[#allocation2 + $0x168] sm:$0xff] }
  0xe8   :  { %1147 = vmatpush.msrb.mxu3 %v984_v24  ;;  %v896_v24 = vld [vmem:[#allocation2 + $0x498] sm:$0xff] }
  0xe9   :  { %v663_v9 = vadd.f32 %v5893_v8, %v662_v63 }
  0xea   :  { %v5895_v15 = vpop.eup %5894  ;;  %1148 = vmatpush.msrb.mxu3 %v976_v43 }
  0xeb   :  { %v667_v52 = vsel %vm666_vm10, %v5893_v8, %v663_v9  ;;  %v777_v9 = vld [vmem:[#allocation2 + $0xe0] sm:$0xff] }
  0xec   :  { %v672_v16 = vsel %vm669_vm11, %v671_v56, %v667_v52  ;;  %1149 = vmatpush.msrb.mxu3 %v968_v13  ;;  %v786_v56 = vld [vmem:[#allocation2 + $0x128] sm:$0xff]  ;;  %v936_v52 = vld [vmem:[#allocation2 + $0x5d8] sm:$0xff] }
  0xed   :  { %v6386_v1 = vmul.f32 %v5895_v15, %v672_v16  ;;  %v769_v15 = vld [vmem:[#allocation2 + $0xa0] sm:$0xff]  ;;  %v770_v16 = vld [vmem:[#allocation2 + $0xa8] sm:$0xff]  ;;  %v888_v13 = vld [vmem:[#allocation2 + $0x458] sm:$0xff] }
  0xef   :  { %746 = vst [vmem:[%s7453_s2] sm:$0xff] %v6386_v1  ;;  %1021 = vmatmul.f32.vlgmr.msra.gmra.mxu0 %v6386_v1  ;;  %1061 = vmatmul.f32.vlgmr.msra.gmra.mxu2 %v6386_v1 }
  0xf0   :  { %1165 = vmatpush.msra.mxu0 %v6271_v18  ;;  %1205 = vmatpush.msra.mxu2 %v6138_v6 }
  0xf2   :  { %1166 = vmatpush.msra.mxu0 %v6274_v23  ;;  %1206 = vmatpush.msra.mxu2 %v866_v21  ;;  %v500_v30 = vpop.f32.mrf.mxu2  ;;  %v520_v31 = vpop.f32.mrf.mxu3  ;;  %v920_v21 = vld [vmem:[#allocation2 + $0x558] sm:$0xff] }
  0xf3   :  { %v460_v18 = vpop.f32.mrf.mxu0  ;;  %v480_v38 = vpop.f32.mrf.mxu1  ;;  %v521_v45 = vadd.f32 %v520_v31, %v500_v30 }
  0xf4   :  { %1167 = vmatpush.msra.mxu0 %v6277_v28  ;;  %1207 = vmatpush.msra.mxu2 %v858_v10  ;;  %v481_v23 = vadd.f32 %v480_v38, %v460_v18  ;;  %v991_v28 = vld [vmem:[#allocation2 + $0x790] sm:$0xff] }
  0xf5   :  { %v680_v53 = vadd.f32 %v5807_v34, %v521_v45  ;;  %1106 = vmatpush.msrb.mxu1 %v991_v28  ;;  %v875_v34 = vld [vmem:[#allocation2 + $0x3f0] sm:$0xff] }
  0xf6   :  { %1168 = vmatpush.msra.mxu0 %v6280_v33  ;;  %1208 = vmatpush.msra.mxu2 %v850_v35  ;;  %v679_v57 = vadd.f32 %v5806_v42, %v481_v23  ;;  %v876_v35 = vld [vmem:[#allocation2 + $0x3f8] sm:$0xff]  ;;  %v911_v45 = vld [vmem:[#allocation2 + $0x510] sm:$0xff] }
  0xf7   :  { %1101 = vmatmul.f32.vlgmr.msrb.gmra.mxu0 %v6386_v1  ;;  %1141 = vmatmul.f32.vlgmr.msrb.gmra.mxu2 %v6386_v1  ;;  %v702_v0 = vsub.f32 0.0, %v680_v53  ;;  %v5809_v42 = vld [vmem:[%s7451_s0 + $0x1f8] sm:$0xff]  ;;  %v867_v53 = vld [vmem:[#allocation2 + $0x3b0] sm:$0xff] }
  0xf8   :  { %1169 = vmatpush.msra.mxu0 %v6283_v41  ;;  %1209 = vmatpush.msra.mxu2 %v842_v47  ;;  %v683_v7 = vsub.f32 0.0, %v679_v57  ;;  %v975_v41 = vld [vmem:[#allocation2 + $0x710] sm:$0xff]  ;;  %v912_v23 = vld [vmem:[#allocation2 + $0x518] sm:$0xff] }
  0xf9   :  { %v703_v33 = vmul.f32 1.442695, %v702_v0  ;;  %1107 = vmatpush.msrb.mxu1 %v983_v32  ;;  %v904_v0 = vld [vmem:[#allocation2 + $0x4d8] sm:$0xff]  ;;  %v895_v32 = vld [vmem:[#allocation2 + $0x490] sm:$0xff] }
  0xfa   :  { %1170 = vmatpush.msra.mxu0 %v6286_v50  ;;  %1210 = vmatpush.msra.mxu2 %v834_v61  ;;  %v684_v8 = vmul.f32 1.442695, %v683_v7  ;;  %v967_v50 = vld [vmem:[#allocation2 + $0x6d0] sm:$0xff] }
  0xfb   :  { %5896 = vpow2.f32 %v703_v33  ;;  %1108 = vmatpush.msrb.mxu1 %v975_v41  ;;  %v903_v61 = vld [vmem:[#allocation2 + $0x4d0] sm:$0xff]  ;;  %v852_v41 = vld [vmem:[#allocation2 + $0x338] sm:$0xff] }
  0xfc   :  { %1171 = vmatpush.msra.mxu0 %v6290_v59  ;;  %1211 = vmatpush.msra.mxu2 %v826_v20  ;;  %5898 = vpow2.f32 %v684_v8  ;;  %v960_v59 = vld [vmem:[#allocation2 + $0x698] sm:$0xff]  ;;  %v859_v7 = vld [vmem:[#allocation2 + $0x370] sm:$0xff] }
  0xfd   :  { %1109 = vmatpush.msrb.mxu1 %v967_v50  ;;  %1150 = vmatpush.msrb.mxu3 %v960_v59  ;;  %v860_v20 = vld [vmem:[#allocation2 + $0x378] sm:$0xff]  ;;  %v5808_v33 = vld [vmem:[%s7451_s0 + $0x1f0] sm:$0xff] }
  0xfe   :  { %1172 = vmatpush.msra.mxu0 %v6294_v5  ;;  %1212 = vmatpush.msra.mxu2 %v818_v37  ;;  %v952_v5 = vld [vmem:[#allocation2 + $0x658] sm:$0xff]  ;;  %v851_v37 = vld [vmem:[#allocation2 + $0x330] sm:$0xff] }
  0xff   :  { %1110 = vmatpush.msrb.mxu1 %v959_v54  ;;  %1151 = vmatpush.msrb.mxu3 %v952_v5  ;;  %v887_v50 = vld [vmem:[#allocation2 + $0x450] sm:$0xff] }
 0x100   :  { %1173 = vmatpush.msra.mxu0 %v6297_v12  ;;  %1213 = vmatpush.msra.mxu2 %v810_v49  ;;  %v943_v12 = vld [vmem:[#allocation2 + $0x610] sm:$0xff] }
 0x101   :  { %v5897_v46 = vpop.eup %5896  ;;  %1111 = vmatpush.msrb.mxu1 %v951_v40  ;;  %1152 = vmatpush.msrb.mxu3 %v944_v44  ;;  %v843_v59 = vld [vmem:[#allocation2 + $0x2f0] sm:$0xff]  ;;  %v880_v40 = vld [vmem:[#allocation2 + $0x418] sm:$0xff] }
 0x102   :  { %1174 = vmatpush.msra.mxu0 %v6300_v17  ;;  %1214 = vmatpush.msra.mxu2 %v802_v36  ;;  %v5899_v51 = vpop.eup %5898  ;;  %v6412_v63 = vadd.f32 1.0, %v5897_v46  ;;  %v778_v17 = vld [vmem:[#allocation2 + $0xe8] sm:$0xff]  ;;  %v879_v46 = vld [vmem:[#allocation2 + $0x410] sm:$0xff] }
 0x103   :  { %v6414_v4 = vadd.f32 1.0, %v5899_v51  ;;  %1112 = vmatpush.msrb.mxu1 %v943_v12  ;;  %1153 = vmatpush.msrb.mxu3 %v936_v52  ;;  %v836_v12 = vld [vmem:[#allocation2 + $0x2b8] sm:$0xff]  ;;  %v929_v52 = vld [vmem:[#allocation2 + $0x5a0] sm:$0xff] }
 0x104   :  { %1175 = vmatpush.msra.mxu0 %v6303_v25  ;;  %1215 = vmatpush.msra.mxu2 %v794_v58  ;;  %5900 = vrcp.f32 %v6412_v63  ;;  %v927_v25 = vld [vmem:[#allocation2 + $0x590] sm:$0xff]  ;;  %vm711_vm12 = vweird.f32 %v6412_v63  ;;  %v844_v58 = vld [vmem:[#allocation2 + $0x2f8] sm:$0xff]  ;;  %v717_v5 = vand.u32 2147483648, %v6412_v63 }
 0x105   :  { %5902 = vrcp.f32 %v6414_v4  ;;  %1113 = vmatpush.msrb.mxu1 %v935_v48  ;;  %1154 = vmatpush.msrb.mxu3 %v928_v19  ;;  %vm692_vm14 = vweird.f32 %v6414_v4  ;;  %v698_v51 = vand.u32 2147483648, %v6414_v4  ;;  %v715_v48 = vand.u32 2147483647, %v6412_v63 }
 0x106   :  { %1176 = vmatpush.msra.mxu0 %v6139_v60  ;;  %1216 = vmatpush.msra.mxu2 %v786_v56  ;;  %v835_v56 = vld [vmem:[#allocation2 + $0x2b0] sm:$0xff]  ;;  %v718_v19 = vor.u32 1.1754944e-38, %v717_v5  ;;  %v970_v5 = vld [vmem:[#allocation2 + $0x6e8] sm:$0xff]  ;;  %v937_v60 = vld [vmem:[#allocation2 + $0x5e0] sm:$0xff] }
 0x107   :  { %1114 = vmatpush.msrb.mxu1 %v927_v25  ;;  %1155 = vmatpush.msrb.mxu3 %v920_v21  ;;  %v699_v25 = vor.u32 1.1754944e-38, %v698_v51  ;;  %vm716_vm3 = vcmp.eq.f32.partialorder %v715_v48, 8.507059e+37  ;;  %v811_v21 = vld [vmem:[#allocation2 + $0x1f0] sm:$0xff]  ;;  %v961_v51 = vld [vmem:[#allocation2 + $0x6a0] sm:$0xff]  ;;  %v938_v48 = vld [vmem:[#allocation2 + $0x5e8] sm:$0xff] }
 0x108   :  { %1177 = vmatpush.msra.mxu0 %v777_v9  ;;  %1217 = vmatpush.msra.mxu2 %v778_v17  ;;  %v696_v9 = vand.u32 2147483647, %v6414_v4 }
 0x109   :  { %1115 = vmatpush.msrb.mxu1 %v919_v2  ;;  %1156 = vmatpush.msrb.mxu3 %v912_v23  ;;  %v780_v23 = vld [vmem:[#allocation2 + $0xf8] sm:$0xff] }
 0x10a   :  { %1178 = vmatpush.msra.mxu0 %v769_v15  ;;  %1218 = vmatpush.msra.mxu2 %v770_v16  ;;  %v6419_v6 = vpop.eup %5900  ;;  %v827_v15 = vld [vmem:[#allocation2 + $0x270] sm:$0xff]  ;;  %v828_v16 = vld [vmem:[#allocation2 + $0x278] sm:$0xff]  ;;  %vm697_vm2 = vcmp.eq.f32.partialorder %v696_v9, 8.507059e+37  ;;  %v945_v9 = vld [vmem:[#allocation2 + $0x620] sm:$0xff] }
 0x10b   :  { %v6421_v10 = vpop.eup %5902  ;;  %v707_v27 = vmul.f32 %v6419_v6, %v6412_v63  ;;  %v540_v30 = vpop.f32.mrf.mxu0  ;;  %1116 = vmatpush.msrb.mxu1 %v911_v45  ;;  %1157 = vmatpush.msrb.mxu3 %v904_v0  ;;  %vm712_vm13 = vweird.f32 %v6419_v6  ;;  %v819_v63 = vld [vmem:[#allocation2 + $0x230] sm:$0xff] }
 0x10c   :  { %1179 = vmatpush.msra.mxu0 %v761_v62  ;;  %1219 = vmatpush.msra.mxu2 %v762_v14  ;;  %v688_v29 = vmul.f32 %v6421_v10, %v6414_v4  ;;  %v560_v31 = vpop.f32.mrf.mxu1  ;;  %vm693_vm15 = vweird.f32 %v6421_v10  ;;  %vm6450_vm0 = vmor %vm711_vm12, %vm712_vm13  ;;  %v820_v62 = vld [vmem:[#allocation2 + $0x238] sm:$0xff]  ;;  %v779_v45 = vld [vmem:[#allocation2 + $0xf0] sm:$0xff] }
 0x10d   :  { %v580_v18 = vpop.f32.mrf.mxu2  ;;  %v600_v38 = vpop.f32.mrf.mxu3  ;;  %v708_v57 = vsub.f32 1.0, %v707_v27  ;;  %v561_v28 = vadd.f32 %v560_v31, %v540_v30  ;;  %1117 = vmatpush.msrb.mxu1 %v903_v61  ;;  %1158 = vmatpush.msrb.mxu3 %v896_v24  ;;  %vm6459_vm1 = vmor %vm692_vm14, %vm693_vm15  ;;  %v803_v31 = vld [vmem:[#allocation2 + $0x1b0] sm:$0xff] }
 0x10e   :  { %1180 = vmatpush.msra.mxu0 %v753_v22  ;;  %1220 = vmatpush.msra.mxu2 %v754_v26  ;;  %v601_v47 = vadd.f32 %v600_v38, %v580_v18  ;;  %v689_v39 = vsub.f32 1.0, %v688_v29  ;;  %v812_v22 = vld [vmem:[#allocation2 + $0x1f8] sm:$0xff]  ;;  %v787_v38 = vld [vmem:[#allocation2 + $0x130] sm:$0xff] }
 0x10f   :  { %1181 = vmatmul.f32.vlgmr.msra.gmra.mxu0 %v6386_v1  ;;  %1221 = vmatmul.f32.vlgmr.msra.gmra.mxu2 %v6386_v1  ;;  %v709_v43 = vmul.f32 %v6419_v6, %v708_v57  ;;  %v681_v36 = vadd.f32 %v5808_v33, %v561_v28  ;;  %v772_v57 = vld [vmem:[#allocation2 + $0xb8] sm:$0xff]  ;;  %v763_v0 = vld [vmem:[#allocation2 + $0x70] sm:$0xff] }
 0x110   :  { %1245 = vmatpush.msrb.mxu0 %v875_v34  ;;  %1285 = vmatpush.msrb.mxu2 %v876_v35  ;;  %v682_v3 = vadd.f32 %v5809_v42, %v601_v47  ;;  %v690_v49 = vmul.f32 %v6421_v10, %v689_v39  ;;  %v804_v34 = vld [vmem:[#allocation2 + $0x1b8] sm:$0xff]  ;;  %v771_v39 = vld [vmem:[#allocation2 + $0xb0] sm:$0xff] }
 0x111   :  { %1118 = vmatpush.msrb.mxu1 %v895_v32  ;;  %1159 = vmatpush.msrb.mxu3 %v888_v13  ;;  %v710_v17 = vadd.f32 %v6419_v6, %v709_v43  ;;  %v796_v35 = vld [vmem:[#allocation2 + $0x178] sm:$0xff]  ;;  %v755_v33 = vld [vmem:[#allocation2 + $0x30] sm:$0xff]  ;;  %v1002_v13 = vld [vmem:[#allocation2 + $0x7e8] sm:$0xff] }
 0x112   :  { %1246 = vmatpush.msrb.mxu0 %v867_v53  ;;  %1286 = vmatpush.msrb.mxu2 %v868_v55  ;;  %v722_v8 = vsub.f32 0.0, %v682_v3  ;;  %v691_v44 = vadd.f32 %v6421_v10, %v690_v49  ;;  %v788_v42 = vld [vmem:[#allocation2 + $0x138] sm:$0xff] }
 0x113   :  { %1119 = vmatpush.msrb.mxu1 %v887_v50  ;;  %1160 = vmatpush.msrb.mxu3 %v880_v40  ;;  %v714_v4 = vsel %vm6450_vm0, %v6419_v6, %v710_v17  ;;  %v764_v28 = vld [vmem:[#allocation2 + $0x78] sm:$0xff]  ;;  %v1001_v50 = vld [vmem:[#allocation2 + $0x7e0] sm:$0xff]  ;;  %v946_v17 = vld [vmem:[#allocation2 + $0x628] sm:$0xff] }
 0x114   :  { %1247 = vmatpush.msrb.mxu0 %v859_v7  ;;  %1287 = vmatpush.msrb.mxu2 %v860_v20  ;;  %v723_v54 = vmul.f32 1.442695, %v722_v8  ;;  %v695_v14 = vsel %vm6459_vm1, %v6421_v10, %v691_v44  ;;  %v719_v30 = vsel %vm716_vm3, %v718_v19, %v714_v4  ;;  %v795_v10 = vld [vmem:[#allocation2 + $0x170] sm:$0xff]  ;;  %v756_v32 = vld [vmem:[#allocation2 + $0x38] sm:$0xff]  ;;  %v969_v40 = vld [vmem:[#allocation2 + $0x6e0] sm:$0xff] }
 0x115   :  { %1120 = vmatpush.msrb.mxu1 %v879_v46  ;;  %v700_v29 = vsel %vm697_vm2, %v699_v25, %v695_v14  ;;  %v741_v6 = vmul.f32 0.0, %v719_v30  ;;  %v978_v46 = vld [vmem:[#allocation2 + $0x728] sm:$0xff]  ;;  %v913_v19 = vld [vmem:[#allocation2 + $0x520] sm:$0xff]  ;;  %v1004_v30 = vld [vmem:[#allocation2 + $0x7f8] sm:$0xff] }
 0x116   :  { %1248 = vmatpush.msrb.mxu0 %v851_v37  ;;  %1288 = vmatpush.msrb.mxu2 %v852_v41  ;;  %5904 = vpow2.f32 %v723_v54  ;;  %v994_v54 = vld [vmem:[#allocation2 + $0x7a8] sm:$0xff]  ;;  %v897_v4 = vld [vmem:[#allocation2 + $0x4a0] sm:$0xff] }
 0x117   :  { %5906 = vtanh.f32 %v681_v36  ;;  %v993_v36 = vld [vmem:[#allocation2 + $0x7a0] sm:$0xff]  ;;  %v954_v44 = vld [vmem:[#allocation2 + $0x668] sm:$0xff] }
 0x118   :  { %1249 = vmatpush.msrb.mxu0 %v843_v59  ;;  %1289 = vmatpush.msrb.mxu2 %v844_v58  ;;  %v986_v59 = vld [vmem:[#allocation2 + $0x768] sm:$0xff]  ;;  %v977_v58 = vld [vmem:[#allocation2 + $0x720] sm:$0xff] }
 0x119   :  { %v922_v25 = vld [vmem:[#allocation2 + $0x568] sm:$0xff] }
 0x11a   :  { %1250 = vmatpush.msrb.mxu0 %v835_v56  ;;  %1290 = vmatpush.msrb.mxu2 %v836_v12  ;;  %v962_v56 = vld [vmem:[#allocation2 + $0x6a8] sm:$0xff]  ;;  %v953_v12 = vld [vmem:[#allocation2 + $0x660] sm:$0xff] }
 0x11b   :  { %v906_v14 = vld [vmem:[#allocation2 + $0x4e8] sm:$0xff] }
 0x11c   :  { %1251 = vmatpush.msrb.mxu0 %v827_v15  ;;  %1291 = vmatpush.msrb.mxu2 %v828_v16  ;;  %v5905_v2 = vpop.eup %5904  ;;  %v930_v15 = vld [vmem:[#allocation2 + $0x5a8] sm:$0xff]  ;;  %v921_v16 = vld [vmem:[#allocation2 + $0x560] sm:$0xff] }
 0x11d   :  { %v725_v26 = vadd.f32 1.0, %v5905_v2  ;;  %v5907_v27 = vpop.eup %5906  ;;  %v898_v2 = vld [vmem:[#allocation2 + $0x4a8] sm:$0xff] }
 0x11e   :  { %1252 = vmatpush.msrb.mxu0 %v819_v63  ;;  %1292 = vmatpush.msrb.mxu2 %v820_v62  ;;  %v742_v18 = vmul.f32 %v5907_v27, %v700_v29  ;;  %v914_v63 = vld [vmem:[#allocation2 + $0x528] sm:$0xff]  ;;  %v905_v62 = vld [vmem:[#allocation2 + $0x4e0] sm:$0xff]  ;;  %v1003_v29 = vld [vmem:[#allocation2 + $0x7f0] sm:$0xff] }
 0x11f   :  { %5908 = vrcp.f32 %v725_v26  ;;  %v737_v3 = vand.u32 2147483648, %v725_v26  ;;  %v735_v20 = vand.u32 2147483647, %v725_v26  ;;  %vm731_vm5 = vweird.f32 %v725_v26  ;;  %v882_v27 = vld [vmem:[#allocation2 + $0x428] sm:$0xff] }
 0x120   :  { %1253 = vmatpush.msrb.mxu0 %v811_v21  ;;  %1293 = vmatpush.msrb.mxu2 %v812_v22  ;;  %v6469_v53 = vadd.f32 %v742_v18, %v741_v6  ;;  %v889_v21 = vld [vmem:[#allocation2 + $0x460] sm:$0xff]  ;;  %v890_v22 = vld [vmem:[#allocation2 + $0x468] sm:$0xff]  ;;  %v979_v6 = vld [vmem:[#allocation2 + $0x730] sm:$0xff] }
 0x121   :  { %v738_v8 = vor.u32 1.1754944e-38, %v737_v3  ;;  %vm736_vm7 = vcmp.eq.f32.partialorder %v735_v20, 8.507059e+37  ;;  %v980_v18 = vld [vmem:[#allocation2 + $0x738] sm:$0xff] }
 0x122   :  { %1254 = vmatpush.msrb.mxu0 %v803_v31  ;;  %1294 = vmatpush.msrb.mxu2 %v804_v34  ;;  %5910 = vtanh.f32 %v6469_v53  ;;  %v995_v31 = vld [vmem:[#allocation2 + $0x7b0] sm:$0xff]  ;;  %v996_v34 = vld [vmem:[#allocation2 + $0x7b8] sm:$0xff] }
 0x123   :  { %v932_v3 = vld [vmem:[#allocation2 + $0x5b8] sm:$0xff] }
 0x124   :  { %1255 = vmatpush.msrb.mxu0 %v795_v10  ;;  %1295 = vmatpush.msrb.mxu2 %v796_v35  ;;  %v987_v10 = vld [vmem:[#allocation2 + $0x770] sm:$0xff]  ;;  %v988_v35 = vld [vmem:[#allocation2 + $0x778] sm:$0xff] }
 0x125   :  { %v5909_v47 = vpop.eup %5908  ;;  %v924_v20 = vld [vmem:[#allocation2 + $0x578] sm:$0xff] }
 0x126   :  { %1256 = vmatpush.msrb.mxu0 %v787_v38  ;;  %1296 = vmatpush.msrb.mxu2 %v788_v42  ;;  %v727_v55 = vmul.f32 %v5909_v47, %v725_v26  ;;  %vm732_vm4 = vweird.f32 %v5909_v47  ;;  %v881_v26 = vld [vmem:[#allocation2 + $0x420] sm:$0xff]  ;;  %v971_v38 = vld [vmem:[#allocation2 + $0x6f0] sm:$0xff]  ;;  %v972_v42 = vld [vmem:[#allocation2 + $0x6f8] sm:$0xff] }
 0x127   :  { %vm733_vm6 = vmor %vm731_vm5, %vm732_vm4 }
 0x128   :  { %1257 = vmatpush.msrb.mxu0 %v779_v45  ;;  %1297 = vmatpush.msrb.mxu2 %v780_v23  ;;  %v728_v61 = vsub.f32 1.0, %v727_v55  ;;  %v5911_v41 = vpop.eup %5910  ;;  %v963_v45 = vld [vmem:[#allocation2 + $0x6b0] sm:$0xff]  ;;  %v964_v23 = vld [vmem:[#allocation2 + $0x6b8] sm:$0xff] }
 0x129   :  { %v956_v55 = vld [vmem:[#allocation2 + $0x678] sm:$0xff] }
 0x12a   :  { %1258 = vmatpush.msrb.mxu0 %v771_v39  ;;  %1298 = vmatpush.msrb.mxu2 %v772_v57  ;;  %v729_v7 = vmul.f32 %v5909_v47, %v728_v61  ;;  %v947_v39 = vld [vmem:[#allocation2 + $0x630] sm:$0xff]  ;;  %v948_v57 = vld [vmem:[#allocation2 + $0x638] sm:$0xff] }
 0x12b   :  { %v939_v61 = vld [vmem:[#allocation2 + $0x5f0] sm:$0xff] }
 0x12c   :  { %1259 = vmatpush.msrb.mxu0 %v763_v0  ;;  %1299 = vmatpush.msrb.mxu2 %v764_v28  ;;  %v730_v24 = vadd.f32 %v5909_v47, %v729_v7  ;;  %v940_v0 = vld [vmem:[#allocation2 + $0x5f8] sm:$0xff]  ;;  %v931_v28 = vld [vmem:[#allocation2 + $0x5b0] sm:$0xff] }
 0x12d   :  { %v923_v7 = vld [vmem:[#allocation2 + $0x570] sm:$0xff] }
 0x12e   :  { %1260 = vmatpush.msrb.mxu0 %v755_v33  ;;  %1300 = vmatpush.msrb.mxu2 %v756_v32  ;;  %v734_v37 = vsel %vm733_vm6, %v5909_v47, %v730_v24  ;;  %v955_v47 = vld [vmem:[#allocation2 + $0x670] sm:$0xff]  ;;  %v916_v32 = vld [vmem:[#allocation2 + $0x538] sm:$0xff] }
 0x12f   :  { %1261 = vmatmul.f32.vlgmr.msrb.gmra.mxu0 %v6386_v1  ;;  %1301 = vmatmul.f32.vlgmr.msrb.gmra.mxu2 %v6386_v1  ;;  %v739_v43 = vsel %vm736_vm7, %v738_v8, %v734_v37  ;;  %v985_v1 = vld [vmem:[#allocation2 + $0x760] sm:$0xff]  ;;  %v915_v33 = vld [vmem:[#allocation2 + $0x530] sm:$0xff]  ;;  %v908_v8 = vld [vmem:[#allocation2 + $0x4f8] sm:$0xff] }
 0x130   :  { %v6474_v49 = vmul.f32 %v5911_v41, %v739_v43  ;;  %v907_v24 = vld [vmem:[#allocation2 + $0x4f0] sm:$0xff]  ;;  %v900_v41 = vld [vmem:[#allocation2 + $0x4b8] sm:$0xff] }
 0x131   :  { %v899_v37 = vld [vmem:[#allocation2 + $0x4b0] sm:$0xff] }
 0x132   :  { %5810 = vst [vmem:[%s7453_s2 + $0x78] sm:$0xff] %v6474_v49  ;;  %1041 = vmatmul.f32.vlgmr.msra.gmra.mxu1 %v6474_v49  ;;  %1081 = vmatmul.f32.vlgmr.msra.gmra.mxu3 %v6474_v49  ;;  %v891_v43 = vld [vmem:[#allocation2 + $0x470] sm:$0xff] }
 0x133   :  { %1185 = vmatpush.msra.mxu1 %v1001_v50  ;;  %1225 = vmatpush.msra.mxu3 %v1002_v13  ;;  %v892_v50 = vld [vmem:[#allocation2 + $0x478] sm:$0xff]  ;;  %v883_v13 = vld [vmem:[#allocation2 + $0x430] sm:$0xff] }
 0x135   :  { %1186 = vmatpush.msra.mxu1 %v993_v36  ;;  %1226 = vmatpush.msra.mxu3 %v994_v54  ;;  %v884_v36 = vld [vmem:[#allocation2 + $0x438] sm:$0xff]  ;;  %v1593_v54 = vld [vmem:[#allocation2 + $0x3c0] sm:$0xff] }
 0x136   :  { %1729 = vmatpush.msra.mxu0 %v1593_v54  ;;  %v1523_v54 = vld [vmem:[#allocation2 + $0x190] sm:$0xff] }
 0x137   :  { %1187 = vmatpush.msra.mxu1 %v985_v1  ;;  %1227 = vmatpush.msra.mxu3 %v986_v59  ;;  %v1594_v1 = vld [vmem:[#allocation2 + $0x3c8] sm:$0xff]  ;;  %v1585_v59 = vld [vmem:[#allocation2 + $0x380] sm:$0xff] }
 0x138   :  { %1769 = vmatpush.msra.mxu2 %v1594_v1  ;;  %1730 = vmatpush.msra.mxu0 %v1585_v59  ;;  %v1524_v1 = vld [vmem:[#allocation2 + $0x198] sm:$0xff] }
 0x139   :  { %1188 = vmatpush.msra.mxu1 %v977_v58  ;;  %1228 = vmatpush.msra.mxu3 %v978_v46  ;;  %v1586_v58 = vld [vmem:[#allocation2 + $0x388] sm:$0xff]  ;;  %v1577_v46 = vld [vmem:[#allocation2 + $0x340] sm:$0xff] }
 0x13a   :  { %1121 = vmatmul.f32.vlgmr.msrb.gmra.mxu1 %v6474_v49  ;;  %1161 = vmatmul.f32.vlgmr.msrb.gmra.mxu3 %v6474_v49 }
 0x13b   :  { %1189 = vmatpush.msra.mxu1 %v969_v40  ;;  %1229 = vmatpush.msra.mxu3 %v970_v5  ;;  %v1578_v40 = vld [vmem:[#allocation2 + $0x348] sm:$0xff]  ;;  %v1569_v5 = vld [vmem:[#allocation2 + $0x300] sm:$0xff] }
 0x13c   :  { %1770 = vmatpush.msra.mxu2 %v1586_v58  ;;  %1731 = vmatpush.msra.mxu0 %v1577_v46  ;;  %v1721_v58 = vld [vmem:[#allocation2 + $0x7c0] sm:$0xff]  ;;  %v1722_v46 = vld [vmem:[#allocation2 + $0x7c8] sm:$0xff] }
 0x13d   :  { %1190 = vmatpush.msra.mxu1 %v961_v51  ;;  %1230 = vmatpush.msra.mxu3 %v962_v56  ;;  %v1570_v51 = vld [vmem:[#allocation2 + $0x308] sm:$0xff]  ;;  %v1561_v56 = vld [vmem:[#allocation2 + $0x2c0] sm:$0xff] }
 0x13e   :  { %1771 = vmatpush.msra.mxu2 %v1578_v40  ;;  %1732 = vmatpush.msra.mxu0 %v1569_v5  ;;  %v1515_v40 = vld [vmem:[#allocation2 + $0x150] sm:$0xff] }
 0x13f   :  { %1191 = vmatpush.msra.mxu1 %v953_v12  ;;  %1231 = vmatpush.msra.mxu3 %v954_v44  ;;  %v1562_v12 = vld [vmem:[#allocation2 + $0x2c8] sm:$0xff]  ;;  %v1553_v44 = vld [vmem:[#allocation2 + $0x280] sm:$0xff] }
 0x140   :  { %1772 = vmatpush.msra.mxu2 %v1570_v51  ;;  %1733 = vmatpush.msra.mxu0 %v1561_v56  ;;  %v5814_v51 = vld [vmem:[%s7451_s0 + $0x58] sm:$0xff] }
 0x141   :  { %1192 = vmatpush.msra.mxu1 %v945_v9  ;;  %1232 = vmatpush.msra.mxu3 %v946_v17  ;;  %v1545_v9 = vld [vmem:[#allocation2 + $0x240] sm:$0xff]  ;;  %v1546_v17 = vld [vmem:[#allocation2 + $0x248] sm:$0xff]  ;;  %v1516_v56 = vld [vmem:[#allocation2 + $0x158] sm:$0xff] }
 0x142   :  { %1773 = vmatpush.msra.mxu2 %v1562_v12  ;;  %1734 = vmatpush.msra.mxu0 %v1553_v44 }
 0x143   :  { %1193 = vmatpush.msra.mxu1 %v937_v60  ;;  %1233 = vmatpush.msra.mxu3 %v938_v48  ;;  %v1537_v60 = vld [vmem:[#allocation2 + $0x200] sm:$0xff]  ;;  %v1538_v48 = vld [vmem:[#allocation2 + $0x208] sm:$0xff] }
 0x144   :  { %1735 = vmatpush.msra.mxu0 %v1545_v9  ;;  %v1714_v9 = vld [vmem:[#allocation2 + $0x788] sm:$0xff] }
 0x145   :  { %1194 = vmatpush.msra.mxu1 %v929_v52  ;;  %1234 = vmatpush.msra.mxu3 %v930_v15  ;;  %v1529_v52 = vld [vmem:[#allocation2 + $0x1c0] sm:$0xff]  ;;  %v1530_v15 = vld [vmem:[#allocation2 + $0x1c8] sm:$0xff] }
 0x146   :  { %1736 = vmatpush.msra.mxu0 %v1537_v60 }
 0x147   :  { %1195 = vmatpush.msra.mxu1 %v921_v16  ;;  %1235 = vmatpush.msra.mxu3 %v922_v25  ;;  %v1521_v16 = vld [vmem:[#allocation2 + $0x180] sm:$0xff]  ;;  %v1522_v25 = vld [vmem:[#allocation2 + $0x188] sm:$0xff] }
 0x148   :  { %1737 = vmatpush.msra.mxu0 %v1529_v52  ;;  %v1508_v52 = vld [vmem:[#allocation2 + $0x118] sm:$0xff] }
 0x149   :  { %1196 = vmatpush.msra.mxu1 %v913_v19  ;;  %1236 = vmatpush.msra.mxu3 %v914_v63  ;;  %v1513_v19 = vld [vmem:[#allocation2 + $0x140] sm:$0xff]  ;;  %v1514_v63 = vld [vmem:[#allocation2 + $0x148] sm:$0xff] }
 0x14a   :  { %1738 = vmatpush.msra.mxu0 %v1521_v16  ;;  %v1705_v16 = vld [vmem:[#allocation2 + $0x740] sm:$0xff] }
 0x14b   :  { %1197 = vmatpush.msra.mxu1 %v905_v62  ;;  %1237 = vmatpush.msra.mxu3 %v906_v14  ;;  %v1505_v62 = vld [vmem:[#allocation2 + $0x100] sm:$0xff]  ;;  %v1506_v14 = vld [vmem:[#allocation2 + $0x108] sm:$0xff] }
 0x14c   :  { %1739 = vmatpush.msra.mxu0 %v1513_v19  ;;  %v1499_v19 = vld [vmem:[#allocation2 + $0xd0] sm:$0xff] }
 0x14d   :  { %1198 = vmatpush.msra.mxu1 %v897_v4  ;;  %1238 = vmatpush.msra.mxu3 %v898_v2  ;;  %v1497_v4 = vld [vmem:[#allocation2 + $0xc0] sm:$0xff]  ;;  %v1498_v2 = vld [vmem:[#allocation2 + $0xc8] sm:$0xff] }
 0x14e   :  { %1740 = vmatpush.msra.mxu0 %v1505_v62  ;;  %v1500_v62 = vld [vmem:[#allocation2 + $0xd8] sm:$0xff] }
 0x14f   :  { %1199 = vmatpush.msra.mxu1 %v889_v21  ;;  %1239 = vmatpush.msra.mxu3 %v890_v22  ;;  %v1489_v21 = vld [vmem:[#allocation2 + $0x80] sm:$0xff]  ;;  %v1490_v22 = vld [vmem:[#allocation2 + $0x88] sm:$0xff] }
 0x150   :  { %1741 = vmatpush.msra.mxu0 %v1497_v4  ;;  %v1698_v4 = vld [vmem:[#allocation2 + $0x708] sm:$0xff] }
 0x151   :  { %1200 = vmatpush.msra.mxu1 %v881_v26  ;;  %1240 = vmatpush.msra.mxu3 %v882_v27  ;;  %v1481_v26 = vld [vmem:[#allocation2 + $0x40] sm:$0xff]  ;;  %v1482_v27 = vld [vmem:[#allocation2 + $0x48] sm:$0xff] }
 0x152   :  { %1201 = vmatmul.f32.vlgmr.msra.gmra.mxu1 %v6474_v49  ;;  %1241 = vmatmul.f32.vlgmr.msra.gmra.mxu3 %v6474_v49 }
 0x153   :  { %1265 = vmatpush.msrb.mxu1 %v1003_v29  ;;  %1305 = vmatpush.msrb.mxu3 %v1004_v30  ;;  %v1473_v29 = vld [vmem:[#allocation2] sm:$0xff]  ;;  %v1474_v30 = vld [vmem:[#allocation2 + $0x8] sm:$0xff] }
 0x154   :  { %1742 = vmatpush.msra.mxu0 %v1489_v21 }
 0x155   :  { %1266 = vmatpush.msrb.mxu1 %v995_v31  ;;  %1306 = vmatpush.msrb.mxu3 %v996_v34  ;;  %v1595_v31 = vld [vmem:[#allocation2 + $0x3d0] sm:$0xff]  ;;  %v1596_v34 = vld [vmem:[#allocation2 + $0x3d8] sm:$0xff] }
 0x156   :  { %1743 = vmatpush.msra.mxu0 %v1481_v26  ;;  %v1689_v26 = vld [vmem:[#allocation2 + $0x6c0] sm:$0xff] }
 0x157   :  { %1267 = vmatpush.msrb.mxu1 %v987_v10  ;;  %1307 = vmatpush.msrb.mxu3 %v988_v35  ;;  %v1587_v10 = vld [vmem:[#allocation2 + $0x390] sm:$0xff]  ;;  %v1588_v35 = vld [vmem:[#allocation2 + $0x398] sm:$0xff] }
 0x158   :  { %1744 = vmatpush.msra.mxu0 %v1473_v29  ;;  %v1483_v29 = vld [vmem:[#allocation2 + $0x50] sm:$0xff] }
 0x159   :  { %1268 = vmatpush.msrb.mxu1 %v979_v6  ;;  %1308 = vmatpush.msrb.mxu3 %v980_v18  ;;  %v1579_v6 = vld [vmem:[#allocation2 + $0x350] sm:$0xff]  ;;  %v1580_v18 = vld [vmem:[#allocation2 + $0x358] sm:$0xff] }
 0x15a   :  { %1809 = vmatpush.msrb.mxu0 %v1595_v31 }
 0x15b   :  { %1269 = vmatpush.msrb.mxu1 %v971_v38  ;;  %1309 = vmatpush.msrb.mxu3 %v972_v42  ;;  %v1571_v38 = vld [vmem:[#allocation2 + $0x310] sm:$0xff]  ;;  %v1572_v42 = vld [vmem:[#allocation2 + $0x318] sm:$0xff] }
 0x15c   :  { %1810 = vmatpush.msrb.mxu0 %v1587_v10 }
 0x15d   :  { %1270 = vmatpush.msrb.mxu1 %v963_v45  ;;  %1310 = vmatpush.msrb.mxu3 %v964_v23 }
 0x15e   :  { %1811 = vmatpush.msrb.mxu0 %v1579_v6  ;;  %v1682_v6 = vld [vmem:[#allocation2 + $0x688] sm:$0xff] }
 0x15f   :  { %1271 = vmatpush.msrb.mxu1 %v955_v47  ;;  %1311 = vmatpush.msrb.mxu3 %v956_v55  ;;  %v5811_v47 = vld [vmem:[%s7451_s0 + $0x40] sm:$0xff]  ;;  %v1563_v55 = vld [vmem:[#allocation2 + $0x2d0] sm:$0xff] }
 0x160   :  { %1812 = vmatpush.msrb.mxu0 %v1571_v38 }
 0x161   :  { %1272 = vmatpush.msrb.mxu1 %v947_v39  ;;  %1312 = vmatpush.msrb.mxu3 %v948_v57  ;;  %v1564_v39 = vld [vmem:[#allocation2 + $0x2d8] sm:$0xff] }
 0x162   :  { %1813 = vmatpush.msrb.mxu0 %v1563_v55  ;;  %v1674_v55 = vld [vmem:[#allocation2 + $0x648] sm:$0xff] }
 0x163   :  { %1273 = vmatpush.msrb.mxu1 %v939_v61  ;;  %1313 = vmatpush.msrb.mxu3 %v940_v0  ;;  %v1555_v61 = vld [vmem:[#allocation2 + $0x290] sm:$0xff]  ;;  %v1556_v0 = vld [vmem:[#allocation2 + $0x298] sm:$0xff] }
 0x164   :  { %1814 = vmatpush.msrb.mxu0 %v1555_v61  ;;  %v1665_v61 = vld [vmem:[#allocation2 + $0x600] sm:$0xff] }
 0x165   :  { %1274 = vmatpush.msrb.mxu1 %v931_v28  ;;  %1314 = vmatpush.msrb.mxu3 %v932_v3 }
 0x167   :  { %1275 = vmatpush.msrb.mxu1 %v923_v7  ;;  %1315 = vmatpush.msrb.mxu3 %v924_v20  ;;  %v1547_v7 = vld [vmem:[#allocation2 + $0x250] sm:$0xff]  ;;  %v1548_v20 = vld [vmem:[#allocation2 + $0x258] sm:$0xff] }
 0x168   :  { %1815 = vmatpush.msrb.mxu0 %v1547_v7  ;;  %v1657_v7 = vld [vmem:[#allocation2 + $0x5c0] sm:$0xff] }
 0x169   :  { %1276 = vmatpush.msrb.mxu1 %v915_v33  ;;  %1316 = vmatpush.msrb.mxu3 %v916_v32 }
 0x16b   :  { %1277 = vmatpush.msrb.mxu1 %v907_v24  ;;  %1317 = vmatpush.msrb.mxu3 %v908_v8  ;;  %v5812_v24 = vld [vmem:[%s7451_s0 + $0x48] sm:$0xff]  ;;  %v1539_v8 = vld [vmem:[#allocation2 + $0x210] sm:$0xff] }
 0x16c   :  { %v1022_v45 = vpop.f32.mrf.mxu0  ;;  %1816 = vmatpush.msrb.mxu0 %v1539_v8 }
 0x16d   :  { %1278 = vmatpush.msrb.mxu1 %v899_v37  ;;  %1318 = vmatpush.msrb.mxu3 %v900_v41  ;;  %v1540_v37 = vld [vmem:[#allocation2 + $0x218] sm:$0xff] }
 0x16f   :  { %1279 = vmatpush.msrb.mxu1 %v891_v43  ;;  %1319 = vmatpush.msrb.mxu3 %v892_v50  ;;  %v1531_v50 = vld [vmem:[#allocation2 + $0x1d0] sm:$0xff] }
 0x170   :  { %1817 = vmatpush.msrb.mxu0 %v1531_v50 }
 0x171   :  { %1280 = vmatpush.msrb.mxu1 %v883_v13  ;;  %1320 = vmatpush.msrb.mxu3 %v884_v36  ;;  %v1532_v13 = vld [vmem:[#allocation2 + $0x1d8] sm:$0xff] }
 0x172   :  { %1281 = vmatmul.f32.vlgmr.msrb.gmra.mxu1 %v6474_v49  ;;  %1321 = vmatmul.f32.vlgmr.msrb.gmra.mxu3 %v6474_v49  ;;  %v1554_v49 = vld [vmem:[#allocation2 + $0x288] sm:$0xff]  ;;  %v1062_v3 = vpop.f32.mrf.mxu2 }
 0x173   :  { %1774 = vmatpush.msra.mxu2 %v1554_v49  ;;  %1818 = vmatpush.msrb.mxu0 %v1523_v54  ;;  %v1713_v49 = vld [vmem:[#allocation2 + $0x780] sm:$0xff] }
 0x174   :  { %1749 = vmatpush.msra.mxu1 %v1721_v58  ;;  %1789 = vmatpush.msra.mxu3 %v1722_v46 }
 0x175   :  { %1775 = vmatpush.msra.mxu2 %v1546_v17  ;;  %1819 = vmatpush.msrb.mxu0 %v1515_v40  ;;  %v1507_v17 = vld [vmem:[#allocation2 + $0x110] sm:$0xff] }
 0x176   :  { %1750 = vmatpush.msra.mxu1 %v1713_v49  ;;  %1790 = vmatpush.msra.mxu3 %v1714_v9 }
 0x177   :  { %1776 = vmatpush.msra.mxu2 %v1538_v48  ;;  %1820 = vmatpush.msrb.mxu0 %v1507_v17 }
 0x178   :  { %1751 = vmatpush.msra.mxu1 %v1705_v16  ;;  %v1625_v16 = vld [vmem:[#allocation2 + $0x4c0] sm:$0xff] }
 0x179   :  { %1777 = vmatpush.msra.mxu2 %v1530_v15  ;;  %1821 = vmatpush.msrb.mxu0 %v1499_v19 }
 0x17a   :  { %v1142_v12 = vpop.f32.mrf.mxu2 }
 0x17b   :  { %1778 = vmatpush.msra.mxu2 %v1522_v25  ;;  %v1706_v25 = vld [vmem:[#allocation2 + $0x748] sm:$0xff] }
 0x17c   :  { %1791 = vmatpush.msra.mxu3 %v1706_v25  ;;  %v1626_v25 = vld [vmem:[#allocation2 + $0x4c8] sm:$0xff] }
 0x17d   :  { %1779 = vmatpush.msra.mxu2 %v1514_v63 }
 0x17e   :  { %1792 = vmatpush.msra.mxu3 %v1698_v4 }
 0x17f   :  { %1780 = vmatpush.msra.mxu2 %v1506_v14  ;;  %v1697_v14 = vld [vmem:[#allocation2 + $0x700] sm:$0xff] }
 0x180   :  { %1752 = vmatpush.msra.mxu1 %v1697_v14 }
 0x181   :  { %1781 = vmatpush.msra.mxu2 %v1498_v2  ;;  %v1491_v2 = vld [vmem:[#allocation2 + $0x90] sm:$0xff] }
 0x182   :  { %1822 = vmatpush.msrb.mxu0 %v1491_v2  ;;  %1753 = vmatpush.msra.mxu1 %v1689_v26 }
 0x183   :  { %1782 = vmatpush.msra.mxu2 %v1490_v22  ;;  %v1492_v22 = vld [vmem:[#allocation2 + $0x98] sm:$0xff] }
 0x184   :  { %1823 = vmatpush.msrb.mxu0 %v1483_v29  ;;  %v1617_v29 = vld [vmem:[#allocation2 + $0x480] sm:$0xff] }
 0x185   :  { %1783 = vmatpush.msra.mxu2 %v1482_v27  ;;  %v1690_v27 = vld [vmem:[#allocation2 + $0x6c8] sm:$0xff] }
 0x186   :  { %1793 = vmatpush.msra.mxu3 %v1690_v27  ;;  %v5816_v27 = vld [vmem:[%s7451_s0 + $0x1a8] sm:$0xff] }
 0x187   :  { %1784 = vmatpush.msra.mxu2 %v1474_v30 }
 0x188   :  { %1794 = vmatpush.msra.mxu3 %v1682_v6 }
 0x189   :  { %1849 = vmatpush.msrb.mxu2 %v1596_v34  ;;  %v1484_v34 = vld [vmem:[#allocation2 + $0x58] sm:$0xff] }
 0x18a   :  { %1795 = vmatpush.msra.mxu3 %v1674_v55 }
 0x18b   :  { %1850 = vmatpush.msrb.mxu2 %v1588_v35  ;;  %v1681_v35 = vld [vmem:[#allocation2 + $0x680] sm:$0xff] }
 0x18c   :  { %1754 = vmatpush.msra.mxu1 %v1681_v35 }
 0x18d   :  { %1851 = vmatpush.msrb.mxu2 %v1580_v18  ;;  %v1475_v18 = vld [vmem:[#allocation2 + $0x10] sm:$0xff] }
 0x18e   :  { %1824 = vmatpush.msrb.mxu0 %v1475_v18 }
 0x18f   :  { %1852 = vmatpush.msrb.mxu2 %v1572_v42  ;;  %v1476_v42 = vld [vmem:[#allocation2 + $0x18] sm:$0xff] }
 0x191   :  { %1853 = vmatpush.msrb.mxu2 %v1564_v39 }
 0x192   :  { %v1222_v2 = vpop.f32.mrf.mxu2 }
 0x193   :  { %1854 = vmatpush.msrb.mxu2 %v1556_v0  ;;  %v1666_v0 = vld [vmem:[#allocation2 + $0x608] sm:$0xff] }
 0x194   :  { %1796 = vmatpush.msra.mxu3 %v1666_v0  ;;  %v1724_v0 = vld [vmem:[#allocation2 + $0x7d8] sm:$0xff] }
 0x195   :  { %1855 = vmatpush.msrb.mxu2 %v1548_v20  ;;  %v1658_v20 = vld [vmem:[#allocation2 + $0x5c8] sm:$0xff] }
 0x196   :  { %1797 = vmatpush.msra.mxu3 %v1658_v20 }
 0x197   :  { %1856 = vmatpush.msrb.mxu2 %v1540_v37 }
 0x199   :  { %1857 = vmatpush.msrb.mxu2 %v1532_v13 }
 0x19b   :  { %1858 = vmatpush.msrb.mxu2 %v1524_v1 }
 0x19d   :  { %1859 = vmatpush.msrb.mxu2 %v1516_v56 }
 0x19f   :  { %1860 = vmatpush.msrb.mxu2 %v1508_v52 }
 0x1a1   :  { %1861 = vmatpush.msrb.mxu2 %v1500_v62 }
 0x1a3   :  { %1862 = vmatpush.msrb.mxu2 %v1492_v22 }
 0x1a5   :  { %1863 = vmatpush.msrb.mxu2 %v1484_v34 }
 0x1a7   :  { %1864 = vmatpush.msrb.mxu2 %v1476_v42  ;;  %v1610_v42 = vld [vmem:[#allocation2 + $0x448] sm:$0xff] }
 0x1af   :  { %v1042_v23 = vpop.f32.mrf.mxu1 }
 0x1b0   :  { %v1043_v57 = vadd.f32 %v1042_v23, %v1022_v45  ;;  %v1102_v23 = vpop.f32.mrf.mxu0 }
 0x1b2   :  { %v1335_v28 = vadd.f32 %v5811_v47, %v1043_v57  ;;  %v1673_v47 = vld [vmem:[#allocation2 + $0x640] sm:$0xff] }
 0x1b3   :  { %1755 = vmatpush.msra.mxu1 %v1673_v47 }
 0x1b4   :  { %v1339_v33 = vsub.f32 0.0, %v1335_v28 }
 0x1b5   :  { %v1082_v32 = vpop.f32.mrf.mxu3  ;;  %1756 = vmatpush.msra.mxu1 %v1665_v61 }
 0x1b6   :  { %v1340_v41 = vmul.f32 1.442695, %v1339_v33  ;;  %v1083_v43 = vadd.f32 %v1082_v32, %v1062_v3  ;;  %v5813_v3 = vld [vmem:[%s7451_s0 + $0x50] sm:$0xff] }
 0x1b7   :  { %v1122_v38 = vpop.f32.mrf.mxu1  ;;  %1757 = vmatpush.msra.mxu1 %v1657_v7 }
 0x1b8   :  { %5912 = vpow2.f32 %v1340_v41  ;;  %v1336_v36 = vadd.f32 %v5812_v24, %v1083_v43  ;;  %v1123_v57 = vadd.f32 %v1122_v38, %v1102_v23  ;;  %v1649_v41 = vld [vmem:[#allocation2 + $0x580] sm:$0xff]  ;;  %v1650_v43 = vld [vmem:[#allocation2 + $0x588] sm:$0xff] }
 0x1b9   :  { %1758 = vmatpush.msra.mxu1 %v1649_v41  ;;  %1798 = vmatpush.msra.mxu3 %v1650_v43  ;;  %v1609_v38 = vld [vmem:[#allocation2 + $0x440] sm:$0xff]  ;;  %v1707_v41 = vld [vmem:[#allocation2 + $0x750] sm:$0xff]  ;;  %v1708_v43 = vld [vmem:[#allocation2 + $0x758] sm:$0xff] }
 0x1ba   :  { %v1358_v59 = vsub.f32 0.0, %v1336_v36  ;;  %v1337_v8 = vadd.f32 %v5813_v3, %v1123_v57  ;;  %v1182_v36 = vpop.f32.mrf.mxu0  ;;  %v1602_v57 = vld [vmem:[#allocation2 + $0x408] sm:$0xff] }
 0x1bc   :  { %v1359_v5 = vmul.f32 1.442695, %v1358_v59  ;;  %v5815_v59 = vld [vmem:[%s7451_s0 + $0x1a0] sm:$0xff] }
 0x1bd   :  { %v1162_v44 = vpop.f32.mrf.mxu3 }
 0x1be   :  { %v5913_v60 = vpop.eup %5912  ;;  %5914 = vpow2.f32 %v1359_v5  ;;  %v1163_v48 = vadd.f32 %v1162_v44, %v1142_v12  ;;  %v1641_v5 = vld [vmem:[#allocation2 + $0x540] sm:$0xff]  ;;  %v1590_v12 = vld [vmem:[#allocation2 + $0x3a8] sm:$0xff] }
 0x1bf   :  { %v6497_v15 = vadd.f32 1.0, %v5913_v60  ;;  %1759 = vmatpush.msra.mxu1 %v1641_v5  ;;  %v1633_v60 = vld [vmem:[#allocation2 + $0x500] sm:$0xff] }
 0x1c0   :  { %v1338_v63 = vadd.f32 %v5814_v51, %v1163_v48  ;;  %v1642_v51 = vld [vmem:[#allocation2 + $0x548] sm:$0xff] }
 0x1c1   :  { %5916 = vrcp.f32 %v6497_v15  ;;  %v1354_v54 = vand.u32 2147483648, %v6497_v15  ;;  %vm1348_vm9 = vweird.f32 %v6497_v15  ;;  %v1352_v46 = vand.u32 2147483647, %v6497_v15  ;;  %1799 = vmatpush.msra.mxu3 %v1642_v51  ;;  %v1634_v48 = vld [vmem:[#allocation2 + $0x508] sm:$0xff]  ;;  %1760 = vmatpush.msra.mxu1 %v1633_v60  ;;  %v1589_v51 = vld [vmem:[#allocation2 + $0x3a0] sm:$0xff] }
 0x1c2   :  { %v1378_v21 = vsub.f32 0.0, %v1338_v63  ;;  %v1582_v60 = vld [vmem:[#allocation2 + $0x368] sm:$0xff]  ;;  %v1668_v63 = vld [vmem:[#allocation2 + $0x618] sm:$0xff] }
 0x1c3   :  { %v1355_v52 = vor.u32 1.1754944e-38, %v1354_v54  ;;  %1800 = vmatpush.msra.mxu3 %v1634_v48  ;;  %vm1353_vm13 = vcmp.eq.f32.partialorder %v1352_v46, 8.507059e+37  ;;  %1761 = vmatpush.msra.mxu1 %v1625_v16  ;;  %v1691_v46 = vld [vmem:[#allocation2 + $0x6d0] sm:$0xff]  ;;  %v1573_v16 = vld [vmem:[#allocation2 + $0x320] sm:$0xff] }
 0x1c4   :  { %v5915_v30 = vpop.eup %5914  ;;  %v1379_v31 = vmul.f32 1.442695, %v1378_v21  ;;  %v1675_v48 = vld [vmem:[#allocation2 + $0x650] sm:$0xff] }
 0x1c5   :  { %v6500_v10 = vadd.f32 1.0, %v5915_v30  ;;  %1801 = vmatpush.msra.mxu3 %v1626_v25  ;;  %v1618_v30 = vld [vmem:[#allocation2 + $0x488] sm:$0xff]  ;;  %1762 = vmatpush.msra.mxu1 %v1617_v29  ;;  %v1549_v29 = vld [vmem:[#allocation2 + $0x260] sm:$0xff] }
 0x1c6   :  { %5918 = vpow2.f32 %v1379_v31  ;;  %v1574_v25 = vld [vmem:[#allocation2 + $0x328] sm:$0xff] }
 0x1c7   :  { %v6502_v45 = vpop.eup %5916  ;;  %5920 = vrcp.f32 %v6500_v10  ;;  %v1373_v56 = vand.u32 2147483648, %v6500_v10  ;;  %v1371_v44 = vand.u32 2147483647, %v6500_v10  ;;  %vm1367_vm12 = vweird.f32 %v6500_v10  ;;  %1802 = vmatpush.msra.mxu3 %v1618_v30  ;;  %1763 = vmatpush.msra.mxu1 %v1609_v38  ;;  %v1550_v30 = vld [vmem:[#allocation2 + $0x268] sm:$0xff]  ;;  %v1635_v38 = vld [vmem:[#allocation2 + $0x510] sm:$0xff] }
 0x1c8   :  { %v1344_v39 = vmul.f32 %v6502_v45, %v6497_v15  ;;  %vm1349_vm8 = vweird.f32 %v6502_v45 }
 0x1c9   :  { %vm6526_vm10 = vmor %vm1348_vm9, %vm1349_vm8  ;;  %v1374_v62 = vor.u32 1.1754944e-38, %v1373_v56  ;;  %vm1372_vm15 = vcmp.eq.f32.partialorder %v1371_v44, 8.507059e+37  ;;  %1803 = vmatpush.msra.mxu3 %v1610_v42  ;;  %v1683_v44 = vld [vmem:[#allocation2 + $0x690] sm:$0xff]  ;;  %v1636_v42 = vld [vmem:[#allocation2 + $0x518] sm:$0xff] }
 0x1ca   :  { %v1345_v28 = vsub.f32 1.0, %v1344_v39  ;;  %v1601_v39 = vld [vmem:[#allocation2 + $0x400] sm:$0xff] }
 0x1cb   :  { %1764 = vmatpush.msra.mxu1 %v1601_v39  ;;  %1804 = vmatpush.msra.mxu3 %v1602_v57  ;;  %v1627_v39 = vld [vmem:[#allocation2 + $0x4d0] sm:$0xff]  ;;  %v1628_v57 = vld [vmem:[#allocation2 + $0x4d8] sm:$0xff] }
 0x1cc   :  { %v5919_v33 = vpop.eup %5918  ;;  %v1346_v32 = vmul.f32 %v6502_v45, %v1345_v28 }
 0x1cd   :  { %v5921_v24 = vpop.eup %5920  ;;  %v6511_v37 = vadd.f32 1.0, %v5919_v33  ;;  %1869 = vmatpush.msrb.mxu3 %v1724_v0  ;;  %v1715_v33 = vld [vmem:[#allocation2 + $0x790] sm:$0xff] }
 0x1ce   :  { %v1363_v50 = vmul.f32 %v5921_v24, %v6500_v10  ;;  %v1347_v13 = vadd.f32 %v6502_v45, %v1346_v32  ;;  %vm1368_vm11 = vweird.f32 %v5921_v24  ;;  %v1716_v32 = vld [vmem:[#allocation2 + $0x798] sm:$0xff] }
 0x1cf   :  { %5922 = vrcp.f32 %v6511_v37  ;;  %v1202_v1 = vpop.f32.mrf.mxu1  ;;  %vm6537_vm14 = vmor %vm1367_vm12, %vm1368_vm11  ;;  %v1393_v3 = vand.u32 2147483648, %v6511_v37  ;;  %vm1387_vm1 = vweird.f32 %v6511_v37  ;;  %v1391_v7 = vand.u32 2147483647, %v6511_v37  ;;  %1870 = vmatpush.msrb.mxu3 %v1716_v32  ;;  %v1619_v32 = vld [vmem:[#allocation2 + $0x490] sm:$0xff] }
 0x1d0   :  { %v1364_v58 = vsub.f32 1.0, %v1363_v50  ;;  %v1203_v40 = vadd.f32 %v1202_v1, %v1182_v36  ;;  %5924 = vtanh.f32 %v1337_v8  ;;  %v1351_v9 = vsel %vm6526_vm10, %v6502_v45, %v1347_v13  ;;  %v1699_v50 = vld [vmem:[#allocation2 + $0x710] sm:$0xff]  ;;  %v1700_v13 = vld [vmem:[#allocation2 + $0x718] sm:$0xff]  ;;  %v1597_v1 = vld [vmem:[#allocation2 + $0x3e0] sm:$0xff] }
 0x1d1   :  { %v1356_v14 = vsel %vm1353_vm13, %v1355_v52, %v1351_v9  ;;  %1871 = vmatpush.msrb.mxu3 %v1708_v43  ;;  %vm1392_vm3 = vcmp.eq.f32.partialorder %v1391_v7, 8.507059e+37  ;;  %v1581_v9 = vld [vmem:[#allocation2 + $0x360] sm:$0xff]  ;;  %v1676_v52 = vld [vmem:[#allocation2 + $0x658] sm:$0xff]  ;;  %v1518_v43 = vld [vmem:[#allocation2 + $0x168] sm:$0xff] }
 0x1d2   :  { %v1365_v49 = vmul.f32 %v5921_v24, %v1364_v58  ;;  %v1402_v17 = vadd.f32 %v5815_v59, %v1203_v40  ;;  %v1598_v58 = vld [vmem:[#allocation2 + $0x3e8] sm:$0xff]  ;;  %v1692_v40 = vld [vmem:[#allocation2 + $0x6d8] sm:$0xff]  ;;  %v1525_v7 = vld [vmem:[#allocation2 + $0x1a0] sm:$0xff] }
 0x1d3   :  { %1872 = vmatpush.msrb.mxu3 %v1700_v13  ;;  %v1611_v13 = vld [vmem:[#allocation2 + $0x450] sm:$0xff] }
 0x1d4   :  { %v1366_v15 = vadd.f32 %v5921_v24, %v1365_v49  ;;  %v1406_v26 = vsub.f32 0.0, %v1402_v17  ;;  %v1684_v49 = vld [vmem:[#allocation2 + $0x698] sm:$0xff] }
 0x1d5   :  { %v6535_v19 = vpop.eup %5922  ;;  %v1242_v4 = vpop.f32.mrf.mxu3  ;;  %1873 = vmatpush.msrb.mxu3 %v1692_v40  ;;  %v1510_v40 = vld [vmem:[#allocation2 + $0x128] sm:$0xff] }
 0x1d6   :  { %v1370_v21 = vsel %vm6537_vm14, %v5921_v24, %v1366_v15  ;;  %v1383_v22 = vmul.f32 %v6535_v19, %v6511_v37  ;;  %v5925_v31 = vpop.eup %5924  ;;  %v1243_v10 = vadd.f32 %v1242_v4, %v1222_v2  ;;  %v1407_v55 = vmul.f32 1.442695, %v1406_v26  ;;  %v1659_v4 = vld [vmem:[#allocation2 + $0x5d0] sm:$0xff]  ;;  %v1660_v2 = vld [vmem:[#allocation2 + $0x5d8] sm:$0xff] }
 0x1d7   :  { %v1375_v34 = vsel %vm1372_vm15, %v1374_v62, %v1370_v21  ;;  %v1398_v6 = vmul.f32 %v5925_v31, %v1356_v14  ;;  %vm1388_vm0 = vweird.f32 %v6535_v19  ;;  %v1394_v37 = vor.u32 1.1754944e-38, %v1393_v3  ;;  %1874 = vmatpush.msrb.mxu3 %v1684_v49  ;;  %v1565_v62 = vld [vmem:[#allocation2 + $0x2e0] sm:$0xff]  ;;  %v1566_v14 = vld [vmem:[#allocation2 + $0x2e8] sm:$0xff]  ;;  %v1651_v26 = vld [vmem:[#allocation2 + $0x590] sm:$0xff] }
 0x1d8   :  { %v1397_v35 = vmul.f32 %v1375_v34, %v6383_v11  ;;  %v1384_v18 = vsub.f32 1.0, %v1383_v22  ;;  %v1403_v45 = vadd.f32 %v5816_v27, %v1243_v10  ;;  %v1723_v11 = vld [vmem:[#allocation2 + $0x7d0] sm:$0xff]  ;;  %vm6560_vm2 = vmor %vm1387_vm1, %vm1388_vm0  ;;  %v1557_v21 = vld [vmem:[#allocation2 + $0x2a0] sm:$0xff] }
 0x1d9   :  { %1829 = vmatpush.msrb.mxu1 %v1723_v11  ;;  %1875 = vmatpush.msrb.mxu3 %v1676_v52  ;;  %v1558_v22 = vld [vmem:[#allocation2 + $0x2a8] sm:$0xff]  ;;  %v1652_v27 = vld [vmem:[#allocation2 + $0x598] sm:$0xff]  ;;  %v1643_v31 = vld [vmem:[#allocation2 + $0x550] sm:$0xff] }
 0x1da   :  { %v6549_v23 = vadd.f32 %v1398_v6, %v1397_v35  ;;  %v1385_v47 = vmul.f32 %v6535_v19, %v1384_v18  ;;  %v1425_v61 = vsub.f32 0.0, %v1403_v45  ;;  %v1644_v34 = vld [vmem:[#allocation2 + $0x558] sm:$0xff]  ;;  %v1541_v35 = vld [vmem:[#allocation2 + $0x220] sm:$0xff]  ;;  %v1542_v6 = vld [vmem:[#allocation2 + $0x228] sm:$0xff] }
 0x1db   :  { %1830 = vmatpush.msrb.mxu1 %v1715_v33  ;;  %1876 = vmatpush.msrb.mxu3 %v1668_v63  ;;  %v1533_v45 = vld [vmem:[#allocation2 + $0x1e0] sm:$0xff]  ;;  %v5818_v3 = vld [vmem:[%s7451_s0 + $0x1b8] sm:$0xff] }
 0x1dc   :  { %5926 = vtanh.f32 %v6549_v23  ;;  %v1386_v28 = vadd.f32 %v6535_v19, %v1385_v47  ;;  %v1426_v20 = vmul.f32 1.442695, %v1425_v61  ;;  %v1534_v47 = vld [vmem:[#allocation2 + $0x1e8] sm:$0xff]  ;;  %v1620_v24 = vld [vmem:[#allocation2 + $0x498] sm:$0xff]  ;;  %v1493_v52 = vld [vmem:[#allocation2 + $0xa0] sm:$0xff] }
 0x1dd   :  { %5928 = vpow2.f32 %v1407_v55  ;;  %1831 = vmatpush.msrb.mxu1 %v1707_v41  ;;  %1877 = vmatpush.msrb.mxu3 %v1660_v2  ;;  %v1302_v55 = vpop.f32.mrf.mxu2  ;;  %v1517_v41 = vld [vmem:[#allocation2 + $0x160] sm:$0xff] }
 0x1de   :  { %v1390_v8 = vsel %vm6560_vm2, %v6535_v19, %v1386_v28  ;;  %5930 = vpow2.f32 %v1426_v20  ;;  %v1667_v19 = vld [vmem:[#allocation2 + $0x610] sm:$0xff]  ;;  %v1526_v20 = vld [vmem:[#allocation2 + $0x1a8] sm:$0xff] }
 0x1df   :  { %v1395_v54 = vsel %vm1392_vm3, %v1394_v37, %v1390_v8  ;;  %1832 = vmatpush.msrb.mxu1 %v1699_v50  ;;  %1878 = vmatpush.msrb.mxu3 %v1652_v27  ;;  %v1262_v8 = vpop.f32.mrf.mxu0 }
 0x1e1   :  { %1833 = vmatpush.msrb.mxu1 %v1691_v46  ;;  %1879 = vmatpush.msrb.mxu3 %v1644_v34  ;;  %v1509_v46 = vld [vmem:[#allocation2 + $0x120] sm:$0xff] }
 0x1e2   :  { %v5927_v36 = vpop.eup %5926  ;;  %v1685_v34 = vld [vmem:[#allocation2 + $0x6a0] sm:$0xff] }
 0x1e3   :  { %v6567_v59 = vmul.f32 %v5927_v36, %v1395_v54  ;;  %v5929_v5 = vpop.eup %5928  ;;  %1834 = vmatpush.msrb.mxu1 %v1683_v44  ;;  %1880 = vmatpush.msrb.mxu3 %v1636_v42  ;;  %v1612_v36 = vld [vmem:[#allocation2 + $0x458] sm:$0xff]  ;;  %v1502_v44 = vld [vmem:[#allocation2 + $0xe8] sm:$0xff] }
 0x1e4   :  { %v5931_v56 = vpop.eup %5930  ;;  %v6575_v17 = vadd.f32 1.0, %v5929_v5 }
 0x1e5   :  { %5819 = vst [vmem:[%s7453_s2 + $0x10] sm:$0xff] %v6567_v59  ;;  %1745 = vmatmul.f32.vlgmr.msra.gmra.mxu0 %v6567_v59  ;;  %1785 = vmatmul.f32.vlgmr.msra.gmra.mxu2 %v6567_v59  ;;  %v6577_v15 = vadd.f32 1.0, %v5931_v56  ;;  %v1604_v56 = vld [vmem:[#allocation2 + $0x418] sm:$0xff] }
 0x1e6   :  { %1889 = vmatpush.msra.mxu0 %v1597_v1  ;;  %1929 = vmatpush.msra.mxu2 %v1598_v58  ;;  %5932 = vrcp.f32 %v6575_v17  ;;  %v5817_v58 = vld [vmem:[%s7451_s0 + $0x1b0] sm:$0xff]  ;;  %vm1415_vm6 = vweird.f32 %v6575_v17 }
 0x1e7   :  { %1835 = vmatpush.msrb.mxu1 %v1675_v48  ;;  %5934 = vrcp.f32 %v6577_v15  ;;  %1881 = vmatpush.msrb.mxu3 %v1628_v57  ;;  %v1440_v2 = vand.u32 2147483648, %v6577_v15  ;;  %vm1434_vm7 = vweird.f32 %v6577_v15  ;;  %v1438_v27 = vand.u32 2147483647, %v6577_v15 }
 0x1e8   :  { %1890 = vmatpush.msra.mxu0 %v1589_v51  ;;  %1930 = vmatpush.msra.mxu2 %v1590_v12  ;;  %v1603_v51 = vld [vmem:[#allocation2 + $0x410] sm:$0xff]  ;;  %v1501_v12 = vld [vmem:[#allocation2 + $0xe0] sm:$0xff] }
 0x1e9   :  { %1836 = vmatpush.msrb.mxu1 %v1667_v19  ;;  %1882 = vmatpush.msrb.mxu3 %v1620_v24  ;;  %v1486_v19 = vld [vmem:[#allocation2 + $0x68] sm:$0xff]  ;;  %vm1439_vm11 = vcmp.eq.f32.partialorder %v1438_v27, 8.507059e+37  ;;  %v1693_v27 = vld [vmem:[#allocation2 + $0x6e0] sm:$0xff] }
 0x1ea   :  { %1891 = vmatpush.msra.mxu0 %v1581_v9  ;;  %1931 = vmatpush.msra.mxu2 %v1582_v60 }
 0x1eb   :  { %1837 = vmatpush.msrb.mxu1 %v1659_v4  ;;  %1883 = vmatpush.msrb.mxu3 %v1612_v36  ;;  %v1478_v4 = vld [vmem:[#allocation2 + $0x28] sm:$0xff] }
 0x1ec   :  { %1892 = vmatpush.msra.mxu0 %v1573_v16  ;;  %1932 = vmatpush.msra.mxu2 %v1574_v25  ;;  %v6583_v10 = vpop.eup %5932  ;;  %v1494_v16 = vld [vmem:[#allocation2 + $0xa8] sm:$0xff]  ;;  %v1485_v25 = vld [vmem:[#allocation2 + $0x60] sm:$0xff] }
 0x1ed   :  { %1825 = vmatmul.f32.vlgmr.msrb.gmra.mxu0 %v6567_v59  ;;  %1865 = vmatmul.f32.vlgmr.msrb.gmra.mxu2 %v6567_v59  ;;  %v6585_v18 = vpop.eup %5934  ;;  %v1411_v61 = vmul.f32 %v6583_v10, %v6575_v17  ;;  %vm1416_vm4 = vweird.f32 %v6583_v10 }
 0x1ee   :  { %1893 = vmatpush.msra.mxu0 %v1565_v62  ;;  %1933 = vmatpush.msra.mxu2 %v1566_v14  ;;  %v1430_v11 = vmul.f32 %v6585_v18, %v6577_v15  ;;  %vm1435_vm5 = vweird.f32 %v6585_v18  ;;  %v1477_v14 = vld [vmem:[#allocation2 + $0x20] sm:$0xff]  ;;  %vm6609_vm8 = vmor %vm1415_vm6, %vm1416_vm4 }
 0x1ef   :  { %1838 = vmatpush.msrb.mxu1 %v1651_v26  ;;  %v1282_v0 = vpop.f32.mrf.mxu1  ;;  %v1412_v54 = vsub.f32 1.0, %v1411_v61  ;;  %1884 = vmatpush.msrb.mxu3 %v1604_v56  ;;  %v1419_v26 = vand.u32 2147483647, %v6575_v17  ;;  %vm6617_vm9 = vmor %vm1434_vm7, %vm1435_vm5  ;;  %v1575_v61 = vld [vmem:[#allocation2 + $0x330] sm:$0xff] }
 0x1f0   :  { %1894 = vmatpush.msra.mxu0 %v1557_v21  ;;  %1934 = vmatpush.msra.mxu2 %v1558_v22  ;;  %v1283_v37 = vadd.f32 %v1282_v0, %v1262_v8  ;;  %v1431_v1 = vsub.f32 1.0, %v1430_v11  ;;  %v1421_v21 = vand.u32 2147483648, %v6575_v17  ;;  %v1576_v11 = vld [vmem:[#allocation2 + $0x338] sm:$0xff]  ;;  %v1551_v8 = vld [vmem:[#allocation2 + $0x270] sm:$0xff] }
 0x1f1   :  { %1839 = vmatpush.msrb.mxu1 %v1643_v31  ;;  %v1413_v48 = vmul.f32 %v6583_v10, %v1412_v54  ;;  %vm1420_vm10 = vcmp.eq.f32.partialorder %v1419_v26, 8.507059e+37  ;;  %v1535_v54 = vld [vmem:[#allocation2 + $0x1f0] sm:$0xff]  ;;  %v1496_v26 = vld [vmem:[#allocation2 + $0xb8] sm:$0xff] }
 0x1f2   :  { %1895 = vmatpush.msra.mxu0 %v1549_v29  ;;  %1935 = vmatpush.msra.mxu2 %v1550_v30  ;;  %v1404_v49 = vadd.f32 %v5817_v58, %v1283_v37  ;;  %v1432_v60 = vmul.f32 %v6585_v18, %v1431_v1  ;;  %v1599_v29 = vld [vmem:[#allocation2 + $0x3f0] sm:$0xff]  ;;  %v1600_v30 = vld [vmem:[#allocation2 + $0x3f8] sm:$0xff] }
 0x1f3   :  { %1840 = vmatpush.msrb.mxu1 %v1635_v38  ;;  %v1414_v63 = vadd.f32 %v6583_v10, %v1413_v48  ;;  %v1592_v38 = vld [vmem:[#allocation2 + $0x3b8] sm:$0xff]  ;;  %v1543_v37 = vld [vmem:[#allocation2 + $0x230] sm:$0xff] }
 0x1f4   :  { %1896 = vmatpush.msra.mxu0 %v1541_v35  ;;  %1936 = vmatpush.msra.mxu2 %v1542_v6  ;;  %v1433_v62 = vadd.f32 %v6585_v18, %v1432_v60  ;;  %v1591_v6 = vld [vmem:[#allocation2 + $0x3b0] sm:$0xff]  ;;  %v1536_v1 = vld [vmem:[#allocation2 + $0x1f8] sm:$0xff] }
 0x1f5   :  { %v1322_v28 = vpop.f32.mrf.mxu3  ;;  %1841 = vmatpush.msrb.mxu1 %v1627_v39  ;;  %v1418_v35 = vsel %vm6609_vm8, %v6583_v10, %v1414_v63  ;;  %v1583_v10 = vld [vmem:[#allocation2 + $0x370] sm:$0xff]  ;;  %v1520_v48 = vld [vmem:[#allocation2 + $0x178] sm:$0xff]  ;;  %v1709_v63 = vld [vmem:[#allocation2 + $0x760] sm:$0xff] }
 0x1f6   :  { %v1323_v33 = vadd.f32 %v1322_v28, %v1302_v55  ;;  %1897 = vmatpush.msra.mxu0 %v1533_v45  ;;  %1937 = vmatpush.msra.mxu2 %v1534_v47  ;;  %v1437_v17 = vsel %vm6617_vm9, %v6585_v18, %v1433_v62  ;;  %v1441_v45 = vor.u32 1.1754944e-38, %v1440_v2  ;;  %v1422_v47 = vor.u32 1.1754944e-38, %v1421_v21  ;;  %v1584_v55 = vld [vmem:[#allocation2 + $0x378] sm:$0xff]  ;;  %v1567_v28 = vld [vmem:[#allocation2 + $0x2f0] sm:$0xff]  ;;  %v1710_v62 = vld [vmem:[#allocation2 + $0x768] sm:$0xff] }
 0x1f7   :  { %1842 = vmatpush.msrb.mxu1 %v1619_v32  ;;  %v1560_v32 = vld [vmem:[#allocation2 + $0x2b8] sm:$0xff]  ;;  %v1519_v60 = vld [vmem:[#allocation2 + $0x170] sm:$0xff]  ;;  %v1701_v2 = vld [vmem:[#allocation2 + $0x720] sm:$0xff] }
 0x1f8   :  { %v1405_v50 = vadd.f32 %v5818_v3, %v1323_v33  ;;  %1898 = vmatpush.msra.mxu0 %v1525_v7  ;;  %1938 = vmatpush.msra.mxu2 %v1526_v20  ;;  %v1423_v39 = vsel %vm1420_vm10, %v1422_v47, %v1418_v35  ;;  %v1442_v57 = vsel %vm1439_vm11, %v1441_v45, %v1437_v17  ;;  %v1568_v3 = vld [vmem:[#allocation2 + $0x2f8] sm:$0xff]  ;;  %v1559_v33 = vld [vmem:[#allocation2 + $0x2b0] sm:$0xff]  ;;  %v1702_v21 = vld [vmem:[#allocation2 + $0x728] sm:$0xff] }
 0x1f9   :  { %1843 = vmatpush.msrb.mxu1 %v1611_v13  ;;  %v1464_v0 = vmul.f32 %v1442_v57, %v6469_v53  ;;  %v1495_v22 = vld [vmem:[#allocation2 + $0xb0] sm:$0xff]  ;;  %v1686_v35 = vld [vmem:[#allocation2 + $0x6a8] sm:$0xff]  ;;  %v1661_v47 = vld [vmem:[#allocation2 + $0x5e0] sm:$0xff] }
 0x1fa   :  { %v1445_v5 = vsub.f32 0.0, %v1405_v50  ;;  %1899 = vmatpush.msra.mxu0 %v1517_v41  ;;  %1939 = vmatpush.msra.mxu2 %v1518_v43  ;;  %v1552_v41 = vld [vmem:[#allocation2 + $0x278] sm:$0xff]  ;;  %v1479_v17 = vld [vmem:[#allocation2 + $0x30] sm:$0xff]  ;;  %v1670_v45 = vld [vmem:[#allocation2 + $0x628] sm:$0xff] }
 0x1fb   :  { %1844 = vmatpush.msrb.mxu1 %v1603_v51  ;;  %v1544_v50 = vld [vmem:[#allocation2 + $0x238] sm:$0xff]  ;;  %v1645_v57 = vld [vmem:[#allocation2 + $0x560] sm:$0xff] }
 0x1fc   :  { %v1446_v9 = vmul.f32 1.442695, %v1445_v5  ;;  %1900 = vmatpush.msra.mxu0 %v1509_v46  ;;  %1940 = vmatpush.msra.mxu2 %v1510_v40  ;;  %v1527_v40 = vld [vmem:[#allocation2 + $0x1b0] sm:$0xff]  ;;  %v1528_v5 = vld [vmem:[#allocation2 + $0x1b8] sm:$0xff] }
 0x1fe   :  { %5936 = vpow2.f32 %v1446_v9  ;;  %1901 = vmatpush.msra.mxu0 %v1501_v12  ;;  %1941 = vmatpush.msra.mxu2 %v1502_v44  ;;  %v1726_v9 = vld [vmem:[#allocation2 + $0x7e8] sm:$0xff] }
 0x1ff   :  { %5938 = vtanh.f32 %v1404_v49  ;;  %v1725_v49 = vld [vmem:[#allocation2 + $0x7e0] sm:$0xff] }
 0x200   :  { %1902 = vmatpush.msra.mxu0 %v1493_v52  ;;  %1942 = vmatpush.msra.mxu2 %v1494_v16  ;;  %v1717_v52 = vld [vmem:[#allocation2 + $0x7a0] sm:$0xff]  ;;  %v1718_v16 = vld [vmem:[#allocation2 + $0x7a8] sm:$0xff] }
 0x202   :  { %1903 = vmatpush.msra.mxu0 %v1485_v25  ;;  %1943 = vmatpush.msra.mxu2 %v1486_v19  ;;  %v1511_v25 = vld [vmem:[#allocation2 + $0x130] sm:$0xff]  ;;  %v1512_v19 = vld [vmem:[#allocation2 + $0x138] sm:$0xff] }
 0x204   :  { %v5937_v31 = vpop.eup %5936  ;;  %1904 = vmatpush.msra.mxu0 %v1477_v14  ;;  %1944 = vmatpush.msra.mxu2 %v1478_v4  ;;  %v1503_v14 = vld [vmem:[#allocation2 + $0xf0] sm:$0xff]  ;;  %v1504_v4 = vld [vmem:[#allocation2 + $0xf8] sm:$0xff] }
 0x205   :  { %v1448_v15 = vadd.f32 1.0, %v5937_v31  ;;  %1905 = vmatmul.f32.vlgmr.msra.gmra.mxu0 %v6567_v59  ;;  %1945 = vmatmul.f32.vlgmr.msra.gmra.mxu2 %v6567_v59  ;;  %v5939_v42 = vpop.eup %5938  ;;  %v1488_v31 = vld [vmem:[#allocation2 + $0x78] sm:$0xff] }
 0x206   :  { %1969 = vmatpush.msrb.mxu0 %v1599_v29  ;;  %2009 = vmatpush.msrb.mxu2 %v1600_v30  ;;  %v1465_v18 = vmul.f32 %v5939_v42, %v1423_v39  ;;  %v1694_v29 = vld [vmem:[#allocation2 + $0x6e8] sm:$0xff]  ;;  %v1487_v30 = vld [vmem:[#allocation2 + $0x70] sm:$0xff]  ;;  %v1669_v42 = vld [vmem:[#allocation2 + $0x620] sm:$0xff] }
 0x207   :  { %5940 = vrcp.f32 %v1448_v15  ;;  %v1460_v53 = vand.u32 2147483648, %v1448_v15  ;;  %v1458_v36 = vand.u32 2147483647, %v1448_v15  ;;  %vm1454_vm13 = vweird.f32 %v1448_v15  ;;  %v1654_v39 = vld [vmem:[#allocation2 + $0x5a8] sm:$0xff] }
 0x208   :  { %1970 = vmatpush.msrb.mxu0 %v1591_v6  ;;  %2010 = vmatpush.msrb.mxu2 %v1592_v38  ;;  %v6630_v20 = vadd.f32 %v1465_v18, %v1464_v0  ;;  %v1677_v6 = vld [vmem:[#allocation2 + $0x660] sm:$0xff]  ;;  %v1678_v38 = vld [vmem:[#allocation2 + $0x668] sm:$0xff] }
 0x209   :  { %v1461_v46 = vor.u32 1.1754944e-38, %v1460_v53  ;;  %vm1459_vm15 = vcmp.eq.f32.partialorder %v1458_v36, 8.507059e+37  ;;  %v1646_v18 = vld [vmem:[#allocation2 + $0x568] sm:$0xff]  ;;  %v1720_v53 = vld [vmem:[#allocation2 + $0x7b8] sm:$0xff] }
 0x20a   :  { %1971 = vmatpush.msrb.mxu0 %v1583_v10  ;;  %2011 = vmatpush.msrb.mxu2 %v1584_v55  ;;  %5942 = vtanh.f32 %v6630_v20  ;;  %v1662_v10 = vld [vmem:[#allocation2 + $0x5e8] sm:$0xff]  ;;  %v1653_v55 = vld [vmem:[#allocation2 + $0x5a0] sm:$0xff]  ;;  %v1704_v36 = vld [vmem:[#allocation2 + $0x738] sm:$0xff] }
 0x20b   :  { %v1630_v0 = vld [vmem:[#allocation2 + $0x4e8] sm:$0xff] }
 0x20c   :  { %1972 = vmatpush.msrb.mxu0 %v1575_v61  ;;  %2012 = vmatpush.msrb.mxu2 %v1576_v11  ;;  %v1637_v61 = vld [vmem:[#allocation2 + $0x520] sm:$0xff]  ;;  %v1638_v11 = vld [vmem:[#allocation2 + $0x528] sm:$0xff] }
 0x20d   :  { %v5941_v7 = vpop.eup %5940 }
 0x20e   :  { %v1450_v24 = vmul.f32 %v5941_v7, %v1448_v15  ;;  %1973 = vmatpush.msrb.mxu0 %v1567_v28  ;;  %2013 = vmatpush.msrb.mxu2 %v1568_v3  ;;  %vm1455_vm12 = vweird.f32 %v5941_v7  ;;  %v1480_v15 = vld [vmem:[#allocation2 + $0x38] sm:$0xff]  ;;  %v1621_v28 = vld [vmem:[#allocation2 + $0x4a0] sm:$0xff]  ;;  %v1622_v3 = vld [vmem:[#allocation2 + $0x4a8] sm:$0xff] }
 0x20f   :  { %vm1456_vm14 = vmor %vm1454_vm13, %vm1455_vm12 }
 0x210   :  { %v1451_v43 = vsub.f32 1.0, %v1450_v24  ;;  %1974 = vmatpush.msrb.mxu0 %v1559_v33  ;;  %2014 = vmatpush.msrb.mxu2 %v1560_v32  ;;  %v5943_v56 = vpop.eup %5942  ;;  %v1614_v33 = vld [vmem:[#allocation2 + $0x468] sm:$0xff]  ;;  %v1605_v32 = vld [vmem:[#allocation2 + $0x420] sm:$0xff] }
 0x211   :  { %v1606_v24 = vld [vmem:[#allocation2 + $0x428] sm:$0xff] }
 0x212   :  { %v1452_v13 = vmul.f32 %v5941_v7, %v1451_v43  ;;  %1975 = vmatpush.msrb.mxu0 %v1551_v8  ;;  %2015 = vmatpush.msrb.mxu2 %v1552_v41  ;;  %v1727_v8 = vld [vmem:[#allocation2 + $0x7f0] sm:$0xff]  ;;  %v1728_v41 = vld [vmem:[#allocation2 + $0x7f8] sm:$0xff] }
 0x213   :  { %v1719_v43 = vld [vmem:[#allocation2 + $0x7b0] sm:$0xff] }
 0x214   :  { %v1453_v58 = vadd.f32 %v5941_v7, %v1452_v13  ;;  %1976 = vmatpush.msrb.mxu0 %v1543_v37  ;;  %2016 = vmatpush.msrb.mxu2 %v1544_v50  ;;  %v1711_v37 = vld [vmem:[#allocation2 + $0x770] sm:$0xff]  ;;  %v1712_v50 = vld [vmem:[#allocation2 + $0x778] sm:$0xff] }
 0x215   :  { %v1703_v13 = vld [vmem:[#allocation2 + $0x730] sm:$0xff] }
 0x216   :  { %v1457_v51 = vsel %vm1456_vm14, %v5941_v7, %v1453_v58  ;;  %1977 = vmatpush.msrb.mxu0 %v1535_v54  ;;  %2017 = vmatpush.msrb.mxu2 %v1536_v1  ;;  %v1613_v7 = vld [vmem:[#allocation2 + $0x460] sm:$0xff]  ;;  %v1695_v54 = vld [vmem:[#allocation2 + $0x6f0] sm:$0xff]  ;;  %v1696_v1 = vld [vmem:[#allocation2 + $0x6f8] sm:$0xff] }
 0x217   :  { %v1462_v12 = vsel %vm1459_vm15, %v1461_v46, %v1457_v51  ;;  %v1687_v58 = vld [vmem:[#allocation2 + $0x6b0] sm:$0xff]  ;;  %v1688_v46 = vld [vmem:[#allocation2 + $0x6b8] sm:$0xff] }
 0x218   :  { %v6633_v44 = vmul.f32 %v5943_v56, %v1462_v12  ;;  %1978 = vmatpush.msrb.mxu0 %v1527_v40  ;;  %2018 = vmatpush.msrb.mxu2 %v1528_v5  ;;  %v1679_v40 = vld [vmem:[#allocation2 + $0x670] sm:$0xff]  ;;  %v1680_v5 = vld [vmem:[#allocation2 + $0x678] sm:$0xff] }
 0x219   :  { %v1671_v51 = vld [vmem:[#allocation2 + $0x630] sm:$0xff]  ;;  %v1672_v56 = vld [vmem:[#allocation2 + $0x638] sm:$0xff] }
 0x21a   :  { %5820 = vst [vmem:[%s7453_s2 + $0x68] sm:$0xff] %v6633_v44  ;;  %1765 = vmatmul.f32.vlgmr.msra.gmra.mxu1 %v6633_v44  ;;  %1805 = vmatmul.f32.vlgmr.msra.gmra.mxu3 %v6633_v44  ;;  %v1663_v12 = vld [vmem:[#allocation2 + $0x5f0] sm:$0xff] }
 0x21b   :  { %1909 = vmatpush.msra.mxu1 %v1725_v49  ;;  %1949 = vmatpush.msra.mxu3 %v1726_v9  ;;  %v1664_v49 = vld [vmem:[#allocation2 + $0x5f8] sm:$0xff]  ;;  %v1655_v9 = vld [vmem:[#allocation2 + $0x5b0] sm:$0xff] }
 0x21c   :  { %1979 = vmatpush.msrb.mxu0 %v1519_v60  ;;  %2019 = vmatpush.msrb.mxu2 %v1520_v48  ;;  %v1656_v60 = vld [vmem:[#allocation2 + $0x5b8] sm:$0xff]  ;;  %v1647_v48 = vld [vmem:[#allocation2 + $0x570] sm:$0xff] }
 0x21d   :  { %1910 = vmatpush.msra.mxu1 %v1717_v52  ;;  %1950 = vmatpush.msra.mxu3 %v1718_v16  ;;  %v1648_v52 = vld [vmem:[#allocation2 + $0x578] sm:$0xff]  ;;  %v1639_v16 = vld [vmem:[#allocation2 + $0x530] sm:$0xff] }
 0x21e   :  { %1980 = vmatpush.msrb.mxu0 %v1511_v25  ;;  %2020 = vmatpush.msrb.mxu2 %v1512_v19  ;;  %v1640_v25 = vld [vmem:[#allocation2 + $0x538] sm:$0xff]  ;;  %v1631_v19 = vld [vmem:[#allocation2 + $0x4f0] sm:$0xff] }
 0x21f   :  { %1911 = vmatpush.msra.mxu1 %v1709_v63  ;;  %1951 = vmatpush.msra.mxu3 %v1710_v62  ;;  %v1632_v63 = vld [vmem:[#allocation2 + $0x4f8] sm:$0xff]  ;;  %v1623_v62 = vld [vmem:[#allocation2 + $0x4b0] sm:$0xff] }
 0x220   :  { %1981 = vmatpush.msrb.mxu0 %v1503_v14  ;;  %2021 = vmatpush.msrb.mxu2 %v1504_v4  ;;  %v1624_v14 = vld [vmem:[#allocation2 + $0x4b8] sm:$0xff]  ;;  %v1615_v4 = vld [vmem:[#allocation2 + $0x470] sm:$0xff] }
 0x221   :  { %1912 = vmatpush.msra.mxu1 %v1701_v2  ;;  %1952 = vmatpush.msra.mxu3 %v1702_v21  ;;  %v1616_v2 = vld [vmem:[#allocation2 + $0x478] sm:$0xff]  ;;  %v1607_v21 = vld [vmem:[#allocation2 + $0x430] sm:$0xff] }
 0x222   :  { %1982 = vmatpush.msrb.mxu0 %v1495_v22  ;;  %2022 = vmatpush.msrb.mxu2 %v1496_v26  ;;  %v1608_v22 = vld [vmem:[#allocation2 + $0x438] sm:$0xff]  ;;  %v2317_v26 = vld [vmem:[#allocation2 + $0x3c0] sm:$0xff] }
 0x223   :  { %1845 = vmatmul.f32.vlgmr.msrb.gmra.mxu1 %v6633_v44  ;;  %1885 = vmatmul.f32.vlgmr.msrb.gmra.mxu3 %v6633_v44 }
 0x224   :  { %1913 = vmatpush.msra.mxu1 %v1693_v27  ;;  %1953 = vmatpush.msra.mxu3 %v1694_v29  ;;  %v2318_v27 = vld [vmem:[#allocation2 + $0x3c8] sm:$0xff]  ;;  %v2309_v29 = vld [vmem:[#allocation2 + $0x380] sm:$0xff] }
 0x225   :  { %1983 = vmatpush.msrb.mxu0 %v1487_v30  ;;  %2023 = vmatpush.msrb.mxu2 %v1488_v31  ;;  %v2310_v30 = vld [vmem:[#allocation2 + $0x388] sm:$0xff]  ;;  %v2301_v31 = vld [vmem:[#allocation2 + $0x340] sm:$0xff] }
 0x226   :  { %1914 = vmatpush.msra.mxu1 %v1685_v34  ;;  %1954 = vmatpush.msra.mxu3 %v1686_v35  ;;  %v2302_v34 = vld [vmem:[#allocation2 + $0x348] sm:$0xff]  ;;  %v2293_v35 = vld [vmem:[#allocation2 + $0x300] sm:$0xff] }
 0x227   :  { %1984 = vmatpush.msrb.mxu0 %v1479_v17  ;;  %2024 = vmatpush.msrb.mxu2 %v1480_v15  ;;  %v2294_v17 = vld [vmem:[#allocation2 + $0x308] sm:$0xff]  ;;  %v2285_v15 = vld [vmem:[#allocation2 + $0x2c0] sm:$0xff] }
 0x228   :  { %1985 = vmatmul.f32.vlgmr.msrb.gmra.mxu0 %v6567_v59  ;;  %2025 = vmatmul.f32.vlgmr.msrb.gmra.mxu2 %v6567_v59  ;;  %v1629_v59 = vld [vmem:[#allocation2 + $0x4e0] sm:$0xff] }
 0x229   :  { %1915 = vmatpush.msra.mxu1 %v1677_v6  ;;  %1955 = vmatpush.msra.mxu3 %v1678_v38  ;;  %v2286_v6 = vld [vmem:[#allocation2 + $0x2c8] sm:$0xff] }
 0x22a   :  { %2453 = vmatpush.msra.mxu0 %v2317_v26  ;;  %2493 = vmatpush.msra.mxu2 %v2318_v27  ;;  %v2278_v38 = vld [vmem:[#allocation2 + $0x288] sm:$0xff]  ;;  %v2247_v27 = vld [vmem:[#allocation2 + $0x190] sm:$0xff] }
 0x22b   :  { %1916 = vmatpush.msra.mxu1 %v1669_v42  ;;  %1956 = vmatpush.msra.mxu3 %v1670_v45  ;;  %v2269_v42 = vld [vmem:[#allocation2 + $0x240] sm:$0xff]  ;;  %v2270_v45 = vld [vmem:[#allocation2 + $0x248] sm:$0xff] }
 0x22c   :  { %2454 = vmatpush.msra.mxu0 %v2309_v29  ;;  %2494 = vmatpush.msra.mxu2 %v2310_v30  ;;  %v2248_v29 = vld [vmem:[#allocation2 + $0x198] sm:$0xff] }
 0x22d   :  { %1917 = vmatpush.msra.mxu1 %v1661_v47  ;;  %1957 = vmatpush.msra.mxu3 %v1662_v10  ;;  %v2261_v47 = vld [vmem:[#allocation2 + $0x200] sm:$0xff]  ;;  %v2262_v10 = vld [vmem:[#allocation2 + $0x208] sm:$0xff] }
 0x22e   :  { %2455 = vmatpush.msra.mxu0 %v2301_v31  ;;  %2495 = vmatpush.msra.mxu2 %v2302_v34  ;;  %v2445_v31 = vld [vmem:[#allocation2 + $0x7c0] sm:$0xff]  ;;  %v2446_v34 = vld [vmem:[#allocation2 + $0x7c8] sm:$0xff] }
 0x22f   :  { %1918 = vmatpush.msra.mxu1 %v1653_v55  ;;  %1958 = vmatpush.msra.mxu3 %v1654_v39  ;;  %v2253_v55 = vld [vmem:[#allocation2 + $0x1c0] sm:$0xff]  ;;  %v2254_v39 = vld [vmem:[#allocation2 + $0x1c8] sm:$0xff] }
 0x230   :  { %2456 = vmatpush.msra.mxu0 %v2293_v35  ;;  %2496 = vmatpush.msra.mxu2 %v2294_v17  ;;  %v2239_v35 = vld [vmem:[#allocation2 + $0x150] sm:$0xff] }
 0x231   :  { %1919 = vmatpush.msra.mxu1 %v1645_v57  ;;  %1959 = vmatpush.msra.mxu3 %v1646_v18  ;;  %v2245_v57 = vld [vmem:[#allocation2 + $0x180] sm:$0xff]  ;;  %v2246_v18 = vld [vmem:[#allocation2 + $0x188] sm:$0xff] }
 0x232   :  { %2457 = vmatpush.msra.mxu0 %v2285_v15  ;;  %2497 = vmatpush.msra.mxu2 %v2286_v6 }
 0x233   :  { %1920 = vmatpush.msra.mxu1 %v1637_v61  ;;  %1960 = vmatpush.msra.mxu3 %v1638_v11  ;;  %v2237_v61 = vld [vmem:[#allocation2 + $0x140] sm:$0xff]  ;;  %v2238_v11 = vld [vmem:[#allocation2 + $0x148] sm:$0xff] }
 0x234   :  { %2498 = vmatpush.msra.mxu2 %v2278_v38  ;;  %v2240_v38 = vld [vmem:[#allocation2 + $0x158] sm:$0xff] }
 0x235   :  { %1921 = vmatpush.msra.mxu1 %v1629_v59  ;;  %1961 = vmatpush.msra.mxu3 %v1630_v0  ;;  %v2229_v59 = vld [vmem:[#allocation2 + $0x100] sm:$0xff]  ;;  %v2230_v0 = vld [vmem:[#allocation2 + $0x108] sm:$0xff] }
 0x236   :  { %2499 = vmatpush.msra.mxu2 %v2270_v45 }
 0x237   :  { %1922 = vmatpush.msra.mxu1 %v1621_v28  ;;  %1962 = vmatpush.msra.mxu3 %v1622_v3  ;;  %v2221_v28 = vld [vmem:[#allocation2 + $0xc0] sm:$0xff]  ;;  %v2222_v3 = vld [vmem:[#allocation2 + $0xc8] sm:$0xff] }
 0x238   :  { %2500 = vmatpush.msra.mxu2 %v2262_v10  ;;  %v2438_v10 = vld [vmem:[#allocation2 + $0x788] sm:$0xff] }
 0x239   :  { %1923 = vmatpush.msra.mxu1 %v1613_v7  ;;  %1963 = vmatpush.msra.mxu3 %v1614_v33  ;;  %v2213_v7 = vld [vmem:[#allocation2 + $0x80] sm:$0xff]  ;;  %v2214_v33 = vld [vmem:[#allocation2 + $0x88] sm:$0xff] }
 0x23a   :  { %2501 = vmatpush.msra.mxu2 %v2254_v39  ;;  %v2232_v39 = vld [vmem:[#allocation2 + $0x118] sm:$0xff] }
 0x23b   :  { %1924 = vmatpush.msra.mxu1 %v1605_v32  ;;  %1964 = vmatpush.msra.mxu3 %v1606_v24  ;;  %v2205_v32 = vld [vmem:[#allocation2 + $0x40] sm:$0xff]  ;;  %v2206_v24 = vld [vmem:[#allocation2 + $0x48] sm:$0xff] }
 0x23c   :  { %1925 = vmatmul.f32.vlgmr.msra.gmra.mxu1 %v6633_v44  ;;  %1965 = vmatmul.f32.vlgmr.msra.gmra.mxu3 %v6633_v44 }
 0x23d   :  { %1989 = vmatpush.msrb.mxu1 %v1727_v8  ;;  %2029 = vmatpush.msrb.mxu3 %v1728_v41  ;;  %v2197_v8 = vld [vmem:[#allocation2] sm:$0xff]  ;;  %v2198_v41 = vld [vmem:[#allocation2 + $0x8] sm:$0xff] }
 0x23e   :  { %2502 = vmatpush.msra.mxu2 %v2246_v18  ;;  %v2430_v18 = vld [vmem:[#allocation2 + $0x748] sm:$0xff] }
 0x23f   :  { %1990 = vmatpush.msrb.mxu1 %v1719_v43  ;;  %2030 = vmatpush.msrb.mxu3 %v1720_v53  ;;  %v2319_v43 = vld [vmem:[#allocation2 + $0x3d0] sm:$0xff]  ;;  %v2320_v53 = vld [vmem:[#allocation2 + $0x3d8] sm:$0xff] }
 0x240   :  { %2503 = vmatpush.msra.mxu2 %v2238_v11 }
 0x241   :  { %1991 = vmatpush.msrb.mxu1 %v1711_v37  ;;  %2031 = vmatpush.msrb.mxu3 %v1712_v50  ;;  %v2311_v37 = vld [vmem:[#allocation2 + $0x390] sm:$0xff]  ;;  %v2312_v50 = vld [vmem:[#allocation2 + $0x398] sm:$0xff] }
 0x242   :  { %2504 = vmatpush.msra.mxu2 %v2230_v0  ;;  %v2421_v0 = vld [vmem:[#allocation2 + $0x700] sm:$0xff] }
 0x243   :  { %1992 = vmatpush.msrb.mxu1 %v1703_v13  ;;  %2032 = vmatpush.msrb.mxu3 %v1704_v36  ;;  %v2303_v13 = vld [vmem:[#allocation2 + $0x350] sm:$0xff]  ;;  %v2304_v36 = vld [vmem:[#allocation2 + $0x358] sm:$0xff] }
 0x244   :  { %2505 = vmatpush.msra.mxu2 %v2222_v3  ;;  %v2215_v3 = vld [vmem:[#allocation2 + $0x90] sm:$0xff] }
 0x245   :  { %1993 = vmatpush.msrb.mxu1 %v1695_v54  ;;  %2033 = vmatpush.msrb.mxu3 %v1696_v1 }
 0x246   :  { %2506 = vmatpush.msra.mxu2 %v2214_v33 }
 0x247   :  { %1994 = vmatpush.msrb.mxu1 %v1687_v58  ;;  %2034 = vmatpush.msrb.mxu3 %v1688_v46  ;;  %v5821_v58 = vld [vmem:[%s7451_s0 + $0x80] sm:$0xff]  ;;  %v2295_v46 = vld [vmem:[#allocation2 + $0x310] sm:$0xff] }
 0x248   :  { %2507 = vmatpush.msra.mxu2 %v2206_v24 }
 0x249   :  { %1995 = vmatpush.msrb.mxu1 %v1679_v40  ;;  %2035 = vmatpush.msrb.mxu3 %v1680_v5  ;;  %v2296_v40 = vld [vmem:[#allocation2 + $0x318] sm:$0xff] }
 0x24a   :  { %2508 = vmatpush.msra.mxu2 %v2198_v41  ;;  %v2413_v41 = vld [vmem:[#allocation2 + $0x6c0] sm:$0xff] }
 0x24b   :  { %1996 = vmatpush.msrb.mxu1 %v1671_v51  ;;  %2036 = vmatpush.msrb.mxu3 %v1672_v56  ;;  %v2287_v51 = vld [vmem:[#allocation2 + $0x2d0] sm:$0xff]  ;;  %v2288_v56 = vld [vmem:[#allocation2 + $0x2d8] sm:$0xff] }
 0x24c   :  { %2573 = vmatpush.msrb.mxu2 %v2320_v53  ;;  %v2207_v53 = vld [vmem:[#allocation2 + $0x50] sm:$0xff] }
 0x24d   :  { %1997 = vmatpush.msrb.mxu1 %v1663_v12  ;;  %2037 = vmatpush.msrb.mxu3 %v1664_v49  ;;  %v2279_v49 = vld [vmem:[#allocation2 + $0x290] sm:$0xff] }
 0x24e   :  { %2574 = vmatpush.msrb.mxu2 %v2312_v50  ;;  %v2208_v50 = vld [vmem:[#allocation2 + $0x58] sm:$0xff] }
 0x24f   :  { %1998 = vmatpush.msrb.mxu1 %v1655_v9  ;;  %2038 = vmatpush.msrb.mxu3 %v1656_v60  ;;  %v2280_v9 = vld [vmem:[#allocation2 + $0x298] sm:$0xff] }
 0x250   :  { %2575 = vmatpush.msrb.mxu2 %v2304_v36 }
 0x251   :  { %1999 = vmatpush.msrb.mxu1 %v1647_v48  ;;  %2039 = vmatpush.msrb.mxu3 %v1648_v52 }
 0x252   :  { %2576 = vmatpush.msrb.mxu2 %v2296_v40 }
 0x253   :  { %2000 = vmatpush.msrb.mxu1 %v1639_v16  ;;  %2040 = vmatpush.msrb.mxu3 %v1640_v25  ;;  %v5822_v16 = vld [vmem:[%s7451_s0 + $0x88] sm:$0xff]  ;;  %v2271_v25 = vld [vmem:[#allocation2 + $0x250] sm:$0xff] }
 0x254   :  { %2577 = vmatpush.msrb.mxu2 %v2288_v56  ;;  %v2397_v56 = vld [vmem:[#allocation2 + $0x640] sm:$0xff] }
 0x255   :  { %2001 = vmatpush.msrb.mxu1 %v1631_v19  ;;  %2041 = vmatpush.msrb.mxu3 %v1632_v63  ;;  %v2272_v19 = vld [vmem:[#allocation2 + $0x258] sm:$0xff] }
 0x256   :  { %2578 = vmatpush.msrb.mxu2 %v2280_v9  ;;  %v2389_v9 = vld [vmem:[#allocation2 + $0x600] sm:$0xff] }
 0x257   :  { %2002 = vmatpush.msrb.mxu1 %v1623_v62  ;;  %2042 = vmatpush.msrb.mxu3 %v1624_v14  ;;  %v2263_v14 = vld [vmem:[#allocation2 + $0x210] sm:$0xff] }
 0x258   :  { %2579 = vmatpush.msrb.mxu2 %v2272_v19  ;;  %v2382_v19 = vld [vmem:[#allocation2 + $0x5c8] sm:$0xff] }
 0x259   :  { %2003 = vmatpush.msrb.mxu1 %v1615_v4  ;;  %2043 = vmatpush.msrb.mxu3 %v1616_v2  ;;  %v2264_v4 = vld [vmem:[#allocation2 + $0x218] sm:$0xff] }
 0x25a   :  { %2580 = vmatpush.msrb.mxu2 %v2264_v4 }
 0x25b   :  { %2004 = vmatpush.msrb.mxu1 %v1607_v21  ;;  %2044 = vmatpush.msrb.mxu3 %v1608_v22  ;;  %v2255_v21 = vld [vmem:[#allocation2 + $0x1d0] sm:$0xff]  ;;  %v2256_v22 = vld [vmem:[#allocation2 + $0x1d8] sm:$0xff] }
 0x25c   :  { %2005 = vmatmul.f32.vlgmr.msrb.gmra.mxu1 %v6633_v44  ;;  %2045 = vmatmul.f32.vlgmr.msrb.gmra.mxu3 %v6633_v44  ;;  %v2277_v44 = vld [vmem:[#allocation2 + $0x280] sm:$0xff] }
 0x25d   :  { %2458 = vmatpush.msra.mxu0 %v2277_v44  ;;  %2581 = vmatpush.msrb.mxu2 %v2256_v22  ;;  %v5824_v44 = vld [vmem:[%s7451_s0 + $0x98] sm:$0xff]  ;;  %v2374_v22 = vld [vmem:[#allocation2 + $0x588] sm:$0xff] }
 0x25e   :  { %2473 = vmatpush.msra.mxu1 %v2445_v31  ;;  %2513 = vmatpush.msra.mxu3 %v2446_v34  ;;  %v2415_v31 = vld [vmem:[#allocation2 + $0x6d0] sm:$0xff] }
 0x25f   :  { %2459 = vmatpush.msra.mxu0 %v2269_v42  ;;  %2582 = vmatpush.msrb.mxu2 %v2248_v29 }
 0x260   :  { %2514 = vmatpush.msra.mxu3 %v2438_v10 }
 0x261   :  { %2460 = vmatpush.msra.mxu0 %v2261_v47  ;;  %2583 = vmatpush.msrb.mxu2 %v2240_v38  ;;  %v2437_v47 = vld [vmem:[#allocation2 + $0x780] sm:$0xff] }
 0x262   :  { %v1746_v54 = vpop.f32.mrf.mxu0  ;;  %2474 = vmatpush.msra.mxu1 %v2437_v47  ;;  %2515 = vmatpush.msra.mxu3 %v2430_v18  ;;  %v2365_v38 = vld [vmem:[#allocation2 + $0x540] sm:$0xff] }
 0x263   :  { %2461 = vmatpush.msra.mxu0 %v2253_v55  ;;  %v2231_v55 = vld [vmem:[#allocation2 + $0x110] sm:$0xff]  ;;  %2584 = vmatpush.msrb.mxu2 %v2232_v39  ;;  %v2358_v39 = vld [vmem:[#allocation2 + $0x508] sm:$0xff] }
 0x265   :  { %2462 = vmatpush.msra.mxu0 %v2245_v57  ;;  %v2429_v57 = vld [vmem:[#allocation2 + $0x740] sm:$0xff] }
 0x266   :  { %2475 = vmatpush.msra.mxu1 %v2429_v57 }
 0x267   :  { %2463 = vmatpush.msra.mxu0 %v2237_v61  ;;  %v2223_v61 = vld [vmem:[#allocation2 + $0xd0] sm:$0xff] }
 0x268   :  { %v1786_v60 = vpop.f32.mrf.mxu2  ;;  %2476 = vmatpush.msra.mxu1 %v2421_v0  ;;  %v2350_v0 = vld [vmem:[#allocation2 + $0x4c8] sm:$0xff] }
 0x269   :  { %2464 = vmatpush.msra.mxu0 %v2229_v59  ;;  %v2224_v59 = vld [vmem:[#allocation2 + $0xd8] sm:$0xff] }
 0x26a   :  { %2585 = vmatpush.msrb.mxu2 %v2224_v59  ;;  %2477 = vmatpush.msra.mxu1 %v2413_v41  ;;  %v1826_v36 = vpop.f32.mrf.mxu0  ;;  %v2349_v59 = vld [vmem:[#allocation2 + $0x4c0] sm:$0xff] }
 0x26b   :  { %2465 = vmatpush.msra.mxu0 %v2221_v28  ;;  %v2422_v28 = vld [vmem:[#allocation2 + $0x708] sm:$0xff] }
 0x26c   :  { %2516 = vmatpush.msra.mxu3 %v2422_v28 }
 0x26d   :  { %2466 = vmatpush.msra.mxu0 %v2213_v7 }
 0x26f   :  { %2467 = vmatpush.msra.mxu0 %v2205_v32  ;;  %v2216_v32 = vld [vmem:[#allocation2 + $0x98] sm:$0xff] }
 0x270   :  { %v1866_v15 = vpop.f32.mrf.mxu2  ;;  %2586 = vmatpush.msrb.mxu2 %v2216_v32 }
 0x271   :  { %2468 = vmatpush.msra.mxu0 %v2197_v8 }
 0x272   :  { %2587 = vmatpush.msrb.mxu2 %v2208_v50 }
 0x273   :  { %2533 = vmatpush.msrb.mxu0 %v2319_v43  ;;  %v2414_v43 = vld [vmem:[#allocation2 + $0x6c8] sm:$0xff] }
 0x274   :  { %2517 = vmatpush.msra.mxu3 %v2414_v43  ;;  %v5826_v43 = vld [vmem:[%s7451_s0 + $0x168] sm:$0xff] }
 0x275   :  { %2534 = vmatpush.msrb.mxu0 %v2311_v37 }
 0x277   :  { %2535 = vmatpush.msrb.mxu0 %v2303_v13 }
 0x279   :  { %2536 = vmatpush.msrb.mxu0 %v2295_v46 }
 0x27b   :  { %2537 = vmatpush.msrb.mxu0 %v2287_v51  ;;  %v5823_v51 = vld [vmem:[%s7451_s0 + $0x90] sm:$0xff] }
 0x27d   :  { %2538 = vmatpush.msrb.mxu0 %v2279_v49 }
 0x27f   :  { %2539 = vmatpush.msrb.mxu0 %v2271_v25  ;;  %v2381_v25 = vld [vmem:[#allocation2 + $0x5c0] sm:$0xff] }
 0x281   :  { %2540 = vmatpush.msrb.mxu0 %v2263_v14 }
 0x282   :  { %v1906_v29 = vpop.f32.mrf.mxu0 }
 0x283   :  { %2541 = vmatpush.msrb.mxu0 %v2255_v21  ;;  %v2373_v21 = vld [vmem:[#allocation2 + $0x580] sm:$0xff] }
 0x285   :  { %2542 = vmatpush.msrb.mxu0 %v2247_v27 }
 0x287   :  { %2543 = vmatpush.msrb.mxu0 %v2239_v35 }
 0x289   :  { %2544 = vmatpush.msrb.mxu0 %v2231_v55  ;;  %v2357_v55 = vld [vmem:[#allocation2 + $0x500] sm:$0xff] }
 0x28b   :  { %2545 = vmatpush.msrb.mxu0 %v2223_v61 }
 0x28d   :  { %2546 = vmatpush.msrb.mxu0 %v2215_v3 }
 0x28f   :  { %2547 = vmatpush.msrb.mxu0 %v2207_v53  ;;  %v2341_v53 = vld [vmem:[#allocation2 + $0x480] sm:$0xff] }
 0x297   :  { %v1766_v1 = vpop.f32.mrf.mxu1 }
 0x298   :  { %v1767_v5 = vadd.f32 %v1766_v1, %v1746_v54  ;;  %v2405_v54 = vld [vmem:[#allocation2 + $0x680] sm:$0xff]  ;;  %v2406_v1 = vld [vmem:[#allocation2 + $0x688] sm:$0xff] }
 0x299   :  { %2478 = vmatpush.msra.mxu1 %v2405_v54  ;;  %2518 = vmatpush.msra.mxu3 %v2406_v1  ;;  %v2333_v54 = vld [vmem:[#allocation2 + $0x440] sm:$0xff]  ;;  %v2334_v1 = vld [vmem:[#allocation2 + $0x448] sm:$0xff] }
 0x29a   :  { %v2059_v12 = vadd.f32 %v5821_v58, %v1767_v5  ;;  %v2199_v58 = vld [vmem:[#allocation2 + $0x10] sm:$0xff]  ;;  %v2200_v5 = vld [vmem:[#allocation2 + $0x18] sm:$0xff] }
 0x29b   :  { %2548 = vmatpush.msrb.mxu0 %v2199_v58  ;;  %2588 = vmatpush.msrb.mxu2 %v2200_v5  ;;  %v2325_v5 = vld [vmem:[#allocation2 + $0x400] sm:$0xff] }
 0x29c   :  { %v2063_v48 = vsub.f32 0.0, %v2059_v12  ;;  %v2398_v12 = vld [vmem:[#allocation2 + $0x648] sm:$0xff]  ;;  %2479 = vmatpush.msra.mxu1 %v2397_v56 }
 0x29d   :  { %v1806_v52 = vpop.f32.mrf.mxu3  ;;  %2519 = vmatpush.msra.mxu3 %v2398_v12 }
 0x29e   :  { %v2064_v63 = vmul.f32 1.442695, %v2063_v48  ;;  %v1807_v62 = vadd.f32 %v1806_v52, %v1786_v60  ;;  %v2390_v60 = vld [vmem:[#allocation2 + $0x608] sm:$0xff]  ;;  %2480 = vmatpush.msra.mxu1 %v2389_v9  ;;  %v2448_v9 = vld [vmem:[#allocation2 + $0x7d8] sm:$0xff] }
 0x29f   :  { %2520 = vmatpush.msra.mxu3 %v2390_v60 }
 0x2a0   :  { %5944 = vpow2.f32 %v2064_v63  ;;  %v2060_v2 = vadd.f32 %v5822_v16, %v1807_v62  ;;  %v1846_v8 = vpop.f32.mrf.mxu1  ;;  %2481 = vmatpush.msra.mxu1 %v2381_v25 }
 0x2a1   :  { %v1847_v40 = vadd.f32 %v1846_v8, %v1826_v36  ;;  %2521 = vmatpush.msra.mxu3 %v2382_v19 }
 0x2a2   :  { %v2082_v26 = vsub.f32 0.0, %v2060_v2  ;;  %2482 = vmatpush.msra.mxu1 %v2373_v21  ;;  %v2321_v21 = vld [vmem:[#allocation2 + $0x3e0] sm:$0xff] }
 0x2a3   :  { %v2061_v48 = vadd.f32 %v5823_v51, %v1847_v40  ;;  %2522 = vmatpush.msra.mxu3 %v2374_v22  ;;  %v2326_v51 = vld [vmem:[#allocation2 + $0x408] sm:$0xff] }
 0x2a4   :  { %v2083_v30 = vmul.f32 1.442695, %v2082_v26  ;;  %2483 = vmatpush.msra.mxu1 %v2365_v38  ;;  %v2322_v22 = vld [vmem:[#allocation2 + $0x3e8] sm:$0xff]  ;;  %v2408_v38 = vld [vmem:[#allocation2 + $0x698] sm:$0xff] }
 0x2a6   :  { %v5945_v17 = vpop.eup %5944  ;;  %5946 = vpow2.f32 %v2083_v30  ;;  %v1886_v6 = vpop.f32.mrf.mxu3  ;;  %2484 = vmatpush.msra.mxu1 %v2357_v55  ;;  %v2400_v55 = vld [vmem:[#allocation2 + $0x658] sm:$0xff] }
 0x2a7   :  { %v6658_v42 = vadd.f32 1.0, %v5945_v17  ;;  %v1887_v45 = vadd.f32 %v1886_v6, %v1866_v15  ;;  %v5825_v17 = vld [vmem:[%s7451_s0 + $0x160] sm:$0xff] }
 0x2a8   :  { %2485 = vmatpush.msra.mxu1 %v2349_v59  ;;  %v2281_v59 = vld [vmem:[#allocation2 + $0x2a0] sm:$0xff] }
 0x2a9   :  { %5948 = vrcp.f32 %v6658_v42  ;;  %v2062_v11 = vadd.f32 %v5824_v44, %v1887_v45  ;;  %v2078_v4 = vand.u32 2147483648, %v6658_v42  ;;  %vm2072_vm1 = vweird.f32 %v6658_v42 }
 0x2aa   :  { %v2076_v27 = vand.u32 2147483647, %v6658_v42  ;;  %2486 = vmatpush.msra.mxu1 %v2341_v53  ;;  %v2368_v53 = vld [vmem:[#allocation2 + $0x558] sm:$0xff] }
 0x2ab   :  { %v2102_v33 = vsub.f32 0.0, %v2062_v11  ;;  %v2079_v45 = vor.u32 1.1754944e-38, %v2078_v4 }
 0x2ac   :  { %v5947_v7 = vpop.eup %5946  ;;  %vm2077_vm5 = vcmp.eq.f32.partialorder %v2076_v27, 8.507059e+37  ;;  %2487 = vmatpush.msra.mxu1 %v2333_v54  ;;  %v2424_v27 = vld [vmem:[#allocation2 + $0x718] sm:$0xff] }
 0x2ad   :  { %v6661_v24 = vadd.f32 1.0, %v5947_v7  ;;  %v2103_v37 = vmul.f32 1.442695, %v2102_v33  ;;  %v1946_v33 = vpop.f32.mrf.mxu2 }
 0x2ae   :  { %2488 = vmatpush.msra.mxu1 %v2325_v5  ;;  %v2351_v5 = vld [vmem:[#allocation2 + $0x4d0] sm:$0xff] }
 0x2af   :  { %v6663_v13 = vpop.eup %5948  ;;  %5950 = vrcp.f32 %v6661_v24  ;;  %v2097_v30 = vand.u32 2147483648, %v6661_v24  ;;  %v2095_v34 = vand.u32 2147483647, %v6661_v24  ;;  %vm2091_vm4 = vweird.f32 %v6661_v24 }
 0x2b0   :  { %v2068_v46 = vmul.f32 %v6663_v13, %v6658_v42  ;;  %5952 = vpow2.f32 %v2103_v37  ;;  %vm2073_vm0 = vweird.f32 %v6663_v13  ;;  %v2366_v42 = vld [vmem:[#allocation2 + $0x548] sm:$0xff] }
 0x2b1   :  { %5954 = vtanh.f32 %v2061_v48  ;;  %vm6683_vm2 = vmor %vm2072_vm1, %vm2073_vm0  ;;  %2523 = vmatpush.msra.mxu3 %v2366_v42  ;;  %v2098_v57 = vor.u32 1.1754944e-38, %v2097_v30  ;;  %vm2096_vm7 = vcmp.eq.f32.partialorder %v2095_v34, 8.507059e+37  ;;  %v2342_v37 = vld [vmem:[#allocation2 + $0x488] sm:$0xff]  ;;  %v2416_v34 = vld [vmem:[#allocation2 + $0x6d8] sm:$0xff] }
 0x2b2   :  { %v2069_v49 = vsub.f32 1.0, %v2068_v46  ;;  %v2314_v30 = vld [vmem:[#allocation2 + $0x3a8] sm:$0xff]  ;;  %v2297_v42 = vld [vmem:[#allocation2 + $0x320] sm:$0xff] }
 0x2b3   :  { %2524 = vmatpush.msra.mxu3 %v2358_v39 }
 0x2b4   :  { %v2070_v52 = vmul.f32 %v6663_v13, %v2069_v49  ;;  %v2447_v49 = vld [vmem:[#allocation2 + $0x7d0] sm:$0xff] }
 0x2b5   :  { %v5951_v16 = vpop.eup %5950  ;;  %2525 = vmatpush.msra.mxu3 %v2350_v0  ;;  %2553 = vmatpush.msrb.mxu1 %v2447_v49  ;;  %v2282_v0 = vld [vmem:[#allocation2 + $0x2a8] sm:$0xff] }
 0x2b6   :  { %v5953_v63 = vpop.eup %5952  ;;  %v2087_v62 = vmul.f32 %v5951_v16, %v6661_v24  ;;  %v2071_v14 = vadd.f32 %v6663_v13, %v2070_v52  ;;  %vm2092_vm3 = vweird.f32 %v5951_v16  ;;  %v2439_v52 = vld [vmem:[#allocation2 + $0x790] sm:$0xff] }
 0x2b7   :  { %v6676_v2 = vadd.f32 1.0, %v5953_v63  ;;  %vm2093_vm6 = vmor %vm2091_vm4, %vm2092_vm3  ;;  %v5955_v61 = vpop.eup %5954  ;;  %2526 = vmatpush.msra.mxu3 %v2342_v37  ;;  %2554 = vmatpush.msrb.mxu1 %v2439_v52  ;;  %v2431_v63 = vld [vmem:[#allocation2 + $0x750] sm:$0xff]  ;;  %v2242_v52 = vld [vmem:[#allocation2 + $0x168] sm:$0xff] }
 0x2b8   :  { %v2088_v26 = vsub.f32 1.0, %v2087_v62  ;;  %v2075_v6 = vsel %vm6683_vm2, %v6663_v13, %v2071_v14  ;;  %v2432_v62 = vld [vmem:[#allocation2 + $0x758] sm:$0xff] }
 0x2b9   :  { %5956 = vrcp.f32 %v6676_v2  ;;  %v1926_v35 = vpop.f32.mrf.mxu1  ;;  %v2080_v18 = vsel %vm2077_vm5, %v2079_v45, %v2075_v6  ;;  %2527 = vmatpush.msra.mxu3 %v2334_v1  ;;  %v2115_v56 = vand.u32 2147483647, %v6676_v2  ;;  %vm2111_vm9 = vweird.f32 %v6676_v2  ;;  %2555 = vmatpush.msrb.mxu1 %v2431_v63  ;;  %v2306_v6 = vld [vmem:[#allocation2 + $0x368] sm:$0xff]  ;;  %v2359_v1 = vld [vmem:[#allocation2 + $0x510] sm:$0xff]  ;;  %v1986_v63 = vpop.f32.mrf.mxu0 }
 0x2ba   :  { %v2089_v15 = vmul.f32 %v5951_v16, %v2088_v26  ;;  %v1927_v44 = vadd.f32 %v1926_v35, %v1906_v29  ;;  %v2122_v24 = vmul.f32 %v5955_v61, %v2080_v18  ;;  %v2423_v26 = vld [vmem:[#allocation2 + $0x710] sm:$0xff]  ;;  %v2313_v29 = vld [vmem:[#allocation2 + $0x3a0] sm:$0xff]  ;;  %v2290_v18 = vld [vmem:[#allocation2 + $0x2e8] sm:$0xff] }
 0x2bb   :  { %2528 = vmatpush.msra.mxu3 %v2326_v51  ;;  %vm2116_vm11 = vcmp.eq.f32.partialorder %v2115_v56, 8.507059e+37  ;;  %2556 = vmatpush.msrb.mxu1 %v2423_v26  ;;  %v2391_v61 = vld [vmem:[#allocation2 + $0x610] sm:$0xff]  ;;  %v2352_v51 = vld [vmem:[#allocation2 + $0x4d8] sm:$0xff] }
 0x2bc   :  { %v2090_v47 = vadd.f32 %v5951_v16, %v2089_v15  ;;  %v2126_v10 = vadd.f32 %v5825_v17, %v1927_v44  ;;  %v2305_v17 = vld [vmem:[#allocation2 + $0x360] sm:$0xff]  ;;  %v2407_v44 = vld [vmem:[#allocation2 + $0x690] sm:$0xff]  ;;  %v2336_v26 = vld [vmem:[#allocation2 + $0x458] sm:$0xff] }
 0x2bd   :  { %2593 = vmatpush.msrb.mxu3 %v2448_v9  ;;  %2557 = vmatpush.msrb.mxu1 %v2415_v31  ;;  %v2225_v31 = vld [vmem:[#allocation2 + $0xe0] sm:$0xff] }
 0x2be   :  { %v2094_v11 = vsel %vm2093_vm6, %v5951_v16, %v2090_v47  ;;  %v2130_v41 = vsub.f32 0.0, %v2126_v10  ;;  %v2440_v16 = vld [vmem:[#allocation2 + $0x798] sm:$0xff]  ;;  %v2298_v47 = vld [vmem:[#allocation2 + $0x328] sm:$0xff]  ;;  %v2399_v10 = vld [vmem:[#allocation2 + $0x650] sm:$0xff] }
 0x2bf   :  { %v5957_v28 = vpop.eup %5956  ;;  %v2099_v3 = vsel %vm2096_vm7, %v2098_v57, %v2094_v11  ;;  %v1966_v7 = vpop.f32.mrf.mxu3  ;;  %2594 = vmatpush.msrb.mxu3 %v2440_v16  ;;  %2558 = vmatpush.msrb.mxu1 %v2407_v44  ;;  %v2289_v57 = vld [vmem:[#allocation2 + $0x2e0] sm:$0xff]  ;;  %v2392_v11 = vld [vmem:[#allocation2 + $0x618] sm:$0xff]  ;;  %v2218_v44 = vld [vmem:[#allocation2 + $0xa8] sm:$0xff] }
 0x2c0   :  { %v2121_v32 = vmul.f32 %v2099_v3, %v6549_v23  ;;  %v2107_v8 = vmul.f32 %v5957_v28, %v6676_v2  ;;  %v1967_v50 = vadd.f32 %v1966_v7, %v1946_v33  ;;  %v2117_v23 = vand.u32 2147483648, %v6676_v2  ;;  %v2384_v3 = vld [vmem:[#allocation2 + $0x5d8] sm:$0xff]  ;;  %v2273_v7 = vld [vmem:[#allocation2 + $0x260] sm:$0xff]  ;;  %v2274_v33 = vld [vmem:[#allocation2 + $0x268] sm:$0xff] }
 0x2c1   :  { %vm2112_vm8 = vweird.f32 %v5957_v28  ;;  %v2131_v40 = vmul.f32 1.442695, %v2130_v41  ;;  %2595 = vmatpush.msrb.mxu3 %v2432_v62  ;;  %2559 = vmatpush.msrb.mxu1 %v2399_v10  ;;  %v2266_v41 = vld [vmem:[#allocation2 + $0x228] sm:$0xff]  ;;  %v2233_v62 = vld [vmem:[#allocation2 + $0x120] sm:$0xff] }
 0x2c2   :  { %v6701_v13 = vadd.f32 %v2122_v24, %v2121_v32  ;;  %v2108_v36 = vsub.f32 1.0, %v2107_v8  ;;  %v2127_v58 = vadd.f32 %v5826_v43, %v1967_v50  ;;  %vm2113_vm10 = vmor %vm2111_vm9, %vm2112_vm8  ;;  %v2118_v19 = vor.u32 1.1754944e-38, %v2117_v23  ;;  %v2375_v32 = vld [vmem:[#allocation2 + $0x590] sm:$0xff]  ;;  %v2376_v24 = vld [vmem:[#allocation2 + $0x598] sm:$0xff] }
 0x2c3   :  { %2596 = vmatpush.msrb.mxu3 %v2424_v27  ;;  %2560 = vmatpush.msrb.mxu1 %v2391_v61  ;;  %v2265_v8 = vld [vmem:[#allocation2 + $0x220] sm:$0xff]  ;;  %v2367_v43 = vld [vmem:[#allocation2 + $0x550] sm:$0xff]  ;;  %v2360_v23 = vld [vmem:[#allocation2 + $0x518] sm:$0xff] }
 0x2c4   :  { %5958 = vtanh.f32 %v6701_v13  ;;  %v2109_v46 = vmul.f32 %v5957_v28, %v2108_v36  ;;  %v2149_v12 = vsub.f32 0.0, %v2127_v58  ;;  %v2257_v50 = vld [vmem:[#allocation2 + $0x1e0] sm:$0xff]  ;;  %v2258_v36 = vld [vmem:[#allocation2 + $0x1e8] sm:$0xff] }
 0x2c5   :  { %5960 = vpow2.f32 %v2131_v40  ;;  %2597 = vmatpush.msrb.mxu3 %v2416_v34  ;;  %v2249_v58 = vld [vmem:[#allocation2 + $0x1a0] sm:$0xff]  ;;  %v2026_v40 = vpop.f32.mrf.mxu2  ;;  %v2226_v34 = vld [vmem:[#allocation2 + $0xe8] sm:$0xff] }
 0x2c6   :  { %v2110_v60 = vadd.f32 %v5957_v28, %v2109_v46  ;;  %v2150_v48 = vmul.f32 1.442695, %v2149_v12  ;;  %v2250_v46 = vld [vmem:[#allocation2 + $0x1a8] sm:$0xff] }
 0x2c7   :  { %2598 = vmatpush.msrb.mxu3 %v2408_v38  ;;  %v2202_v61 = vld [vmem:[#allocation2 + $0x28] sm:$0xff] }
 0x2c8   :  { %v2114_v25 = vsel %vm2113_vm10, %v5957_v28, %v2110_v60  ;;  %5962 = vpow2.f32 %v2150_v48  ;;  %v2383_v28 = vld [vmem:[#allocation2 + $0x5d0] sm:$0xff]  ;;  %v5828_v60 = vld [vmem:[%s7451_s0 + $0x178] sm:$0xff]  ;;  %v2241_v48 = vld [vmem:[#allocation2 + $0x160] sm:$0xff] }
 0x2c9   :  { %v2119_v4 = vsel %vm2116_vm11, %v2118_v19, %v2114_v25  ;;  %2599 = vmatpush.msrb.mxu3 %v2400_v55  ;;  %2561 = vmatpush.msrb.mxu1 %v2383_v28  ;;  %v2343_v25 = vld [vmem:[#allocation2 + $0x490] sm:$0xff]  ;;  %v2344_v19 = vld [vmem:[#allocation2 + $0x498] sm:$0xff]  ;;  %v2209_v55 = vld [vmem:[#allocation2 + $0x60] sm:$0xff] }
 0x2ca   :  { %v5959_v14 = vpop.eup %5958  ;;  %v2324_v28 = vld [vmem:[#allocation2 + $0x3f8] sm:$0xff] }
 0x2cb   :  { %v6707_v2 = vmul.f32 %v5959_v14, %v2119_v4  ;;  %v5961_v35 = vpop.eup %5960  ;;  %2600 = vmatpush.msrb.mxu3 %v2392_v11  ;;  %2562 = vmatpush.msrb.mxu1 %v2375_v32  ;;  %v2234_v14 = vld [vmem:[#allocation2 + $0x128] sm:$0xff] }
 0x2cc   :  { %v6715_v45 = vadd.f32 1.0, %v5961_v35 }
 0x2cd   :  { %5829 = vst [vmem:[%s7453_s2 + $0x20] sm:$0xff] %v6707_v2  ;;  %2469 = vmatmul.f32.vlgmr.msra.gmra.mxu0 %v6707_v2  ;;  %2509 = vmatmul.f32.vlgmr.msra.gmra.mxu2 %v6707_v2 }
 0x2ce   :  { %2613 = vmatpush.msra.mxu0 %v2321_v21  ;;  %2653 = vmatpush.msra.mxu2 %v2322_v22  ;;  %v5963_v15 = vpop.eup %5962  ;;  %5964 = vrcp.f32 %v6715_v45  ;;  %v2335_v22 = vld [vmem:[#allocation2 + $0x450] sm:$0xff]  ;;  %vm2139_vm14 = vweird.f32 %v6715_v45  ;;  %v2143_v32 = vand.u32 2147483647, %v6715_v45 }
 0x2cf   :  { %v6717_v39 = vadd.f32 1.0, %v5963_v15  ;;  %2601 = vmatpush.msrb.mxu3 %v2384_v3  ;;  %2563 = vmatpush.msrb.mxu1 %v2367_v43  ;;  %v2328_v15 = vld [vmem:[#allocation2 + $0x418] sm:$0xff] }
 0x2d0   :  { %2614 = vmatpush.msra.mxu0 %v2313_v29  ;;  %2654 = vmatpush.msra.mxu2 %v2314_v30  ;;  %v5827_v30 = vld [vmem:[%s7451_s0 + $0x170] sm:$0xff]  ;;  %vm2144_vm2 = vcmp.eq.f32.partialorder %v2143_v32, 8.507059e+37  ;;  %v2418_v32 = vld [vmem:[#allocation2 + $0x6e8] sm:$0xff] }
 0x2d1   :  { %5966 = vrcp.f32 %v6717_v39  ;;  %2602 = vmatpush.msrb.mxu3 %v2376_v24  ;;  %2564 = vmatpush.msrb.mxu1 %v2359_v1  ;;  %v2164_v3 = vand.u32 2147483648, %v6717_v39  ;;  %vm2158_vm15 = vweird.f32 %v6717_v39  ;;  %v2162_v24 = vand.u32 2147483647, %v6717_v39  ;;  %v2308_v1 = vld [vmem:[#allocation2 + $0x378] sm:$0xff] }
 0x2d2   :  { %2615 = vmatpush.msra.mxu0 %v2305_v17  ;;  %2655 = vmatpush.msra.mxu2 %v2306_v6  ;;  %v2327_v17 = vld [vmem:[#allocation2 + $0x410] sm:$0xff]  ;;  %v2217_v6 = vld [vmem:[#allocation2 + $0xa0] sm:$0xff] }
 0x2d3   :  { %2603 = vmatpush.msrb.mxu3 %v2368_v53  ;;  %2565 = vmatpush.msrb.mxu1 %v2351_v5  ;;  %vm2163_vm3 = vcmp.eq.f32.partialorder %v2162_v24, 8.507059e+37  ;;  %v2300_v5 = vld [vmem:[#allocation2 + $0x338] sm:$0xff]  ;;  %v2211_v24 = vld [vmem:[#allocation2 + $0x70] sm:$0xff] }
 0x2d4   :  { %2616 = vmatpush.msra.mxu0 %v2297_v42  ;;  %2656 = vmatpush.msra.mxu2 %v2298_v47  ;;  %v6723_v37 = vpop.eup %5964  ;;  %v2203_v53 = vld [vmem:[#allocation2 + $0x30] sm:$0xff] }
 0x2d5   :  { %2549 = vmatmul.f32.vlgmr.msrb.gmra.mxu0 %v6707_v2  ;;  %2589 = vmatmul.f32.vlgmr.msrb.gmra.mxu2 %v6707_v2  ;;  %v2135_v56 = vmul.f32 %v6723_v37, %v6715_v45  ;;  %vm2140_vm12 = vweird.f32 %v6723_v37 }
 0x2d6   :  { %2617 = vmatpush.msra.mxu0 %v2289_v57  ;;  %2657 = vmatpush.msra.mxu2 %v2290_v18  ;;  %v2210_v57 = vld [vmem:[#allocation2 + $0x68] sm:$0xff]  ;;  %v2201_v18 = vld [vmem:[#allocation2 + $0x20] sm:$0xff]  ;;  %vm6749_vm0 = vmor %vm2139_vm14, %vm2140_vm12 }
 0x2d7   :  { %v6725_v54 = vpop.eup %5966  ;;  %2604 = vmatpush.msrb.mxu3 %v2360_v23  ;;  %v2136_v27 = vsub.f32 1.0, %v2135_v56  ;;  %2566 = vmatpush.msrb.mxu1 %v2343_v25  ;;  %v2276_v25 = vld [vmem:[#allocation2 + $0x278] sm:$0xff] }
 0x2d8   :  { %2618 = vmatpush.msra.mxu0 %v2281_v59  ;;  %2658 = vmatpush.msra.mxu2 %v2282_v0  ;;  %v2154_v12 = vmul.f32 %v6725_v54, %v6717_v39  ;;  %vm2159_vm13 = vweird.f32 %v6725_v54  ;;  %v2323_v0 = vld [vmem:[#allocation2 + $0x3f0] sm:$0xff] }
 0x2d9   :  { %v2006_v49 = vpop.f32.mrf.mxu1  ;;  %2605 = vmatpush.msrb.mxu3 %v2352_v51  ;;  %2567 = vmatpush.msrb.mxu1 %v2335_v22  ;;  %v2137_v10 = vmul.f32 %v6723_v37, %v2136_v27  ;;  %vm6759_vm1 = vmor %vm2158_vm15, %vm2159_vm13  ;;  %v2251_v27 = vld [vmem:[#allocation2 + $0x1b0] sm:$0xff] }
 0x2da   :  { %2619 = vmatpush.msra.mxu0 %v2273_v7  ;;  %2659 = vmatpush.msra.mxu2 %v2274_v33  ;;  %v2007_v4 = vadd.f32 %v2006_v49, %v1986_v63  ;;  %v2155_v29 = vsub.f32 1.0, %v2154_v12  ;;  %v2145_v7 = vand.u32 2147483648, %v6715_v45  ;;  %v2291_v12 = vld [vmem:[#allocation2 + $0x2f0] sm:$0xff]  ;;  %v2417_v33 = vld [vmem:[#allocation2 + $0x6e0] sm:$0xff] }
 0x2db   :  { %2606 = vmatpush.msrb.mxu3 %v2344_v19  ;;  %2568 = vmatpush.msrb.mxu1 %v2327_v17  ;;  %v2138_v11 = vadd.f32 %v6723_v37, %v2137_v10  ;;  %v2267_v63 = vld [vmem:[#allocation2 + $0x230] sm:$0xff]  ;;  %v2236_v10 = vld [vmem:[#allocation2 + $0x138] sm:$0xff] }
 0x2dc   :  { %2620 = vmatpush.msra.mxu0 %v2265_v8  ;;  %2660 = vmatpush.msra.mxu2 %v2266_v41  ;;  %v2128_v38 = vadd.f32 %v5827_v30, %v2007_v4  ;;  %v2156_v47 = vmul.f32 %v6725_v54, %v2155_v29  ;;  %v2315_v8 = vld [vmem:[#allocation2 + $0x3b0] sm:$0xff]  ;;  %v2316_v41 = vld [vmem:[#allocation2 + $0x3b8] sm:$0xff] }
 0x2dd   :  { %2607 = vmatpush.msrb.mxu3 %v2336_v26  ;;  %v2142_v45 = vsel %vm6749_vm0, %v6723_v37, %v2138_v11  ;;  %v2259_v4 = vld [vmem:[#allocation2 + $0x1f0] sm:$0xff]  ;;  %v2252_v29 = vld [vmem:[#allocation2 + $0x1b8] sm:$0xff]  ;;  %v2433_v11 = vld [vmem:[#allocation2 + $0x760] sm:$0xff] }
 0x2de   :  { %2621 = vmatpush.msra.mxu0 %v2257_v50  ;;  %2661 = vmatpush.msra.mxu2 %v2258_v36  ;;  %v2157_v59 = vadd.f32 %v6725_v54, %v2156_v47  ;;  %v2307_v36 = vld [vmem:[#allocation2 + $0x370] sm:$0xff] }
 0x2df   :  { %v2046_v9 = vpop.f32.mrf.mxu3  ;;  %2608 = vmatpush.msrb.mxu3 %v2328_v15  ;;  %v2235_v47 = vld [vmem:[#allocation2 + $0x130] sm:$0xff] }
 0x2e0   :  { %v2047_v16 = vadd.f32 %v2046_v9, %v2026_v40  ;;  %2622 = vmatpush.msra.mxu0 %v2249_v58  ;;  %2662 = vmatpush.msra.mxu2 %v2250_v46  ;;  %v2161_v39 = vsel %vm6759_vm1, %v6725_v54, %v2157_v59  ;;  %v2165_v58 = vor.u32 1.1754944e-38, %v2164_v3  ;;  %v2146_v46 = vor.u32 1.1754944e-38, %v2145_v7  ;;  %v2299_v40 = vld [vmem:[#allocation2 + $0x330] sm:$0xff]  ;;  %v2292_v54 = vld [vmem:[#allocation2 + $0x2f8] sm:$0xff]  ;;  %v2434_v59 = vld [vmem:[#allocation2 + $0x768] sm:$0xff] }
 0x2e1   :  { %v2283_v9 = vld [vmem:[#allocation2 + $0x2b0] sm:$0xff]  ;;  %v2425_v3 = vld [vmem:[#allocation2 + $0x720] sm:$0xff]  ;;  %v2426_v7 = vld [vmem:[#allocation2 + $0x728] sm:$0xff] }
 0x2e2   :  { %v2129_v21 = vadd.f32 %v5828_v60, %v2047_v16  ;;  %2623 = vmatpush.msra.mxu0 %v2241_v48  ;;  %2663 = vmatpush.msra.mxu2 %v2242_v52  ;;  %v2147_v51 = vsel %vm2144_vm2, %v2146_v46, %v2142_v45  ;;  %v2166_v56 = vsel %vm2163_vm3, %v2165_v58, %v2161_v39  ;;  %v2284_v60 = vld [vmem:[#allocation2 + $0x2b8] sm:$0xff]  ;;  %v2275_v16 = vld [vmem:[#allocation2 + $0x270] sm:$0xff]  ;;  %v2401_v39 = vld [vmem:[#allocation2 + $0x660] sm:$0xff] }
 0x2e3   :  { %v2188_v49 = vmul.f32 %v2166_v56, %v6630_v20  ;;  %v2204_v45 = vld [vmem:[#allocation2 + $0x38] sm:$0xff]  ;;  %v2386_v58 = vld [vmem:[#allocation2 + $0x5e8] sm:$0xff]  ;;  %v2377_v46 = vld [vmem:[#allocation2 + $0x5a0] sm:$0xff] }
 0x2e4   :  { %v2169_v35 = vsub.f32 0.0, %v2129_v21  ;;  %2624 = vmatpush.msra.mxu0 %v2233_v62  ;;  %2664 = vmatpush.msra.mxu2 %v2234_v14  ;;  %v2268_v62 = vld [vmem:[#allocation2 + $0x238] sm:$0xff]  ;;  %v2361_v56 = vld [vmem:[#allocation2 + $0x520] sm:$0xff] }
 0x2e5   :  { %v2260_v21 = vld [vmem:[#allocation2 + $0x1f8] sm:$0xff] }
 0x2e6   :  { %v2170_v42 = vmul.f32 1.442695, %v2169_v35  ;;  %2625 = vmatpush.msra.mxu0 %v2225_v31  ;;  %2665 = vmatpush.msra.mxu2 %v2226_v34  ;;  %v2243_v34 = vld [vmem:[#allocation2 + $0x170] sm:$0xff]  ;;  %v2244_v35 = vld [vmem:[#allocation2 + $0x178] sm:$0xff] }
 0x2e8   :  { %5968 = vpow2.f32 %v2170_v42  ;;  %2626 = vmatpush.msra.mxu0 %v2217_v6  ;;  %2666 = vmatpush.msra.mxu2 %v2218_v44  ;;  %v2450_v42 = vld [vmem:[#allocation2 + $0x7e8] sm:$0xff] }
 0x2e9   :  { %5970 = vtanh.f32 %v2128_v38  ;;  %v2449_v38 = vld [vmem:[#allocation2 + $0x7e0] sm:$0xff] }
 0x2ea   :  { %2627 = vmatpush.msra.mxu0 %v2209_v55  ;;  %2667 = vmatpush.msra.mxu2 %v2210_v57  ;;  %v2441_v55 = vld [vmem:[#allocation2 + $0x7a0] sm:$0xff]  ;;  %v2442_v57 = vld [vmem:[#allocation2 + $0x7a8] sm:$0xff] }
 0x2ec   :  { %2628 = vmatpush.msra.mxu0 %v2201_v18  ;;  %2668 = vmatpush.msra.mxu2 %v2202_v61  ;;  %v2227_v18 = vld [vmem:[#allocation2 + $0xf0] sm:$0xff]  ;;  %v2228_v61 = vld [vmem:[#allocation2 + $0xf8] sm:$0xff] }
 0x2ed   :  { %2629 = vmatmul.f32.vlgmr.msra.gmra.mxu0 %v6707_v2  ;;  %2669 = vmatmul.f32.vlgmr.msra.gmra.mxu2 %v6707_v2 }
 0x2ee   :  { %v5969_v43 = vpop.eup %5968  ;;  %2693 = vmatpush.msrb.mxu0 %v2323_v0  ;;  %2733 = vmatpush.msrb.mxu2 %v2324_v28  ;;  %v2219_v0 = vld [vmem:[#allocation2 + $0xb0] sm:$0xff]  ;;  %v2220_v28 = vld [vmem:[#allocation2 + $0xb8] sm:$0xff] }
 0x2ef   :  { %v2172_v50 = vadd.f32 1.0, %v5969_v43  ;;  %v5971_v23 = vpop.eup %5970  ;;  %v2410_v43 = vld [vmem:[#allocation2 + $0x6a8] sm:$0xff] }
 0x2f0   :  { %2694 = vmatpush.msrb.mxu0 %v2315_v8  ;;  %2734 = vmatpush.msrb.mxu2 %v2316_v41  ;;  %v2189_v37 = vmul.f32 %v5971_v23, %v2147_v51  ;;  %v2212_v8 = vld [vmem:[#allocation2 + $0x78] sm:$0xff]  ;;  %v2409_v41 = vld [vmem:[#allocation2 + $0x6a0] sm:$0xff]  ;;  %v2370_v51 = vld [vmem:[#allocation2 + $0x568] sm:$0xff] }
 0x2f1   :  { %5972 = vrcp.f32 %v2172_v50  ;;  %v2184_v20 = vand.u32 2147483648, %v2172_v50  ;;  %v2182_v26 = vand.u32 2147483647, %v2172_v50  ;;  %vm2178_vm5 = vweird.f32 %v2172_v50  ;;  %v2385_v23 = vld [vmem:[#allocation2 + $0x5e0] sm:$0xff] }
 0x2f2   :  { %2695 = vmatpush.msrb.mxu0 %v2307_v36  ;;  %2735 = vmatpush.msrb.mxu2 %v2308_v1  ;;  %v6770_v52 = vadd.f32 %v2189_v37, %v2188_v49  ;;  %v2393_v36 = vld [vmem:[#allocation2 + $0x620] sm:$0xff]  ;;  %v2394_v1 = vld [vmem:[#allocation2 + $0x628] sm:$0xff] }
 0x2f3   :  { %v2185_v31 = vor.u32 1.1754944e-38, %v2184_v20  ;;  %vm2183_vm7 = vcmp.eq.f32.partialorder %v2182_v26, 8.507059e+37  ;;  %v2362_v37 = vld [vmem:[#allocation2 + $0x528] sm:$0xff]  ;;  %v2436_v20 = vld [vmem:[#allocation2 + $0x778] sm:$0xff] }
 0x2f4   :  { %2696 = vmatpush.msrb.mxu0 %v2299_v40  ;;  %2736 = vmatpush.msrb.mxu2 %v2300_v5  ;;  %5974 = vtanh.f32 %v6770_v52  ;;  %v2378_v40 = vld [vmem:[#allocation2 + $0x5a8] sm:$0xff]  ;;  %v2369_v5 = vld [vmem:[#allocation2 + $0x560] sm:$0xff]  ;;  %v2420_v26 = vld [vmem:[#allocation2 + $0x6f8] sm:$0xff] }
 0x2f5   :  { %v2346_v49 = vld [vmem:[#allocation2 + $0x4a8] sm:$0xff] }
 0x2f6   :  { %2697 = vmatpush.msrb.mxu0 %v2291_v12  ;;  %2737 = vmatpush.msrb.mxu2 %v2292_v54  ;;  %v2354_v12 = vld [vmem:[#allocation2 + $0x4e8] sm:$0xff]  ;;  %v2345_v54 = vld [vmem:[#allocation2 + $0x4a0] sm:$0xff] }
 0x2f7   :  { %v5973_v48 = vpop.eup %5972 }
 0x2f8   :  { %v2174_v19 = vmul.f32 %v5973_v48, %v2172_v50  ;;  %2698 = vmatpush.msrb.mxu0 %v2283_v9  ;;  %2738 = vmatpush.msrb.mxu2 %v2284_v60  ;;  %vm2179_vm4 = vweird.f32 %v5973_v48  ;;  %v2402_v50 = vld [vmem:[#allocation2 + $0x668] sm:$0xff]  ;;  %v2337_v9 = vld [vmem:[#allocation2 + $0x460] sm:$0xff] }
 0x2f9   :  { %vm2180_vm6 = vmor %vm2178_vm5, %vm2179_vm4  ;;  %v2338_v60 = vld [vmem:[#allocation2 + $0x468] sm:$0xff] }
 0x2fa   :  { %v2175_v14 = vsub.f32 1.0, %v2174_v19  ;;  %2699 = vmatpush.msrb.mxu0 %v2275_v16  ;;  %2739 = vmatpush.msrb.mxu2 %v2276_v25  ;;  %v5975_v15 = vpop.eup %5974  ;;  %v2330_v16 = vld [vmem:[#allocation2 + $0x428] sm:$0xff]  ;;  %v2451_v25 = vld [vmem:[#allocation2 + $0x7f0] sm:$0xff]  ;;  %v2452_v19 = vld [vmem:[#allocation2 + $0x7f8] sm:$0xff] }
 0x2fc   :  { %v2176_v22 = vmul.f32 %v5973_v48, %v2175_v14  ;;  %2700 = vmatpush.msrb.mxu0 %v2267_v63  ;;  %2740 = vmatpush.msrb.mxu2 %v2268_v62  ;;  %v2443_v63 = vld [vmem:[#allocation2 + $0x7b0] sm:$0xff]  ;;  %v2444_v62 = vld [vmem:[#allocation2 + $0x7b8] sm:$0xff] }
 0x2fd   :  { %v2435_v14 = vld [vmem:[#allocation2 + $0x770] sm:$0xff] }
 0x2fe   :  { %v2177_v30 = vadd.f32 %v5973_v48, %v2176_v22  ;;  %2701 = vmatpush.msrb.mxu0 %v2259_v4  ;;  %2741 = vmatpush.msrb.mxu2 %v2260_v21  ;;  %v2427_v4 = vld [vmem:[#allocation2 + $0x730] sm:$0xff]  ;;  %v2428_v21 = vld [vmem:[#allocation2 + $0x738] sm:$0xff] }
 0x2ff   :  { %v2419_v22 = vld [vmem:[#allocation2 + $0x6f0] sm:$0xff] }
 0x300   :  { %v2181_v17 = vsel %vm2180_vm6, %v5973_v48, %v2177_v30  ;;  %2702 = vmatpush.msrb.mxu0 %v2251_v27  ;;  %2742 = vmatpush.msrb.mxu2 %v2252_v29  ;;  %v2329_v48 = vld [vmem:[#allocation2 + $0x420] sm:$0xff]  ;;  %v2411_v27 = vld [vmem:[#allocation2 + $0x6b0] sm:$0xff]  ;;  %v2412_v29 = vld [vmem:[#allocation2 + $0x6b8] sm:$0xff] }
 0x301   :  { %v2186_v6 = vsel %vm2183_vm7, %v2185_v31, %v2181_v17  ;;  %v2403_v30 = vld [vmem:[#allocation2 + $0x670] sm:$0xff]  ;;  %v2404_v31 = vld [vmem:[#allocation2 + $0x678] sm:$0xff] }
 0x302   :  { %v6773_v44 = vmul.f32 %v5975_v15, %v2186_v6  ;;  %2703 = vmatpush.msrb.mxu0 %v2243_v34  ;;  %2743 = vmatpush.msrb.mxu2 %v2244_v35  ;;  %v2395_v34 = vld [vmem:[#allocation2 + $0x630] sm:$0xff]  ;;  %v2396_v35 = vld [vmem:[#allocation2 + $0x638] sm:$0xff] }
 0x303   :  { %v2387_v17 = vld [vmem:[#allocation2 + $0x5f0] sm:$0xff]  ;;  %v2388_v15 = vld [vmem:[#allocation2 + $0x5f8] sm:$0xff] }
 0x304   :  { %5830 = vst [vmem:[%s7453_s2 + $0x58] sm:$0xff] %v6773_v44  ;;  %2489 = vmatmul.f32.vlgmr.msra.gmra.mxu1 %v6773_v44  ;;  %2529 = vmatmul.f32.vlgmr.msra.gmra.mxu3 %v6773_v44  ;;  %v2379_v6 = vld [vmem:[#allocation2 + $0x5b0] sm:$0xff] }
 0x305   :  { %2633 = vmatpush.msra.mxu1 %v2449_v38  ;;  %2673 = vmatpush.msra.mxu3 %v2450_v42  ;;  %v2380_v38 = vld [vmem:[#allocation2 + $0x5b8] sm:$0xff]  ;;  %v2371_v42 = vld [vmem:[#allocation2 + $0x570] sm:$0xff] }
 0x306   :  { %2704 = vmatpush.msrb.mxu0 %v2235_v47  ;;  %2744 = vmatpush.msrb.mxu2 %v2236_v10  ;;  %v2372_v47 = vld [vmem:[#allocation2 + $0x578] sm:$0xff]  ;;  %v2363_v10 = vld [vmem:[#allocation2 + $0x530] sm:$0xff] }
 0x307   :  { %2634 = vmatpush.msra.mxu1 %v2441_v55  ;;  %2674 = vmatpush.msra.mxu3 %v2442_v57  ;;  %v2364_v55 = vld [vmem:[#allocation2 + $0x538] sm:$0xff]  ;;  %v2355_v57 = vld [vmem:[#allocation2 + $0x4f0] sm:$0xff] }
 0x308   :  { %2705 = vmatpush.msrb.mxu0 %v2227_v18  ;;  %2745 = vmatpush.msrb.mxu2 %v2228_v61  ;;  %v2356_v18 = vld [vmem:[#allocation2 + $0x4f8] sm:$0xff]  ;;  %v2347_v61 = vld [vmem:[#allocation2 + $0x4b0] sm:$0xff] }
 0x309   :  { %2635 = vmatpush.msra.mxu1 %v2433_v11  ;;  %2675 = vmatpush.msra.mxu3 %v2434_v59  ;;  %v2348_v11 = vld [vmem:[#allocation2 + $0x4b8] sm:$0xff]  ;;  %v2339_v59 = vld [vmem:[#allocation2 + $0x470] sm:$0xff] }
 0x30a   :  { %2706 = vmatpush.msrb.mxu0 %v2219_v0  ;;  %2746 = vmatpush.msrb.mxu2 %v2220_v28  ;;  %v2340_v0 = vld [vmem:[#allocation2 + $0x478] sm:$0xff]  ;;  %v2331_v28 = vld [vmem:[#allocation2 + $0x430] sm:$0xff] }
 0x30b   :  { %2636 = vmatpush.msra.mxu1 %v2425_v3  ;;  %2676 = vmatpush.msra.mxu3 %v2426_v7  ;;  %v2332_v3 = vld [vmem:[#allocation2 + $0x438] sm:$0xff]  ;;  %v3041_v7 = vld [vmem:[#allocation2 + $0x3c0] sm:$0xff] }
 0x30c   :  { %2569 = vmatmul.f32.vlgmr.msrb.gmra.mxu1 %v6773_v44  ;;  %2609 = vmatmul.f32.vlgmr.msrb.gmra.mxu3 %v6773_v44 }
 0x30d   :  { %2637 = vmatpush.msra.mxu1 %v2417_v33  ;;  %2677 = vmatpush.msra.mxu3 %v2418_v32  ;;  %v3042_v33 = vld [vmem:[#allocation2 + $0x3c8] sm:$0xff]  ;;  %v3033_v32 = vld [vmem:[#allocation2 + $0x380] sm:$0xff] }
 0x30e   :  { %2707 = vmatpush.msrb.mxu0 %v2211_v24  ;;  %2747 = vmatpush.msrb.mxu2 %v2212_v8  ;;  %v3034_v24 = vld [vmem:[#allocation2 + $0x388] sm:$0xff]  ;;  %v3025_v8 = vld [vmem:[#allocation2 + $0x340] sm:$0xff] }
 0x30f   :  { %2638 = vmatpush.msra.mxu1 %v2409_v41  ;;  %2678 = vmatpush.msra.mxu3 %v2410_v43  ;;  %v3026_v41 = vld [vmem:[#allocation2 + $0x348] sm:$0xff]  ;;  %v3017_v43 = vld [vmem:[#allocation2 + $0x300] sm:$0xff] }
 0x310   :  { %2708 = vmatpush.msrb.mxu0 %v2203_v53  ;;  %2748 = vmatpush.msrb.mxu2 %v2204_v45  ;;  %v3018_v53 = vld [vmem:[#allocation2 + $0x308] sm:$0xff]  ;;  %v3009_v45 = vld [vmem:[#allocation2 + $0x2c0] sm:$0xff] }
 0x311   :  { %2709 = vmatmul.f32.vlgmr.msrb.gmra.mxu0 %v6707_v2  ;;  %2749 = vmatmul.f32.vlgmr.msrb.gmra.mxu2 %v6707_v2  ;;  %v2353_v2 = vld [vmem:[#allocation2 + $0x4e0] sm:$0xff] }
 0x312   :  { %2639 = vmatpush.msra.mxu1 %v2401_v39  ;;  %2679 = vmatpush.msra.mxu3 %v2402_v50  ;;  %v3010_v39 = vld [vmem:[#allocation2 + $0x2c8] sm:$0xff] }
 0x313   :  { %3177 = vmatpush.msra.mxu0 %v3041_v7  ;;  %3217 = vmatpush.msra.mxu2 %v3042_v33  ;;  %v3002_v50 = vld [vmem:[#allocation2 + $0x288] sm:$0xff]  ;;  %v2971_v33 = vld [vmem:[#allocation2 + $0x190] sm:$0xff] }
 0x314   :  { %2640 = vmatpush.msra.mxu1 %v2393_v36  ;;  %2680 = vmatpush.msra.mxu3 %v2394_v1  ;;  %v2993_v36 = vld [vmem:[#allocation2 + $0x240] sm:$0xff]  ;;  %v2994_v1 = vld [vmem:[#allocation2 + $0x248] sm:$0xff] }
 0x315   :  { %3178 = vmatpush.msra.mxu0 %v3033_v32  ;;  %3218 = vmatpush.msra.mxu2 %v3034_v24  ;;  %v2972_v32 = vld [vmem:[#allocation2 + $0x198] sm:$0xff] }
 0x316   :  { %2641 = vmatpush.msra.mxu1 %v2385_v23  ;;  %2681 = vmatpush.msra.mxu3 %v2386_v58  ;;  %v2985_v23 = vld [vmem:[#allocation2 + $0x200] sm:$0xff]  ;;  %v2986_v58 = vld [vmem:[#allocation2 + $0x208] sm:$0xff] }
 0x317   :  { %3179 = vmatpush.msra.mxu0 %v3025_v8  ;;  %3219 = vmatpush.msra.mxu2 %v3026_v41  ;;  %v3169_v8 = vld [vmem:[#allocation2 + $0x7c0] sm:$0xff]  ;;  %v3170_v41 = vld [vmem:[#allocation2 + $0x7c8] sm:$0xff] }
 0x318   :  { %2642 = vmatpush.msra.mxu1 %v2377_v46  ;;  %2682 = vmatpush.msra.mxu3 %v2378_v40  ;;  %v2977_v46 = vld [vmem:[#allocation2 + $0x1c0] sm:$0xff]  ;;  %v2978_v40 = vld [vmem:[#allocation2 + $0x1c8] sm:$0xff] }
 0x319   :  { %3180 = vmatpush.msra.mxu0 %v3017_v43  ;;  %3220 = vmatpush.msra.mxu2 %v3018_v53  ;;  %v2963_v43 = vld [vmem:[#allocation2 + $0x150] sm:$0xff] }
 0x31a   :  { %2643 = vmatpush.msra.mxu1 %v2369_v5  ;;  %2683 = vmatpush.msra.mxu3 %v2370_v51  ;;  %v2969_v5 = vld [vmem:[#allocation2 + $0x180] sm:$0xff]  ;;  %v2970_v51 = vld [vmem:[#allocation2 + $0x188] sm:$0xff] }
 0x31b   :  { %3181 = vmatpush.msra.mxu0 %v3009_v45  ;;  %3221 = vmatpush.msra.mxu2 %v3010_v39  ;;  %v5834_v39 = vld [vmem:[%s7451_s0 + $0xd8] sm:$0xff] }
 0x31c   :  { %2644 = vmatpush.msra.mxu1 %v2361_v56  ;;  %2684 = vmatpush.msra.mxu3 %v2362_v37  ;;  %v2961_v56 = vld [vmem:[#allocation2 + $0x140] sm:$0xff]  ;;  %v2962_v37 = vld [vmem:[#allocation2 + $0x148] sm:$0xff] }
 0x31d   :  { %3222 = vmatpush.msra.mxu2 %v3002_v50 }
 0x31e   :  { %2645 = vmatpush.msra.mxu1 %v2353_v2  ;;  %2685 = vmatpush.msra.mxu3 %v2354_v12  ;;  %v2953_v2 = vld [vmem:[#allocation2 + $0x100] sm:$0xff]  ;;  %v2954_v12 = vld [vmem:[#allocation2 + $0x108] sm:$0xff] }
 0x31f   :  { %3223 = vmatpush.msra.mxu2 %v2994_v1  ;;  %v3161_v1 = vld [vmem:[#allocation2 + $0x780] sm:$0xff] }
 0x320   :  { %2646 = vmatpush.msra.mxu1 %v2345_v54  ;;  %2686 = vmatpush.msra.mxu3 %v2346_v49  ;;  %v2945_v54 = vld [vmem:[#allocation2 + $0xc0] sm:$0xff]  ;;  %v2946_v49 = vld [vmem:[#allocation2 + $0xc8] sm:$0xff] }
 0x321   :  { %3224 = vmatpush.msra.mxu2 %v2986_v58  ;;  %v2955_v58 = vld [vmem:[#allocation2 + $0x110] sm:$0xff] }
 0x322   :  { %2647 = vmatpush.msra.mxu1 %v2337_v9  ;;  %2687 = vmatpush.msra.mxu3 %v2338_v60  ;;  %v2937_v9 = vld [vmem:[#allocation2 + $0x80] sm:$0xff]  ;;  %v2938_v60 = vld [vmem:[#allocation2 + $0x88] sm:$0xff] }
 0x323   :  { %3225 = vmatpush.msra.mxu2 %v2978_v40  ;;  %v2956_v40 = vld [vmem:[#allocation2 + $0x118] sm:$0xff] }
 0x324   :  { %2648 = vmatpush.msra.mxu1 %v2329_v48  ;;  %2688 = vmatpush.msra.mxu3 %v2330_v16  ;;  %v2929_v48 = vld [vmem:[#allocation2 + $0x40] sm:$0xff]  ;;  %v2930_v16 = vld [vmem:[#allocation2 + $0x48] sm:$0xff] }
 0x325   :  { %2649 = vmatmul.f32.vlgmr.msra.gmra.mxu1 %v6773_v44  ;;  %2689 = vmatmul.f32.vlgmr.msra.gmra.mxu3 %v6773_v44 }
 0x326   :  { %2713 = vmatpush.msrb.mxu1 %v2451_v25  ;;  %2753 = vmatpush.msrb.mxu3 %v2452_v19  ;;  %v2921_v25 = vld [vmem:[#allocation2] sm:$0xff]  ;;  %v2922_v19 = vld [vmem:[#allocation2 + $0x8] sm:$0xff] }
 0x327   :  { %3226 = vmatpush.msra.mxu2 %v2970_v51  ;;  %v3153_v51 = vld [vmem:[#allocation2 + $0x740] sm:$0xff] }
 0x328   :  { %2714 = vmatpush.msrb.mxu1 %v2443_v63  ;;  %2754 = vmatpush.msrb.mxu3 %v2444_v62  ;;  %v3043_v63 = vld [vmem:[#allocation2 + $0x3d0] sm:$0xff]  ;;  %v3044_v62 = vld [vmem:[#allocation2 + $0x3d8] sm:$0xff] }
 0x329   :  { %3227 = vmatpush.msra.mxu2 %v2962_v37  ;;  %v2947_v37 = vld [vmem:[#allocation2 + $0xd0] sm:$0xff] }
 0x32a   :  { %2715 = vmatpush.msrb.mxu1 %v2435_v14  ;;  %2755 = vmatpush.msrb.mxu3 %v2436_v20  ;;  %v3035_v14 = vld [vmem:[#allocation2 + $0x390] sm:$0xff]  ;;  %v3036_v20 = vld [vmem:[#allocation2 + $0x398] sm:$0xff] }
 0x32b   :  { %3228 = vmatpush.msra.mxu2 %v2954_v12 }
 0x32c   :  { %2716 = vmatpush.msrb.mxu1 %v2427_v4  ;;  %2756 = vmatpush.msrb.mxu3 %v2428_v21  ;;  %v3027_v4 = vld [vmem:[#allocation2 + $0x350] sm:$0xff]  ;;  %v3028_v21 = vld [vmem:[#allocation2 + $0x358] sm:$0xff] }
 0x32d   :  { %3229 = vmatpush.msra.mxu2 %v2946_v49  ;;  %v3146_v49 = vld [vmem:[#allocation2 + $0x708] sm:$0xff] }
 0x32e   :  { %2717 = vmatpush.msrb.mxu1 %v2419_v22  ;;  %2757 = vmatpush.msrb.mxu3 %v2420_v26  ;;  %v3019_v22 = vld [vmem:[#allocation2 + $0x310] sm:$0xff]  ;;  %v3020_v26 = vld [vmem:[#allocation2 + $0x318] sm:$0xff] }
 0x32f   :  { %3230 = vmatpush.msra.mxu2 %v2938_v60  ;;  %v2940_v60 = vld [vmem:[#allocation2 + $0x98] sm:$0xff] }
 0x330   :  { %2718 = vmatpush.msrb.mxu1 %v2411_v27  ;;  %2758 = vmatpush.msrb.mxu3 %v2412_v29 }
 0x331   :  { %3231 = vmatpush.msra.mxu2 %v2930_v16 }
 0x332   :  { %2719 = vmatpush.msrb.mxu1 %v2403_v30  ;;  %2759 = vmatpush.msrb.mxu3 %v2404_v31  ;;  %v5831_v30 = vld [vmem:[%s7451_s0 + $0xc0] sm:$0xff] }
 0x333   :  { %3232 = vmatpush.msra.mxu2 %v2922_v19  ;;  %v3138_v19 = vld [vmem:[#allocation2 + $0x6c8] sm:$0xff] }
 0x334   :  { %2720 = vmatpush.msrb.mxu1 %v2395_v34  ;;  %2760 = vmatpush.msrb.mxu3 %v2396_v35  ;;  %v3011_v34 = vld [vmem:[#allocation2 + $0x2d0] sm:$0xff]  ;;  %v3012_v35 = vld [vmem:[#allocation2 + $0x2d8] sm:$0xff] }
 0x335   :  { %3297 = vmatpush.msrb.mxu2 %v3044_v62 }
 0x336   :  { %2721 = vmatpush.msrb.mxu1 %v2387_v17  ;;  %2761 = vmatpush.msrb.mxu3 %v2388_v15  ;;  %v3003_v15 = vld [vmem:[#allocation2 + $0x290] sm:$0xff] }
 0x337   :  { %3298 = vmatpush.msrb.mxu2 %v3036_v20 }
 0x338   :  { %2722 = vmatpush.msrb.mxu1 %v2379_v6  ;;  %2762 = vmatpush.msrb.mxu3 %v2380_v38  ;;  %v3004_v6 = vld [vmem:[#allocation2 + $0x298] sm:$0xff] }
 0x339   :  { %3299 = vmatpush.msrb.mxu2 %v3028_v21  ;;  %v3130_v21 = vld [vmem:[#allocation2 + $0x688] sm:$0xff] }
 0x33a   :  { %2723 = vmatpush.msrb.mxu1 %v2371_v42  ;;  %2763 = vmatpush.msrb.mxu3 %v2372_v47  ;;  %v2995_v47 = vld [vmem:[#allocation2 + $0x250] sm:$0xff] }
 0x33b   :  { %3300 = vmatpush.msrb.mxu2 %v3020_v26 }
 0x33c   :  { %2724 = vmatpush.msrb.mxu1 %v2363_v10  ;;  %2764 = vmatpush.msrb.mxu3 %v2364_v55  ;;  %v2996_v10 = vld [vmem:[#allocation2 + $0x258] sm:$0xff] }
 0x33d   :  { %3301 = vmatpush.msrb.mxu2 %v3012_v35 }
 0x33e   :  { %2725 = vmatpush.msrb.mxu1 %v2355_v57  ;;  %2765 = vmatpush.msrb.mxu3 %v2356_v18  ;;  %v5832_v57 = vld [vmem:[%s7451_s0 + $0xc8] sm:$0xff] }
 0x33f   :  { %3302 = vmatpush.msrb.mxu2 %v3004_v6  ;;  %v3113_v6 = vld [vmem:[#allocation2 + $0x600] sm:$0xff] }
 0x340   :  { %2726 = vmatpush.msrb.mxu1 %v2347_v61  ;;  %2766 = vmatpush.msrb.mxu3 %v2348_v11  ;;  %v2987_v11 = vld [vmem:[#allocation2 + $0x210] sm:$0xff] }
 0x341   :  { %3303 = vmatpush.msrb.mxu2 %v2996_v10  ;;  %v3105_v10 = vld [vmem:[#allocation2 + $0x5c0] sm:$0xff] }
 0x342   :  { %2727 = vmatpush.msrb.mxu1 %v2339_v59  ;;  %2767 = vmatpush.msrb.mxu3 %v2340_v0  ;;  %v2988_v59 = vld [vmem:[#allocation2 + $0x218] sm:$0xff] }
 0x343   :  { %3304 = vmatpush.msrb.mxu2 %v2988_v59 }
 0x344   :  { %2728 = vmatpush.msrb.mxu1 %v2331_v28  ;;  %2768 = vmatpush.msrb.mxu3 %v2332_v3  ;;  %v2979_v28 = vld [vmem:[#allocation2 + $0x1d0] sm:$0xff]  ;;  %v2980_v3 = vld [vmem:[#allocation2 + $0x1d8] sm:$0xff] }
 0x345   :  { %2729 = vmatmul.f32.vlgmr.msrb.gmra.mxu1 %v6773_v44  ;;  %2769 = vmatmul.f32.vlgmr.msrb.gmra.mxu3 %v6773_v44  ;;  %v3001_v44 = vld [vmem:[#allocation2 + $0x280] sm:$0xff] }
 0x346   :  { %3182 = vmatpush.msra.mxu0 %v3001_v44  ;;  %3305 = vmatpush.msrb.mxu2 %v2980_v3  ;;  %v2964_v44 = vld [vmem:[#allocation2 + $0x158] sm:$0xff] }
 0x347   :  { %3197 = vmatpush.msra.mxu1 %v3169_v8  ;;  %3237 = vmatpush.msra.mxu3 %v3170_v41  ;;  %v5835_v8 = vld [vmem:[%s7451_s0 + $0x120] sm:$0xff] }
 0x348   :  { %3183 = vmatpush.msra.mxu0 %v2993_v36  ;;  %3306 = vmatpush.msrb.mxu2 %v2972_v32  ;;  %v3089_v41 = vld [vmem:[#allocation2 + $0x540] sm:$0xff] }
 0x349   :  { %3198 = vmatpush.msra.mxu1 %v3161_v1  ;;  %v3081_v1 = vld [vmem:[#allocation2 + $0x500] sm:$0xff] }
 0x34a   :  { %3184 = vmatpush.msra.mxu0 %v2985_v23  ;;  %v2470_v27 = vpop.f32.mrf.mxu0  ;;  %3307 = vmatpush.msrb.mxu2 %v2964_v44  ;;  %v3162_v23 = vld [vmem:[#allocation2 + $0x788] sm:$0xff] }
 0x34b   :  { %3238 = vmatpush.msra.mxu3 %v3162_v23  ;;  %3199 = vmatpush.msra.mxu1 %v3153_v51  ;;  %v3082_v23 = vld [vmem:[#allocation2 + $0x508] sm:$0xff] }
 0x34c   :  { %3185 = vmatpush.msra.mxu0 %v2977_v46  ;;  %3308 = vmatpush.msrb.mxu2 %v2956_v40  ;;  %v3074_v51 = vld [vmem:[#allocation2 + $0x4c8] sm:$0xff] }
 0x34e   :  { %3186 = vmatpush.msra.mxu0 %v2969_v5 }
 0x350   :  { %3187 = vmatpush.msra.mxu0 %v2961_v56  ;;  %v2510_v38 = vpop.f32.mrf.mxu2  ;;  %v3154_v56 = vld [vmem:[#allocation2 + $0x748] sm:$0xff] }
 0x351   :  { %3239 = vmatpush.msra.mxu3 %v3154_v56 }
 0x352   :  { %3188 = vmatpush.msra.mxu0 %v2953_v2  ;;  %v2948_v2 = vld [vmem:[#allocation2 + $0xd8] sm:$0xff] }
 0x353   :  { %3309 = vmatpush.msrb.mxu2 %v2948_v2  ;;  %3240 = vmatpush.msra.mxu3 %v3146_v49 }
 0x354   :  { %3189 = vmatpush.msra.mxu0 %v2945_v54  ;;  %v3145_v54 = vld [vmem:[#allocation2 + $0x700] sm:$0xff] }
 0x355   :  { %3200 = vmatpush.msra.mxu1 %v3145_v54  ;;  %3310 = vmatpush.msrb.mxu2 %v2940_v60  ;;  %v5836_v60 = vld [vmem:[%s7451_s0 + $0x128] sm:$0xff] }
 0x356   :  { %3190 = vmatpush.msra.mxu0 %v2937_v9  ;;  %v2939_v9 = vld [vmem:[#allocation2 + $0x90] sm:$0xff]  ;;  %3241 = vmatpush.msra.mxu3 %v3138_v19 }
 0x358   :  { %3191 = vmatpush.msra.mxu0 %v2929_v48  ;;  %v2590_v53 = vpop.f32.mrf.mxu2  ;;  %3242 = vmatpush.msra.mxu3 %v3130_v21  ;;  %v3057_v21 = vld [vmem:[#allocation2 + $0x440] sm:$0xff] }
 0x35a   :  { %3192 = vmatpush.msra.mxu0 %v2921_v25  ;;  %v3137_v25 = vld [vmem:[#allocation2 + $0x6c0] sm:$0xff] }
 0x35b   :  { %3201 = vmatpush.msra.mxu1 %v3137_v25 }
 0x35c   :  { %3257 = vmatpush.msrb.mxu0 %v3043_v63  ;;  %v2931_v63 = vld [vmem:[#allocation2 + $0x50] sm:$0xff] }
 0x35e   :  { %3258 = vmatpush.msrb.mxu0 %v3035_v14  ;;  %v2932_v14 = vld [vmem:[#allocation2 + $0x58] sm:$0xff] }
 0x35f   :  { %3311 = vmatpush.msrb.mxu2 %v2932_v14 }
 0x360   :  { %3259 = vmatpush.msrb.mxu0 %v3027_v4  ;;  %v3129_v4 = vld [vmem:[#allocation2 + $0x680] sm:$0xff] }
 0x361   :  { %3202 = vmatpush.msra.mxu1 %v3129_v4 }
 0x362   :  { %3260 = vmatpush.msrb.mxu0 %v3019_v22  ;;  %v2923_v22 = vld [vmem:[#allocation2 + $0x10] sm:$0xff] }
 0x364   :  { %3261 = vmatpush.msrb.mxu0 %v3011_v34  ;;  %v3122_v34 = vld [vmem:[#allocation2 + $0x648] sm:$0xff] }
 0x365   :  { %3243 = vmatpush.msra.mxu3 %v3122_v34 }
 0x366   :  { %3262 = vmatpush.msrb.mxu0 %v3003_v15  ;;  %v5833_v15 = vld [vmem:[%s7451_s0 + $0xd0] sm:$0xff] }
 0x368   :  { %3263 = vmatpush.msrb.mxu0 %v2995_v47 }
 0x36a   :  { %3264 = vmatpush.msrb.mxu0 %v2987_v11 }
 0x36c   :  { %3265 = vmatpush.msrb.mxu0 %v2979_v28  ;;  %v3098_v28 = vld [vmem:[#allocation2 + $0x588] sm:$0xff] }
 0x36e   :  { %3266 = vmatpush.msrb.mxu0 %v2971_v33 }
 0x370   :  { %3267 = vmatpush.msrb.mxu0 %v2963_v43  ;;  %v3090_v43 = vld [vmem:[#allocation2 + $0x548] sm:$0xff] }
 0x372   :  { %3268 = vmatpush.msrb.mxu0 %v2955_v58 }
 0x374   :  { %3269 = vmatpush.msrb.mxu0 %v2947_v37 }
 0x376   :  { %3270 = vmatpush.msrb.mxu0 %v2939_v9 }
 0x378   :  { %3271 = vmatpush.msrb.mxu0 %v2931_v63 }
 0x37a   :  { %3272 = vmatpush.msrb.mxu0 %v2923_v22  ;;  %v3058_v22 = vld [vmem:[#allocation2 + $0x448] sm:$0xff] }
 0x381   :  { %v2490_v29 = vpop.f32.mrf.mxu1 }
 0x382   :  { %v2491_v31 = vadd.f32 %v2490_v29, %v2470_v27  ;;  %v2924_v27 = vld [vmem:[#allocation2 + $0x18] sm:$0xff]  ;;  %v2550_v29 = vpop.f32.mrf.mxu0 }
 0x383   :  { %3312 = vmatpush.msrb.mxu2 %v2924_v27 }
 0x384   :  { %v2783_v17 = vadd.f32 %v5831_v30, %v2491_v31  ;;  %v3121_v31 = vld [vmem:[#allocation2 + $0x640] sm:$0xff] }
 0x385   :  { %3203 = vmatpush.msra.mxu1 %v3121_v31  ;;  %v3050_v31 = vld [vmem:[#allocation2 + $0x408] sm:$0xff] }
 0x386   :  { %v2787_v42 = vsub.f32 0.0, %v2783_v17 }
 0x387   :  { %v2530_v55 = vpop.f32.mrf.mxu3  ;;  %3204 = vmatpush.msra.mxu1 %v3113_v6 }
 0x388   :  { %v2788_v18 = vmul.f32 1.442695, %v2787_v42  ;;  %v2531_v61 = vadd.f32 %v2530_v55, %v2510_v38  ;;  %v3114_v38 = vld [vmem:[#allocation2 + $0x608] sm:$0xff] }
 0x389   :  { %v2570_v20 = vpop.f32.mrf.mxu1  ;;  %3244 = vmatpush.msra.mxu3 %v3114_v38  ;;  %v3106_v55 = vld [vmem:[#allocation2 + $0x5c8] sm:$0xff]  ;;  %3205 = vmatpush.msra.mxu1 %v3105_v10  ;;  %v3164_v10 = vld [vmem:[#allocation2 + $0x798] sm:$0xff] }
 0x38a   :  { %5976 = vpow2.f32 %v2788_v18  ;;  %v2784_v0 = vadd.f32 %v5832_v57, %v2531_v61  ;;  %v2571_v35 = vadd.f32 %v2570_v20, %v2550_v29 }
 0x38b   :  { %3245 = vmatpush.msra.mxu3 %v3106_v55 }
 0x38c   :  { %v2806_v7 = vsub.f32 0.0, %v2784_v0  ;;  %v2785_v18 = vadd.f32 %v5833_v15, %v2571_v35  ;;  %v3097_v0 = vld [vmem:[#allocation2 + $0x580] sm:$0xff] }
 0x38d   :  { %3206 = vmatpush.msra.mxu1 %v3097_v0  ;;  %3246 = vmatpush.msra.mxu3 %v3098_v28  ;;  %v3148_v0 = vld [vmem:[#allocation2 + $0x718] sm:$0xff] }
 0x38e   :  { %v2807_v24 = vmul.f32 1.442695, %v2806_v7  ;;  %v2630_v7 = vpop.f32.mrf.mxu0 }
 0x38f   :  { %v2610_v45 = vpop.f32.mrf.mxu3  ;;  %3207 = vmatpush.msra.mxu1 %v3089_v41  ;;  %3247 = vmatpush.msra.mxu3 %v3090_v43  ;;  %v3037_v41 = vld [vmem:[#allocation2 + $0x3a0] sm:$0xff] }
 0x390   :  { %v5977_v50 = vpop.eup %5976  ;;  %5978 = vpow2.f32 %v2807_v24  ;;  %v2611_v36 = vadd.f32 %v2610_v45, %v2590_v53  ;;  %v3131_v45 = vld [vmem:[#allocation2 + $0x690] sm:$0xff] }
 0x391   :  { %v6798_v46 = vadd.f32 1.0, %v5977_v50  ;;  %3208 = vmatpush.msra.mxu1 %v3081_v1  ;;  %3248 = vmatpush.msra.mxu3 %v3082_v23  ;;  %v3123_v1 = vld [vmem:[#allocation2 + $0x650] sm:$0xff]  ;;  %v3124_v23 = vld [vmem:[#allocation2 + $0x658] sm:$0xff] }
 0x392   :  { %v2786_v5 = vadd.f32 %v5834_v39, %v2611_v36 }
 0x393   :  { %5980 = vrcp.f32 %v6798_v46  ;;  %v2802_v3 = vand.u32 2147483648, %v6798_v46  ;;  %vm2796_vm9 = vweird.f32 %v6798_v46  ;;  %v2800_v32 = vand.u32 2147483647, %v6798_v46  ;;  %3249 = vmatpush.msra.mxu3 %v3074_v51  ;;  %v3115_v51 = vld [vmem:[#allocation2 + $0x610] sm:$0xff] }
 0x394   :  { %v2826_v12 = vsub.f32 0.0, %v2786_v5  ;;  %v3073_v5 = vld [vmem:[#allocation2 + $0x4c0] sm:$0xff] }
 0x395   :  { %v2803_v58 = vor.u32 1.1754944e-38, %v2802_v3  ;;  %vm2801_vm13 = vcmp.eq.f32.partialorder %v2800_v32, 8.507059e+37  ;;  %3209 = vmatpush.msra.mxu1 %v3073_v5  ;;  %v3046_v32 = vld [vmem:[#allocation2 + $0x3e8] sm:$0xff] }
 0x396   :  { %v5979_v48 = vpop.eup %5978  ;;  %v2827_v16 = vmul.f32 1.442695, %v2826_v12  ;;  %v2670_v12 = vpop.f32.mrf.mxu2  ;;  %v3022_v5 = vld [vmem:[#allocation2 + $0x328] sm:$0xff] }
 0x397   :  { %v6801_v62 = vadd.f32 1.0, %v5979_v48  ;;  %v3065_v48 = vld [vmem:[#allocation2 + $0x480] sm:$0xff] }
 0x398   :  { %5982 = vpow2.f32 %v2827_v16  ;;  %v3066_v16 = vld [vmem:[#allocation2 + $0x488] sm:$0xff]  ;;  %3210 = vmatpush.msra.mxu1 %v3065_v48  ;;  %v3100_v48 = vld [vmem:[#allocation2 + $0x598] sm:$0xff] }
 0x399   :  { %v6803_v26 = vpop.eup %5980  ;;  %5984 = vrcp.f32 %v6801_v62  ;;  %v2821_v53 = vand.u32 2147483648, %v6801_v62  ;;  %v2819_v36 = vand.u32 2147483647, %v6801_v62  ;;  %vm2815_vm12 = vweird.f32 %v6801_v62  ;;  %3250 = vmatpush.msra.mxu3 %v3066_v16  ;;  %v2997_v16 = vld [vmem:[#allocation2 + $0x260] sm:$0xff] }
 0x39a   :  { %v2792_v30 = vmul.f32 %v6803_v26, %v6798_v46  ;;  %vm2797_vm8 = vweird.f32 %v6803_v26  ;;  %3211 = vmatpush.msra.mxu1 %v3057_v21  ;;  %v3084_v21 = vld [vmem:[#allocation2 + $0x518] sm:$0xff] }
 0x39b   :  { %vm6827_vm10 = vmor %vm2796_vm9, %vm2797_vm8  ;;  %v2822_v37 = vor.u32 1.1754944e-38, %v2821_v53  ;;  %vm2820_vm15 = vcmp.eq.f32.partialorder %v2819_v36, 8.507059e+37  ;;  %3251 = vmatpush.msra.mxu3 %v3058_v22  ;;  %v3038_v53 = vld [vmem:[#allocation2 + $0x3a8] sm:$0xff] }
 0x39c   :  { %v2793_v17 = vsub.f32 1.0, %v2792_v30  ;;  %v3049_v30 = vld [vmem:[#allocation2 + $0x400] sm:$0xff]  ;;  %v3030_v36 = vld [vmem:[#allocation2 + $0x368] sm:$0xff] }
 0x39d   :  { %3212 = vmatpush.msra.mxu1 %v3049_v30  ;;  %3252 = vmatpush.msra.mxu3 %v3050_v31  ;;  %v3075_v30 = vld [vmem:[#allocation2 + $0x4d0] sm:$0xff]  ;;  %v3076_v31 = vld [vmem:[#allocation2 + $0x4d8] sm:$0xff] }
 0x39e   :  { %v5983_v42 = vpop.eup %5982  ;;  %v2794_v47 = vmul.f32 %v6803_v26, %v2793_v17  ;;  %v3172_v17 = vld [vmem:[#allocation2 + $0x7d8] sm:$0xff] }
 0x39f   :  { %v5985_v57 = vpop.eup %5984  ;;  %v6812_v61 = vadd.f32 1.0, %v5983_v42  ;;  %3317 = vmatpush.msrb.mxu3 %v3172_v17 }
 0x3a0   :  { %v2811_v11 = vmul.f32 %v5985_v57, %v6801_v62  ;;  %v2795_v59 = vadd.f32 %v6803_v26, %v2794_v47  ;;  %vm2816_vm11 = vweird.f32 %v5985_v57  ;;  %v3163_v47 = vld [vmem:[#allocation2 + $0x790] sm:$0xff] }
 0x3a1   :  { %5986 = vrcp.f32 %v6812_v61  ;;  %vm2817_vm14 = vmor %vm2815_vm12, %vm2816_vm11  ;;  %v2841_v6 = vand.u32 2147483648, %v6812_v61  ;;  %vm2835_vm1 = vweird.f32 %v6812_v61  ;;  %v2839_v38 = vand.u32 2147483647, %v6812_v61  ;;  %3318 = vmatpush.msrb.mxu3 %v3164_v10  ;;  %v3068_v10 = vld [vmem:[#allocation2 + $0x498] sm:$0xff] }
 0x3a2   :  { %v2812_v33 = vsub.f32 1.0, %v2811_v11  ;;  %v2650_v24 = vpop.f32.mrf.mxu1  ;;  %5988 = vtanh.f32 %v2785_v18  ;;  %v2799_v50 = vsel %vm6827_vm10, %v6803_v26, %v2795_v59  ;;  %v3155_v18 = vld [vmem:[#allocation2 + $0x750] sm:$0xff]  ;;  %v3156_v11 = vld [vmem:[#allocation2 + $0x758] sm:$0xff] }
 0x3a3   :  { %v2651_v39 = vadd.f32 %v2650_v24, %v2630_v7  ;;  %v2804_v2 = vsel %vm2801_vm13, %v2803_v58, %v2799_v50  ;;  %v2842_v59 = vor.u32 1.1754944e-38, %v2841_v6  ;;  %3319 = vmatpush.msrb.mxu3 %v3156_v11  ;;  %vm2840_vm3 = vcmp.eq.f32.partialorder %v2839_v38, 8.507059e+37  ;;  %v3045_v7 = vld [vmem:[#allocation2 + $0x3e0] sm:$0xff]  ;;  %v3139_v24 = vld [vmem:[#allocation2 + $0x6d0] sm:$0xff]  ;;  %v2710_v11 = vpop.f32.mrf.mxu0 }
 0x3a4   :  { %v2813_v44 = vmul.f32 %v5985_v57, %v2812_v33  ;;  %v3029_v50 = vld [vmem:[#allocation2 + $0x360] sm:$0xff] }
 0x3a5   :  { %v2850_v46 = vadd.f32 %v5835_v8, %v2651_v39  ;;  %3320 = vmatpush.msrb.mxu3 %v3148_v0  ;;  %v3140_v8 = vld [vmem:[#allocation2 + $0x6d8] sm:$0xff] }
 0x3a6   :  { %v2814_v40 = vadd.f32 %v5985_v57, %v2813_v44  ;;  %v3132_v39 = vld [vmem:[#allocation2 + $0x698] sm:$0xff] }
 0x3a7   :  { %v6836_v56 = vpop.eup %5986  ;;  %v2854_v63 = vsub.f32 0.0, %v2850_v46  ;;  %3321 = vmatpush.msrb.mxu3 %v3140_v8  ;;  %v3021_v46 = vld [vmem:[#allocation2 + $0x320] sm:$0xff]  ;;  %v5837_v8 = vld [vmem:[%s7451_s0 + $0x130] sm:$0xff] }
 0x3a8   :  { %v2818_v54 = vsel %vm2817_vm14, %v5985_v57, %v2814_v40  ;;  %v2831_v49 = vmul.f32 %v6836_v56, %v6812_v61  ;;  %v2690_v9 = vpop.f32.mrf.mxu3  ;;  %v5989_v25 = vpop.eup %5988  ;;  %vm2836_vm0 = vweird.f32 %v6836_v56  ;;  %v3147_v61 = vld [vmem:[#allocation2 + $0x710] sm:$0xff] }
 0x3a9   :  { %v2823_v19 = vsel %vm2820_vm15, %v2822_v37, %v2818_v54  ;;  %v2691_v62 = vadd.f32 %v2690_v9, %v2670_v12  ;;  %v2846_v20 = vmul.f32 %v5989_v25, %v2804_v2  ;;  %v2855_v34 = vmul.f32 1.442695, %v2854_v63  ;;  %vm6856_vm2 = vmor %vm2835_vm1, %vm2836_vm0  ;;  %3322 = vmatpush.msrb.mxu3 %v3132_v39  ;;  %v3013_v37 = vld [vmem:[#allocation2 + $0x2e0] sm:$0xff]  ;;  %v3014_v2 = vld [vmem:[#allocation2 + $0x2e8] sm:$0xff] }
 0x3aa   :  { %v2845_v14 = vmul.f32 %v2823_v19, %v6701_v13  ;;  %v2832_v4 = vsub.f32 1.0, %v2831_v49  ;;  %v3171_v13 = vld [vmem:[#allocation2 + $0x7d0] sm:$0xff]  ;;  %v3108_v54 = vld [vmem:[#allocation2 + $0x5d8] sm:$0xff]  ;;  %v3005_v49 = vld [vmem:[#allocation2 + $0x2a0] sm:$0xff] }
 0x3ab   :  { %v2851_v26 = vadd.f32 %v5836_v60, %v2691_v62  ;;  %3277 = vmatpush.msrb.mxu1 %v3171_v13  ;;  %3323 = vmatpush.msrb.mxu3 %v3124_v23  ;;  %v3107_v12 = vld [vmem:[#allocation2 + $0x5d0] sm:$0xff]  ;;  %v3006_v9 = vld [vmem:[#allocation2 + $0x2a8] sm:$0xff]  ;;  %v3092_v63 = vld [vmem:[#allocation2 + $0x558] sm:$0xff] }
 0x3ac   :  { %v6845_v27 = vadd.f32 %v2846_v20, %v2845_v14  ;;  %v2833_v29 = vmul.f32 %v6836_v56, %v2832_v4  ;;  %v3099_v60 = vld [vmem:[#allocation2 + $0x590] sm:$0xff]  ;;  %v2998_v25 = vld [vmem:[#allocation2 + $0x268] sm:$0xff]  ;;  %v2989_v62 = vld [vmem:[#allocation2 + $0x220] sm:$0xff] }
 0x3ad   :  { %v2873_v35 = vsub.f32 0.0, %v2851_v26  ;;  %3278 = vmatpush.msrb.mxu1 %v3163_v47  ;;  %v3091_v19 = vld [vmem:[#allocation2 + $0x550] sm:$0xff]  ;;  %v2990_v14 = vld [vmem:[#allocation2 + $0x228] sm:$0xff]  ;;  %v2981_v26 = vld [vmem:[#allocation2 + $0x1e0] sm:$0xff] }
 0x3ae   :  { %5990 = vtanh.f32 %v6845_v27  ;;  %v2834_v15 = vadd.f32 %v6836_v56, %v2833_v29  ;;  %v3083_v4 = vld [vmem:[#allocation2 + $0x510] sm:$0xff]  ;;  %v2982_v29 = vld [vmem:[#allocation2 + $0x1e8] sm:$0xff] }
 0x3af   :  { %v2874_v42 = vmul.f32 1.442695, %v2873_v35  ;;  %5992 = vpow2.f32 %v2855_v34  ;;  %3279 = vmatpush.msrb.mxu1 %v3155_v18  ;;  %v2750_v34 = vpop.f32.mrf.mxu2  ;;  %v2973_v35 = vld [vmem:[#allocation2 + $0x1a0] sm:$0xff]  ;;  %v2974_v13 = vld [vmem:[#allocation2 + $0x1a8] sm:$0xff]  ;;  %v3067_v47 = vld [vmem:[#allocation2 + $0x490] sm:$0xff] }
 0x3b0   :  { %v2838_v57 = vsel %vm6856_vm2, %v6836_v56, %v2834_v15  ;;  %v3116_v56 = vld [vmem:[#allocation2 + $0x618] sm:$0xff]  ;;  %v2966_v18 = vld [vmem:[#allocation2 + $0x168] sm:$0xff] }
 0x3b1   :  { %5994 = vpow2.f32 %v2874_v42  ;;  %v2843_v3 = vsel %vm2840_vm3, %v2842_v59, %v2838_v57  ;;  %3280 = vmatpush.msrb.mxu1 %v3147_v61  ;;  %3324 = vmatpush.msrb.mxu3 %v3116_v56  ;;  %v5838_v42 = vld [vmem:[%s7451_s0 + $0x138] sm:$0xff]  ;;  %v2965_v57 = vld [vmem:[#allocation2 + $0x160] sm:$0xff]  ;;  %v3059_v59 = vld [vmem:[#allocation2 + $0x450] sm:$0xff] }
 0x3b2   :  { %v3060_v61 = vld [vmem:[#allocation2 + $0x458] sm:$0xff]  ;;  %v2950_v39 = vld [vmem:[#allocation2 + $0xe8] sm:$0xff]  ;;  %v2925_v56 = vld [vmem:[#allocation2 + $0x20] sm:$0xff] }
 0x3b3   :  { %3281 = vmatpush.msrb.mxu1 %v3139_v24  ;;  %3325 = vmatpush.msrb.mxu3 %v3108_v54 }
 0x3b4   :  { %v5991_v28 = vpop.eup %5990 }
 0x3b5   :  { %v6863_v33 = vmul.f32 %v5991_v28, %v2843_v3  ;;  %v5993_v43 = vpop.eup %5992  ;;  %3282 = vmatpush.msrb.mxu1 %v3131_v45  ;;  %3326 = vmatpush.msrb.mxu3 %v3100_v48  ;;  %v2957_v3 = vld [vmem:[#allocation2 + $0x120] sm:$0xff] }
 0x3b6   :  { %v6871_v58 = vadd.f32 1.0, %v5993_v43  ;;  %v3052_v43 = vld [vmem:[#allocation2 + $0x418] sm:$0xff]  ;;  %v2949_v45 = vld [vmem:[#allocation2 + $0xe0] sm:$0xff] }
 0x3b7   :  { %5839 = vst [vmem:[%s7453_s2 + $0x30] sm:$0xff] %v6863_v33  ;;  %3193 = vmatmul.f32.vlgmr.msra.gmra.mxu0 %v6863_v33  ;;  %3233 = vmatmul.f32.vlgmr.msra.gmra.mxu2 %v6863_v33  ;;  %v5995_v44 = vpop.eup %5994  ;;  %v3141_v48 = vld [vmem:[#allocation2 + $0x6e0] sm:$0xff] }
 0x3b8   :  { %3337 = vmatpush.msra.mxu0 %v3045_v7  ;;  %3377 = vmatpush.msra.mxu2 %v3046_v32  ;;  %v6873_v40 = vadd.f32 1.0, %v5995_v44  ;;  %5996 = vrcp.f32 %v6871_v58  ;;  %v2958_v7 = vld [vmem:[#allocation2 + $0x128] sm:$0xff]  ;;  %vm2863_vm6 = vweird.f32 %v6871_v58 }
 0x3b9   :  { %3283 = vmatpush.msrb.mxu1 %v3123_v1  ;;  %3327 = vmatpush.msrb.mxu3 %v3092_v63  ;;  %v2942_v1 = vld [vmem:[#allocation2 + $0xa8] sm:$0xff]  ;;  %v3133_v63 = vld [vmem:[#allocation2 + $0x6a0] sm:$0xff] }
 0x3ba   :  { %3338 = vmatpush.msra.mxu0 %v3037_v41  ;;  %3378 = vmatpush.msra.mxu2 %v3038_v53  ;;  %5998 = vrcp.f32 %v6873_v40  ;;  %v3051_v41 = vld [vmem:[#allocation2 + $0x410] sm:$0xff]  ;;  %v2888_v54 = vand.u32 2147483648, %v6873_v40  ;;  %vm2882_vm7 = vweird.f32 %v6873_v40 }
 0x3bb   :  { %3284 = vmatpush.msrb.mxu1 %v3115_v51  ;;  %3328 = vmatpush.msrb.mxu3 %v3084_v21  ;;  %v2934_v51 = vld [vmem:[#allocation2 + $0x68] sm:$0xff] }
 0x3bc   :  { %3339 = vmatpush.msra.mxu0 %v3029_v50  ;;  %3379 = vmatpush.msra.mxu2 %v3030_v36  ;;  %v2941_v36 = vld [vmem:[#allocation2 + $0xa0] sm:$0xff] }
 0x3bd   :  { %3285 = vmatpush.msrb.mxu1 %v3107_v12  ;;  %3329 = vmatpush.msrb.mxu3 %v3076_v31  ;;  %v3032_v31 = vld [vmem:[#allocation2 + $0x378] sm:$0xff] }
 0x3be   :  { %3340 = vmatpush.msra.mxu0 %v3021_v46  ;;  %3380 = vmatpush.msra.mxu2 %v3022_v5  ;;  %v6879_v20 = vpop.eup %5996  ;;  %v2933_v5 = vld [vmem:[#allocation2 + $0x60] sm:$0xff] }
 0x3bf   :  { %3273 = vmatmul.f32.vlgmr.msrb.gmra.mxu0 %v6863_v33  ;;  %3313 = vmatmul.f32.vlgmr.msrb.gmra.mxu2 %v6863_v33  ;;  %v2859_v17 = vmul.f32 %v6879_v20, %v6871_v58  ;;  %vm2864_vm4 = vweird.f32 %v6879_v20 }
 0x3c0   :  { %3341 = vmatpush.msra.mxu0 %v3013_v37  ;;  %3381 = vmatpush.msra.mxu2 %v3014_v2  ;;  %v6881_v22 = vpop.eup %5998  ;;  %v2926_v37 = vld [vmem:[#allocation2 + $0x28] sm:$0xff]  ;;  %vm6905_vm8 = vmor %vm2863_vm6, %vm2864_vm4 }
 0x3c1   :  { %3286 = vmatpush.msrb.mxu1 %v3099_v60  ;;  %v2878_v15 = vmul.f32 %v6881_v22, %v6873_v40  ;;  %3330 = vmatpush.msrb.mxu3 %v3068_v10  ;;  %v2860_v32 = vsub.f32 1.0, %v2859_v17  ;;  %vm2883_vm5 = vweird.f32 %v6881_v22  ;;  %v3048_v60 = vld [vmem:[#allocation2 + $0x3f8] sm:$0xff] }
 0x3c2   :  { %3342 = vmatpush.msra.mxu0 %v3005_v49  ;;  %3382 = vmatpush.msra.mxu2 %v3006_v9  ;;  %v2730_v6 = vpop.f32.mrf.mxu1  ;;  %v2869_v49 = vand.u32 2147483648, %v6871_v58  ;;  %v3047_v9 = vld [vmem:[#allocation2 + $0x3f0] sm:$0xff]  ;;  %vm6913_vm9 = vmor %vm2882_vm7, %vm2883_vm5 }
 0x3c3   :  { %3287 = vmatpush.msrb.mxu1 %v3091_v19  ;;  %v2731_v0 = vadd.f32 %v2730_v6, %v2710_v11  ;;  %v2879_v24 = vsub.f32 1.0, %v2878_v15  ;;  %3331 = vmatpush.msrb.mxu3 %v3060_v61  ;;  %v2861_v46 = vmul.f32 %v6879_v20, %v2860_v32  ;;  %v3016_v15 = vld [vmem:[#allocation2 + $0x2f8] sm:$0xff] }
 0x3c4   :  { %3343 = vmatpush.msra.mxu0 %v2997_v16  ;;  %3383 = vmatpush.msra.mxu2 %v2998_v25  ;;  %v2867_v16 = vand.u32 2147483647, %v6871_v58  ;;  %v2886_v25 = vand.u32 2147483647, %v6873_v40  ;;  %v2992_v61 = vld [vmem:[#allocation2 + $0x238] sm:$0xff] }
 0x3c5   :  { %3288 = vmatpush.msrb.mxu1 %v3083_v4  ;;  %v2852_v44 = vadd.f32 %v5837_v8, %v2731_v0  ;;  %3332 = vmatpush.msrb.mxu3 %v3052_v43  ;;  %v2880_v23 = vmul.f32 %v6881_v22, %v2879_v24  ;;  %v2862_v2 = vadd.f32 %v6879_v20, %v2861_v46  ;;  %v2975_v24 = vld [vmem:[#allocation2 + $0x1b0] sm:$0xff]  ;;  %v2976_v8 = vld [vmem:[#allocation2 + $0x1b8] sm:$0xff] }
 0x3c6   :  { %3344 = vmatpush.msra.mxu0 %v2989_v62  ;;  %3384 = vmatpush.msra.mxu2 %v2990_v14  ;;  %v3039_v62 = vld [vmem:[#allocation2 + $0x3b0] sm:$0xff]  ;;  %v3040_v14 = vld [vmem:[#allocation2 + $0x3b8] sm:$0xff]  ;;  %vm2868_vm10 = vcmp.eq.f32.partialorder %v2867_v16, 8.507059e+37  ;;  %vm2887_vm11 = vcmp.eq.f32.partialorder %v2886_v25, 8.507059e+37  ;;  %v3142_v16 = vld [vmem:[#allocation2 + $0x6e8] sm:$0xff] }
 0x3c7   :  { %3289 = vmatpush.msrb.mxu1 %v3075_v30  ;;  %v2881_v12 = vadd.f32 %v6881_v22, %v2880_v23  ;;  %v2866_v58 = vsel %vm6905_vm8, %v6879_v20, %v2862_v2  ;;  %v3031_v30 = vld [vmem:[#allocation2 + $0x370] sm:$0xff]  ;;  %v2960_v46 = vld [vmem:[#allocation2 + $0x138] sm:$0xff]  ;;  %v3157_v2 = vld [vmem:[#allocation2 + $0x760] sm:$0xff] }
 0x3c8   :  { %v2770_v38 = vpop.f32.mrf.mxu3  ;;  %3345 = vmatpush.msra.mxu0 %v2981_v26  ;;  %3385 = vmatpush.msra.mxu2 %v2982_v29  ;;  %v2889_v26 = vor.u32 1.1754944e-38, %v2888_v54  ;;  %v2870_v29 = vor.u32 1.1754944e-38, %v2869_v49  ;;  %v3023_v20 = vld [vmem:[#allocation2 + $0x330] sm:$0xff]  ;;  %v2944_v49 = vld [vmem:[#allocation2 + $0xb8] sm:$0xff] }
 0x3c9   :  { %v2771_v55 = vadd.f32 %v2770_v38, %v2750_v34  ;;  %3290 = vmatpush.msrb.mxu1 %v3067_v47  ;;  %v2885_v40 = vsel %vm6913_vm9, %v6881_v22, %v2881_v12  ;;  %v3015_v22 = vld [vmem:[#allocation2 + $0x2f0] sm:$0xff]  ;;  %v3158_v12 = vld [vmem:[#allocation2 + $0x768] sm:$0xff] }
 0x3ca   :  { %3346 = vmatpush.msra.mxu0 %v2973_v35  ;;  %3386 = vmatpush.msra.mxu2 %v2974_v13  ;;  %v2871_v34 = vsel %vm2868_vm10, %v2870_v29, %v2866_v58  ;;  %v2890_v35 = vsel %vm2887_vm11, %v2889_v26, %v2885_v40  ;;  %v3024_v13 = vld [vmem:[#allocation2 + $0x338] sm:$0xff]  ;;  %v3007_v38 = vld [vmem:[#allocation2 + $0x2b0] sm:$0xff]  ;;  %v3125_v40 = vld [vmem:[#allocation2 + $0x660] sm:$0xff] }
 0x3cb   :  { %v2853_v28 = vadd.f32 %v5838_v42, %v2771_v55  ;;  %3291 = vmatpush.msrb.mxu1 %v3059_v59  ;;  %v2912_v6 = vmul.f32 %v2890_v35, %v6770_v52  ;;  %v3008_v42 = vld [vmem:[#allocation2 + $0x2b8] sm:$0xff]  ;;  %v2991_v59 = vld [vmem:[#allocation2 + $0x230] sm:$0xff]  ;;  %v3118_v26 = vld [vmem:[#allocation2 + $0x628] sm:$0xff] }
 0x3cc   :  { %3347 = vmatpush.msra.mxu0 %v2965_v57  ;;  %3387 = vmatpush.msra.mxu2 %v2966_v18  ;;  %v2999_v57 = vld [vmem:[#allocation2 + $0x270] sm:$0xff]  ;;  %v3000_v18 = vld [vmem:[#allocation2 + $0x278] sm:$0xff]  ;;  %v3109_v29 = vld [vmem:[#allocation2 + $0x5e0] sm:$0xff] }
 0x3cd   :  { %v2893_v53 = vsub.f32 0.0, %v2853_v28  ;;  %3292 = vmatpush.msrb.mxu1 %v3051_v41  ;;  %v2959_v23 = vld [vmem:[#allocation2 + $0x130] sm:$0xff]  ;;  %v2928_v58 = vld [vmem:[#allocation2 + $0x38] sm:$0xff]  ;;  %v3093_v35 = vld [vmem:[#allocation2 + $0x560] sm:$0xff] }
 0x3ce   :  { %3348 = vmatpush.msra.mxu0 %v2957_v3  ;;  %3388 = vmatpush.msra.mxu2 %v2958_v7  ;;  %v2983_v3 = vld [vmem:[#allocation2 + $0x1f0] sm:$0xff]  ;;  %v2984_v7 = vld [vmem:[#allocation2 + $0x1f8] sm:$0xff] }
 0x3cf   :  { %v2894_v50 = vmul.f32 1.442695, %v2893_v53  ;;  %v2967_v53 = vld [vmem:[#allocation2 + $0x170] sm:$0xff] }
 0x3d0   :  { %3349 = vmatpush.msra.mxu0 %v2949_v45  ;;  %3389 = vmatpush.msra.mxu2 %v2950_v39  ;;  %v2968_v45 = vld [vmem:[#allocation2 + $0x178] sm:$0xff]  ;;  %v2943_v54 = vld [vmem:[#allocation2 + $0xb0] sm:$0xff] }
 0x3d1   :  { %6000 = vpow2.f32 %v2894_v50  ;;  %v2935_v25 = vld [vmem:[#allocation2 + $0x70] sm:$0xff] }
 0x3d2   :  { %3350 = vmatpush.msra.mxu0 %v2941_v36  ;;  %3390 = vmatpush.msra.mxu2 %v2942_v1  ;;  %6002 = vtanh.f32 %v2852_v44  ;;  %v3173_v36 = vld [vmem:[#allocation2 + $0x7e0] sm:$0xff]  ;;  %v3174_v1 = vld [vmem:[#allocation2 + $0x7e8] sm:$0xff] }
 0x3d4   :  { %3351 = vmatpush.msra.mxu0 %v2933_v5  ;;  %3391 = vmatpush.msra.mxu2 %v2934_v51  ;;  %v3165_v5 = vld [vmem:[#allocation2 + $0x7a0] sm:$0xff]  ;;  %v3166_v51 = vld [vmem:[#allocation2 + $0x7a8] sm:$0xff] }
 0x3d6   :  { %3352 = vmatpush.msra.mxu0 %v2925_v56  ;;  %3392 = vmatpush.msra.mxu2 %v2926_v37  ;;  %v2951_v56 = vld [vmem:[#allocation2 + $0xf0] sm:$0xff]  ;;  %v2952_v37 = vld [vmem:[#allocation2 + $0xf8] sm:$0xff] }
 0x3d7   :  { %v6001_v19 = vpop.eup %6000  ;;  %3353 = vmatmul.f32.vlgmr.msra.gmra.mxu0 %v6863_v33  ;;  %3393 = vmatmul.f32.vlgmr.msra.gmra.mxu2 %v6863_v33 }
 0x3d8   :  { %v2896_v4 = vadd.f32 1.0, %v6001_v19  ;;  %3417 = vmatpush.msrb.mxu0 %v3047_v9  ;;  %3457 = vmatpush.msrb.mxu2 %v3048_v60  ;;  %v6003_v21 = vpop.eup %6002  ;;  %v3149_v9 = vld [vmem:[#allocation2 + $0x720] sm:$0xff]  ;;  %v3150_v60 = vld [vmem:[#allocation2 + $0x728] sm:$0xff]  ;;  %v2936_v19 = vld [vmem:[#allocation2 + $0x78] sm:$0xff] }
 0x3d9   :  { %v2913_v17 = vmul.f32 %v6003_v21, %v2871_v34  ;;  %v3117_v21 = vld [vmem:[#allocation2 + $0x620] sm:$0xff]  ;;  %v3102_v34 = vld [vmem:[#allocation2 + $0x5a8] sm:$0xff] }
 0x3da   :  { %6004 = vrcp.f32 %v2896_v4  ;;  %3418 = vmatpush.msrb.mxu0 %v3039_v62  ;;  %3458 = vmatpush.msrb.mxu2 %v3040_v14  ;;  %v2908_v52 = vand.u32 2147483648, %v2896_v4  ;;  %v2906_v28 = vand.u32 2147483647, %v2896_v4  ;;  %vm2902_vm13 = vweird.f32 %v2896_v4  ;;  %v3134_v62 = vld [vmem:[#allocation2 + $0x6a8] sm:$0xff]  ;;  %v2927_v14 = vld [vmem:[#allocation2 + $0x30] sm:$0xff] }
 0x3db   :  { %v6926_v10 = vadd.f32 %v2913_v17, %v2912_v6  ;;  %v3086_v17 = vld [vmem:[#allocation2 + $0x528] sm:$0xff] }
 0x3dc   :  { %3419 = vmatpush.msrb.mxu0 %v3031_v30  ;;  %3459 = vmatpush.msrb.mxu2 %v3032_v31  ;;  %v2909_v41 = vor.u32 1.1754944e-38, %v2908_v52  ;;  %vm2907_vm15 = vcmp.eq.f32.partialorder %v2906_v28, 8.507059e+37  ;;  %v3110_v30 = vld [vmem:[#allocation2 + $0x5e8] sm:$0xff]  ;;  %v3101_v31 = vld [vmem:[#allocation2 + $0x5a0] sm:$0xff]  ;;  %v3160_v52 = vld [vmem:[#allocation2 + $0x778] sm:$0xff] }
 0x3dd   :  { %6006 = vtanh.f32 %v6926_v10  ;;  %v3070_v6 = vld [vmem:[#allocation2 + $0x4a8] sm:$0xff]  ;;  %v3152_v28 = vld [vmem:[#allocation2 + $0x738] sm:$0xff] }
 0x3de   :  { %3420 = vmatpush.msrb.mxu0 %v3023_v20  ;;  %3460 = vmatpush.msrb.mxu2 %v3024_v13  ;;  %v3094_v20 = vld [vmem:[#allocation2 + $0x568] sm:$0xff]  ;;  %v3085_v13 = vld [vmem:[#allocation2 + $0x520] sm:$0xff] }
 0x3e0   :  { %v6005_v47 = vpop.eup %6004  ;;  %3421 = vmatpush.msrb.mxu0 %v3015_v22  ;;  %3461 = vmatpush.msrb.mxu2 %v3016_v15  ;;  %v3078_v22 = vld [vmem:[#allocation2 + $0x4e8] sm:$0xff]  ;;  %v3069_v15 = vld [vmem:[#allocation2 + $0x4a0] sm:$0xff] }
 0x3e1   :  { %v2898_v55 = vmul.f32 %v6005_v47, %v2896_v4  ;;  %vm2903_vm12 = vweird.f32 %v6005_v47  ;;  %v3126_v4 = vld [vmem:[#allocation2 + $0x668] sm:$0xff] }
 0x3e2   :  { %3422 = vmatpush.msrb.mxu0 %v3007_v38  ;;  %3462 = vmatpush.msrb.mxu2 %v3008_v42  ;;  %vm2904_vm14 = vmor %vm2902_vm13, %vm2903_vm12  ;;  %v3061_v38 = vld [vmem:[#allocation2 + $0x460] sm:$0xff]  ;;  %v3062_v42 = vld [vmem:[#allocation2 + $0x468] sm:$0xff] }
 0x3e3   :  { %v2899_v11 = vsub.f32 1.0, %v2898_v55  ;;  %v6007_v39 = vpop.eup %6006  ;;  %v3054_v55 = vld [vmem:[#allocation2 + $0x428] sm:$0xff] }
 0x3e4   :  { %3423 = vmatpush.msrb.mxu0 %v2999_v57  ;;  %3463 = vmatpush.msrb.mxu2 %v3000_v18  ;;  %v3175_v57 = vld [vmem:[#allocation2 + $0x7f0] sm:$0xff]  ;;  %v3176_v18 = vld [vmem:[#allocation2 + $0x7f8] sm:$0xff] }
 0x3e5   :  { %v2900_v0 = vmul.f32 %v6005_v47, %v2899_v11  ;;  %v3167_v11 = vld [vmem:[#allocation2 + $0x7b0] sm:$0xff] }
 0x3e6   :  { %3424 = vmatpush.msrb.mxu0 %v2991_v59  ;;  %3464 = vmatpush.msrb.mxu2 %v2992_v61  ;;  %v3168_v59 = vld [vmem:[#allocation2 + $0x7b8] sm:$0xff]  ;;  %v3159_v61 = vld [vmem:[#allocation2 + $0x770] sm:$0xff] }
 0x3e7   :  { %v2901_v32 = vadd.f32 %v6005_v47, %v2900_v0  ;;  %v3151_v0 = vld [vmem:[#allocation2 + $0x730] sm:$0xff] }
 0x3e8   :  { %3425 = vmatpush.msrb.mxu0 %v2983_v3  ;;  %3465 = vmatpush.msrb.mxu2 %v2984_v7  ;;  %v3143_v3 = vld [vmem:[#allocation2 + $0x6f0] sm:$0xff]  ;;  %v3144_v7 = vld [vmem:[#allocation2 + $0x6f8] sm:$0xff] }
 0x3e9   :  { %v2905_v43 = vsel %vm2904_vm14, %v6005_v47, %v2901_v32  ;;  %v3053_v47 = vld [vmem:[#allocation2 + $0x420] sm:$0xff]  ;;  %v3135_v32 = vld [vmem:[#allocation2 + $0x6b0] sm:$0xff] }
 0x3ea   :  { %v2910_v44 = vsel %vm2907_vm15, %v2909_v41, %v2905_v43  ;;  %3426 = vmatpush.msrb.mxu0 %v2975_v24  ;;  %3466 = vmatpush.msrb.mxu2 %v2976_v8  ;;  %v3136_v24 = vld [vmem:[#allocation2 + $0x6b8] sm:$0xff]  ;;  %v3127_v8 = vld [vmem:[#allocation2 + $0x670] sm:$0xff] }
 0x3eb   :  { %v6929_v50 = vmul.f32 %v6007_v39, %v2910_v44  ;;  %v3128_v41 = vld [vmem:[#allocation2 + $0x678] sm:$0xff]  ;;  %v3119_v43 = vld [vmem:[#allocation2 + $0x630] sm:$0xff] }
 0x3ec   :  { %3427 = vmatpush.msrb.mxu0 %v2967_v53  ;;  %3467 = vmatpush.msrb.mxu2 %v2968_v45  ;;  %v3120_v53 = vld [vmem:[#allocation2 + $0x638] sm:$0xff]  ;;  %v3111_v45 = vld [vmem:[#allocation2 + $0x5f0] sm:$0xff] }
 0x3ed   :  { %5840 = vst [vmem:[%s7453_s2 + $0x48] sm:$0xff] %v6929_v50  ;;  %3213 = vmatmul.f32.vlgmr.msra.gmra.mxu1 %v6929_v50  ;;  %3253 = vmatmul.f32.vlgmr.msra.gmra.mxu3 %v6929_v50  ;;  %v3112_v39 = vld [vmem:[#allocation2 + $0x5f8] sm:$0xff]  ;;  %v3103_v44 = vld [vmem:[#allocation2 + $0x5b0] sm:$0xff] }
 0x3ee   :  { %3357 = vmatpush.msra.mxu1 %v3173_v36  ;;  %3397 = vmatpush.msra.mxu3 %v3174_v1  ;;  %v3104_v36 = vld [vmem:[#allocation2 + $0x5b8] sm:$0xff]  ;;  %v3095_v1 = vld [vmem:[#allocation2 + $0x570] sm:$0xff] }
 0x3ef   :  { %3428 = vmatpush.msrb.mxu0 %v2959_v23  ;;  %3468 = vmatpush.msrb.mxu2 %v2960_v46  ;;  %v3096_v23 = vld [vmem:[#allocation2 + $0x578] sm:$0xff]  ;;  %v3087_v46 = vld [vmem:[#allocation2 + $0x530] sm:$0xff] }
 0x3f0   :  { %3358 = vmatpush.msra.mxu1 %v3165_v5  ;;  %3398 = vmatpush.msra.mxu3 %v3166_v51  ;;  %v3088_v5 = vld [vmem:[#allocation2 + $0x538] sm:$0xff]  ;;  %v3079_v51 = vld [vmem:[#allocation2 + $0x4f0] sm:$0xff] }
 0x3f1   :  { %3429 = vmatpush.msrb.mxu0 %v2951_v56  ;;  %3469 = vmatpush.msrb.mxu2 %v2952_v37  ;;  %v3080_v56 = vld [vmem:[#allocation2 + $0x4f8] sm:$0xff]  ;;  %v3071_v37 = vld [vmem:[#allocation2 + $0x4b0] sm:$0xff] }
 0x3f2   :  { %3359 = vmatpush.msra.mxu1 %v3157_v2  ;;  %3399 = vmatpush.msra.mxu3 %v3158_v12  ;;  %v3072_v2 = vld [vmem:[#allocation2 + $0x4b8] sm:$0xff]  ;;  %v3063_v12 = vld [vmem:[#allocation2 + $0x470] sm:$0xff] }
 0x3f3   :  { %3430 = vmatpush.msrb.mxu0 %v2943_v54  ;;  %3470 = vmatpush.msrb.mxu2 %v2944_v49  ;;  %v3064_v54 = vld [vmem:[#allocation2 + $0x478] sm:$0xff]  ;;  %v3055_v49 = vld [vmem:[#allocation2 + $0x430] sm:$0xff] }
 0x3f4   :  { %3360 = vmatpush.msra.mxu1 %v3149_v9  ;;  %3400 = vmatpush.msra.mxu3 %v3150_v60  ;;  %v3056_v9 = vld [vmem:[#allocation2 + $0x438] sm:$0xff]  ;;  %v3761_v60 = vld [vmem:[#allocation2 + $0x3c0] sm:$0xff] }
 0x3f5   :  { %3293 = vmatmul.f32.vlgmr.msrb.gmra.mxu1 %v6929_v50  ;;  %3333 = vmatmul.f32.vlgmr.msrb.gmra.mxu3 %v6929_v50 }
 0x3f6   :  { %3361 = vmatpush.msra.mxu1 %v3141_v48  ;;  %3401 = vmatpush.msra.mxu3 %v3142_v16  ;;  %v3762_v48 = vld [vmem:[#allocation2 + $0x3c8] sm:$0xff]  ;;  %v3753_v16 = vld [vmem:[#allocation2 + $0x380] sm:$0xff] }
 0x3f7   :  { %3431 = vmatpush.msrb.mxu0 %v2935_v25  ;;  %3471 = vmatpush.msrb.mxu2 %v2936_v19  ;;  %v3754_v25 = vld [vmem:[#allocation2 + $0x388] sm:$0xff]  ;;  %v3745_v19 = vld [vmem:[#allocation2 + $0x340] sm:$0xff] }
 0x3f8   :  { %3362 = vmatpush.msra.mxu1 %v3133_v63  ;;  %3402 = vmatpush.msra.mxu3 %v3134_v62  ;;  %v3746_v63 = vld [vmem:[#allocation2 + $0x348] sm:$0xff]  ;;  %v3737_v62 = vld [vmem:[#allocation2 + $0x300] sm:$0xff] }
 0x3f9   :  { %3432 = vmatpush.msrb.mxu0 %v2927_v14  ;;  %3472 = vmatpush.msrb.mxu2 %v2928_v58  ;;  %v3738_v14 = vld [vmem:[#allocation2 + $0x308] sm:$0xff]  ;;  %v3729_v58 = vld [vmem:[#allocation2 + $0x2c0] sm:$0xff] }
 0x3fa   :  { %3433 = vmatmul.f32.vlgmr.msrb.gmra.mxu0 %v6863_v33  ;;  %3473 = vmatmul.f32.vlgmr.msrb.gmra.mxu2 %v6863_v33  ;;  %v3077_v33 = vld [vmem:[#allocation2 + $0x4e0] sm:$0xff] }
 0x3fb   :  { %3363 = vmatpush.msra.mxu1 %v3125_v40  ;;  %3403 = vmatpush.msra.mxu3 %v3126_v4  ;;  %v3730_v40 = vld [vmem:[#allocation2 + $0x2c8] sm:$0xff] }
 0x3fc   :  { %3897 = vmatpush.msra.mxu0 %v3761_v60  ;;  %3937 = vmatpush.msra.mxu2 %v3762_v48  ;;  %v3722_v4 = vld [vmem:[#allocation2 + $0x288] sm:$0xff]  ;;  %v3691_v48 = vld [vmem:[#allocation2 + $0x190] sm:$0xff] }
 0x3fd   :  { %3364 = vmatpush.msra.mxu1 %v3117_v21  ;;  %3404 = vmatpush.msra.mxu3 %v3118_v26  ;;  %v3713_v21 = vld [vmem:[#allocation2 + $0x240] sm:$0xff]  ;;  %v3714_v26 = vld [vmem:[#allocation2 + $0x248] sm:$0xff] }
 0x3fe   :  { %3898 = vmatpush.msra.mxu0 %v3753_v16  ;;  %3938 = vmatpush.msra.mxu2 %v3754_v25  ;;  %v3692_v16 = vld [vmem:[#allocation2 + $0x198] sm:$0xff] }
 0x3ff   :  { %3365 = vmatpush.msra.mxu1 %v3109_v29  ;;  %3405 = vmatpush.msra.mxu3 %v3110_v30  ;;  %v3705_v29 = vld [vmem:[#allocation2 + $0x200] sm:$0xff]  ;;  %v3706_v30 = vld [vmem:[#allocation2 + $0x208] sm:$0xff] }
 0x400   :  { %3899 = vmatpush.msra.mxu0 %v3745_v19  ;;  %3939 = vmatpush.msra.mxu2 %v3746_v63  ;;  %v3889_v19 = vld [vmem:[#allocation2 + $0x7c0] sm:$0xff]  ;;  %v3890_v63 = vld [vmem:[#allocation2 + $0x7c8] sm:$0xff] }
 0x401   :  { %3366 = vmatpush.msra.mxu1 %v3101_v31  ;;  %3406 = vmatpush.msra.mxu3 %v3102_v34  ;;  %v3697_v31 = vld [vmem:[#allocation2 + $0x1c0] sm:$0xff]  ;;  %v3698_v34 = vld [vmem:[#allocation2 + $0x1c8] sm:$0xff] }
 0x402   :  { %3900 = vmatpush.msra.mxu0 %v3737_v62  ;;  %3940 = vmatpush.msra.mxu2 %v3738_v14  ;;  %v3683_v62 = vld [vmem:[#allocation2 + $0x150] sm:$0xff] }
 0x403   :  { %3367 = vmatpush.msra.mxu1 %v3093_v35  ;;  %3407 = vmatpush.msra.mxu3 %v3094_v20  ;;  %v3689_v35 = vld [vmem:[#allocation2 + $0x180] sm:$0xff]  ;;  %v3690_v20 = vld [vmem:[#allocation2 + $0x188] sm:$0xff] }
 0x404   :  { %3901 = vmatpush.msra.mxu0 %v3729_v58  ;;  %3941 = vmatpush.msra.mxu2 %v3730_v40  ;;  %v5844_v40 = vld [vmem:[%s7451_s0 + $0x118] sm:$0xff] }
 0x405   :  { %3368 = vmatpush.msra.mxu1 %v3085_v13  ;;  %3408 = vmatpush.msra.mxu3 %v3086_v17  ;;  %v3681_v13 = vld [vmem:[#allocation2 + $0x140] sm:$0xff]  ;;  %v3682_v17 = vld [vmem:[#allocation2 + $0x148] sm:$0xff] }
 0x406   :  { %3942 = vmatpush.msra.mxu2 %v3722_v4 }
 0x407   :  { %3369 = vmatpush.msra.mxu1 %v3077_v33  ;;  %3409 = vmatpush.msra.mxu3 %v3078_v22  ;;  %v3673_v33 = vld [vmem:[#allocation2 + $0x100] sm:$0xff]  ;;  %v3674_v22 = vld [vmem:[#allocation2 + $0x108] sm:$0xff] }
 0x408   :  { %3943 = vmatpush.msra.mxu2 %v3714_v26  ;;  %v3881_v26 = vld [vmem:[#allocation2 + $0x780] sm:$0xff] }
 0x409   :  { %3370 = vmatpush.msra.mxu1 %v3069_v15  ;;  %3410 = vmatpush.msra.mxu3 %v3070_v6  ;;  %v3665_v15 = vld [vmem:[#allocation2 + $0xc0] sm:$0xff]  ;;  %v3666_v6 = vld [vmem:[#allocation2 + $0xc8] sm:$0xff] }
 0x40a   :  { %3944 = vmatpush.msra.mxu2 %v3706_v30  ;;  %v3675_v30 = vld [vmem:[#allocation2 + $0x110] sm:$0xff] }
 0x40b   :  { %3371 = vmatpush.msra.mxu1 %v3061_v38  ;;  %3411 = vmatpush.msra.mxu3 %v3062_v42  ;;  %v3657_v38 = vld [vmem:[#allocation2 + $0x80] sm:$0xff]  ;;  %v3658_v42 = vld [vmem:[#allocation2 + $0x88] sm:$0xff] }
 0x40c   :  { %3945 = vmatpush.msra.mxu2 %v3698_v34  ;;  %v3676_v34 = vld [vmem:[#allocation2 + $0x118] sm:$0xff] }
 0x40d   :  { %3372 = vmatpush.msra.mxu1 %v3053_v47  ;;  %3412 = vmatpush.msra.mxu3 %v3054_v55  ;;  %v3649_v47 = vld [vmem:[#allocation2 + $0x40] sm:$0xff]  ;;  %v3650_v55 = vld [vmem:[#allocation2 + $0x48] sm:$0xff] }
 0x40e   :  { %3373 = vmatmul.f32.vlgmr.msra.gmra.mxu1 %v6929_v50  ;;  %3413 = vmatmul.f32.vlgmr.msra.gmra.mxu3 %v6929_v50 }
 0x40f   :  { %3437 = vmatpush.msrb.mxu1 %v3175_v57  ;;  %3477 = vmatpush.msrb.mxu3 %v3176_v18  ;;  %v3641_v57 = vld [vmem:[#allocation2] sm:$0xff]  ;;  %v3642_v18 = vld [vmem:[#allocation2 + $0x8] sm:$0xff] }
 0x410   :  { %3946 = vmatpush.msra.mxu2 %v3690_v20  ;;  %v3873_v20 = vld [vmem:[#allocation2 + $0x740] sm:$0xff] }
 0x411   :  { %3438 = vmatpush.msrb.mxu1 %v3167_v11  ;;  %3478 = vmatpush.msrb.mxu3 %v3168_v59  ;;  %v3763_v11 = vld [vmem:[#allocation2 + $0x3d0] sm:$0xff]  ;;  %v3764_v59 = vld [vmem:[#allocation2 + $0x3d8] sm:$0xff] }
 0x412   :  { %3947 = vmatpush.msra.mxu2 %v3682_v17  ;;  %v3667_v17 = vld [vmem:[#allocation2 + $0xd0] sm:$0xff] }
 0x413   :  { %3439 = vmatpush.msrb.mxu1 %v3159_v61  ;;  %3479 = vmatpush.msrb.mxu3 %v3160_v52  ;;  %v3755_v61 = vld [vmem:[#allocation2 + $0x390] sm:$0xff]  ;;  %v3756_v52 = vld [vmem:[#allocation2 + $0x398] sm:$0xff] }
 0x414   :  { %3948 = vmatpush.msra.mxu2 %v3674_v22 }
 0x415   :  { %3440 = vmatpush.msrb.mxu1 %v3151_v0  ;;  %3480 = vmatpush.msrb.mxu3 %v3152_v28  ;;  %v3747_v0 = vld [vmem:[#allocation2 + $0x350] sm:$0xff]  ;;  %v3748_v28 = vld [vmem:[#allocation2 + $0x358] sm:$0xff] }
 0x416   :  { %3949 = vmatpush.msra.mxu2 %v3666_v6  ;;  %v3866_v6 = vld [vmem:[#allocation2 + $0x708] sm:$0xff] }
 0x417   :  { %3441 = vmatpush.msrb.mxu1 %v3143_v3  ;;  %3481 = vmatpush.msrb.mxu3 %v3144_v7  ;;  %v3739_v3 = vld [vmem:[#allocation2 + $0x310] sm:$0xff]  ;;  %v3740_v7 = vld [vmem:[#allocation2 + $0x318] sm:$0xff] }
 0x418   :  { %3950 = vmatpush.msra.mxu2 %v3658_v42  ;;  %v3660_v42 = vld [vmem:[#allocation2 + $0x98] sm:$0xff] }
 0x419   :  { %3442 = vmatpush.msrb.mxu1 %v3135_v32  ;;  %3482 = vmatpush.msrb.mxu3 %v3136_v24 }
 0x41a   :  { %3951 = vmatpush.msra.mxu2 %v3650_v55 }
 0x41b   :  { %3443 = vmatpush.msrb.mxu1 %v3127_v8  ;;  %3483 = vmatpush.msrb.mxu3 %v3128_v41  ;;  %v5841_v8 = vld [vmem:[%s7451_s0 + $0x100] sm:$0xff] }
 0x41c   :  { %3952 = vmatpush.msra.mxu2 %v3642_v18  ;;  %v3858_v18 = vld [vmem:[#allocation2 + $0x6c8] sm:$0xff] }
 0x41d   :  { %3444 = vmatpush.msrb.mxu1 %v3119_v43  ;;  %3484 = vmatpush.msrb.mxu3 %v3120_v53  ;;  %v3731_v43 = vld [vmem:[#allocation2 + $0x2d0] sm:$0xff]  ;;  %v3732_v53 = vld [vmem:[#allocation2 + $0x2d8] sm:$0xff] }
 0x41e   :  { %4017 = vmatpush.msrb.mxu2 %v3764_v59 }
 0x41f   :  { %3445 = vmatpush.msrb.mxu1 %v3111_v45  ;;  %3485 = vmatpush.msrb.mxu3 %v3112_v39  ;;  %v3723_v39 = vld [vmem:[#allocation2 + $0x290] sm:$0xff] }
 0x420   :  { %4018 = vmatpush.msrb.mxu2 %v3756_v52 }
 0x421   :  { %3446 = vmatpush.msrb.mxu1 %v3103_v44  ;;  %3486 = vmatpush.msrb.mxu3 %v3104_v36  ;;  %v3724_v44 = vld [vmem:[#allocation2 + $0x298] sm:$0xff] }
 0x422   :  { %4019 = vmatpush.msrb.mxu2 %v3748_v28  ;;  %v3850_v28 = vld [vmem:[#allocation2 + $0x688] sm:$0xff] }
 0x423   :  { %3447 = vmatpush.msrb.mxu1 %v3095_v1  ;;  %3487 = vmatpush.msrb.mxu3 %v3096_v23  ;;  %v3715_v23 = vld [vmem:[#allocation2 + $0x250] sm:$0xff] }
 0x424   :  { %4020 = vmatpush.msrb.mxu2 %v3740_v7 }
 0x425   :  { %3448 = vmatpush.msrb.mxu1 %v3087_v46  ;;  %3488 = vmatpush.msrb.mxu3 %v3088_v5  ;;  %v3716_v46 = vld [vmem:[#allocation2 + $0x258] sm:$0xff] }
 0x426   :  { %4021 = vmatpush.msrb.mxu2 %v3732_v53 }
 0x427   :  { %3449 = vmatpush.msrb.mxu1 %v3079_v51  ;;  %3489 = vmatpush.msrb.mxu3 %v3080_v56  ;;  %v5842_v51 = vld [vmem:[%s7451_s0 + $0x108] sm:$0xff] }
 0x428   :  { %4022 = vmatpush.msrb.mxu2 %v3724_v44  ;;  %v3833_v44 = vld [vmem:[#allocation2 + $0x600] sm:$0xff] }
 0x429   :  { %3450 = vmatpush.msrb.mxu1 %v3071_v37  ;;  %3490 = vmatpush.msrb.mxu3 %v3072_v2  ;;  %v3707_v2 = vld [vmem:[#allocation2 + $0x210] sm:$0xff] }
 0x42a   :  { %4023 = vmatpush.msrb.mxu2 %v3716_v46  ;;  %v3825_v46 = vld [vmem:[#allocation2 + $0x5c0] sm:$0xff] }
 0x42b   :  { %3451 = vmatpush.msrb.mxu1 %v3063_v12  ;;  %3491 = vmatpush.msrb.mxu3 %v3064_v54  ;;  %v3708_v12 = vld [vmem:[#allocation2 + $0x218] sm:$0xff] }
 0x42c   :  { %4024 = vmatpush.msrb.mxu2 %v3708_v12 }
 0x42d   :  { %3452 = vmatpush.msrb.mxu1 %v3055_v49  ;;  %3492 = vmatpush.msrb.mxu3 %v3056_v9  ;;  %v3699_v49 = vld [vmem:[#allocation2 + $0x1d0] sm:$0xff]  ;;  %v3700_v9 = vld [vmem:[#allocation2 + $0x1d8] sm:$0xff] }
 0x42e   :  { %3453 = vmatmul.f32.vlgmr.msrb.gmra.mxu1 %v6929_v50  ;;  %3493 = vmatmul.f32.vlgmr.msrb.gmra.mxu3 %v6929_v50  ;;  %v3721_v50 = vld [vmem:[#allocation2 + $0x280] sm:$0xff] }
 0x42f   :  { %3902 = vmatpush.msra.mxu0 %v3721_v50  ;;  %4025 = vmatpush.msrb.mxu2 %v3700_v9  ;;  %v3684_v50 = vld [vmem:[#allocation2 + $0x158] sm:$0xff] }
 0x430   :  { %3917 = vmatpush.msra.mxu1 %v3889_v19  ;;  %3957 = vmatpush.msra.mxu3 %v3890_v63  ;;  %v5845_v19 = vld [vmem:[%s7451_s0 + $0xe0] sm:$0xff] }
 0x431   :  { %3903 = vmatpush.msra.mxu0 %v3713_v21  ;;  %4026 = vmatpush.msrb.mxu2 %v3692_v16  ;;  %v3809_v63 = vld [vmem:[#allocation2 + $0x540] sm:$0xff] }
 0x432   :  { %3918 = vmatpush.msra.mxu1 %v3881_v26  ;;  %v3801_v26 = vld [vmem:[#allocation2 + $0x500] sm:$0xff] }
 0x433   :  { %3904 = vmatpush.msra.mxu0 %v3705_v29  ;;  %4027 = vmatpush.msrb.mxu2 %v3684_v50  ;;  %v3882_v29 = vld [vmem:[#allocation2 + $0x788] sm:$0xff] }
 0x434   :  { %v3194_v32 = vpop.f32.mrf.mxu0  ;;  %3958 = vmatpush.msra.mxu3 %v3882_v29  ;;  %3919 = vmatpush.msra.mxu1 %v3873_v20  ;;  %v3802_v29 = vld [vmem:[#allocation2 + $0x508] sm:$0xff] }
 0x435   :  { %3905 = vmatpush.msra.mxu0 %v3697_v31  ;;  %4028 = vmatpush.msrb.mxu2 %v3676_v34  ;;  %v3794_v20 = vld [vmem:[#allocation2 + $0x4c8] sm:$0xff] }
 0x437   :  { %3906 = vmatpush.msra.mxu0 %v3689_v35 }
 0x439   :  { %3907 = vmatpush.msra.mxu0 %v3681_v13  ;;  %v3874_v13 = vld [vmem:[#allocation2 + $0x748] sm:$0xff] }
 0x43a   :  { %v3234_v36 = vpop.f32.mrf.mxu2  ;;  %3959 = vmatpush.msra.mxu3 %v3874_v13 }
 0x43b   :  { %3908 = vmatpush.msra.mxu0 %v3673_v33  ;;  %v3668_v33 = vld [vmem:[#allocation2 + $0xd8] sm:$0xff] }
 0x43c   :  { %4029 = vmatpush.msrb.mxu2 %v3668_v33  ;;  %3960 = vmatpush.msra.mxu3 %v3866_v6 }
 0x43d   :  { %3909 = vmatpush.msra.mxu0 %v3665_v15  ;;  %v3865_v15 = vld [vmem:[#allocation2 + $0x700] sm:$0xff] }
 0x43e   :  { %3920 = vmatpush.msra.mxu1 %v3865_v15  ;;  %4030 = vmatpush.msrb.mxu2 %v3660_v42  ;;  %v5846_v42 = vld [vmem:[%s7451_s0 + $0xe8] sm:$0xff] }
 0x43f   :  { %3910 = vmatpush.msra.mxu0 %v3657_v38  ;;  %v3659_v38 = vld [vmem:[#allocation2 + $0x90] sm:$0xff]  ;;  %3961 = vmatpush.msra.mxu3 %v3858_v18 }
 0x441   :  { %3911 = vmatpush.msra.mxu0 %v3649_v47  ;;  %3962 = vmatpush.msra.mxu3 %v3850_v28  ;;  %v3777_v28 = vld [vmem:[#allocation2 + $0x440] sm:$0xff] }
 0x442   :  { %v3314_v14 = vpop.f32.mrf.mxu2 }
 0x443   :  { %3912 = vmatpush.msra.mxu0 %v3641_v57  ;;  %v3857_v57 = vld [vmem:[#allocation2 + $0x6c0] sm:$0xff] }
 0x444   :  { %3921 = vmatpush.msra.mxu1 %v3857_v57 }
 0x445   :  { %3977 = vmatpush.msrb.mxu0 %v3763_v11  ;;  %v3651_v11 = vld [vmem:[#allocation2 + $0x50] sm:$0xff] }
 0x447   :  { %3978 = vmatpush.msrb.mxu0 %v3755_v61  ;;  %v3652_v61 = vld [vmem:[#allocation2 + $0x58] sm:$0xff] }
 0x448   :  { %4031 = vmatpush.msrb.mxu2 %v3652_v61 }
 0x449   :  { %3979 = vmatpush.msrb.mxu0 %v3747_v0  ;;  %v3849_v0 = vld [vmem:[#allocation2 + $0x680] sm:$0xff] }
 0x44a   :  { %3922 = vmatpush.msra.mxu1 %v3849_v0 }
 0x44b   :  { %3980 = vmatpush.msrb.mxu0 %v3739_v3  ;;  %v3643_v3 = vld [vmem:[#allocation2 + $0x10] sm:$0xff] }
 0x44d   :  { %3981 = vmatpush.msrb.mxu0 %v3731_v43  ;;  %v3842_v43 = vld [vmem:[#allocation2 + $0x648] sm:$0xff] }
 0x44e   :  { %3963 = vmatpush.msra.mxu3 %v3842_v43 }
 0x44f   :  { %3982 = vmatpush.msrb.mxu0 %v3723_v39  ;;  %v5843_v39 = vld [vmem:[%s7451_s0 + $0x110] sm:$0xff] }
 0x451   :  { %3983 = vmatpush.msrb.mxu0 %v3715_v23 }
 0x453   :  { %3984 = vmatpush.msrb.mxu0 %v3707_v2 }
 0x455   :  { %3985 = vmatpush.msrb.mxu0 %v3699_v49  ;;  %v3818_v49 = vld [vmem:[#allocation2 + $0x588] sm:$0xff] }
 0x457   :  { %3986 = vmatpush.msrb.mxu0 %v3691_v48 }
 0x459   :  { %3987 = vmatpush.msrb.mxu0 %v3683_v62  ;;  %v3810_v62 = vld [vmem:[#allocation2 + $0x548] sm:$0xff] }
 0x45b   :  { %3988 = vmatpush.msrb.mxu0 %v3675_v30 }
 0x45d   :  { %3989 = vmatpush.msrb.mxu0 %v3667_v17 }
 0x45f   :  { %3990 = vmatpush.msrb.mxu0 %v3659_v38 }
 0x461   :  { %3991 = vmatpush.msrb.mxu0 %v3651_v11 }
 0x463   :  { %3992 = vmatpush.msrb.mxu0 %v3643_v3  ;;  %v3778_v3 = vld [vmem:[#allocation2 + $0x448] sm:$0xff] }
 0x46a   :  { %v3214_v24 = vpop.f32.mrf.mxu1 }
 0x46b   :  { %v3215_v41 = vadd.f32 %v3214_v24, %v3194_v32  ;;  %v3644_v32 = vld [vmem:[#allocation2 + $0x18] sm:$0xff]  ;;  %v3274_v24 = vpop.f32.mrf.mxu0 }
 0x46c   :  { %4032 = vmatpush.msrb.mxu2 %v3644_v32 }
 0x46d   :  { %v3505_v45 = vadd.f32 %v5841_v8, %v3215_v41  ;;  %v3841_v41 = vld [vmem:[#allocation2 + $0x640] sm:$0xff] }
 0x46e   :  { %3923 = vmatpush.msra.mxu1 %v3841_v41  ;;  %v3770_v41 = vld [vmem:[#allocation2 + $0x408] sm:$0xff] }
 0x46f   :  { %v3509_v1 = vsub.f32 0.0, %v3505_v45 }
 0x470   :  { %v3254_v5 = vpop.f32.mrf.mxu3  ;;  %3924 = vmatpush.msra.mxu1 %v3833_v44 }
 0x471   :  { %v3510_v56 = vmul.f32 1.442695, %v3509_v1  ;;  %v3255_v37 = vadd.f32 %v3254_v5, %v3234_v36  ;;  %v3834_v36 = vld [vmem:[#allocation2 + $0x608] sm:$0xff] }
 0x472   :  { %v3294_v52 = vpop.f32.mrf.mxu1  ;;  %3964 = vmatpush.msra.mxu3 %v3834_v36  ;;  %v3826_v5 = vld [vmem:[#allocation2 + $0x5c8] sm:$0xff]  ;;  %3925 = vmatpush.msra.mxu1 %v3825_v46  ;;  %v3884_v46 = vld [vmem:[#allocation2 + $0x798] sm:$0xff] }
 0x473   :  { %6008 = vpow2.f32 %v3510_v56  ;;  %v3506_v54 = vadd.f32 %v5842_v51, %v3255_v37  ;;  %v3295_v53 = vadd.f32 %v3294_v52, %v3274_v24 }
 0x474   :  { %3965 = vmatpush.msra.mxu3 %v3826_v5 }
 0x475   :  { %v3528_v60 = vsub.f32 0.0, %v3506_v54  ;;  %v3507_v56 = vadd.f32 %v5843_v39, %v3295_v53  ;;  %v3817_v54 = vld [vmem:[#allocation2 + $0x580] sm:$0xff] }
 0x476   :  { %3926 = vmatpush.msra.mxu1 %v3817_v54  ;;  %3966 = vmatpush.msra.mxu3 %v3818_v49  ;;  %v3868_v54 = vld [vmem:[#allocation2 + $0x718] sm:$0xff] }
 0x477   :  { %v3529_v25 = vmul.f32 1.442695, %v3528_v60  ;;  %v3354_v60 = vpop.f32.mrf.mxu0 }
 0x478   :  { %v3334_v58 = vpop.f32.mrf.mxu3  ;;  %3927 = vmatpush.msra.mxu1 %v3809_v63  ;;  %3967 = vmatpush.msra.mxu3 %v3810_v62  ;;  %v3757_v63 = vld [vmem:[#allocation2 + $0x3a0] sm:$0xff] }
 0x479   :  { %v6009_v4 = vpop.eup %6008  ;;  %6010 = vpow2.f32 %v3529_v25  ;;  %v3335_v21 = vadd.f32 %v3334_v58, %v3314_v14  ;;  %v3851_v58 = vld [vmem:[#allocation2 + $0x690] sm:$0xff] }
 0x47a   :  { %v6954_v31 = vadd.f32 1.0, %v6009_v4  ;;  %3928 = vmatpush.msra.mxu1 %v3801_v26  ;;  %3968 = vmatpush.msra.mxu3 %v3802_v29  ;;  %v3843_v26 = vld [vmem:[#allocation2 + $0x650] sm:$0xff]  ;;  %v3844_v29 = vld [vmem:[#allocation2 + $0x658] sm:$0xff] }
 0x47b   :  { %v3508_v35 = vadd.f32 %v5844_v40, %v3335_v21 }
 0x47c   :  { %6012 = vrcp.f32 %v6954_v31  ;;  %v3524_v9 = vand.u32 2147483648, %v6954_v31  ;;  %vm3518_vm1 = vweird.f32 %v6954_v31  ;;  %v3522_v16 = vand.u32 2147483647, %v6954_v31  ;;  %3969 = vmatpush.msra.mxu3 %v3794_v20  ;;  %v3835_v20 = vld [vmem:[#allocation2 + $0x610] sm:$0xff] }
 0x47d   :  { %v3548_v22 = vsub.f32 0.0, %v3508_v35  ;;  %v3793_v35 = vld [vmem:[#allocation2 + $0x4c0] sm:$0xff] }
 0x47e   :  { %v3525_v30 = vor.u32 1.1754944e-38, %v3524_v9  ;;  %vm3523_vm5 = vcmp.eq.f32.partialorder %v3522_v16, 8.507059e+37  ;;  %3929 = vmatpush.msra.mxu1 %v3793_v35  ;;  %v3766_v16 = vld [vmem:[#allocation2 + $0x3e8] sm:$0xff] }
 0x47f   :  { %v6011_v47 = vpop.eup %6010  ;;  %v3549_v55 = vmul.f32 1.442695, %v3548_v22  ;;  %v3394_v22 = vpop.f32.mrf.mxu2  ;;  %v3742_v35 = vld [vmem:[#allocation2 + $0x328] sm:$0xff] }
 0x480   :  { %v6957_v59 = vadd.f32 1.0, %v6011_v47  ;;  %v3785_v47 = vld [vmem:[#allocation2 + $0x480] sm:$0xff] }
 0x481   :  { %6014 = vpow2.f32 %v3549_v55  ;;  %v3786_v55 = vld [vmem:[#allocation2 + $0x488] sm:$0xff]  ;;  %3930 = vmatpush.msra.mxu1 %v3785_v47  ;;  %v3820_v47 = vld [vmem:[#allocation2 + $0x598] sm:$0xff] }
 0x482   :  { %v6959_v7 = vpop.eup %6012  ;;  %6016 = vrcp.f32 %v6957_v59  ;;  %v3543_v14 = vand.u32 2147483648, %v6957_v59  ;;  %v3541_v21 = vand.u32 2147483647, %v6957_v59  ;;  %vm3537_vm4 = vweird.f32 %v6957_v59  ;;  %3970 = vmatpush.msra.mxu3 %v3786_v55  ;;  %v3717_v55 = vld [vmem:[#allocation2 + $0x260] sm:$0xff] }
 0x483   :  { %v3514_v8 = vmul.f32 %v6959_v7, %v6954_v31  ;;  %vm3519_vm0 = vweird.f32 %v6959_v7  ;;  %3931 = vmatpush.msra.mxu1 %v3777_v28  ;;  %v3804_v28 = vld [vmem:[#allocation2 + $0x518] sm:$0xff] }
 0x484   :  { %vm6983_vm2 = vmor %vm3518_vm1, %vm3519_vm0  ;;  %v3544_v17 = vor.u32 1.1754944e-38, %v3543_v14  ;;  %vm3542_vm7 = vcmp.eq.f32.partialorder %v3541_v21, 8.507059e+37  ;;  %3971 = vmatpush.msra.mxu3 %v3778_v3  ;;  %v3758_v14 = vld [vmem:[#allocation2 + $0x3a8] sm:$0xff] }
 0x485   :  { %v3515_v45 = vsub.f32 1.0, %v3514_v8  ;;  %v3769_v8 = vld [vmem:[#allocation2 + $0x400] sm:$0xff]  ;;  %v3750_v21 = vld [vmem:[#allocation2 + $0x368] sm:$0xff] }
 0x486   :  { %3932 = vmatpush.msra.mxu1 %v3769_v8  ;;  %3972 = vmatpush.msra.mxu3 %v3770_v41  ;;  %v3795_v8 = vld [vmem:[#allocation2 + $0x4d0] sm:$0xff]  ;;  %v3796_v41 = vld [vmem:[#allocation2 + $0x4d8] sm:$0xff] }
 0x487   :  { %v6015_v1 = vpop.eup %6014  ;;  %v3516_v23 = vmul.f32 %v6959_v7, %v3515_v45  ;;  %v3892_v45 = vld [vmem:[#allocation2 + $0x7d8] sm:$0xff] }
 0x488   :  { %v6017_v51 = vpop.eup %6016  ;;  %v6968_v37 = vadd.f32 1.0, %v6015_v1  ;;  %4037 = vmatpush.msrb.mxu3 %v3892_v45 }
 0x489   :  { %v3533_v2 = vmul.f32 %v6017_v51, %v6957_v59  ;;  %v3517_v12 = vadd.f32 %v6959_v7, %v3516_v23  ;;  %vm3538_vm3 = vweird.f32 %v6017_v51  ;;  %v3883_v23 = vld [vmem:[#allocation2 + $0x790] sm:$0xff] }
 0x48a   :  { %6018 = vrcp.f32 %v6968_v37  ;;  %vm3539_vm6 = vmor %vm3537_vm4, %vm3538_vm3  ;;  %v3563_v44 = vand.u32 2147483648, %v6968_v37  ;;  %vm3557_vm9 = vweird.f32 %v6968_v37  ;;  %v3561_v36 = vand.u32 2147483647, %v6968_v37  ;;  %4038 = vmatpush.msrb.mxu3 %v3884_v46  ;;  %v3788_v46 = vld [vmem:[#allocation2 + $0x498] sm:$0xff] }
 0x48b   :  { %v3534_v48 = vsub.f32 1.0, %v3533_v2  ;;  %v3374_v25 = vpop.f32.mrf.mxu1  ;;  %6020 = vtanh.f32 %v3507_v56  ;;  %v3521_v4 = vsel %vm6983_vm2, %v6959_v7, %v3517_v12  ;;  %v3875_v56 = vld [vmem:[#allocation2 + $0x750] sm:$0xff]  ;;  %v3876_v2 = vld [vmem:[#allocation2 + $0x758] sm:$0xff] }
 0x48c   :  { %v3375_v40 = vadd.f32 %v3374_v25, %v3354_v60  ;;  %v3526_v33 = vsel %vm3523_vm5, %v3525_v30, %v3521_v4  ;;  %v3564_v12 = vor.u32 1.1754944e-38, %v3563_v44  ;;  %4039 = vmatpush.msrb.mxu3 %v3876_v2  ;;  %vm3562_vm11 = vcmp.eq.f32.partialorder %v3561_v36, 8.507059e+37  ;;  %v3765_v60 = vld [vmem:[#allocation2 + $0x3e0] sm:$0xff]  ;;  %v3859_v25 = vld [vmem:[#allocation2 + $0x6d0] sm:$0xff]  ;;  %v3434_v2 = vpop.f32.mrf.mxu0 }
 0x48d   :  { %v3535_v50 = vmul.f32 %v6017_v51, %v3534_v48  ;;  %v3749_v4 = vld [vmem:[#allocation2 + $0x360] sm:$0xff] }
 0x48e   :  { %v3572_v31 = vadd.f32 %v5845_v19, %v3375_v40  ;;  %4040 = vmatpush.msrb.mxu3 %v3868_v54  ;;  %v3860_v19 = vld [vmem:[#allocation2 + $0x6d8] sm:$0xff] }
 0x48f   :  { %v3536_v34 = vadd.f32 %v6017_v51, %v3535_v50  ;;  %v3852_v40 = vld [vmem:[#allocation2 + $0x698] sm:$0xff] }
 0x490   :  { %v6992_v13 = vpop.eup %6018  ;;  %v3576_v11 = vsub.f32 0.0, %v3572_v31  ;;  %4041 = vmatpush.msrb.mxu3 %v3860_v19  ;;  %v3741_v31 = vld [vmem:[#allocation2 + $0x320] sm:$0xff]  ;;  %v5847_v19 = vld [vmem:[%s7451_s0 + $0xf0] sm:$0xff] }
 0x491   :  { %v3540_v15 = vsel %vm3539_vm6, %v6017_v51, %v3536_v34  ;;  %v3553_v6 = vmul.f32 %v6992_v13, %v6968_v37  ;;  %v3414_v38 = vpop.f32.mrf.mxu3  ;;  %v6021_v57 = vpop.eup %6020  ;;  %vm3558_vm8 = vweird.f32 %v6992_v13  ;;  %v3867_v37 = vld [vmem:[#allocation2 + $0x710] sm:$0xff] }
 0x492   :  { %v3545_v18 = vsel %vm3542_vm7, %v3544_v17, %v3540_v15  ;;  %v3415_v59 = vadd.f32 %v3414_v38, %v3394_v22  ;;  %v3568_v52 = vmul.f32 %v6021_v57, %v3526_v33  ;;  %v3577_v43 = vmul.f32 1.442695, %v3576_v11  ;;  %vm7012_vm10 = vmor %vm3557_vm9, %vm3558_vm8  ;;  %4042 = vmatpush.msrb.mxu3 %v3852_v40  ;;  %v3733_v17 = vld [vmem:[#allocation2 + $0x2e0] sm:$0xff]  ;;  %v3734_v33 = vld [vmem:[#allocation2 + $0x2e8] sm:$0xff] }
 0x493   :  { %v3567_v61 = vmul.f32 %v3545_v18, %v6845_v27  ;;  %v3554_v0 = vsub.f32 1.0, %v3553_v6  ;;  %v3891_v27 = vld [vmem:[#allocation2 + $0x7d0] sm:$0xff]  ;;  %v3828_v15 = vld [vmem:[#allocation2 + $0x5d8] sm:$0xff]  ;;  %v3725_v6 = vld [vmem:[#allocation2 + $0x2a0] sm:$0xff] }
 0x494   :  { %v3573_v7 = vadd.f32 %v5846_v42, %v3415_v59  ;;  %3997 = vmatpush.msrb.mxu1 %v3891_v27  ;;  %4043 = vmatpush.msrb.mxu3 %v3844_v29  ;;  %v3827_v22 = vld [vmem:[#allocation2 + $0x5d0] sm:$0xff]  ;;  %v3726_v38 = vld [vmem:[#allocation2 + $0x2a8] sm:$0xff]  ;;  %v3812_v11 = vld [vmem:[#allocation2 + $0x558] sm:$0xff] }
 0x495   :  { %v7001_v32 = vadd.f32 %v3568_v52, %v3567_v61  ;;  %v3555_v24 = vmul.f32 %v6992_v13, %v3554_v0  ;;  %v3819_v42 = vld [vmem:[#allocation2 + $0x590] sm:$0xff]  ;;  %v3718_v57 = vld [vmem:[#allocation2 + $0x268] sm:$0xff]  ;;  %v3709_v59 = vld [vmem:[#allocation2 + $0x220] sm:$0xff] }
 0x496   :  { %v3595_v53 = vsub.f32 0.0, %v3573_v7  ;;  %3998 = vmatpush.msrb.mxu1 %v3883_v23  ;;  %v3811_v18 = vld [vmem:[#allocation2 + $0x550] sm:$0xff]  ;;  %v3710_v61 = vld [vmem:[#allocation2 + $0x228] sm:$0xff]  ;;  %v3701_v7 = vld [vmem:[#allocation2 + $0x1e0] sm:$0xff] }
 0x497   :  { %6022 = vtanh.f32 %v7001_v32  ;;  %v3556_v39 = vadd.f32 %v6992_v13, %v3555_v24  ;;  %v3803_v0 = vld [vmem:[#allocation2 + $0x510] sm:$0xff]  ;;  %v3702_v24 = vld [vmem:[#allocation2 + $0x1e8] sm:$0xff] }
 0x498   :  { %v3596_v1 = vmul.f32 1.442695, %v3595_v53  ;;  %6024 = vpow2.f32 %v3577_v43  ;;  %3999 = vmatpush.msrb.mxu1 %v3875_v56  ;;  %v3474_v43 = vpop.f32.mrf.mxu2  ;;  %v3693_v53 = vld [vmem:[#allocation2 + $0x1a0] sm:$0xff]  ;;  %v3694_v27 = vld [vmem:[#allocation2 + $0x1a8] sm:$0xff]  ;;  %v3787_v23 = vld [vmem:[#allocation2 + $0x490] sm:$0xff] }
 0x499   :  { %v3560_v51 = vsel %vm7012_vm10, %v6992_v13, %v3556_v39  ;;  %v3836_v13 = vld [vmem:[#allocation2 + $0x618] sm:$0xff]  ;;  %v3686_v56 = vld [vmem:[#allocation2 + $0x168] sm:$0xff] }
 0x49a   :  { %6026 = vpow2.f32 %v3596_v1  ;;  %v3565_v9 = vsel %vm3562_vm11, %v3564_v12, %v3560_v51  ;;  %4000 = vmatpush.msrb.mxu1 %v3867_v37  ;;  %4044 = vmatpush.msrb.mxu3 %v3836_v13  ;;  %v5848_v1 = vld [vmem:[%s7451_s0 + $0xf8] sm:$0xff]  ;;  %v3685_v51 = vld [vmem:[#allocation2 + $0x160] sm:$0xff]  ;;  %v3779_v12 = vld [vmem:[#allocation2 + $0x450] sm:$0xff] }
 0x49b   :  { %v3780_v37 = vld [vmem:[#allocation2 + $0x458] sm:$0xff]  ;;  %v3670_v40 = vld [vmem:[#allocation2 + $0xe8] sm:$0xff]  ;;  %v3645_v13 = vld [vmem:[#allocation2 + $0x20] sm:$0xff] }
 0x49c   :  { %4001 = vmatpush.msrb.mxu1 %v3859_v25  ;;  %4045 = vmatpush.msrb.mxu3 %v3828_v15 }
 0x49d   :  { %v6023_v49 = vpop.eup %6022 }
 0x49e   :  { %v7019_v48 = vmul.f32 %v6023_v49, %v3565_v9  ;;  %v6025_v62 = vpop.eup %6024  ;;  %4002 = vmatpush.msrb.mxu1 %v3851_v58  ;;  %4046 = vmatpush.msrb.mxu3 %v3820_v47  ;;  %v3677_v9 = vld [vmem:[#allocation2 + $0x120] sm:$0xff] }
 0x49f   :  { %v7027_v30 = vadd.f32 1.0, %v6025_v62  ;;  %v3772_v62 = vld [vmem:[#allocation2 + $0x418] sm:$0xff]  ;;  %v3669_v58 = vld [vmem:[#allocation2 + $0xe0] sm:$0xff] }
 0x4a0   :  { %5849 = vst [vmem:[%s7453_s2 + $0x40] sm:$0xff] %v7019_v48  ;;  %3913 = vmatmul.f32.vlgmr.msra.gmra.mxu0 %v7019_v48  ;;  %3953 = vmatmul.f32.vlgmr.msra.gmra.mxu2 %v7019_v48  ;;  %v6027_v50 = vpop.eup %6026  ;;  %v3861_v47 = vld [vmem:[#allocation2 + $0x6e0] sm:$0xff] }
 0x4a1   :  { %4057 = vmatpush.msra.mxu0 %v3765_v60  ;;  %4097 = vmatpush.msra.mxu2 %v3766_v16  ;;  %v7029_v34 = vadd.f32 1.0, %v6027_v50  ;;  %6028 = vrcp.f32 %v7027_v30  ;;  %v3678_v60 = vld [vmem:[#allocation2 + $0x128] sm:$0xff]  ;;  %vm3585_vm14 = vweird.f32 %v7027_v30 }
 0x4a2   :  { %4003 = vmatpush.msrb.mxu1 %v3843_v26  ;;  %4047 = vmatpush.msrb.mxu3 %v3812_v11  ;;  %v3662_v26 = vld [vmem:[#allocation2 + $0xa8] sm:$0xff]  ;;  %v3853_v11 = vld [vmem:[#allocation2 + $0x6a0] sm:$0xff] }
 0x4a3   :  { %4058 = vmatpush.msra.mxu0 %v3757_v63  ;;  %4098 = vmatpush.msra.mxu2 %v3758_v14  ;;  %6030 = vrcp.f32 %v7029_v34  ;;  %v3771_v63 = vld [vmem:[#allocation2 + $0x410] sm:$0xff]  ;;  %v3610_v15 = vand.u32 2147483648, %v7029_v34  ;;  %vm3604_vm15 = vweird.f32 %v7029_v34 }
 0x4a4   :  { %4004 = vmatpush.msrb.mxu1 %v3835_v20  ;;  %4048 = vmatpush.msrb.mxu3 %v3804_v28  ;;  %v3654_v20 = vld [vmem:[#allocation2 + $0x68] sm:$0xff] }
 0x4a5   :  { %4059 = vmatpush.msra.mxu0 %v3749_v4  ;;  %4099 = vmatpush.msra.mxu2 %v3750_v21  ;;  %v3661_v21 = vld [vmem:[#allocation2 + $0xa0] sm:$0xff] }
 0x4a6   :  { %4005 = vmatpush.msrb.mxu1 %v3827_v22  ;;  %4049 = vmatpush.msrb.mxu3 %v3796_v41  ;;  %v3752_v41 = vld [vmem:[#allocation2 + $0x378] sm:$0xff] }
 0x4a7   :  { %4060 = vmatpush.msra.mxu0 %v3741_v31  ;;  %4100 = vmatpush.msra.mxu2 %v3742_v35  ;;  %v7035_v52 = vpop.eup %6028  ;;  %v3653_v35 = vld [vmem:[#allocation2 + $0x60] sm:$0xff] }
 0x4a8   :  { %3993 = vmatmul.f32.vlgmr.msrb.gmra.mxu0 %v7019_v48  ;;  %4033 = vmatmul.f32.vlgmr.msrb.gmra.mxu2 %v7019_v48  ;;  %v3581_v45 = vmul.f32 %v7035_v52, %v7027_v30  ;;  %vm3586_vm12 = vweird.f32 %v7035_v52 }
 0x4a9   :  { %4061 = vmatpush.msra.mxu0 %v3733_v17  ;;  %4101 = vmatpush.msra.mxu2 %v3734_v33  ;;  %v7037_v3 = vpop.eup %6030  ;;  %v3646_v17 = vld [vmem:[#allocation2 + $0x28] sm:$0xff]  ;;  %vm7061_vm0 = vmor %vm3585_vm14, %vm3586_vm12 }
 0x4aa   :  { %4006 = vmatpush.msrb.mxu1 %v3819_v42  ;;  %v3600_v39 = vmul.f32 %v7037_v3, %v7029_v34  ;;  %4050 = vmatpush.msrb.mxu3 %v3788_v46  ;;  %v3582_v16 = vsub.f32 1.0, %v3581_v45  ;;  %vm3605_vm13 = vweird.f32 %v7037_v3  ;;  %v3768_v42 = vld [vmem:[#allocation2 + $0x3f8] sm:$0xff] }
 0x4ab   :  { %4062 = vmatpush.msra.mxu0 %v3725_v6  ;;  %4102 = vmatpush.msra.mxu2 %v3726_v38  ;;  %v3454_v44 = vpop.f32.mrf.mxu1  ;;  %v3591_v6 = vand.u32 2147483648, %v7027_v30  ;;  %v3767_v38 = vld [vmem:[#allocation2 + $0x3f0] sm:$0xff]  ;;  %vm7069_vm1 = vmor %vm3604_vm15, %vm3605_vm13 }
 0x4ac   :  { %4007 = vmatpush.msrb.mxu1 %v3811_v18  ;;  %v3455_v54 = vadd.f32 %v3454_v44, %v3434_v2  ;;  %v3601_v25 = vsub.f32 1.0, %v3600_v39  ;;  %4051 = vmatpush.msrb.mxu3 %v3780_v37  ;;  %v3583_v31 = vmul.f32 %v7035_v52, %v3582_v16  ;;  %v3736_v39 = vld [vmem:[#allocation2 + $0x2f8] sm:$0xff] }
 0x4ad   :  { %4063 = vmatpush.msra.mxu0 %v3717_v55  ;;  %4103 = vmatpush.msra.mxu2 %v3718_v57  ;;  %v3589_v55 = vand.u32 2147483647, %v7027_v30  ;;  %v3608_v57 = vand.u32 2147483647, %v7029_v34  ;;  %v3712_v37 = vld [vmem:[#allocation2 + $0x238] sm:$0xff] }
 0x4ae   :  { %4008 = vmatpush.msrb.mxu1 %v3803_v0  ;;  %v3574_v50 = vadd.f32 %v5847_v19, %v3455_v54  ;;  %4052 = vmatpush.msrb.mxu3 %v3772_v62  ;;  %v3602_v29 = vmul.f32 %v7037_v3, %v3601_v25  ;;  %v3584_v33 = vadd.f32 %v7035_v52, %v3583_v31  ;;  %v3695_v25 = vld [vmem:[#allocation2 + $0x1b0] sm:$0xff]  ;;  %v3696_v19 = vld [vmem:[#allocation2 + $0x1b8] sm:$0xff] }
 0x4af   :  { %4064 = vmatpush.msra.mxu0 %v3709_v59  ;;  %4104 = vmatpush.msra.mxu2 %v3710_v61  ;;  %v3759_v59 = vld [vmem:[#allocation2 + $0x3b0] sm:$0xff]  ;;  %v3760_v61 = vld [vmem:[#allocation2 + $0x3b8] sm:$0xff]  ;;  %vm3590_vm2 = vcmp.eq.f32.partialorder %v3589_v55, 8.507059e+37  ;;  %vm3609_vm3 = vcmp.eq.f32.partialorder %v3608_v57, 8.507059e+37  ;;  %v3862_v55 = vld [vmem:[#allocation2 + $0x6e8] sm:$0xff] }
 0x4b0   :  { %4009 = vmatpush.msrb.mxu1 %v3795_v8  ;;  %v3603_v22 = vadd.f32 %v7037_v3, %v3602_v29  ;;  %v3588_v30 = vsel %vm7061_vm0, %v7035_v52, %v3584_v33  ;;  %v3751_v8 = vld [vmem:[#allocation2 + $0x370] sm:$0xff]  ;;  %v3680_v31 = vld [vmem:[#allocation2 + $0x138] sm:$0xff]  ;;  %v3877_v33 = vld [vmem:[#allocation2 + $0x760] sm:$0xff] }
 0x4b1   :  { %v3494_v36 = vpop.f32.mrf.mxu3  ;;  %4065 = vmatpush.msra.mxu0 %v3701_v7  ;;  %4105 = vmatpush.msra.mxu2 %v3702_v24  ;;  %v3611_v7 = vor.u32 1.1754944e-38, %v3610_v15  ;;  %v3592_v24 = vor.u32 1.1754944e-38, %v3591_v6  ;;  %v3743_v52 = vld [vmem:[#allocation2 + $0x330] sm:$0xff]  ;;  %v3664_v6 = vld [vmem:[#allocation2 + $0xb8] sm:$0xff] }
 0x4b2   :  { %v3495_v5 = vadd.f32 %v3494_v36, %v3474_v43  ;;  %4010 = vmatpush.msrb.mxu1 %v3787_v23  ;;  %v3607_v34 = vsel %vm7069_vm1, %v7037_v3, %v3603_v22  ;;  %v3735_v3 = vld [vmem:[#allocation2 + $0x2f0] sm:$0xff]  ;;  %v3878_v22 = vld [vmem:[#allocation2 + $0x768] sm:$0xff] }
 0x4b3   :  { %4066 = vmatpush.msra.mxu0 %v3693_v53  ;;  %4106 = vmatpush.msra.mxu2 %v3694_v27  ;;  %v3593_v43 = vsel %vm3590_vm2, %v3592_v24, %v3588_v30  ;;  %v3612_v53 = vsel %vm3609_vm3, %v3611_v7, %v3607_v34  ;;  %v3744_v27 = vld [vmem:[#allocation2 + $0x338] sm:$0xff]  ;;  %v3727_v36 = vld [vmem:[#allocation2 + $0x2b0] sm:$0xff]  ;;  %v3845_v34 = vld [vmem:[#allocation2 + $0x660] sm:$0xff] }
 0x4b4   :  { %v3575_v49 = vadd.f32 %v5848_v1, %v3495_v5  ;;  %4011 = vmatpush.msrb.mxu1 %v3779_v12  ;;  %v3634_v44 = vmul.f32 %v3612_v53, %v6926_v10  ;;  %v3728_v1 = vld [vmem:[#allocation2 + $0x2b8] sm:$0xff]  ;;  %v3711_v12 = vld [vmem:[#allocation2 + $0x230] sm:$0xff]  ;;  %v3838_v7 = vld [vmem:[#allocation2 + $0x628] sm:$0xff] }
 0x4b5   :  { %4067 = vmatpush.msra.mxu0 %v3685_v51  ;;  %4107 = vmatpush.msra.mxu2 %v3686_v56  ;;  %v3719_v51 = vld [vmem:[#allocation2 + $0x270] sm:$0xff]  ;;  %v3720_v56 = vld [vmem:[#allocation2 + $0x278] sm:$0xff]  ;;  %v3829_v24 = vld [vmem:[#allocation2 + $0x5e0] sm:$0xff] }
 0x4b6   :  { %v3615_v14 = vsub.f32 0.0, %v3575_v49  ;;  %4012 = vmatpush.msrb.mxu1 %v3771_v63  ;;  %v3679_v29 = vld [vmem:[#allocation2 + $0x130] sm:$0xff]  ;;  %v3648_v30 = vld [vmem:[#allocation2 + $0x38] sm:$0xff]  ;;  %v3813_v53 = vld [vmem:[#allocation2 + $0x560] sm:$0xff] }
 0x4b7   :  { %4068 = vmatpush.msra.mxu0 %v3677_v9  ;;  %4108 = vmatpush.msra.mxu2 %v3678_v60  ;;  %v3703_v9 = vld [vmem:[#allocation2 + $0x1f0] sm:$0xff]  ;;  %v3704_v60 = vld [vmem:[#allocation2 + $0x1f8] sm:$0xff] }
 0x4b8   :  { %v3616_v4 = vmul.f32 1.442695, %v3615_v14  ;;  %v3687_v14 = vld [vmem:[#allocation2 + $0x170] sm:$0xff] }
 0x4b9   :  { %4069 = vmatpush.msra.mxu0 %v3669_v58  ;;  %4109 = vmatpush.msra.mxu2 %v3670_v40  ;;  %v3688_v58 = vld [vmem:[#allocation2 + $0x178] sm:$0xff]  ;;  %v3663_v15 = vld [vmem:[#allocation2 + $0xb0] sm:$0xff] }
 0x4ba   :  { %6032 = vpow2.f32 %v3616_v4  ;;  %v3655_v57 = vld [vmem:[#allocation2 + $0x70] sm:$0xff] }
 0x4bb   :  { %4070 = vmatpush.msra.mxu0 %v3661_v21  ;;  %4110 = vmatpush.msra.mxu2 %v3662_v26  ;;  %6034 = vtanh.f32 %v3574_v50  ;;  %v3893_v21 = vld [vmem:[#allocation2 + $0x7e0] sm:$0xff]  ;;  %v3894_v26 = vld [vmem:[#allocation2 + $0x7e8] sm:$0xff] }
 0x4bd   :  { %4071 = vmatpush.msra.mxu0 %v3653_v35  ;;  %4111 = vmatpush.msra.mxu2 %v3654_v20  ;;  %v3885_v35 = vld [vmem:[#allocation2 + $0x7a0] sm:$0xff]  ;;  %v3886_v20 = vld [vmem:[#allocation2 + $0x7a8] sm:$0xff] }
 0x4bf   :  { %4072 = vmatpush.msra.mxu0 %v3645_v13  ;;  %4112 = vmatpush.msra.mxu2 %v3646_v17  ;;  %v3671_v13 = vld [vmem:[#allocation2 + $0xf0] sm:$0xff]  ;;  %v3672_v17 = vld [vmem:[#allocation2 + $0xf8] sm:$0xff] }
 0x4c0   :  { %v6033_v18 = vpop.eup %6032  ;;  %4073 = vmatmul.f32.vlgmr.msra.gmra.mxu0 %v7019_v48  ;;  %4113 = vmatmul.f32.vlgmr.msra.gmra.mxu2 %v7019_v48 }
 0x4c1   :  { %v3618_v0 = vadd.f32 1.0, %v6033_v18  ;;  %4137 = vmatpush.msrb.mxu0 %v3767_v38  ;;  %4177 = vmatpush.msrb.mxu2 %v3768_v42  ;;  %v6035_v28 = vpop.eup %6034  ;;  %v3869_v38 = vld [vmem:[#allocation2 + $0x720] sm:$0xff]  ;;  %v3870_v42 = vld [vmem:[#allocation2 + $0x728] sm:$0xff]  ;;  %v3656_v18 = vld [vmem:[#allocation2 + $0x78] sm:$0xff] }
 0x4c2   :  { %v3635_v45 = vmul.f32 %v6035_v28, %v3593_v43  ;;  %v3837_v28 = vld [vmem:[#allocation2 + $0x620] sm:$0xff]  ;;  %v3822_v43 = vld [vmem:[#allocation2 + $0x5a8] sm:$0xff] }
 0x4c3   :  { %6036 = vrcp.f32 %v3618_v0  ;;  %4138 = vmatpush.msrb.mxu0 %v3759_v59  ;;  %4178 = vmatpush.msrb.mxu2 %v3760_v61  ;;  %v3630_v10 = vand.u32 2147483648, %v3618_v0  ;;  %v3628_v49 = vand.u32 2147483647, %v3618_v0  ;;  %vm3624_vm5 = vweird.f32 %v3618_v0  ;;  %v3854_v59 = vld [vmem:[#allocation2 + $0x6a8] sm:$0xff]  ;;  %v3647_v61 = vld [vmem:[#allocation2 + $0x30] sm:$0xff] }
 0x4c4   :  { %v7082_v46 = vadd.f32 %v3635_v45, %v3634_v44  ;;  %v3806_v45 = vld [vmem:[#allocation2 + $0x528] sm:$0xff] }
 0x4c5   :  { %4139 = vmatpush.msrb.mxu0 %v3751_v8  ;;  %4179 = vmatpush.msrb.mxu2 %v3752_v41  ;;  %v3631_v63 = vor.u32 1.1754944e-38, %v3630_v10  ;;  %vm3629_vm7 = vcmp.eq.f32.partialorder %v3628_v49, 8.507059e+37  ;;  %v3830_v8 = vld [vmem:[#allocation2 + $0x5e8] sm:$0xff]  ;;  %v3821_v41 = vld [vmem:[#allocation2 + $0x5a0] sm:$0xff]  ;;  %v3880_v10 = vld [vmem:[#allocation2 + $0x778] sm:$0xff] }
 0x4c6   :  { %6038 = vtanh.f32 %v7082_v46  ;;  %v3790_v44 = vld [vmem:[#allocation2 + $0x4a8] sm:$0xff]  ;;  %v3872_v49 = vld [vmem:[#allocation2 + $0x738] sm:$0xff] }
 0x4c7   :  { %4140 = vmatpush.msrb.mxu0 %v3743_v52  ;;  %4180 = vmatpush.msrb.mxu2 %v3744_v27  ;;  %v3814_v52 = vld [vmem:[#allocation2 + $0x568] sm:$0xff]  ;;  %v3805_v27 = vld [vmem:[#allocation2 + $0x520] sm:$0xff] }
 0x4c9   :  { %v6037_v23 = vpop.eup %6036  ;;  %4141 = vmatpush.msrb.mxu0 %v3735_v3  ;;  %4181 = vmatpush.msrb.mxu2 %v3736_v39  ;;  %v3798_v3 = vld [vmem:[#allocation2 + $0x4e8] sm:$0xff]  ;;  %v3789_v39 = vld [vmem:[#allocation2 + $0x4a0] sm:$0xff] }
 0x4ca   :  { %v3620_v5 = vmul.f32 %v6037_v23, %v3618_v0  ;;  %vm3625_vm4 = vweird.f32 %v6037_v23  ;;  %v3846_v0 = vld [vmem:[#allocation2 + $0x668] sm:$0xff] }
 0x4cb   :  { %4142 = vmatpush.msrb.mxu0 %v3727_v36  ;;  %4182 = vmatpush.msrb.mxu2 %v3728_v1  ;;  %vm3626_vm6 = vmor %vm3624_vm5, %vm3625_vm4  ;;  %v3781_v36 = vld [vmem:[#allocation2 + $0x460] sm:$0xff]  ;;  %v3782_v1 = vld [vmem:[#allocation2 + $0x468] sm:$0xff] }
 0x4cc   :  { %v3621_v2 = vsub.f32 1.0, %v3620_v5  ;;  %v6039_v40 = vpop.eup %6038  ;;  %v3774_v5 = vld [vmem:[#allocation2 + $0x428] sm:$0xff] }
 0x4cd   :  { %4143 = vmatpush.msrb.mxu0 %v3719_v51  ;;  %4183 = vmatpush.msrb.mxu2 %v3720_v56  ;;  %v3895_v51 = vld [vmem:[#allocation2 + $0x7f0] sm:$0xff]  ;;  %v3896_v56 = vld [vmem:[#allocation2 + $0x7f8] sm:$0xff] }
 0x4ce   :  { %v3622_v54 = vmul.f32 %v6037_v23, %v3621_v2  ;;  %v3887_v2 = vld [vmem:[#allocation2 + $0x7b0] sm:$0xff] }
 0x4cf   :  { %4144 = vmatpush.msrb.mxu0 %v3711_v12  ;;  %4184 = vmatpush.msrb.mxu2 %v3712_v37  ;;  %v3888_v12 = vld [vmem:[#allocation2 + $0x7b8] sm:$0xff]  ;;  %v3879_v37 = vld [vmem:[#allocation2 + $0x770] sm:$0xff] }
 0x4d0   :  { %v3623_v16 = vadd.f32 %v6037_v23, %v3622_v54  ;;  %v3871_v54 = vld [vmem:[#allocation2 + $0x730] sm:$0xff] }
 0x4d1   :  { %4145 = vmatpush.msrb.mxu0 %v3703_v9  ;;  %4185 = vmatpush.msrb.mxu2 %v3704_v60  ;;  %v3863_v9 = vld [vmem:[#allocation2 + $0x6f0] sm:$0xff]  ;;  %v3864_v60 = vld [vmem:[#allocation2 + $0x6f8] sm:$0xff] }
 0x4d2   :  { %v3627_v62 = vsel %vm3626_vm6, %v6037_v23, %v3623_v16  ;;  %v3773_v23 = vld [vmem:[#allocation2 + $0x420] sm:$0xff]  ;;  %v3855_v16 = vld [vmem:[#allocation2 + $0x6b0] sm:$0xff] }
 0x4d3   :  { %v3632_v50 = vsel %vm3629_vm7, %v3631_v63, %v3627_v62  ;;  %4146 = vmatpush.msrb.mxu0 %v3695_v25  ;;  %4186 = vmatpush.msrb.mxu2 %v3696_v19  ;;  %v3856_v25 = vld [vmem:[#allocation2 + $0x6b8] sm:$0xff]  ;;  %v3847_v19 = vld [vmem:[#allocation2 + $0x670] sm:$0xff] }
 0x4d4   :  { %v7085_v4 = vmul.f32 %v6039_v40, %v3632_v50  ;;  %v3848_v63 = vld [vmem:[#allocation2 + $0x678] sm:$0xff]  ;;  %v3839_v62 = vld [vmem:[#allocation2 + $0x630] sm:$0xff] }
 0x4d5   :  { %4147 = vmatpush.msrb.mxu0 %v3687_v14  ;;  %4187 = vmatpush.msrb.mxu2 %v3688_v58  ;;  %v3840_v14 = vld [vmem:[#allocation2 + $0x638] sm:$0xff]  ;;  %v3831_v58 = vld [vmem:[#allocation2 + $0x5f0] sm:$0xff] }
 0x4d6   :  { %5850 = vst [vmem:[%s7453_s2 + $0x38] sm:$0xff] %v7085_v4  ;;  %3933 = vmatmul.f32.vlgmr.msra.gmra.mxu1 %v7085_v4  ;;  %3973 = vmatmul.f32.vlgmr.msra.gmra.mxu3 %v7085_v4  ;;  %v3832_v40 = vld [vmem:[#allocation2 + $0x5f8] sm:$0xff]  ;;  %v3823_v50 = vld [vmem:[#allocation2 + $0x5b0] sm:$0xff] }
 0x4d7   :  { %4077 = vmatpush.msra.mxu1 %v3893_v21  ;;  %4117 = vmatpush.msra.mxu3 %v3894_v26  ;;  %v3824_v21 = vld [vmem:[#allocation2 + $0x5b8] sm:$0xff]  ;;  %v3815_v26 = vld [vmem:[#allocation2 + $0x570] sm:$0xff] }
 0x4d8   :  { %4148 = vmatpush.msrb.mxu0 %v3679_v29  ;;  %4188 = vmatpush.msrb.mxu2 %v3680_v31  ;;  %v3816_v29 = vld [vmem:[#allocation2 + $0x578] sm:$0xff]  ;;  %v3807_v31 = vld [vmem:[#allocation2 + $0x530] sm:$0xff] }
 0x4d9   :  { %4078 = vmatpush.msra.mxu1 %v3885_v35  ;;  %4118 = vmatpush.msra.mxu3 %v3886_v20  ;;  %v3808_v35 = vld [vmem:[#allocation2 + $0x538] sm:$0xff]  ;;  %v3799_v20 = vld [vmem:[#allocation2 + $0x4f0] sm:$0xff] }
 0x4da   :  { %4149 = vmatpush.msrb.mxu0 %v3671_v13  ;;  %4189 = vmatpush.msrb.mxu2 %v3672_v17  ;;  %v3800_v13 = vld [vmem:[#allocation2 + $0x4f8] sm:$0xff]  ;;  %v3791_v17 = vld [vmem:[#allocation2 + $0x4b0] sm:$0xff] }
 0x4db   :  { %4079 = vmatpush.msra.mxu1 %v3877_v33  ;;  %4119 = vmatpush.msra.mxu3 %v3878_v22  ;;  %v3792_v33 = vld [vmem:[#allocation2 + $0x4b8] sm:$0xff]  ;;  %v3783_v22 = vld [vmem:[#allocation2 + $0x470] sm:$0xff] }
 0x4dc   :  { %4150 = vmatpush.msrb.mxu0 %v3663_v15  ;;  %4190 = vmatpush.msrb.mxu2 %v3664_v6  ;;  %v3784_v15 = vld [vmem:[#allocation2 + $0x478] sm:$0xff]  ;;  %v3775_v6 = vld [vmem:[#allocation2 + $0x430] sm:$0xff] }
 0x4dd   :  { %4080 = vmatpush.msra.mxu1 %v3869_v38  ;;  %4120 = vmatpush.msra.mxu3 %v3870_v42  ;;  %v3776_v38 = vld [vmem:[#allocation2 + $0x438] sm:$0xff]  ;;  %v4481_v42 = vld [vmem:[#allocation2 + $0x3c0] sm:$0xff] }
 0x4de   :  { %4013 = vmatmul.f32.vlgmr.msrb.gmra.mxu1 %v7085_v4  ;;  %4053 = vmatmul.f32.vlgmr.msrb.gmra.mxu3 %v7085_v4 }
 0x4df   :  { %4081 = vmatpush.msra.mxu1 %v3861_v47  ;;  %4121 = vmatpush.msra.mxu3 %v3862_v55  ;;  %v4482_v47 = vld [vmem:[#allocation2 + $0x3c8] sm:$0xff]  ;;  %v4473_v55 = vld [vmem:[#allocation2 + $0x380] sm:$0xff] }
 0x4e0   :  { %4151 = vmatpush.msrb.mxu0 %v3655_v57  ;;  %4191 = vmatpush.msrb.mxu2 %v3656_v18  ;;  %v4474_v57 = vld [vmem:[#allocation2 + $0x388] sm:$0xff]  ;;  %v4465_v18 = vld [vmem:[#allocation2 + $0x340] sm:$0xff] }
 0x4e1   :  { %4082 = vmatpush.msra.mxu1 %v3853_v11  ;;  %4122 = vmatpush.msra.mxu3 %v3854_v59  ;;  %v4466_v11 = vld [vmem:[#allocation2 + $0x348] sm:$0xff]  ;;  %v4457_v59 = vld [vmem:[#allocation2 + $0x300] sm:$0xff] }
 0x4e2   :  { %4152 = vmatpush.msrb.mxu0 %v3647_v61  ;;  %4192 = vmatpush.msrb.mxu2 %v3648_v30  ;;  %v4458_v61 = vld [vmem:[#allocation2 + $0x308] sm:$0xff]  ;;  %v4449_v30 = vld [vmem:[#allocation2 + $0x2c0] sm:$0xff] }
 0x4e3   :  { %4153 = vmatmul.f32.vlgmr.msrb.gmra.mxu0 %v7019_v48  ;;  %4193 = vmatmul.f32.vlgmr.msrb.gmra.mxu2 %v7019_v48  ;;  %v3797_v48 = vld [vmem:[#allocation2 + $0x4e0] sm:$0xff] }
 0x4e4   :  { %4083 = vmatpush.msra.mxu1 %v3845_v34  ;;  %4123 = vmatpush.msra.mxu3 %v3846_v0  ;;  %v4450_v34 = vld [vmem:[#allocation2 + $0x2c8] sm:$0xff] }
 0x4e5   :  { %4617 = vmatpush.msra.mxu0 %v4481_v42  ;;  %4657 = vmatpush.msra.mxu2 %v4482_v47  ;;  %v4442_v0 = vld [vmem:[#allocation2 + $0x288] sm:$0xff]  ;;  %v4411_v47 = vld [vmem:[#allocation2 + $0x190] sm:$0xff] }
 0x4e6   :  { %4084 = vmatpush.msra.mxu1 %v3837_v28  ;;  %4124 = vmatpush.msra.mxu3 %v3838_v7  ;;  %v4433_v28 = vld [vmem:[#allocation2 + $0x240] sm:$0xff]  ;;  %v4434_v7 = vld [vmem:[#allocation2 + $0x248] sm:$0xff] }
 0x4e7   :  { %4618 = vmatpush.msra.mxu0 %v4473_v55  ;;  %4658 = vmatpush.msra.mxu2 %v4474_v57  ;;  %v4412_v55 = vld [vmem:[#allocation2 + $0x198] sm:$0xff] }
 0x4e8   :  { %4085 = vmatpush.msra.mxu1 %v3829_v24  ;;  %4125 = vmatpush.msra.mxu3 %v3830_v8  ;;  %v4425_v24 = vld [vmem:[#allocation2 + $0x200] sm:$0xff]  ;;  %v4426_v8 = vld [vmem:[#allocation2 + $0x208] sm:$0xff] }
 0x4e9   :  { %4619 = vmatpush.msra.mxu0 %v4465_v18  ;;  %4659 = vmatpush.msra.mxu2 %v4466_v11  ;;  %v4609_v18 = vld [vmem:[#allocation2 + $0x7c0] sm:$0xff]  ;;  %v4610_v11 = vld [vmem:[#allocation2 + $0x7c8] sm:$0xff] }
 0x4ea   :  { %4086 = vmatpush.msra.mxu1 %v3821_v41  ;;  %4126 = vmatpush.msra.mxu3 %v3822_v43  ;;  %v4417_v41 = vld [vmem:[#allocation2 + $0x1c0] sm:$0xff]  ;;  %v4418_v43 = vld [vmem:[#allocation2 + $0x1c8] sm:$0xff] }
 0x4eb   :  { %4620 = vmatpush.msra.mxu0 %v4457_v59  ;;  %4660 = vmatpush.msra.mxu2 %v4458_v61  ;;  %v4403_v59 = vld [vmem:[#allocation2 + $0x150] sm:$0xff] }
 0x4ec   :  { %4087 = vmatpush.msra.mxu1 %v3813_v53  ;;  %4127 = vmatpush.msra.mxu3 %v3814_v52  ;;  %v4409_v53 = vld [vmem:[#allocation2 + $0x180] sm:$0xff]  ;;  %v4410_v52 = vld [vmem:[#allocation2 + $0x188] sm:$0xff] }
 0x4ed   :  { %4621 = vmatpush.msra.mxu0 %v4449_v30  ;;  %4661 = vmatpush.msra.mxu2 %v4450_v34  ;;  %v5854_v34 = vld [vmem:[%s7451_s0 + $0x158] sm:$0xff] }
 0x4ee   :  { %4088 = vmatpush.msra.mxu1 %v3805_v27  ;;  %4128 = vmatpush.msra.mxu3 %v3806_v45  ;;  %v4401_v27 = vld [vmem:[#allocation2 + $0x140] sm:$0xff]  ;;  %v4402_v45 = vld [vmem:[#allocation2 + $0x148] sm:$0xff] }
 0x4ef   :  { %4662 = vmatpush.msra.mxu2 %v4442_v0 }
 0x4f0   :  { %4089 = vmatpush.msra.mxu1 %v3797_v48  ;;  %4129 = vmatpush.msra.mxu3 %v3798_v3  ;;  %v4393_v48 = vld [vmem:[#allocation2 + $0x100] sm:$0xff]  ;;  %v4394_v3 = vld [vmem:[#allocation2 + $0x108] sm:$0xff] }
 0x4f1   :  { %4663 = vmatpush.msra.mxu2 %v4434_v7  ;;  %v4601_v7 = vld [vmem:[#allocation2 + $0x780] sm:$0xff] }
 0x4f2   :  { %4090 = vmatpush.msra.mxu1 %v3789_v39  ;;  %4130 = vmatpush.msra.mxu3 %v3790_v44  ;;  %v4385_v39 = vld [vmem:[#allocation2 + $0xc0] sm:$0xff]  ;;  %v4386_v44 = vld [vmem:[#allocation2 + $0xc8] sm:$0xff] }
 0x4f3   :  { %4664 = vmatpush.msra.mxu2 %v4426_v8  ;;  %v4395_v8 = vld [vmem:[#allocation2 + $0x110] sm:$0xff] }
 0x4f4   :  { %4091 = vmatpush.msra.mxu1 %v3781_v36  ;;  %4131 = vmatpush.msra.mxu3 %v3782_v1  ;;  %v4377_v36 = vld [vmem:[#allocation2 + $0x80] sm:$0xff]  ;;  %v4378_v1 = vld [vmem:[#allocation2 + $0x88] sm:$0xff] }
 0x4f5   :  { %4665 = vmatpush.msra.mxu2 %v4418_v43  ;;  %v4396_v43 = vld [vmem:[#allocation2 + $0x118] sm:$0xff] }
 0x4f6   :  { %4092 = vmatpush.msra.mxu1 %v3773_v23  ;;  %4132 = vmatpush.msra.mxu3 %v3774_v5  ;;  %v4369_v23 = vld [vmem:[#allocation2 + $0x40] sm:$0xff]  ;;  %v4370_v5 = vld [vmem:[#allocation2 + $0x48] sm:$0xff] }
 0x4f7   :  { %4093 = vmatmul.f32.vlgmr.msra.gmra.mxu1 %v7085_v4  ;;  %4133 = vmatmul.f32.vlgmr.msra.gmra.mxu3 %v7085_v4 }
 0x4f8   :  { %4157 = vmatpush.msrb.mxu1 %v3895_v51  ;;  %4197 = vmatpush.msrb.mxu3 %v3896_v56  ;;  %v4361_v51 = vld [vmem:[#allocation2] sm:$0xff]  ;;  %v4362_v56 = vld [vmem:[#allocation2 + $0x8] sm:$0xff] }
 0x4f9   :  { %4666 = vmatpush.msra.mxu2 %v4410_v52  ;;  %v4593_v52 = vld [vmem:[#allocation2 + $0x740] sm:$0xff] }
 0x4fa   :  { %4158 = vmatpush.msrb.mxu1 %v3887_v2  ;;  %4198 = vmatpush.msrb.mxu3 %v3888_v12  ;;  %v4483_v2 = vld [vmem:[#allocation2 + $0x3d0] sm:$0xff]  ;;  %v4484_v12 = vld [vmem:[#allocation2 + $0x3d8] sm:$0xff] }
 0x4fb   :  { %4667 = vmatpush.msra.mxu2 %v4402_v45  ;;  %v4387_v45 = vld [vmem:[#allocation2 + $0xd0] sm:$0xff] }
 0x4fc   :  { %4159 = vmatpush.msrb.mxu1 %v3879_v37  ;;  %4199 = vmatpush.msrb.mxu3 %v3880_v10  ;;  %v4475_v37 = vld [vmem:[#allocation2 + $0x390] sm:$0xff]  ;;  %v4476_v10 = vld [vmem:[#allocation2 + $0x398] sm:$0xff] }
 0x4fd   :  { %4668 = vmatpush.msra.mxu2 %v4394_v3 }
 0x4fe   :  { %4160 = vmatpush.msrb.mxu1 %v3871_v54  ;;  %4200 = vmatpush.msrb.mxu3 %v3872_v49  ;;  %v4467_v54 = vld [vmem:[#allocation2 + $0x350] sm:$0xff]  ;;  %v4468_v49 = vld [vmem:[#allocation2 + $0x358] sm:$0xff] }
 0x4ff   :  { %4669 = vmatpush.msra.mxu2 %v4386_v44  ;;  %v4586_v44 = vld [vmem:[#allocation2 + $0x708] sm:$0xff] }
 0x500   :  { %4161 = vmatpush.msrb.mxu1 %v3863_v9  ;;  %4201 = vmatpush.msrb.mxu3 %v3864_v60  ;;  %v4459_v9 = vld [vmem:[#allocation2 + $0x310] sm:$0xff]  ;;  %v4460_v60 = vld [vmem:[#allocation2 + $0x318] sm:$0xff] }
 0x501   :  { %4670 = vmatpush.msra.mxu2 %v4378_v1  ;;  %v4380_v1 = vld [vmem:[#allocation2 + $0x98] sm:$0xff] }
 0x502   :  { %4162 = vmatpush.msrb.mxu1 %v3855_v16  ;;  %4202 = vmatpush.msrb.mxu3 %v3856_v25 }
 0x503   :  { %4671 = vmatpush.msra.mxu2 %v4370_v5 }
 0x504   :  { %4163 = vmatpush.msrb.mxu1 %v3847_v19  ;;  %4203 = vmatpush.msrb.mxu3 %v3848_v63  ;;  %v5851_v19 = vld [vmem:[%s7451_s0 + $0x140] sm:$0xff] }
 0x505   :  { %4672 = vmatpush.msra.mxu2 %v4362_v56  ;;  %v4578_v56 = vld [vmem:[#allocation2 + $0x6c8] sm:$0xff] }
 0x506   :  { %4164 = vmatpush.msrb.mxu1 %v3839_v62  ;;  %4204 = vmatpush.msrb.mxu3 %v3840_v14  ;;  %v4451_v62 = vld [vmem:[#allocation2 + $0x2d0] sm:$0xff]  ;;  %v4452_v14 = vld [vmem:[#allocation2 + $0x2d8] sm:$0xff] }
 0x507   :  { %4737 = vmatpush.msrb.mxu2 %v4484_v12 }
 0x508   :  { %4165 = vmatpush.msrb.mxu1 %v3831_v58  ;;  %4205 = vmatpush.msrb.mxu3 %v3832_v40  ;;  %v4443_v40 = vld [vmem:[#allocation2 + $0x290] sm:$0xff] }
 0x509   :  { %4738 = vmatpush.msrb.mxu2 %v4476_v10 }
 0x50a   :  { %4166 = vmatpush.msrb.mxu1 %v3823_v50  ;;  %4206 = vmatpush.msrb.mxu3 %v3824_v21  ;;  %v4444_v50 = vld [vmem:[#allocation2 + $0x298] sm:$0xff] }
 0x50b   :  { %4739 = vmatpush.msrb.mxu2 %v4468_v49  ;;  %v4570_v49 = vld [vmem:[#allocation2 + $0x688] sm:$0xff] }
 0x50c   :  { %4167 = vmatpush.msrb.mxu1 %v3815_v26  ;;  %4207 = vmatpush.msrb.mxu3 %v3816_v29  ;;  %v4435_v29 = vld [vmem:[#allocation2 + $0x250] sm:$0xff] }
 0x50d   :  { %4740 = vmatpush.msrb.mxu2 %v4460_v60 }
 0x50e   :  { %4168 = vmatpush.msrb.mxu1 %v3807_v31  ;;  %4208 = vmatpush.msrb.mxu3 %v3808_v35  ;;  %v4436_v31 = vld [vmem:[#allocation2 + $0x258] sm:$0xff] }
 0x50f   :  { %4741 = vmatpush.msrb.mxu2 %v4452_v14 }
 0x510   :  { %4169 = vmatpush.msrb.mxu1 %v3799_v20  ;;  %4209 = vmatpush.msrb.mxu3 %v3800_v13  ;;  %v5852_v20 = vld [vmem:[%s7451_s0 + $0x148] sm:$0xff] }
 0x511   :  { %4742 = vmatpush.msrb.mxu2 %v4444_v50  ;;  %v4553_v50 = vld [vmem:[#allocation2 + $0x600] sm:$0xff] }
 0x512   :  { %4170 = vmatpush.msrb.mxu1 %v3791_v17  ;;  %4210 = vmatpush.msrb.mxu3 %v3792_v33  ;;  %v4427_v33 = vld [vmem:[#allocation2 + $0x210] sm:$0xff] }
 0x513   :  { %4743 = vmatpush.msrb.mxu2 %v4436_v31  ;;  %v4545_v31 = vld [vmem:[#allocation2 + $0x5c0] sm:$0xff] }
 0x514   :  { %4171 = vmatpush.msrb.mxu1 %v3783_v22  ;;  %4211 = vmatpush.msrb.mxu3 %v3784_v15  ;;  %v4428_v22 = vld [vmem:[#allocation2 + $0x218] sm:$0xff] }
 0x515   :  { %4744 = vmatpush.msrb.mxu2 %v4428_v22 }
 0x516   :  { %4172 = vmatpush.msrb.mxu1 %v3775_v6  ;;  %4212 = vmatpush.msrb.mxu3 %v3776_v38  ;;  %v4419_v6 = vld [vmem:[#allocation2 + $0x1d0] sm:$0xff]  ;;  %v4420_v38 = vld [vmem:[#allocation2 + $0x1d8] sm:$0xff] }
 0x517   :  { %4173 = vmatmul.f32.vlgmr.msrb.gmra.mxu1 %v7085_v4  ;;  %4213 = vmatmul.f32.vlgmr.msrb.gmra.mxu3 %v7085_v4  ;;  %v4441_v4 = vld [vmem:[#allocation2 + $0x280] sm:$0xff] }
 0x518   :  { %4622 = vmatpush.msra.mxu0 %v4441_v4  ;;  %4745 = vmatpush.msrb.mxu2 %v4420_v38  ;;  %v4404_v4 = vld [vmem:[#allocation2 + $0x158] sm:$0xff] }
 0x519   :  { %4637 = vmatpush.msra.mxu1 %v4609_v18  ;;  %4677 = vmatpush.msra.mxu3 %v4610_v11  ;;  %v5855_v18 = vld [vmem:[%s7451_s0 + $0xa0] sm:$0xff] }
 0x51a   :  { %4623 = vmatpush.msra.mxu0 %v4433_v28  ;;  %4746 = vmatpush.msrb.mxu2 %v4412_v55  ;;  %v4529_v11 = vld [vmem:[#allocation2 + $0x540] sm:$0xff] }
 0x51b   :  { %4638 = vmatpush.msra.mxu1 %v4601_v7  ;;  %v4521_v7 = vld [vmem:[#allocation2 + $0x500] sm:$0xff] }
 0x51c   :  { %4624 = vmatpush.msra.mxu0 %v4425_v24  ;;  %4747 = vmatpush.msrb.mxu2 %v4404_v4  ;;  %v4602_v24 = vld [vmem:[#allocation2 + $0x788] sm:$0xff] }
 0x51d   :  { %v3914_v16 = vpop.f32.mrf.mxu0  ;;  %4678 = vmatpush.msra.mxu3 %v4602_v24  ;;  %4639 = vmatpush.msra.mxu1 %v4593_v52  ;;  %v4522_v24 = vld [vmem:[#allocation2 + $0x508] sm:$0xff] }
 0x51e   :  { %4625 = vmatpush.msra.mxu0 %v4417_v41  ;;  %4748 = vmatpush.msrb.mxu2 %v4396_v43  ;;  %v4514_v52 = vld [vmem:[#allocation2 + $0x4c8] sm:$0xff] }
 0x520   :  { %4626 = vmatpush.msra.mxu0 %v4409_v53 }
 0x522   :  { %4627 = vmatpush.msra.mxu0 %v4401_v27  ;;  %v4594_v27 = vld [vmem:[#allocation2 + $0x748] sm:$0xff] }
 0x523   :  { %v3954_v21 = vpop.f32.mrf.mxu2  ;;  %4679 = vmatpush.msra.mxu3 %v4594_v27 }
 0x524   :  { %4628 = vmatpush.msra.mxu0 %v4393_v48  ;;  %v4388_v48 = vld [vmem:[#allocation2 + $0xd8] sm:$0xff] }
 0x525   :  { %4749 = vmatpush.msrb.mxu2 %v4388_v48  ;;  %4680 = vmatpush.msra.mxu3 %v4586_v44 }
 0x526   :  { %4629 = vmatpush.msra.mxu0 %v4385_v39  ;;  %v4585_v39 = vld [vmem:[#allocation2 + $0x700] sm:$0xff] }
 0x527   :  { %4640 = vmatpush.msra.mxu1 %v4585_v39  ;;  %4750 = vmatpush.msrb.mxu2 %v4380_v1  ;;  %v5856_v1 = vld [vmem:[%s7451_s0 + $0xa8] sm:$0xff] }
 0x528   :  { %4630 = vmatpush.msra.mxu0 %v4377_v36  ;;  %v4379_v36 = vld [vmem:[#allocation2 + $0x90] sm:$0xff]  ;;  %4681 = vmatpush.msra.mxu3 %v4578_v56 }
 0x52a   :  { %4631 = vmatpush.msra.mxu0 %v4369_v23  ;;  %4682 = vmatpush.msra.mxu3 %v4570_v49  ;;  %v4497_v49 = vld [vmem:[#allocation2 + $0x440] sm:$0xff] }
 0x52b   :  { %v4034_v61 = vpop.f32.mrf.mxu2 }
 0x52c   :  { %4632 = vmatpush.msra.mxu0 %v4361_v51  ;;  %v4577_v51 = vld [vmem:[#allocation2 + $0x6c0] sm:$0xff] }
 0x52d   :  { %4641 = vmatpush.msra.mxu1 %v4577_v51 }
 0x52e   :  { %4697 = vmatpush.msrb.mxu0 %v4483_v2  ;;  %v4371_v2 = vld [vmem:[#allocation2 + $0x50] sm:$0xff] }
 0x530   :  { %4698 = vmatpush.msrb.mxu0 %v4475_v37  ;;  %v4372_v37 = vld [vmem:[#allocation2 + $0x58] sm:$0xff] }
 0x531   :  { %4751 = vmatpush.msrb.mxu2 %v4372_v37 }
 0x532   :  { %4699 = vmatpush.msrb.mxu0 %v4467_v54  ;;  %v4569_v54 = vld [vmem:[#allocation2 + $0x680] sm:$0xff] }
 0x533   :  { %4642 = vmatpush.msra.mxu1 %v4569_v54 }
 0x534   :  { %4700 = vmatpush.msrb.mxu0 %v4459_v9  ;;  %v4363_v9 = vld [vmem:[#allocation2 + $0x10] sm:$0xff] }
 0x536   :  { %4701 = vmatpush.msrb.mxu0 %v4451_v62  ;;  %v4562_v62 = vld [vmem:[#allocation2 + $0x648] sm:$0xff] }
 0x537   :  { %4683 = vmatpush.msra.mxu3 %v4562_v62 }
 0x538   :  { %4702 = vmatpush.msrb.mxu0 %v4443_v40  ;;  %v5853_v40 = vld [vmem:[%s7451_s0 + $0x150] sm:$0xff] }
 0x53a   :  { %4703 = vmatpush.msrb.mxu0 %v4435_v29 }
 0x53c   :  { %4704 = vmatpush.msrb.mxu0 %v4427_v33 }
 0x53e   :  { %4705 = vmatpush.msrb.mxu0 %v4419_v6  ;;  %v4538_v6 = vld [vmem:[#allocation2 + $0x588] sm:$0xff] }
 0x540   :  { %4706 = vmatpush.msrb.mxu0 %v4411_v47 }
 0x542   :  { %4707 = vmatpush.msrb.mxu0 %v4403_v59  ;;  %v4530_v59 = vld [vmem:[#allocation2 + $0x548] sm:$0xff] }
 0x544   :  { %4708 = vmatpush.msrb.mxu0 %v4395_v8 }
 0x546   :  { %4709 = vmatpush.msrb.mxu0 %v4387_v45 }
 0x548   :  { %4710 = vmatpush.msrb.mxu0 %v4379_v36 }
 0x54a   :  { %4711 = vmatpush.msrb.mxu0 %v4371_v2 }
 0x54c   :  { %4712 = vmatpush.msrb.mxu0 %v4363_v9  ;;  %v4498_v9 = vld [vmem:[#allocation2 + $0x448] sm:$0xff] }
 0x553   :  { %v3934_v25 = vpop.f32.mrf.mxu1 }
 0x554   :  { %v3935_v63 = vadd.f32 %v3934_v25, %v3914_v16  ;;  %v4364_v16 = vld [vmem:[#allocation2 + $0x18] sm:$0xff]  ;;  %v3994_v25 = vpop.f32.mrf.mxu0 }
 0x555   :  { %4752 = vmatpush.msrb.mxu2 %v4364_v16 }
 0x556   :  { %v4225_v58 = vadd.f32 %v5851_v19, %v3935_v63  ;;  %v4561_v63 = vld [vmem:[#allocation2 + $0x640] sm:$0xff] }
 0x557   :  { %4643 = vmatpush.msra.mxu1 %v4561_v63  ;;  %v4490_v63 = vld [vmem:[#allocation2 + $0x408] sm:$0xff] }
 0x558   :  { %v4229_v26 = vsub.f32 0.0, %v4225_v58 }
 0x559   :  { %v3974_v35 = vpop.f32.mrf.mxu3  ;;  %4644 = vmatpush.msra.mxu1 %v4553_v50 }
 0x55a   :  { %v4230_v13 = vmul.f32 1.442695, %v4229_v26  ;;  %v3975_v17 = vadd.f32 %v3974_v35, %v3954_v21  ;;  %v4554_v21 = vld [vmem:[#allocation2 + $0x608] sm:$0xff] }
 0x55b   :  { %v4014_v10 = vpop.f32.mrf.mxu1  ;;  %4684 = vmatpush.msra.mxu3 %v4554_v21  ;;  %v4546_v35 = vld [vmem:[#allocation2 + $0x5c8] sm:$0xff]  ;;  %4645 = vmatpush.msra.mxu1 %v4545_v31  ;;  %v4604_v31 = vld [vmem:[#allocation2 + $0x798] sm:$0xff] }
 0x55c   :  { %6040 = vpow2.f32 %v4230_v13  ;;  %v4226_v15 = vadd.f32 %v5852_v20, %v3975_v17  ;;  %v4015_v14 = vadd.f32 %v4014_v10, %v3994_v25 }
 0x55d   :  { %4685 = vmatpush.msra.mxu3 %v4546_v35 }
 0x55e   :  { %v4248_v42 = vsub.f32 0.0, %v4226_v15  ;;  %v4227_v13 = vadd.f32 %v5853_v40, %v4015_v14  ;;  %v4537_v15 = vld [vmem:[#allocation2 + $0x580] sm:$0xff] }
 0x55f   :  { %4646 = vmatpush.msra.mxu1 %v4537_v15  ;;  %4686 = vmatpush.msra.mxu3 %v4538_v6  ;;  %v4588_v15 = vld [vmem:[#allocation2 + $0x718] sm:$0xff] }
 0x560   :  { %v4249_v57 = vmul.f32 1.442695, %v4248_v42  ;;  %v4074_v42 = vpop.f32.mrf.mxu0 }
 0x561   :  { %v4054_v30 = vpop.f32.mrf.mxu3  ;;  %4647 = vmatpush.msra.mxu1 %v4529_v11  ;;  %4687 = vmatpush.msra.mxu3 %v4530_v59  ;;  %v4477_v11 = vld [vmem:[#allocation2 + $0x3a0] sm:$0xff] }
 0x562   :  { %v6041_v0 = vpop.eup %6040  ;;  %6042 = vpow2.f32 %v4249_v57  ;;  %v4055_v28 = vadd.f32 %v4054_v30, %v4034_v61  ;;  %v4571_v30 = vld [vmem:[#allocation2 + $0x690] sm:$0xff] }
 0x563   :  { %v7110_v41 = vadd.f32 1.0, %v6041_v0  ;;  %4648 = vmatpush.msra.mxu1 %v4521_v7  ;;  %4688 = vmatpush.msra.mxu3 %v4522_v24  ;;  %v4563_v7 = vld [vmem:[#allocation2 + $0x650] sm:$0xff]  ;;  %v4564_v24 = vld [vmem:[#allocation2 + $0x658] sm:$0xff] }
 0x564   :  { %v4228_v53 = vadd.f32 %v5854_v34, %v4055_v28 }
 0x565   :  { %6044 = vrcp.f32 %v7110_v41  ;;  %v4244_v38 = vand.u32 2147483648, %v7110_v41  ;;  %vm4238_vm9 = vweird.f32 %v7110_v41  ;;  %v4242_v55 = vand.u32 2147483647, %v7110_v41  ;;  %4689 = vmatpush.msra.mxu3 %v4514_v52  ;;  %v4555_v52 = vld [vmem:[#allocation2 + $0x610] sm:$0xff] }
 0x566   :  { %v4268_v3 = vsub.f32 0.0, %v4228_v53  ;;  %v4513_v53 = vld [vmem:[#allocation2 + $0x4c0] sm:$0xff] }
 0x567   :  { %v4245_v8 = vor.u32 1.1754944e-38, %v4244_v38  ;;  %vm4243_vm13 = vcmp.eq.f32.partialorder %v4242_v55, 8.507059e+37  ;;  %4649 = vmatpush.msra.mxu1 %v4513_v53  ;;  %v4486_v55 = vld [vmem:[#allocation2 + $0x3e8] sm:$0xff] }
 0x568   :  { %v6043_v23 = vpop.eup %6042  ;;  %v4269_v5 = vmul.f32 1.442695, %v4268_v3  ;;  %v4114_v3 = vpop.f32.mrf.mxu2  ;;  %v4462_v53 = vld [vmem:[#allocation2 + $0x328] sm:$0xff] }
 0x569   :  { %v7113_v12 = vadd.f32 1.0, %v6043_v23  ;;  %v4505_v23 = vld [vmem:[#allocation2 + $0x480] sm:$0xff] }
 0x56a   :  { %6046 = vpow2.f32 %v4269_v5  ;;  %v4506_v5 = vld [vmem:[#allocation2 + $0x488] sm:$0xff]  ;;  %4650 = vmatpush.msra.mxu1 %v4505_v23  ;;  %v4540_v23 = vld [vmem:[#allocation2 + $0x598] sm:$0xff] }
 0x56b   :  { %v7115_v60 = vpop.eup %6044  ;;  %6048 = vrcp.f32 %v7113_v12  ;;  %v4263_v61 = vand.u32 2147483648, %v7113_v12  ;;  %v4261_v28 = vand.u32 2147483647, %v7113_v12  ;;  %vm4257_vm12 = vweird.f32 %v7113_v12  ;;  %4690 = vmatpush.msra.mxu3 %v4506_v5  ;;  %v4437_v5 = vld [vmem:[#allocation2 + $0x260] sm:$0xff] }
 0x56c   :  { %v4234_v19 = vmul.f32 %v7115_v60, %v7110_v41  ;;  %vm4239_vm8 = vweird.f32 %v7115_v60  ;;  %4651 = vmatpush.msra.mxu1 %v4497_v49  ;;  %v4524_v49 = vld [vmem:[#allocation2 + $0x518] sm:$0xff] }
 0x56d   :  { %vm7139_vm10 = vmor %vm4238_vm9, %vm4239_vm8  ;;  %v4264_v45 = vor.u32 1.1754944e-38, %v4263_v61  ;;  %vm4262_vm15 = vcmp.eq.f32.partialorder %v4261_v28, 8.507059e+37  ;;  %4691 = vmatpush.msra.mxu3 %v4498_v9  ;;  %v4478_v61 = vld [vmem:[#allocation2 + $0x3a8] sm:$0xff] }
 0x56e   :  { %v4235_v58 = vsub.f32 1.0, %v4234_v19  ;;  %v4489_v19 = vld [vmem:[#allocation2 + $0x400] sm:$0xff]  ;;  %v4470_v28 = vld [vmem:[#allocation2 + $0x368] sm:$0xff] }
 0x56f   :  { %4652 = vmatpush.msra.mxu1 %v4489_v19  ;;  %4692 = vmatpush.msra.mxu3 %v4490_v63  ;;  %v4515_v19 = vld [vmem:[#allocation2 + $0x4d0] sm:$0xff]  ;;  %v4516_v63 = vld [vmem:[#allocation2 + $0x4d8] sm:$0xff] }
 0x570   :  { %v6047_v26 = vpop.eup %6046  ;;  %v4236_v29 = vmul.f32 %v7115_v60, %v4235_v58  ;;  %v4612_v58 = vld [vmem:[#allocation2 + $0x7d8] sm:$0xff] }
 0x571   :  { %v6049_v20 = vpop.eup %6048  ;;  %v7124_v17 = vadd.f32 1.0, %v6047_v26  ;;  %4757 = vmatpush.msrb.mxu3 %v4612_v58 }
 0x572   :  { %v4253_v33 = vmul.f32 %v6049_v20, %v7113_v12  ;;  %v4237_v22 = vadd.f32 %v7115_v60, %v4236_v29  ;;  %vm4258_vm11 = vweird.f32 %v6049_v20  ;;  %v4603_v29 = vld [vmem:[#allocation2 + $0x790] sm:$0xff] }
 0x573   :  { %6050 = vrcp.f32 %v7124_v17  ;;  %vm4259_vm14 = vmor %vm4257_vm12, %vm4258_vm11  ;;  %v4283_v50 = vand.u32 2147483648, %v7124_v17  ;;  %vm4277_vm1 = vweird.f32 %v7124_v17  ;;  %v4281_v21 = vand.u32 2147483647, %v7124_v17  ;;  %4758 = vmatpush.msrb.mxu3 %v4604_v31  ;;  %v4508_v31 = vld [vmem:[#allocation2 + $0x498] sm:$0xff] }
 0x574   :  { %v4254_v47 = vsub.f32 1.0, %v4253_v33  ;;  %v4094_v57 = vpop.f32.mrf.mxu1  ;;  %6052 = vtanh.f32 %v4227_v13  ;;  %v4241_v0 = vsel %vm7139_vm10, %v7115_v60, %v4237_v22  ;;  %v4595_v13 = vld [vmem:[#allocation2 + $0x750] sm:$0xff]  ;;  %v4596_v33 = vld [vmem:[#allocation2 + $0x758] sm:$0xff] }
 0x575   :  { %v4095_v34 = vadd.f32 %v4094_v57, %v4074_v42  ;;  %v4246_v48 = vsel %vm4243_vm13, %v4245_v8, %v4241_v0  ;;  %v4284_v22 = vor.u32 1.1754944e-38, %v4283_v50  ;;  %4759 = vmatpush.msrb.mxu3 %v4596_v33  ;;  %vm4282_vm3 = vcmp.eq.f32.partialorder %v4281_v21, 8.507059e+37  ;;  %v4485_v42 = vld [vmem:[#allocation2 + $0x3e0] sm:$0xff]  ;;  %v4579_v57 = vld [vmem:[#allocation2 + $0x6d0] sm:$0xff]  ;;  %v4154_v33 = vpop.f32.mrf.mxu0 }
 0x576   :  { %v4255_v4 = vmul.f32 %v6049_v20, %v4254_v47  ;;  %v4469_v0 = vld [vmem:[#allocation2 + $0x360] sm:$0xff] }
 0x577   :  { %v4292_v41 = vadd.f32 %v5855_v18, %v4095_v34  ;;  %4760 = vmatpush.msrb.mxu3 %v4588_v15  ;;  %v4580_v18 = vld [vmem:[#allocation2 + $0x6d8] sm:$0xff] }
 0x578   :  { %v4256_v43 = vadd.f32 %v6049_v20, %v4255_v4  ;;  %v4572_v34 = vld [vmem:[#allocation2 + $0x698] sm:$0xff] }
 0x579   :  { %v7148_v27 = vpop.eup %6050  ;;  %v4296_v2 = vsub.f32 0.0, %v4292_v41  ;;  %4761 = vmatpush.msrb.mxu3 %v4580_v18  ;;  %v4461_v41 = vld [vmem:[#allocation2 + $0x320] sm:$0xff]  ;;  %v5857_v18 = vld [vmem:[%s7451_s0 + $0xb0] sm:$0xff] }
 0x57a   :  { %v4260_v39 = vsel %vm4259_vm14, %v6049_v20, %v4256_v43  ;;  %v4273_v44 = vmul.f32 %v7148_v27, %v7124_v17  ;;  %v4134_v36 = vpop.f32.mrf.mxu3  ;;  %v6053_v51 = vpop.eup %6052  ;;  %vm4278_vm0 = vweird.f32 %v7148_v27  ;;  %v4587_v17 = vld [vmem:[#allocation2 + $0x710] sm:$0xff] }
 0x57b   :  { %v4265_v56 = vsel %vm4262_vm15, %v4264_v45, %v4260_v39  ;;  %v4135_v12 = vadd.f32 %v4134_v36, %v4114_v3  ;;  %v4288_v10 = vmul.f32 %v6053_v51, %v4246_v48  ;;  %v4297_v62 = vmul.f32 1.442695, %v4296_v2  ;;  %vm7168_vm2 = vmor %vm4277_vm1, %vm4278_vm0  ;;  %4762 = vmatpush.msrb.mxu3 %v4572_v34  ;;  %v4453_v45 = vld [vmem:[#allocation2 + $0x2e0] sm:$0xff]  ;;  %v4454_v48 = vld [vmem:[#allocation2 + $0x2e8] sm:$0xff] }
 0x57c   :  { %v4287_v37 = vmul.f32 %v4265_v56, %v7001_v32  ;;  %v4274_v54 = vsub.f32 1.0, %v4273_v44  ;;  %v4611_v32 = vld [vmem:[#allocation2 + $0x7d0] sm:$0xff]  ;;  %v4548_v39 = vld [vmem:[#allocation2 + $0x5d8] sm:$0xff]  ;;  %v4445_v44 = vld [vmem:[#allocation2 + $0x2a0] sm:$0xff] }
 0x57d   :  { %v4293_v60 = vadd.f32 %v5856_v1, %v4135_v12  ;;  %4717 = vmatpush.msrb.mxu1 %v4611_v32  ;;  %4763 = vmatpush.msrb.mxu3 %v4564_v24  ;;  %v4547_v3 = vld [vmem:[#allocation2 + $0x5d0] sm:$0xff]  ;;  %v4446_v36 = vld [vmem:[#allocation2 + $0x2a8] sm:$0xff]  ;;  %v4532_v2 = vld [vmem:[#allocation2 + $0x558] sm:$0xff] }
 0x57e   :  { %v7157_v16 = vadd.f32 %v4288_v10, %v4287_v37  ;;  %v4275_v25 = vmul.f32 %v7148_v27, %v4274_v54  ;;  %v4539_v1 = vld [vmem:[#allocation2 + $0x590] sm:$0xff]  ;;  %v4438_v51 = vld [vmem:[#allocation2 + $0x268] sm:$0xff]  ;;  %v4429_v12 = vld [vmem:[#allocation2 + $0x220] sm:$0xff] }
 0x57f   :  { %v4315_v14 = vsub.f32 0.0, %v4293_v60  ;;  %4718 = vmatpush.msrb.mxu1 %v4603_v29  ;;  %v4531_v56 = vld [vmem:[#allocation2 + $0x550] sm:$0xff]  ;;  %v4430_v37 = vld [vmem:[#allocation2 + $0x228] sm:$0xff]  ;;  %v4421_v60 = vld [vmem:[#allocation2 + $0x1e0] sm:$0xff] }
 0x580   :  { %6054 = vtanh.f32 %v7157_v16  ;;  %v4276_v40 = vadd.f32 %v7148_v27, %v4275_v25  ;;  %v4523_v54 = vld [vmem:[#allocation2 + $0x510] sm:$0xff]  ;;  %v4422_v25 = vld [vmem:[#allocation2 + $0x1e8] sm:$0xff] }
 0x581   :  { %v4316_v26 = vmul.f32 1.442695, %v4315_v14  ;;  %6056 = vpow2.f32 %v4297_v62  ;;  %4719 = vmatpush.msrb.mxu1 %v4595_v13  ;;  %v4194_v62 = vpop.f32.mrf.mxu2  ;;  %v4413_v14 = vld [vmem:[#allocation2 + $0x1a0] sm:$0xff]  ;;  %v4414_v32 = vld [vmem:[#allocation2 + $0x1a8] sm:$0xff]  ;;  %v4507_v29 = vld [vmem:[#allocation2 + $0x490] sm:$0xff] }
 0x582   :  { %v4280_v20 = vsel %vm7168_vm2, %v7148_v27, %v4276_v40  ;;  %v4556_v27 = vld [vmem:[#allocation2 + $0x618] sm:$0xff]  ;;  %v4406_v13 = vld [vmem:[#allocation2 + $0x168] sm:$0xff] }
 0x583   :  { %6058 = vpow2.f32 %v4316_v26  ;;  %v4285_v38 = vsel %vm4282_vm3, %v4284_v22, %v4280_v20  ;;  %4720 = vmatpush.msrb.mxu1 %v4587_v17  ;;  %4764 = vmatpush.msrb.mxu3 %v4556_v27  ;;  %v5858_v26 = vld [vmem:[%s7451_s0 + $0xb8] sm:$0xff]  ;;  %v4405_v20 = vld [vmem:[#allocation2 + $0x160] sm:$0xff]  ;;  %v4499_v22 = vld [vmem:[#allocation2 + $0x450] sm:$0xff] }
 0x584   :  { %v4500_v17 = vld [vmem:[#allocation2 + $0x458] sm:$0xff]  ;;  %v4390_v34 = vld [vmem:[#allocation2 + $0xe8] sm:$0xff]  ;;  %v4365_v27 = vld [vmem:[#allocation2 + $0x20] sm:$0xff] }
 0x585   :  { %4721 = vmatpush.msrb.mxu1 %v4579_v57  ;;  %4765 = vmatpush.msrb.mxu3 %v4548_v39 }
 0x586   :  { %v6055_v6 = vpop.eup %6054 }
 0x587   :  { %v7175_v47 = vmul.f32 %v6055_v6, %v4285_v38  ;;  %v6057_v59 = vpop.eup %6056  ;;  %4722 = vmatpush.msrb.mxu1 %v4571_v30  ;;  %4766 = vmatpush.msrb.mxu3 %v4540_v23  ;;  %v4397_v38 = vld [vmem:[#allocation2 + $0x120] sm:$0xff] }
 0x588   :  { %v7183_v8 = vadd.f32 1.0, %v6057_v59  ;;  %v4492_v59 = vld [vmem:[#allocation2 + $0x418] sm:$0xff]  ;;  %v4389_v30 = vld [vmem:[#allocation2 + $0xe0] sm:$0xff] }
 0x589   :  { %5859 = vst [vmem:[%s7453_s2 + $0x50] sm:$0xff] %v7175_v47  ;;  %4633 = vmatmul.f32.vlgmr.msra.gmra.mxu0 %v7175_v47  ;;  %4673 = vmatmul.f32.vlgmr.msra.gmra.mxu2 %v7175_v47  ;;  %v6059_v4 = vpop.eup %6058  ;;  %v4581_v23 = vld [vmem:[#allocation2 + $0x6e0] sm:$0xff] }
 0x58a   :  { %4777 = vmatpush.msra.mxu0 %v4485_v42  ;;  %4817 = vmatpush.msra.mxu2 %v4486_v55  ;;  %v7185_v43 = vadd.f32 1.0, %v6059_v4  ;;  %6060 = vrcp.f32 %v7183_v8  ;;  %v4398_v42 = vld [vmem:[#allocation2 + $0x128] sm:$0xff]  ;;  %vm4305_vm6 = vweird.f32 %v7183_v8 }
 0x58b   :  { %4723 = vmatpush.msrb.mxu1 %v4563_v7  ;;  %4767 = vmatpush.msrb.mxu3 %v4532_v2  ;;  %v4382_v7 = vld [vmem:[#allocation2 + $0xa8] sm:$0xff]  ;;  %v4573_v2 = vld [vmem:[#allocation2 + $0x6a0] sm:$0xff] }
 0x58c   :  { %4778 = vmatpush.msra.mxu0 %v4477_v11  ;;  %4818 = vmatpush.msra.mxu2 %v4478_v61  ;;  %6062 = vrcp.f32 %v7185_v43  ;;  %v4491_v11 = vld [vmem:[#allocation2 + $0x410] sm:$0xff]  ;;  %v4330_v39 = vand.u32 2147483648, %v7185_v43  ;;  %vm4324_vm7 = vweird.f32 %v7185_v43 }
 0x58d   :  { %4724 = vmatpush.msrb.mxu1 %v4555_v52  ;;  %4768 = vmatpush.msrb.mxu3 %v4524_v49  ;;  %v4374_v52 = vld [vmem:[#allocation2 + $0x68] sm:$0xff] }
 0x58e   :  { %4779 = vmatpush.msra.mxu0 %v4469_v0  ;;  %4819 = vmatpush.msra.mxu2 %v4470_v28  ;;  %v4381_v28 = vld [vmem:[#allocation2 + $0xa0] sm:$0xff] }
 0x58f   :  { %4725 = vmatpush.msrb.mxu1 %v4547_v3  ;;  %4769 = vmatpush.msrb.mxu3 %v4516_v63  ;;  %v4472_v63 = vld [vmem:[#allocation2 + $0x378] sm:$0xff] }
 0x590   :  { %4780 = vmatpush.msra.mxu0 %v4461_v41  ;;  %4820 = vmatpush.msra.mxu2 %v4462_v53  ;;  %v7191_v10 = vpop.eup %6060  ;;  %v4373_v53 = vld [vmem:[#allocation2 + $0x60] sm:$0xff] }
 0x591   :  { %4713 = vmatmul.f32.vlgmr.msrb.gmra.mxu0 %v7175_v47  ;;  %4753 = vmatmul.f32.vlgmr.msrb.gmra.mxu2 %v7175_v47  ;;  %v4301_v58 = vmul.f32 %v7191_v10, %v7183_v8  ;;  %vm4306_vm4 = vweird.f32 %v7191_v10 }
 0x592   :  { %4781 = vmatpush.msra.mxu0 %v4453_v45  ;;  %4821 = vmatpush.msra.mxu2 %v4454_v48  ;;  %v7193_v9 = vpop.eup %6062  ;;  %v4366_v45 = vld [vmem:[#allocation2 + $0x28] sm:$0xff]  ;;  %vm7217_vm8 = vmor %vm4305_vm6, %vm4306_vm4 }
 0x593   :  { %4726 = vmatpush.msrb.mxu1 %v4539_v1  ;;  %v4320_v40 = vmul.f32 %v7193_v9, %v7185_v43  ;;  %4770 = vmatpush.msrb.mxu3 %v4508_v31  ;;  %v4302_v55 = vsub.f32 1.0, %v4301_v58  ;;  %vm4325_vm5 = vweird.f32 %v7193_v9  ;;  %v4488_v1 = vld [vmem:[#allocation2 + $0x3f8] sm:$0xff] }
 0x594   :  { %4782 = vmatpush.msra.mxu0 %v4445_v44  ;;  %4822 = vmatpush.msra.mxu2 %v4446_v36  ;;  %v4174_v50 = vpop.f32.mrf.mxu1  ;;  %v4311_v44 = vand.u32 2147483648, %v7183_v8  ;;  %v4487_v36 = vld [vmem:[#allocation2 + $0x3f0] sm:$0xff]  ;;  %vm7225_vm9 = vmor %vm4324_vm7, %vm4325_vm5 }
 0x595   :  { %4727 = vmatpush.msrb.mxu1 %v4531_v56  ;;  %v4175_v15 = vadd.f32 %v4174_v50, %v4154_v33  ;;  %v4321_v57 = vsub.f32 1.0, %v4320_v40  ;;  %4771 = vmatpush.msrb.mxu3 %v4500_v17  ;;  %v4303_v41 = vmul.f32 %v7191_v10, %v4302_v55  ;;  %v4456_v40 = vld [vmem:[#allocation2 + $0x2f8] sm:$0xff] }
 0x596   :  { %4783 = vmatpush.msra.mxu0 %v4437_v5  ;;  %4823 = vmatpush.msra.mxu2 %v4438_v51  ;;  %v4309_v5 = vand.u32 2147483647, %v7183_v8  ;;  %v4328_v51 = vand.u32 2147483647, %v7185_v43  ;;  %v4432_v17 = vld [vmem:[#allocation2 + $0x238] sm:$0xff] }
 0x597   :  { %4728 = vmatpush.msrb.mxu1 %v4523_v54  ;;  %v4294_v4 = vadd.f32 %v5857_v18, %v4175_v15  ;;  %4772 = vmatpush.msrb.mxu3 %v4492_v59  ;;  %v4322_v24 = vmul.f32 %v7193_v9, %v4321_v57  ;;  %v4304_v48 = vadd.f32 %v7191_v10, %v4303_v41  ;;  %v4415_v57 = vld [vmem:[#allocation2 + $0x1b0] sm:$0xff]  ;;  %v4416_v18 = vld [vmem:[#allocation2 + $0x1b8] sm:$0xff] }
 0x598   :  { %4784 = vmatpush.msra.mxu0 %v4429_v12  ;;  %4824 = vmatpush.msra.mxu2 %v4430_v37  ;;  %v4479_v12 = vld [vmem:[#allocation2 + $0x3b0] sm:$0xff]  ;;  %v4480_v37 = vld [vmem:[#allocation2 + $0x3b8] sm:$0xff]  ;;  %vm4310_vm10 = vcmp.eq.f32.partialorder %v4309_v5, 8.507059e+37  ;;  %vm4329_vm11 = vcmp.eq.f32.partialorder %v4328_v51, 8.507059e+37  ;;  %v4582_v5 = vld [vmem:[#allocation2 + $0x6e8] sm:$0xff] }
 0x599   :  { %4729 = vmatpush.msrb.mxu1 %v4515_v19  ;;  %v4323_v3 = vadd.f32 %v7193_v9, %v4322_v24  ;;  %v4308_v8 = vsel %vm7217_vm8, %v7191_v10, %v4304_v48  ;;  %v4471_v19 = vld [vmem:[#allocation2 + $0x370] sm:$0xff]  ;;  %v4400_v41 = vld [vmem:[#allocation2 + $0x138] sm:$0xff]  ;;  %v4597_v48 = vld [vmem:[#allocation2 + $0x760] sm:$0xff] }
 0x59a   :  { %v4214_v21 = vpop.f32.mrf.mxu3  ;;  %4785 = vmatpush.msra.mxu0 %v4421_v60  ;;  %4825 = vmatpush.msra.mxu2 %v4422_v25  ;;  %v4331_v60 = vor.u32 1.1754944e-38, %v4330_v39  ;;  %v4312_v25 = vor.u32 1.1754944e-38, %v4311_v44  ;;  %v4463_v10 = vld [vmem:[#allocation2 + $0x330] sm:$0xff]  ;;  %v4384_v44 = vld [vmem:[#allocation2 + $0xb8] sm:$0xff] }
 0x59b   :  { %v4215_v35 = vadd.f32 %v4214_v21, %v4194_v62  ;;  %4730 = vmatpush.msrb.mxu1 %v4507_v29  ;;  %v4327_v43 = vsel %vm7225_vm9, %v7193_v9, %v4323_v3  ;;  %v4455_v9 = vld [vmem:[#allocation2 + $0x2f0] sm:$0xff]  ;;  %v4598_v3 = vld [vmem:[#allocation2 + $0x768] sm:$0xff] }
 0x59c   :  { %4786 = vmatpush.msra.mxu0 %v4413_v14  ;;  %4826 = vmatpush.msra.mxu2 %v4414_v32  ;;  %v4313_v62 = vsel %vm4310_vm10, %v4312_v25, %v4308_v8  ;;  %v4332_v14 = vsel %vm4329_vm11, %v4331_v60, %v4327_v43  ;;  %v4464_v32 = vld [vmem:[#allocation2 + $0x338] sm:$0xff]  ;;  %v4447_v21 = vld [vmem:[#allocation2 + $0x2b0] sm:$0xff]  ;;  %v4565_v43 = vld [vmem:[#allocation2 + $0x660] sm:$0xff] }
 0x59d   :  { %v4295_v6 = vadd.f32 %v5858_v26, %v4215_v35  ;;  %4731 = vmatpush.msrb.mxu1 %v4499_v22  ;;  %v4354_v50 = vmul.f32 %v4332_v14, %v7082_v46  ;;  %v4448_v26 = vld [vmem:[#allocation2 + $0x2b8] sm:$0xff]  ;;  %v4431_v22 = vld [vmem:[#allocation2 + $0x230] sm:$0xff]  ;;  %v4558_v60 = vld [vmem:[#allocation2 + $0x628] sm:$0xff] }
 0x59e   :  { %4787 = vmatpush.msra.mxu0 %v4405_v20  ;;  %4827 = vmatpush.msra.mxu2 %v4406_v13  ;;  %v4439_v20 = vld [vmem:[#allocation2 + $0x270] sm:$0xff]  ;;  %v4440_v13 = vld [vmem:[#allocation2 + $0x278] sm:$0xff]  ;;  %v4549_v25 = vld [vmem:[#allocation2 + $0x5e0] sm:$0xff] }
 0x59f   :  { %v4335_v61 = vsub.f32 0.0, %v4295_v6  ;;  %4732 = vmatpush.msrb.mxu1 %v4491_v11  ;;  %v4399_v24 = vld [vmem:[#allocation2 + $0x130] sm:$0xff]  ;;  %v4368_v8 = vld [vmem:[#allocation2 + $0x38] sm:$0xff]  ;;  %v4533_v14 = vld [vmem:[#allocation2 + $0x560] sm:$0xff] }
 0x5a0   :  { %4788 = vmatpush.msra.mxu0 %v4397_v38  ;;  %4828 = vmatpush.msra.mxu2 %v4398_v42  ;;  %v4423_v38 = vld [vmem:[#allocation2 + $0x1f0] sm:$0xff]  ;;  %v4424_v42 = vld [vmem:[#allocation2 + $0x1f8] sm:$0xff] }
 0x5a1   :  { %v4336_v0 = vmul.f32 1.442695, %v4335_v61  ;;  %v4407_v61 = vld [vmem:[#allocation2 + $0x170] sm:$0xff] }
 0x5a2   :  { %4789 = vmatpush.msra.mxu0 %v4389_v30  ;;  %4829 = vmatpush.msra.mxu2 %v4390_v34  ;;  %v4408_v30 = vld [vmem:[#allocation2 + $0x178] sm:$0xff]  ;;  %v4383_v39 = vld [vmem:[#allocation2 + $0xb0] sm:$0xff] }
 0x5a3   :  { %6064 = vpow2.f32 %v4336_v0  ;;  %v4375_v51 = vld [vmem:[#allocation2 + $0x70] sm:$0xff] }
 0x5a4   :  { %4790 = vmatpush.msra.mxu0 %v4381_v28  ;;  %4830 = vmatpush.msra.mxu2 %v4382_v7  ;;  %6066 = vtanh.f32 %v4294_v4  ;;  %v4613_v28 = vld [vmem:[#allocation2 + $0x7e0] sm:$0xff]  ;;  %v4614_v7 = vld [vmem:[#allocation2 + $0x7e8] sm:$0xff] }
 0x5a6   :  { %4791 = vmatpush.msra.mxu0 %v4373_v53  ;;  %4831 = vmatpush.msra.mxu2 %v4374_v52  ;;  %v4605_v53 = vld [vmem:[#allocation2 + $0x7a0] sm:$0xff]  ;;  %v4606_v52 = vld [vmem:[#allocation2 + $0x7a8] sm:$0xff] }
 0x5a8   :  { %4792 = vmatpush.msra.mxu0 %v4365_v27  ;;  %4832 = vmatpush.msra.mxu2 %v4366_v45  ;;  %v4391_v27 = vld [vmem:[#allocation2 + $0xf0] sm:$0xff]  ;;  %v4392_v45 = vld [vmem:[#allocation2 + $0xf8] sm:$0xff] }
 0x5a9   :  { %v6065_v56 = vpop.eup %6064  ;;  %4793 = vmatmul.f32.vlgmr.msra.gmra.mxu0 %v7175_v47  ;;  %4833 = vmatmul.f32.vlgmr.msra.gmra.mxu2 %v7175_v47 }
 0x5aa   :  { %v4338_v54 = vadd.f32 1.0, %v6065_v56  ;;  %4857 = vmatpush.msrb.mxu0 %v4487_v36  ;;  %4897 = vmatpush.msrb.mxu2 %v4488_v1  ;;  %v6067_v49 = vpop.eup %6066  ;;  %v4589_v36 = vld [vmem:[#allocation2 + $0x720] sm:$0xff]  ;;  %v4590_v1 = vld [vmem:[#allocation2 + $0x728] sm:$0xff]  ;;  %v4376_v56 = vld [vmem:[#allocation2 + $0x78] sm:$0xff] }
 0x5ab   :  { %v4355_v58 = vmul.f32 %v6067_v49, %v4313_v62  ;;  %v4557_v49 = vld [vmem:[#allocation2 + $0x620] sm:$0xff]  ;;  %v4542_v62 = vld [vmem:[#allocation2 + $0x5a8] sm:$0xff] }
 0x5ac   :  { %6068 = vrcp.f32 %v4338_v54  ;;  %4858 = vmatpush.msrb.mxu0 %v4479_v12  ;;  %4898 = vmatpush.msrb.mxu2 %v4480_v37  ;;  %v4350_v46 = vand.u32 2147483648, %v4338_v54  ;;  %v4348_v6 = vand.u32 2147483647, %v4338_v54  ;;  %vm4344_vm13 = vweird.f32 %v4338_v54  ;;  %v4574_v12 = vld [vmem:[#allocation2 + $0x6a8] sm:$0xff]  ;;  %v4367_v37 = vld [vmem:[#allocation2 + $0x30] sm:$0xff] }
 0x5ad   :  { %v7238_v31 = vadd.f32 %v4355_v58, %v4354_v50  ;;  %v4526_v58 = vld [vmem:[#allocation2 + $0x528] sm:$0xff] }
 0x5ae   :  { %4859 = vmatpush.msrb.mxu0 %v4471_v19  ;;  %4899 = vmatpush.msrb.mxu2 %v4472_v63  ;;  %v4351_v11 = vor.u32 1.1754944e-38, %v4350_v46  ;;  %vm4349_vm15 = vcmp.eq.f32.partialorder %v4348_v6, 8.507059e+37  ;;  %v4550_v19 = vld [vmem:[#allocation2 + $0x5e8] sm:$0xff]  ;;  %v4541_v63 = vld [vmem:[#allocation2 + $0x5a0] sm:$0xff]  ;;  %v4600_v46 = vld [vmem:[#allocation2 + $0x778] sm:$0xff] }
 0x5af   :  { %6070 = vtanh.f32 %v7238_v31  ;;  %v4510_v50 = vld [vmem:[#allocation2 + $0x4a8] sm:$0xff]  ;;  %v4592_v6 = vld [vmem:[#allocation2 + $0x738] sm:$0xff] }
 0x5b0   :  { %4860 = vmatpush.msrb.mxu0 %v4463_v10  ;;  %4900 = vmatpush.msrb.mxu2 %v4464_v32  ;;  %v4534_v10 = vld [vmem:[#allocation2 + $0x568] sm:$0xff]  ;;  %v4525_v32 = vld [vmem:[#allocation2 + $0x520] sm:$0xff] }
 0x5b2   :  { %v6069_v29 = vpop.eup %6068  ;;  %4861 = vmatpush.msrb.mxu0 %v4455_v9  ;;  %4901 = vmatpush.msrb.mxu2 %v4456_v40  ;;  %v4518_v9 = vld [vmem:[#allocation2 + $0x4e8] sm:$0xff]  ;;  %v4509_v40 = vld [vmem:[#allocation2 + $0x4a0] sm:$0xff] }
 0x5b3   :  { %v4340_v35 = vmul.f32 %v6069_v29, %v4338_v54  ;;  %vm4345_vm12 = vweird.f32 %v6069_v29  ;;  %v4566_v54 = vld [vmem:[#allocation2 + $0x668] sm:$0xff] }
 0x5b4   :  { %4862 = vmatpush.msrb.mxu0 %v4447_v21  ;;  %4902 = vmatpush.msrb.mxu2 %v4448_v26  ;;  %vm4346_vm14 = vmor %vm4344_vm13, %vm4345_vm12  ;;  %v4501_v21 = vld [vmem:[#allocation2 + $0x460] sm:$0xff]  ;;  %v4502_v26 = vld [vmem:[#allocation2 + $0x468] sm:$0xff] }
 0x5b5   :  { %v4341_v33 = vsub.f32 1.0, %v4340_v35  ;;  %v6071_v34 = vpop.eup %6070  ;;  %v4494_v35 = vld [vmem:[#allocation2 + $0x428] sm:$0xff] }
 0x5b6   :  { %4863 = vmatpush.msrb.mxu0 %v4439_v20  ;;  %4903 = vmatpush.msrb.mxu2 %v4440_v13  ;;  %v4615_v20 = vld [vmem:[#allocation2 + $0x7f0] sm:$0xff]  ;;  %v4616_v13 = vld [vmem:[#allocation2 + $0x7f8] sm:$0xff] }
 0x5b7   :  { %v4342_v15 = vmul.f32 %v6069_v29, %v4341_v33  ;;  %v4607_v33 = vld [vmem:[#allocation2 + $0x7b0] sm:$0xff] }
 0x5b8   :  { %4864 = vmatpush.msrb.mxu0 %v4431_v22  ;;  %4904 = vmatpush.msrb.mxu2 %v4432_v17  ;;  %v4608_v22 = vld [vmem:[#allocation2 + $0x7b8] sm:$0xff]  ;;  %v4599_v17 = vld [vmem:[#allocation2 + $0x770] sm:$0xff] }
 0x5b9   :  { %v4343_v55 = vadd.f32 %v6069_v29, %v4342_v15  ;;  %v4591_v15 = vld [vmem:[#allocation2 + $0x730] sm:$0xff] }
 0x5ba   :  { %4865 = vmatpush.msrb.mxu0 %v4423_v38  ;;  %4905 = vmatpush.msrb.mxu2 %v4424_v42  ;;  %v4583_v38 = vld [vmem:[#allocation2 + $0x6f0] sm:$0xff]  ;;  %v4584_v42 = vld [vmem:[#allocation2 + $0x6f8] sm:$0xff] }
 0x5bb   :  { %v4347_v59 = vsel %vm4346_vm14, %v6069_v29, %v4343_v55  ;;  %v4493_v29 = vld [vmem:[#allocation2 + $0x420] sm:$0xff]  ;;  %v4575_v55 = vld [vmem:[#allocation2 + $0x6b0] sm:$0xff] }
 0x5bc   :  { %v4352_v4 = vsel %vm4349_vm15, %v4351_v11, %v4347_v59  ;;  %4866 = vmatpush.msrb.mxu0 %v4415_v57  ;;  %4906 = vmatpush.msrb.mxu2 %v4416_v18  ;;  %v4576_v57 = vld [vmem:[#allocation2 + $0x6b8] sm:$0xff]  ;;  %v4567_v18 = vld [vmem:[#allocation2 + $0x670] sm:$0xff] }
 0x5bd   :  { %v7241_v0 = vmul.f32 %v6071_v34, %v4352_v4  ;;  %v4568_v11 = vld [vmem:[#allocation2 + $0x678] sm:$0xff]  ;;  %v4559_v59 = vld [vmem:[#allocation2 + $0x630] sm:$0xff] }
 0x5be   :  { %4867 = vmatpush.msrb.mxu0 %v4407_v61  ;;  %4907 = vmatpush.msrb.mxu2 %v4408_v30  ;;  %v4560_v61 = vld [vmem:[#allocation2 + $0x638] sm:$0xff]  ;;  %v4551_v30 = vld [vmem:[#allocation2 + $0x5f0] sm:$0xff] }
 0x5bf   :  { %5860 = vst [vmem:[%s7453_s2 + $0x28] sm:$0xff] %v7241_v0  ;;  %4653 = vmatmul.f32.vlgmr.msra.gmra.mxu1 %v7241_v0  ;;  %4693 = vmatmul.f32.vlgmr.msra.gmra.mxu3 %v7241_v0  ;;  %v4552_v34 = vld [vmem:[#allocation2 + $0x5f8] sm:$0xff]  ;;  %v4543_v4 = vld [vmem:[#allocation2 + $0x5b0] sm:$0xff] }
 0x5c0   :  { %4797 = vmatpush.msra.mxu1 %v4613_v28  ;;  %4837 = vmatpush.msra.mxu3 %v4614_v7  ;;  %v4544_v28 = vld [vmem:[#allocation2 + $0x5b8] sm:$0xff]  ;;  %v4535_v7 = vld [vmem:[#allocation2 + $0x570] sm:$0xff] }
 0x5c1   :  { %4868 = vmatpush.msrb.mxu0 %v4399_v24  ;;  %4908 = vmatpush.msrb.mxu2 %v4400_v41  ;;  %v4536_v24 = vld [vmem:[#allocation2 + $0x578] sm:$0xff]  ;;  %v4527_v41 = vld [vmem:[#allocation2 + $0x530] sm:$0xff] }
 0x5c2   :  { %4798 = vmatpush.msra.mxu1 %v4605_v53  ;;  %4838 = vmatpush.msra.mxu3 %v4606_v52  ;;  %v4528_v53 = vld [vmem:[#allocation2 + $0x538] sm:$0xff]  ;;  %v4519_v52 = vld [vmem:[#allocation2 + $0x4f0] sm:$0xff] }
 0x5c3   :  { %4869 = vmatpush.msrb.mxu0 %v4391_v27  ;;  %4909 = vmatpush.msrb.mxu2 %v4392_v45  ;;  %v4520_v27 = vld [vmem:[#allocation2 + $0x4f8] sm:$0xff]  ;;  %v4511_v45 = vld [vmem:[#allocation2 + $0x4b0] sm:$0xff] }
 0x5c4   :  { %4799 = vmatpush.msra.mxu1 %v4597_v48  ;;  %4839 = vmatpush.msra.mxu3 %v4598_v3  ;;  %v4512_v48 = vld [vmem:[#allocation2 + $0x4b8] sm:$0xff]  ;;  %v4503_v3 = vld [vmem:[#allocation2 + $0x470] sm:$0xff] }
 0x5c5   :  { %4870 = vmatpush.msrb.mxu0 %v4383_v39  ;;  %4910 = vmatpush.msrb.mxu2 %v4384_v44  ;;  %v4504_v39 = vld [vmem:[#allocation2 + $0x478] sm:$0xff]  ;;  %v4495_v44 = vld [vmem:[#allocation2 + $0x430] sm:$0xff] }
 0x5c6   :  { %4800 = vmatpush.msra.mxu1 %v4589_v36  ;;  %4840 = vmatpush.msra.mxu3 %v4590_v1  ;;  %v4496_v36 = vld [vmem:[#allocation2 + $0x438] sm:$0xff]  ;;  %v5201_v1 = vld [vmem:[#allocation2 + $0x3c0] sm:$0xff] }
 0x5c7   :  { %4733 = vmatmul.f32.vlgmr.msrb.gmra.mxu1 %v7241_v0  ;;  %4773 = vmatmul.f32.vlgmr.msrb.gmra.mxu3 %v7241_v0 }
 0x5c8   :  { %4801 = vmatpush.msra.mxu1 %v4581_v23  ;;  %4841 = vmatpush.msra.mxu3 %v4582_v5  ;;  %v5202_v23 = vld [vmem:[#allocation2 + $0x3c8] sm:$0xff]  ;;  %v5193_v5 = vld [vmem:[#allocation2 + $0x380] sm:$0xff] }
 0x5c9   :  { %4871 = vmatpush.msrb.mxu0 %v4375_v51  ;;  %4911 = vmatpush.msrb.mxu2 %v4376_v56  ;;  %v5194_v51 = vld [vmem:[#allocation2 + $0x388] sm:$0xff]  ;;  %v5185_v56 = vld [vmem:[#allocation2 + $0x340] sm:$0xff] }
 0x5ca   :  { %4802 = vmatpush.msra.mxu1 %v4573_v2  ;;  %4842 = vmatpush.msra.mxu3 %v4574_v12  ;;  %v5186_v2 = vld [vmem:[#allocation2 + $0x348] sm:$0xff]  ;;  %v5177_v12 = vld [vmem:[#allocation2 + $0x300] sm:$0xff] }
 0x5cb   :  { %4872 = vmatpush.msrb.mxu0 %v4367_v37  ;;  %4912 = vmatpush.msrb.mxu2 %v4368_v8  ;;  %v5178_v37 = vld [vmem:[#allocation2 + $0x308] sm:$0xff]  ;;  %v5169_v8 = vld [vmem:[#allocation2 + $0x2c0] sm:$0xff] }
 0x5cc   :  { %4873 = vmatmul.f32.vlgmr.msrb.gmra.mxu0 %v7175_v47  ;;  %4913 = vmatmul.f32.vlgmr.msrb.gmra.mxu2 %v7175_v47  ;;  %v4517_v47 = vld [vmem:[#allocation2 + $0x4e0] sm:$0xff] }
 0x5cd   :  { %4803 = vmatpush.msra.mxu1 %v4565_v43  ;;  %4843 = vmatpush.msra.mxu3 %v4566_v54  ;;  %v5170_v43 = vld [vmem:[#allocation2 + $0x2c8] sm:$0xff] }
 0x5ce   :  { %5337 = vmatpush.msra.mxu0 %v5201_v1  ;;  %5377 = vmatpush.msra.mxu2 %v5202_v23  ;;  %v5162_v54 = vld [vmem:[#allocation2 + $0x288] sm:$0xff]  ;;  %v5131_v23 = vld [vmem:[#allocation2 + $0x190] sm:$0xff] }
 0x5cf   :  { %4804 = vmatpush.msra.mxu1 %v4557_v49  ;;  %4844 = vmatpush.msra.mxu3 %v4558_v60  ;;  %v5153_v49 = vld [vmem:[#allocation2 + $0x240] sm:$0xff]  ;;  %v5154_v60 = vld [vmem:[#allocation2 + $0x248] sm:$0xff] }
 0x5d0   :  { %5338 = vmatpush.msra.mxu0 %v5193_v5  ;;  %5378 = vmatpush.msra.mxu2 %v5194_v51  ;;  %v5132_v5 = vld [vmem:[#allocation2 + $0x198] sm:$0xff] }
 0x5d1   :  { %4805 = vmatpush.msra.mxu1 %v4549_v25  ;;  %4845 = vmatpush.msra.mxu3 %v4550_v19  ;;  %v5145_v25 = vld [vmem:[#allocation2 + $0x200] sm:$0xff]  ;;  %v5146_v19 = vld [vmem:[#allocation2 + $0x208] sm:$0xff] }
 0x5d2   :  { %5339 = vmatpush.msra.mxu0 %v5185_v56  ;;  %5379 = vmatpush.msra.mxu2 %v5186_v2  ;;  %v5329_v56 = vld [vmem:[#allocation2 + $0x7c0] sm:$0xff]  ;;  %v5330_v2 = vld [vmem:[#allocation2 + $0x7c8] sm:$0xff] }
 0x5d3   :  { %4806 = vmatpush.msra.mxu1 %v4541_v63  ;;  %4846 = vmatpush.msra.mxu3 %v4542_v62  ;;  %v5137_v63 = vld [vmem:[#allocation2 + $0x1c0] sm:$0xff]  ;;  %v5138_v62 = vld [vmem:[#allocation2 + $0x1c8] sm:$0xff] }
 0x5d4   :  { %5340 = vmatpush.msra.mxu0 %v5177_v12  ;;  %5380 = vmatpush.msra.mxu2 %v5178_v37  ;;  %v5123_v12 = vld [vmem:[#allocation2 + $0x150] sm:$0xff] }
 0x5d5   :  { %4807 = vmatpush.msra.mxu1 %v4533_v14  ;;  %4847 = vmatpush.msra.mxu3 %v4534_v10  ;;  %v5129_v14 = vld [vmem:[#allocation2 + $0x180] sm:$0xff]  ;;  %v5130_v10 = vld [vmem:[#allocation2 + $0x188] sm:$0xff] }
 0x5d6   :  { %5341 = vmatpush.msra.mxu0 %v5169_v8  ;;  %5381 = vmatpush.msra.mxu2 %v5170_v43  ;;  %v5864_v43 = vld [vmem:[%s7451_s0 + $0x198] sm:$0xff] }
 0x5d7   :  { %4808 = vmatpush.msra.mxu1 %v4525_v32  ;;  %4848 = vmatpush.msra.mxu3 %v4526_v58  ;;  %v5121_v32 = vld [vmem:[#allocation2 + $0x140] sm:$0xff]  ;;  %v5122_v58 = vld [vmem:[#allocation2 + $0x148] sm:$0xff] }
 0x5d8   :  { %5382 = vmatpush.msra.mxu2 %v5162_v54 }
 0x5d9   :  { %4809 = vmatpush.msra.mxu1 %v4517_v47  ;;  %4849 = vmatpush.msra.mxu3 %v4518_v9  ;;  %v5113_v47 = vld [vmem:[#allocation2 + $0x100] sm:$0xff]  ;;  %v5114_v9 = vld [vmem:[#allocation2 + $0x108] sm:$0xff] }
 0x5da   :  { %5383 = vmatpush.msra.mxu2 %v5154_v60  ;;  %v5321_v60 = vld [vmem:[#allocation2 + $0x780] sm:$0xff] }
 0x5db   :  { %4810 = vmatpush.msra.mxu1 %v4509_v40  ;;  %4850 = vmatpush.msra.mxu3 %v4510_v50  ;;  %v5105_v40 = vld [vmem:[#allocation2 + $0xc0] sm:$0xff]  ;;  %v5106_v50 = vld [vmem:[#allocation2 + $0xc8] sm:$0xff] }
 0x5dc   :  { %5384 = vmatpush.msra.mxu2 %v5146_v19  ;;  %v5115_v19 = vld [vmem:[#allocation2 + $0x110] sm:$0xff] }
 0x5dd   :  { %4811 = vmatpush.msra.mxu1 %v4501_v21  ;;  %4851 = vmatpush.msra.mxu3 %v4502_v26  ;;  %v5097_v21 = vld [vmem:[#allocation2 + $0x80] sm:$0xff]  ;;  %v5098_v26 = vld [vmem:[#allocation2 + $0x88] sm:$0xff] }
 0x5de   :  { %5385 = vmatpush.msra.mxu2 %v5138_v62  ;;  %v5116_v62 = vld [vmem:[#allocation2 + $0x118] sm:$0xff] }
 0x5df   :  { %4812 = vmatpush.msra.mxu1 %v4493_v29  ;;  %4852 = vmatpush.msra.mxu3 %v4494_v35  ;;  %v5089_v29 = vld [vmem:[#allocation2 + $0x40] sm:$0xff]  ;;  %v5090_v35 = vld [vmem:[#allocation2 + $0x48] sm:$0xff] }
 0x5e0   :  { %4813 = vmatmul.f32.vlgmr.msra.gmra.mxu1 %v7241_v0  ;;  %4853 = vmatmul.f32.vlgmr.msra.gmra.mxu3 %v7241_v0 }
 0x5e1   :  { %4877 = vmatpush.msrb.mxu1 %v4615_v20  ;;  %4917 = vmatpush.msrb.mxu3 %v4616_v13  ;;  %v5081_v20 = vld [vmem:[#allocation2] sm:$0xff]  ;;  %v5082_v13 = vld [vmem:[#allocation2 + $0x8] sm:$0xff] }
 0x5e2   :  { %5386 = vmatpush.msra.mxu2 %v5130_v10  ;;  %v5313_v10 = vld [vmem:[#allocation2 + $0x740] sm:$0xff] }
 0x5e3   :  { %4878 = vmatpush.msrb.mxu1 %v4607_v33  ;;  %4918 = vmatpush.msrb.mxu3 %v4608_v22  ;;  %v5203_v33 = vld [vmem:[#allocation2 + $0x3d0] sm:$0xff]  ;;  %v5204_v22 = vld [vmem:[#allocation2 + $0x3d8] sm:$0xff] }
 0x5e4   :  { %5387 = vmatpush.msra.mxu2 %v5122_v58  ;;  %v5107_v58 = vld [vmem:[#allocation2 + $0xd0] sm:$0xff] }
 0x5e5   :  { %4879 = vmatpush.msrb.mxu1 %v4599_v17  ;;  %4919 = vmatpush.msrb.mxu3 %v4600_v46  ;;  %v5195_v17 = vld [vmem:[#allocation2 + $0x390] sm:$0xff]  ;;  %v5196_v46 = vld [vmem:[#allocation2 + $0x398] sm:$0xff] }
 0x5e6   :  { %5388 = vmatpush.msra.mxu2 %v5114_v9 }
 0x5e7   :  { %4880 = vmatpush.msrb.mxu1 %v4591_v15  ;;  %4920 = vmatpush.msrb.mxu3 %v4592_v6  ;;  %v5187_v15 = vld [vmem:[#allocation2 + $0x350] sm:$0xff]  ;;  %v5188_v6 = vld [vmem:[#allocation2 + $0x358] sm:$0xff] }
 0x5e8   :  { %5389 = vmatpush.msra.mxu2 %v5106_v50  ;;  %v5306_v50 = vld [vmem:[#allocation2 + $0x708] sm:$0xff] }
 0x5e9   :  { %4881 = vmatpush.msrb.mxu1 %v4583_v38  ;;  %4921 = vmatpush.msrb.mxu3 %v4584_v42  ;;  %v5179_v38 = vld [vmem:[#allocation2 + $0x310] sm:$0xff]  ;;  %v5180_v42 = vld [vmem:[#allocation2 + $0x318] sm:$0xff] }
 0x5ea   :  { %5390 = vmatpush.msra.mxu2 %v5098_v26  ;;  %v5100_v26 = vld [vmem:[#allocation2 + $0x98] sm:$0xff] }
 0x5eb   :  { %4882 = vmatpush.msrb.mxu1 %v4575_v55  ;;  %4922 = vmatpush.msrb.mxu3 %v4576_v57 }
 0x5ec   :  { %5391 = vmatpush.msra.mxu2 %v5090_v35 }
 0x5ed   :  { %4883 = vmatpush.msrb.mxu1 %v4567_v18  ;;  %4923 = vmatpush.msrb.mxu3 %v4568_v11  ;;  %v5861_v18 = vld [vmem:[%s7451_s0 + $0x180] sm:$0xff] }
 0x5ee   :  { %5392 = vmatpush.msra.mxu2 %v5082_v13  ;;  %v5298_v13 = vld [vmem:[#allocation2 + $0x6c8] sm:$0xff] }
 0x5ef   :  { %4884 = vmatpush.msrb.mxu1 %v4559_v59  ;;  %4924 = vmatpush.msrb.mxu3 %v4560_v61  ;;  %v5171_v59 = vld [vmem:[#allocation2 + $0x2d0] sm:$0xff]  ;;  %v5172_v61 = vld [vmem:[#allocation2 + $0x2d8] sm:$0xff] }
 0x5f0   :  { %5457 = vmatpush.msrb.mxu2 %v5204_v22 }
 0x5f1   :  { %4885 = vmatpush.msrb.mxu1 %v4551_v30  ;;  %4925 = vmatpush.msrb.mxu3 %v4552_v34  ;;  %v5163_v34 = vld [vmem:[#allocation2 + $0x290] sm:$0xff] }
 0x5f2   :  { %5458 = vmatpush.msrb.mxu2 %v5196_v46 }
 0x5f3   :  { %4886 = vmatpush.msrb.mxu1 %v4543_v4  ;;  %4926 = vmatpush.msrb.mxu3 %v4544_v28  ;;  %v5164_v4 = vld [vmem:[#allocation2 + $0x298] sm:$0xff] }
 0x5f4   :  { %5459 = vmatpush.msrb.mxu2 %v5188_v6  ;;  %v5290_v6 = vld [vmem:[#allocation2 + $0x688] sm:$0xff] }
 0x5f5   :  { %4887 = vmatpush.msrb.mxu1 %v4535_v7  ;;  %4927 = vmatpush.msrb.mxu3 %v4536_v24  ;;  %v5155_v24 = vld [vmem:[#allocation2 + $0x250] sm:$0xff] }
 0x5f6   :  { %5460 = vmatpush.msrb.mxu2 %v5180_v42 }
 0x5f7   :  { %4888 = vmatpush.msrb.mxu1 %v4527_v41  ;;  %4928 = vmatpush.msrb.mxu3 %v4528_v53  ;;  %v5156_v41 = vld [vmem:[#allocation2 + $0x258] sm:$0xff] }
 0x5f8   :  { %5461 = vmatpush.msrb.mxu2 %v5172_v61 }
 0x5f9   :  { %4889 = vmatpush.msrb.mxu1 %v4519_v52  ;;  %4929 = vmatpush.msrb.mxu3 %v4520_v27  ;;  %v5862_v52 = vld [vmem:[%s7451_s0 + $0x188] sm:$0xff] }
 0x5fa   :  { %5462 = vmatpush.msrb.mxu2 %v5164_v4  ;;  %v5273_v4 = vld [vmem:[#allocation2 + $0x600] sm:$0xff] }
 0x5fb   :  { %4890 = vmatpush.msrb.mxu1 %v4511_v45  ;;  %4930 = vmatpush.msrb.mxu3 %v4512_v48  ;;  %v5147_v48 = vld [vmem:[#allocation2 + $0x210] sm:$0xff] }
 0x5fc   :  { %5463 = vmatpush.msrb.mxu2 %v5156_v41  ;;  %v5265_v41 = vld [vmem:[#allocation2 + $0x5c0] sm:$0xff] }
 0x5fd   :  { %4891 = vmatpush.msrb.mxu1 %v4503_v3  ;;  %4931 = vmatpush.msrb.mxu3 %v4504_v39  ;;  %v5148_v3 = vld [vmem:[#allocation2 + $0x218] sm:$0xff] }
 0x5fe   :  { %5464 = vmatpush.msrb.mxu2 %v5148_v3 }
 0x5ff   :  { %4892 = vmatpush.msrb.mxu1 %v4495_v44  ;;  %4932 = vmatpush.msrb.mxu3 %v4496_v36  ;;  %v5139_v44 = vld [vmem:[#allocation2 + $0x1d0] sm:$0xff]  ;;  %v5140_v36 = vld [vmem:[#allocation2 + $0x1d8] sm:$0xff] }
 0x600   :  { %4893 = vmatmul.f32.vlgmr.msrb.gmra.mxu1 %v7241_v0  ;;  %4933 = vmatmul.f32.vlgmr.msrb.gmra.mxu3 %v7241_v0  ;;  %v5161_v0 = vld [vmem:[#allocation2 + $0x280] sm:$0xff] }
 0x601   :  { %5342 = vmatpush.msra.mxu0 %v5161_v0  ;;  %5465 = vmatpush.msrb.mxu2 %v5140_v36  ;;  %v5124_v0 = vld [vmem:[#allocation2 + $0x158] sm:$0xff] }
 0x602   :  { %5357 = vmatpush.msra.mxu1 %v5329_v56  ;;  %5397 = vmatpush.msra.mxu3 %v5330_v2  ;;  %v5865_v56 = vld [vmem:[%s7451_s0 + $0x60] sm:$0xff] }
 0x603   :  { %5343 = vmatpush.msra.mxu0 %v5153_v49  ;;  %5466 = vmatpush.msrb.mxu2 %v5132_v5  ;;  %v5249_v2 = vld [vmem:[#allocation2 + $0x540] sm:$0xff] }
 0x604   :  { %5358 = vmatpush.msra.mxu1 %v5321_v60  ;;  %v5241_v60 = vld [vmem:[#allocation2 + $0x500] sm:$0xff] }
 0x605   :  { %5344 = vmatpush.msra.mxu0 %v5145_v25  ;;  %5467 = vmatpush.msrb.mxu2 %v5124_v0  ;;  %v5322_v25 = vld [vmem:[#allocation2 + $0x788] sm:$0xff] }
 0x606   :  { %v4634_v55 = vpop.f32.mrf.mxu0  ;;  %5398 = vmatpush.msra.mxu3 %v5322_v25  ;;  %5359 = vmatpush.msra.mxu1 %v5313_v10  ;;  %v5242_v25 = vld [vmem:[#allocation2 + $0x508] sm:$0xff] }
 0x607   :  { %5345 = vmatpush.msra.mxu0 %v5137_v63  ;;  %5468 = vmatpush.msrb.mxu2 %v5116_v62  ;;  %v5234_v10 = vld [vmem:[#allocation2 + $0x4c8] sm:$0xff] }
 0x609   :  { %5346 = vmatpush.msra.mxu0 %v5129_v14 }
 0x60b   :  { %5347 = vmatpush.msra.mxu0 %v5121_v32  ;;  %v5314_v32 = vld [vmem:[#allocation2 + $0x748] sm:$0xff] }
 0x60c   :  { %v4674_v28 = vpop.f32.mrf.mxu2  ;;  %5399 = vmatpush.msra.mxu3 %v5314_v32 }
 0x60d   :  { %5348 = vmatpush.msra.mxu0 %v5113_v47  ;;  %v5108_v47 = vld [vmem:[#allocation2 + $0xd8] sm:$0xff] }
 0x60e   :  { %5469 = vmatpush.msrb.mxu2 %v5108_v47  ;;  %5400 = vmatpush.msra.mxu3 %v5306_v50 }
 0x60f   :  { %5349 = vmatpush.msra.mxu0 %v5105_v40  ;;  %v5305_v40 = vld [vmem:[#allocation2 + $0x700] sm:$0xff] }
 0x610   :  { %5360 = vmatpush.msra.mxu1 %v5305_v40  ;;  %5470 = vmatpush.msrb.mxu2 %v5100_v26  ;;  %v5866_v26 = vld [vmem:[%s7451_s0 + $0x68] sm:$0xff] }
 0x611   :  { %5350 = vmatpush.msra.mxu0 %v5097_v21  ;;  %v5099_v21 = vld [vmem:[#allocation2 + $0x90] sm:$0xff]  ;;  %5401 = vmatpush.msra.mxu3 %v5298_v13 }
 0x613   :  { %5351 = vmatpush.msra.mxu0 %v5089_v29  ;;  %5402 = vmatpush.msra.mxu3 %v5290_v6  ;;  %v5217_v6 = vld [vmem:[#allocation2 + $0x440] sm:$0xff] }
 0x614   :  { %v4754_v37 = vpop.f32.mrf.mxu2 }
 0x615   :  { %5352 = vmatpush.msra.mxu0 %v5081_v20  ;;  %v5297_v20 = vld [vmem:[#allocation2 + $0x6c0] sm:$0xff] }
 0x616   :  { %5361 = vmatpush.msra.mxu1 %v5297_v20 }
 0x617   :  { %5417 = vmatpush.msrb.mxu0 %v5203_v33  ;;  %v5091_v33 = vld [vmem:[#allocation2 + $0x50] sm:$0xff] }
 0x619   :  { %5418 = vmatpush.msrb.mxu0 %v5195_v17  ;;  %v5092_v17 = vld [vmem:[#allocation2 + $0x58] sm:$0xff] }
 0x61a   :  { %5471 = vmatpush.msrb.mxu2 %v5092_v17 }
 0x61b   :  { %5419 = vmatpush.msrb.mxu0 %v5187_v15  ;;  %v5289_v15 = vld [vmem:[#allocation2 + $0x680] sm:$0xff] }
 0x61c   :  { %5362 = vmatpush.msra.mxu1 %v5289_v15 }
 0x61d   :  { %5420 = vmatpush.msrb.mxu0 %v5179_v38  ;;  %v5083_v38 = vld [vmem:[#allocation2 + $0x10] sm:$0xff] }
 0x61f   :  { %5421 = vmatpush.msrb.mxu0 %v5171_v59  ;;  %v5282_v59 = vld [vmem:[#allocation2 + $0x648] sm:$0xff] }
 0x620   :  { %5403 = vmatpush.msra.mxu3 %v5282_v59 }
 0x621   :  { %5422 = vmatpush.msrb.mxu0 %v5163_v34  ;;  %v5863_v34 = vld [vmem:[%s7451_s0 + $0x190] sm:$0xff] }
 0x623   :  { %5423 = vmatpush.msrb.mxu0 %v5155_v24 }
 0x625   :  { %5424 = vmatpush.msrb.mxu0 %v5147_v48 }
 0x627   :  { %5425 = vmatpush.msrb.mxu0 %v5139_v44  ;;  %v5258_v44 = vld [vmem:[#allocation2 + $0x588] sm:$0xff] }
 0x629   :  { %5426 = vmatpush.msrb.mxu0 %v5131_v23 }
 0x62b   :  { %5427 = vmatpush.msrb.mxu0 %v5123_v12  ;;  %v5250_v12 = vld [vmem:[#allocation2 + $0x548] sm:$0xff] }
 0x62d   :  { %5428 = vmatpush.msrb.mxu0 %v5115_v19 }
 0x62f   :  { %5429 = vmatpush.msrb.mxu0 %v5107_v58 }
 0x631   :  { %5430 = vmatpush.msrb.mxu0 %v5099_v21 }
 0x633   :  { %5431 = vmatpush.msrb.mxu0 %v5091_v33 }
 0x635   :  { %5432 = vmatpush.msrb.mxu0 %v5083_v38  ;;  %v5218_v38 = vld [vmem:[#allocation2 + $0x448] sm:$0xff] }
 0x63c   :  { %v4654_v57 = vpop.f32.mrf.mxu1 }
 0x63d   :  { %v4655_v11 = vadd.f32 %v4654_v57, %v4634_v55  ;;  %v5084_v55 = vld [vmem:[#allocation2 + $0x18] sm:$0xff]  ;;  %v4714_v57 = vpop.f32.mrf.mxu0 }
 0x63e   :  { %5472 = vmatpush.msrb.mxu2 %v5084_v55 }
 0x63f   :  { %v4945_v30 = vadd.f32 %v5861_v18, %v4655_v11  ;;  %v5281_v11 = vld [vmem:[#allocation2 + $0x640] sm:$0xff] }
 0x640   :  { %5363 = vmatpush.msra.mxu1 %v5281_v11  ;;  %v5210_v11 = vld [vmem:[#allocation2 + $0x408] sm:$0xff] }
 0x641   :  { %v4949_v7 = vsub.f32 0.0, %v4945_v30 }
 0x642   :  { %v4694_v53 = vpop.f32.mrf.mxu3  ;;  %5364 = vmatpush.msra.mxu1 %v5273_v4 }
 0x643   :  { %v4950_v27 = vmul.f32 1.442695, %v4949_v7  ;;  %v4695_v45 = vadd.f32 %v4694_v53, %v4674_v28  ;;  %v5274_v28 = vld [vmem:[#allocation2 + $0x608] sm:$0xff] }
 0x644   :  { %v4734_v46 = vpop.f32.mrf.mxu1  ;;  %5404 = vmatpush.msra.mxu3 %v5274_v28  ;;  %v5266_v53 = vld [vmem:[#allocation2 + $0x5c8] sm:$0xff]  ;;  %5365 = vmatpush.msra.mxu1 %v5265_v41  ;;  %v5324_v41 = vld [vmem:[#allocation2 + $0x798] sm:$0xff] }
 0x645   :  { %6072 = vpow2.f32 %v4950_v27  ;;  %v4946_v39 = vadd.f32 %v5862_v52, %v4695_v45  ;;  %v4735_v61 = vadd.f32 %v4734_v46, %v4714_v57 }
 0x646   :  { %5405 = vmatpush.msra.mxu3 %v5266_v53 }
 0x647   :  { %v4968_v1 = vsub.f32 0.0, %v4946_v39  ;;  %v4947_v27 = vadd.f32 %v5863_v34, %v4735_v61  ;;  %v5257_v39 = vld [vmem:[#allocation2 + $0x580] sm:$0xff] }
 0x648   :  { %5366 = vmatpush.msra.mxu1 %v5257_v39  ;;  %5406 = vmatpush.msra.mxu3 %v5258_v44  ;;  %v5308_v39 = vld [vmem:[#allocation2 + $0x718] sm:$0xff] }
 0x649   :  { %v4969_v51 = vmul.f32 1.442695, %v4968_v1  ;;  %v4794_v1 = vpop.f32.mrf.mxu0 }
 0x64a   :  { %v4774_v8 = vpop.f32.mrf.mxu3  ;;  %5367 = vmatpush.msra.mxu1 %v5249_v2  ;;  %5407 = vmatpush.msra.mxu3 %v5250_v12  ;;  %v5197_v2 = vld [vmem:[#allocation2 + $0x3a0] sm:$0xff] }
 0x64b   :  { %v6073_v54 = vpop.eup %6072  ;;  %6074 = vpow2.f32 %v4969_v51  ;;  %v4775_v49 = vadd.f32 %v4774_v8, %v4754_v37  ;;  %v5291_v8 = vld [vmem:[#allocation2 + $0x690] sm:$0xff] }
 0x64c   :  { %v7266_v63 = vadd.f32 1.0, %v6073_v54  ;;  %5368 = vmatpush.msra.mxu1 %v5241_v60  ;;  %5408 = vmatpush.msra.mxu3 %v5242_v25  ;;  %v5283_v60 = vld [vmem:[#allocation2 + $0x650] sm:$0xff]  ;;  %v5284_v25 = vld [vmem:[#allocation2 + $0x658] sm:$0xff] }
 0x64d   :  { %v4948_v14 = vadd.f32 %v5864_v43, %v4775_v49 }
 0x64e   :  { %6076 = vrcp.f32 %v7266_v63  ;;  %v4964_v36 = vand.u32 2147483648, %v7266_v63  ;;  %vm4958_vm1 = vweird.f32 %v7266_v63  ;;  %v4962_v5 = vand.u32 2147483647, %v7266_v63  ;;  %5409 = vmatpush.msra.mxu3 %v5234_v10  ;;  %v5275_v10 = vld [vmem:[#allocation2 + $0x610] sm:$0xff] }
 0x64f   :  { %v4988_v9 = vsub.f32 0.0, %v4948_v14  ;;  %v5233_v14 = vld [vmem:[#allocation2 + $0x4c0] sm:$0xff] }
 0x650   :  { %v4965_v19 = vor.u32 1.1754944e-38, %v4964_v36  ;;  %vm4963_vm5 = vcmp.eq.f32.partialorder %v4962_v5, 8.507059e+37  ;;  %5369 = vmatpush.msra.mxu1 %v5233_v14  ;;  %v5206_v5 = vld [vmem:[#allocation2 + $0x3e8] sm:$0xff] }
 0x651   :  { %v6075_v29 = vpop.eup %6074  ;;  %v4989_v35 = vmul.f32 1.442695, %v4988_v9  ;;  %v4834_v9 = vpop.f32.mrf.mxu2  ;;  %v5182_v14 = vld [vmem:[#allocation2 + $0x328] sm:$0xff] }
 0x652   :  { %v7269_v22 = vadd.f32 1.0, %v6075_v29  ;;  %v5225_v29 = vld [vmem:[#allocation2 + $0x480] sm:$0xff] }
 0x653   :  { %6078 = vpow2.f32 %v4989_v35  ;;  %v5226_v35 = vld [vmem:[#allocation2 + $0x488] sm:$0xff]  ;;  %5370 = vmatpush.msra.mxu1 %v5225_v29  ;;  %v5260_v29 = vld [vmem:[#allocation2 + $0x598] sm:$0xff] }
 0x654   :  { %v7271_v42 = vpop.eup %6076  ;;  %6080 = vrcp.f32 %v7269_v22  ;;  %v4983_v37 = vand.u32 2147483648, %v7269_v22  ;;  %v4981_v49 = vand.u32 2147483647, %v7269_v22  ;;  %vm4977_vm4 = vweird.f32 %v7269_v22  ;;  %5410 = vmatpush.msra.mxu3 %v5226_v35  ;;  %v5157_v35 = vld [vmem:[#allocation2 + $0x260] sm:$0xff] }
 0x655   :  { %v4954_v18 = vmul.f32 %v7271_v42, %v7266_v63  ;;  %vm4959_vm0 = vweird.f32 %v7271_v42  ;;  %5371 = vmatpush.msra.mxu1 %v5217_v6  ;;  %v5244_v6 = vld [vmem:[#allocation2 + $0x518] sm:$0xff] }
 0x656   :  { %vm7295_vm2 = vmor %vm4958_vm1, %vm4959_vm0  ;;  %v4984_v58 = vor.u32 1.1754944e-38, %v4983_v37  ;;  %vm4982_vm7 = vcmp.eq.f32.partialorder %v4981_v49, 8.507059e+37  ;;  %5411 = vmatpush.msra.mxu3 %v5218_v38  ;;  %v5198_v37 = vld [vmem:[#allocation2 + $0x3a8] sm:$0xff] }
 0x657   :  { %v4955_v30 = vsub.f32 1.0, %v4954_v18  ;;  %v5209_v18 = vld [vmem:[#allocation2 + $0x400] sm:$0xff]  ;;  %v5190_v49 = vld [vmem:[#allocation2 + $0x368] sm:$0xff] }
 0x658   :  { %5372 = vmatpush.msra.mxu1 %v5209_v18  ;;  %5412 = vmatpush.msra.mxu3 %v5210_v11  ;;  %v5235_v18 = vld [vmem:[#allocation2 + $0x4d0] sm:$0xff]  ;;  %v5236_v11 = vld [vmem:[#allocation2 + $0x4d8] sm:$0xff] }
 0x659   :  { %v6079_v7 = vpop.eup %6078  ;;  %v4956_v24 = vmul.f32 %v7271_v42, %v4955_v30  ;;  %v5332_v30 = vld [vmem:[#allocation2 + $0x7d8] sm:$0xff] }
 0x65a   :  { %v6081_v52 = vpop.eup %6080  ;;  %v7280_v45 = vadd.f32 1.0, %v6079_v7  ;;  %5477 = vmatpush.msrb.mxu3 %v5332_v30 }
 0x65b   :  { %v4973_v48 = vmul.f32 %v6081_v52, %v7269_v22  ;;  %v4957_v3 = vadd.f32 %v7271_v42, %v4956_v24  ;;  %vm4978_vm3 = vweird.f32 %v6081_v52  ;;  %v5323_v24 = vld [vmem:[#allocation2 + $0x790] sm:$0xff] }
 0x65c   :  { %6082 = vrcp.f32 %v7280_v45  ;;  %vm4979_vm6 = vmor %vm4977_vm4, %vm4978_vm3  ;;  %v5003_v4 = vand.u32 2147483648, %v7280_v45  ;;  %vm4997_vm9 = vweird.f32 %v7280_v45  ;;  %v5001_v28 = vand.u32 2147483647, %v7280_v45  ;;  %5478 = vmatpush.msrb.mxu3 %v5324_v41  ;;  %v5228_v41 = vld [vmem:[#allocation2 + $0x498] sm:$0xff] }
 0x65d   :  { %v4974_v23 = vsub.f32 1.0, %v4973_v48  ;;  %v4814_v51 = vpop.f32.mrf.mxu1  ;;  %6084 = vtanh.f32 %v4947_v27  ;;  %v4961_v54 = vsel %vm7295_vm2, %v7271_v42, %v4957_v3  ;;  %v5315_v27 = vld [vmem:[#allocation2 + $0x750] sm:$0xff]  ;;  %v5316_v48 = vld [vmem:[#allocation2 + $0x758] sm:$0xff] }
 0x65e   :  { %v4815_v43 = vadd.f32 %v4814_v51, %v4794_v1  ;;  %v4966_v47 = vsel %vm4963_vm5, %v4965_v19, %v4961_v54  ;;  %v5004_v3 = vor.u32 1.1754944e-38, %v5003_v4  ;;  %5479 = vmatpush.msrb.mxu3 %v5316_v48  ;;  %vm5002_vm11 = vcmp.eq.f32.partialorder %v5001_v28, 8.507059e+37  ;;  %v5205_v1 = vld [vmem:[#allocation2 + $0x3e0] sm:$0xff]  ;;  %v5299_v51 = vld [vmem:[#allocation2 + $0x6d0] sm:$0xff]  ;;  %v4874_v48 = vpop.f32.mrf.mxu0 }
 0x65f   :  { %v4975_v0 = vmul.f32 %v6081_v52, %v4974_v23  ;;  %v5189_v54 = vld [vmem:[#allocation2 + $0x360] sm:$0xff] }
 0x660   :  { %v5012_v63 = vadd.f32 %v5865_v56, %v4815_v43  ;;  %5480 = vmatpush.msrb.mxu3 %v5308_v39  ;;  %v5300_v56 = vld [vmem:[#allocation2 + $0x6d8] sm:$0xff] }
 0x661   :  { %v4976_v62 = vadd.f32 %v6081_v52, %v4975_v0  ;;  %v5292_v43 = vld [vmem:[#allocation2 + $0x698] sm:$0xff] }
 0x662   :  { %v7304_v32 = vpop.eup %6082  ;;  %v5016_v33 = vsub.f32 0.0, %v5012_v63  ;;  %5481 = vmatpush.msrb.mxu3 %v5300_v56  ;;  %v5181_v63 = vld [vmem:[#allocation2 + $0x320] sm:$0xff]  ;;  %v5867_v56 = vld [vmem:[%s7451_s0 + $0x70] sm:$0xff] }
 0x663   :  { %v4980_v40 = vsel %vm4979_vm6, %v6081_v52, %v4976_v62  ;;  %v4993_v50 = vmul.f32 %v7304_v32, %v7280_v45  ;;  %v4854_v21 = vpop.f32.mrf.mxu3  ;;  %v6085_v20 = vpop.eup %6084  ;;  %vm4998_vm8 = vweird.f32 %v7304_v32  ;;  %v5307_v45 = vld [vmem:[#allocation2 + $0x710] sm:$0xff] }
 0x664   :  { %v4985_v13 = vsel %vm4982_vm7, %v4984_v58, %v4980_v40  ;;  %v4855_v22 = vadd.f32 %v4854_v21, %v4834_v9  ;;  %v5008_v46 = vmul.f32 %v6085_v20, %v4966_v47  ;;  %v5017_v59 = vmul.f32 1.442695, %v5016_v33  ;;  %vm7324_vm10 = vmor %vm4997_vm9, %vm4998_vm8  ;;  %5482 = vmatpush.msrb.mxu3 %v5292_v43  ;;  %v5173_v58 = vld [vmem:[#allocation2 + $0x2e0] sm:$0xff]  ;;  %v5174_v47 = vld [vmem:[#allocation2 + $0x2e8] sm:$0xff] }
 0x665   :  { %v5007_v17 = vmul.f32 %v4985_v13, %v7157_v16  ;;  %v4994_v15 = vsub.f32 1.0, %v4993_v50  ;;  %v5331_v16 = vld [vmem:[#allocation2 + $0x7d0] sm:$0xff]  ;;  %v5268_v40 = vld [vmem:[#allocation2 + $0x5d8] sm:$0xff]  ;;  %v5165_v50 = vld [vmem:[#allocation2 + $0x2a0] sm:$0xff] }
 0x666   :  { %v5013_v42 = vadd.f32 %v5866_v26, %v4855_v22  ;;  %5437 = vmatpush.msrb.mxu1 %v5331_v16  ;;  %5483 = vmatpush.msrb.mxu3 %v5284_v25  ;;  %v5267_v9 = vld [vmem:[#allocation2 + $0x5d0] sm:$0xff]  ;;  %v5166_v21 = vld [vmem:[#allocation2 + $0x2a8] sm:$0xff]  ;;  %v5252_v33 = vld [vmem:[#allocation2 + $0x558] sm:$0xff] }
 0x667   :  { %v7313_v55 = vadd.f32 %v5008_v46, %v5007_v17  ;;  %v4995_v57 = vmul.f32 %v7304_v32, %v4994_v15  ;;  %v5259_v26 = vld [vmem:[#allocation2 + $0x590] sm:$0xff]  ;;  %v5158_v20 = vld [vmem:[#allocation2 + $0x268] sm:$0xff]  ;;  %v5149_v22 = vld [vmem:[#allocation2 + $0x220] sm:$0xff] }
 0x668   :  { %v5035_v61 = vsub.f32 0.0, %v5013_v42  ;;  %5438 = vmatpush.msrb.mxu1 %v5323_v24  ;;  %v5251_v13 = vld [vmem:[#allocation2 + $0x550] sm:$0xff]  ;;  %v5150_v17 = vld [vmem:[#allocation2 + $0x228] sm:$0xff]  ;;  %v5141_v42 = vld [vmem:[#allocation2 + $0x1e0] sm:$0xff] }
 0x669   :  { %6086 = vtanh.f32 %v7313_v55  ;;  %v4996_v34 = vadd.f32 %v7304_v32, %v4995_v57  ;;  %v5243_v15 = vld [vmem:[#allocation2 + $0x510] sm:$0xff]  ;;  %v5142_v57 = vld [vmem:[#allocation2 + $0x1e8] sm:$0xff] }
 0x66a   :  { %v5036_v7 = vmul.f32 1.442695, %v5035_v61  ;;  %6088 = vpow2.f32 %v5017_v59  ;;  %5439 = vmatpush.msrb.mxu1 %v5315_v27  ;;  %v4914_v59 = vpop.f32.mrf.mxu2  ;;  %v5133_v61 = vld [vmem:[#allocation2 + $0x1a0] sm:$0xff]  ;;  %v5134_v16 = vld [vmem:[#allocation2 + $0x1a8] sm:$0xff]  ;;  %v5227_v24 = vld [vmem:[#allocation2 + $0x490] sm:$0xff] }
 0x66b   :  { %v5000_v52 = vsel %vm7324_vm10, %v7304_v32, %v4996_v34  ;;  %v5276_v32 = vld [vmem:[#allocation2 + $0x618] sm:$0xff]  ;;  %v5126_v27 = vld [vmem:[#allocation2 + $0x168] sm:$0xff] }
 0x66c   :  { %6090 = vpow2.f32 %v5036_v7  ;;  %v5005_v36 = vsel %vm5002_vm11, %v5004_v3, %v5000_v52  ;;  %5440 = vmatpush.msrb.mxu1 %v5307_v45  ;;  %5484 = vmatpush.msrb.mxu3 %v5276_v32  ;;  %v5868_v7 = vld [vmem:[%s7451_s0 + $0x78] sm:$0xff]  ;;  %v5125_v52 = vld [vmem:[#allocation2 + $0x160] sm:$0xff]  ;;  %v5219_v3 = vld [vmem:[#allocation2 + $0x450] sm:$0xff] }
 0x66d   :  { %v5220_v45 = vld [vmem:[#allocation2 + $0x458] sm:$0xff]  ;;  %v5110_v43 = vld [vmem:[#allocation2 + $0xe8] sm:$0xff]  ;;  %v5085_v32 = vld [vmem:[#allocation2 + $0x20] sm:$0xff] }
 0x66e   :  { %5441 = vmatpush.msrb.mxu1 %v5299_v51  ;;  %5485 = vmatpush.msrb.mxu3 %v5268_v40 }
 0x66f   :  { %v6087_v44 = vpop.eup %6086 }
 0x670   :  { %v7331_v23 = vmul.f32 %v6087_v44, %v5005_v36  ;;  %v6089_v12 = vpop.eup %6088  ;;  %5442 = vmatpush.msrb.mxu1 %v5291_v8  ;;  %5486 = vmatpush.msrb.mxu3 %v5260_v29  ;;  %v5117_v36 = vld [vmem:[#allocation2 + $0x120] sm:$0xff] }
 0x671   :  { %v7339_v19 = vadd.f32 1.0, %v6089_v12  ;;  %v5212_v12 = vld [vmem:[#allocation2 + $0x418] sm:$0xff]  ;;  %v5109_v8 = vld [vmem:[#allocation2 + $0xe0] sm:$0xff] }
 0x672   :  { %5869 = vst [vmem:[%s7453_s2 + $0x60] sm:$0xff] %v7331_v23  ;;  %5353 = vmatmul.f32.vlgmr.msra.gmra.mxu0 %v7331_v23  ;;  %5393 = vmatmul.f32.vlgmr.msra.gmra.mxu2 %v7331_v23  ;;  %v6091_v0 = vpop.eup %6090  ;;  %v5301_v29 = vld [vmem:[#allocation2 + $0x6e0] sm:$0xff] }
 0x673   :  { %5497 = vmatpush.msra.mxu0 %v5205_v1  ;;  %5537 = vmatpush.msra.mxu2 %v5206_v5  ;;  %v7341_v62 = vadd.f32 1.0, %v6091_v0  ;;  %6092 = vrcp.f32 %v7339_v19  ;;  %v5118_v1 = vld [vmem:[#allocation2 + $0x128] sm:$0xff]  ;;  %vm5025_vm14 = vweird.f32 %v7339_v19 }
 0x674   :  { %5443 = vmatpush.msrb.mxu1 %v5283_v60  ;;  %5487 = vmatpush.msrb.mxu3 %v5252_v33  ;;  %v5102_v60 = vld [vmem:[#allocation2 + $0xa8] sm:$0xff]  ;;  %v5293_v33 = vld [vmem:[#allocation2 + $0x6a0] sm:$0xff] }
 0x675   :  { %5498 = vmatpush.msra.mxu0 %v5197_v2  ;;  %5538 = vmatpush.msra.mxu2 %v5198_v37  ;;  %6094 = vrcp.f32 %v7341_v62  ;;  %v5211_v2 = vld [vmem:[#allocation2 + $0x410] sm:$0xff]  ;;  %v5050_v40 = vand.u32 2147483648, %v7341_v62  ;;  %vm5044_vm15 = vweird.f32 %v7341_v62 }
 0x676   :  { %5444 = vmatpush.msrb.mxu1 %v5275_v10  ;;  %5488 = vmatpush.msrb.mxu3 %v5244_v6  ;;  %v5094_v10 = vld [vmem:[#allocation2 + $0x68] sm:$0xff] }
 0x677   :  { %5499 = vmatpush.msra.mxu0 %v5189_v54  ;;  %5539 = vmatpush.msra.mxu2 %v5190_v49  ;;  %v5101_v49 = vld [vmem:[#allocation2 + $0xa0] sm:$0xff] }
 0x678   :  { %5445 = vmatpush.msrb.mxu1 %v5267_v9  ;;  %5489 = vmatpush.msrb.mxu3 %v5236_v11  ;;  %v5192_v11 = vld [vmem:[#allocation2 + $0x378] sm:$0xff] }
 0x679   :  { %5500 = vmatpush.msra.mxu0 %v5181_v63  ;;  %5540 = vmatpush.msra.mxu2 %v5182_v14  ;;  %v7347_v46 = vpop.eup %6092  ;;  %v5093_v14 = vld [vmem:[#allocation2 + $0x60] sm:$0xff] }
 0x67a   :  { %5433 = vmatmul.f32.vlgmr.msrb.gmra.mxu0 %v7331_v23  ;;  %5473 = vmatmul.f32.vlgmr.msrb.gmra.mxu2 %v7331_v23  ;;  %v5021_v30 = vmul.f32 %v7347_v46, %v7339_v19  ;;  %vm5026_vm12 = vweird.f32 %v7347_v46 }
 0x67b   :  { %5501 = vmatpush.msra.mxu0 %v5173_v58  ;;  %5541 = vmatpush.msra.mxu2 %v5174_v47  ;;  %v7349_v38 = vpop.eup %6094  ;;  %v5086_v58 = vld [vmem:[#allocation2 + $0x28] sm:$0xff]  ;;  %vm7373_vm0 = vmor %vm5025_vm14, %vm5026_vm12 }
 0x67c   :  { %5446 = vmatpush.msrb.mxu1 %v5259_v26  ;;  %v5040_v34 = vmul.f32 %v7349_v38, %v7341_v62  ;;  %5490 = vmatpush.msrb.mxu3 %v5228_v41  ;;  %v5022_v5 = vsub.f32 1.0, %v5021_v30  ;;  %vm5045_vm13 = vweird.f32 %v7349_v38  ;;  %v5208_v26 = vld [vmem:[#allocation2 + $0x3f8] sm:$0xff] }
 0x67d   :  { %5502 = vmatpush.msra.mxu0 %v5165_v50  ;;  %5542 = vmatpush.msra.mxu2 %v5166_v21  ;;  %v4894_v4 = vpop.f32.mrf.mxu1  ;;  %v5031_v50 = vand.u32 2147483648, %v7339_v19  ;;  %v5207_v21 = vld [vmem:[#allocation2 + $0x3f0] sm:$0xff]  ;;  %vm7381_vm1 = vmor %vm5044_vm15, %vm5045_vm13 }
 0x67e   :  { %5447 = vmatpush.msrb.mxu1 %v5251_v13  ;;  %v4895_v39 = vadd.f32 %v4894_v4, %v4874_v48  ;;  %v5041_v51 = vsub.f32 1.0, %v5040_v34  ;;  %5491 = vmatpush.msrb.mxu3 %v5220_v45  ;;  %v5023_v63 = vmul.f32 %v7347_v46, %v5022_v5  ;;  %v5176_v34 = vld [vmem:[#allocation2 + $0x2f8] sm:$0xff] }
 0x67f   :  { %5503 = vmatpush.msra.mxu0 %v5157_v35  ;;  %5543 = vmatpush.msra.mxu2 %v5158_v20  ;;  %v5029_v35 = vand.u32 2147483647, %v7339_v19  ;;  %v5048_v20 = vand.u32 2147483647, %v7341_v62  ;;  %v5152_v45 = vld [vmem:[#allocation2 + $0x238] sm:$0xff] }
 0x680   :  { %5448 = vmatpush.msrb.mxu1 %v5243_v15  ;;  %v5014_v0 = vadd.f32 %v5867_v56, %v4895_v39  ;;  %5492 = vmatpush.msrb.mxu3 %v5212_v12  ;;  %v5042_v25 = vmul.f32 %v7349_v38, %v5041_v51  ;;  %v5024_v47 = vadd.f32 %v7347_v46, %v5023_v63  ;;  %v5135_v51 = vld [vmem:[#allocation2 + $0x1b0] sm:$0xff]  ;;  %v5136_v56 = vld [vmem:[#allocation2 + $0x1b8] sm:$0xff] }
 0x681   :  { %5504 = vmatpush.msra.mxu0 %v5149_v22  ;;  %5544 = vmatpush.msra.mxu2 %v5150_v17  ;;  %v5199_v22 = vld [vmem:[#allocation2 + $0x3b0] sm:$0xff]  ;;  %v5200_v17 = vld [vmem:[#allocation2 + $0x3b8] sm:$0xff]  ;;  %vm5030_vm2 = vcmp.eq.f32.partialorder %v5029_v35, 8.507059e+37  ;;  %vm5049_vm3 = vcmp.eq.f32.partialorder %v5048_v20, 8.507059e+37  ;;  %v5302_v35 = vld [vmem:[#allocation2 + $0x6e8] sm:$0xff] }
 0x682   :  { %5449 = vmatpush.msrb.mxu1 %v5235_v18  ;;  %v5043_v9 = vadd.f32 %v7349_v38, %v5042_v25  ;;  %v5028_v19 = vsel %vm7373_vm0, %v7347_v46, %v5024_v47  ;;  %v5191_v18 = vld [vmem:[#allocation2 + $0x370] sm:$0xff]  ;;  %v5120_v63 = vld [vmem:[#allocation2 + $0x138] sm:$0xff]  ;;  %v5317_v47 = vld [vmem:[#allocation2 + $0x760] sm:$0xff] }
 0x683   :  { %v4934_v28 = vpop.f32.mrf.mxu3  ;;  %5505 = vmatpush.msra.mxu0 %v5141_v42  ;;  %5545 = vmatpush.msra.mxu2 %v5142_v57  ;;  %v5051_v42 = vor.u32 1.1754944e-38, %v5050_v40  ;;  %v5032_v57 = vor.u32 1.1754944e-38, %v5031_v50  ;;  %v5183_v46 = vld [vmem:[#allocation2 + $0x330] sm:$0xff]  ;;  %v5104_v50 = vld [vmem:[#allocation2 + $0xb8] sm:$0xff] }
 0x684   :  { %v4935_v53 = vadd.f32 %v4934_v28, %v4914_v59  ;;  %5450 = vmatpush.msrb.mxu1 %v5227_v24  ;;  %v5047_v62 = vsel %vm7381_vm1, %v7349_v38, %v5043_v9  ;;  %v5175_v38 = vld [vmem:[#allocation2 + $0x2f0] sm:$0xff]  ;;  %v5318_v9 = vld [vmem:[#allocation2 + $0x768] sm:$0xff] }
 0x685   :  { %5506 = vmatpush.msra.mxu0 %v5133_v61  ;;  %5546 = vmatpush.msra.mxu2 %v5134_v16  ;;  %v5033_v59 = vsel %vm5030_vm2, %v5032_v57, %v5028_v19  ;;  %v5052_v61 = vsel %vm5049_vm3, %v5051_v42, %v5047_v62  ;;  %v5184_v16 = vld [vmem:[#allocation2 + $0x338] sm:$0xff]  ;;  %v5167_v28 = vld [vmem:[#allocation2 + $0x2b0] sm:$0xff]  ;;  %v5285_v62 = vld [vmem:[#allocation2 + $0x660] sm:$0xff] }
 0x686   :  { %v5015_v44 = vadd.f32 %v5868_v7, %v4935_v53  ;;  %5451 = vmatpush.msrb.mxu1 %v5219_v3  ;;  %v5074_v4 = vmul.f32 %v5052_v61, %v7238_v31  ;;  %v5168_v7 = vld [vmem:[#allocation2 + $0x2b8] sm:$0xff]  ;;  %v5151_v3 = vld [vmem:[#allocation2 + $0x230] sm:$0xff]  ;;  %v5278_v42 = vld [vmem:[#allocation2 + $0x628] sm:$0xff] }
 0x687   :  { %5507 = vmatpush.msra.mxu0 %v5125_v52  ;;  %5547 = vmatpush.msra.mxu2 %v5126_v27  ;;  %v5159_v52 = vld [vmem:[#allocation2 + $0x270] sm:$0xff]  ;;  %v5160_v27 = vld [vmem:[#allocation2 + $0x278] sm:$0xff]  ;;  %v5269_v57 = vld [vmem:[#allocation2 + $0x5e0] sm:$0xff] }
 0x688   :  { %v5055_v37 = vsub.f32 0.0, %v5015_v44  ;;  %5452 = vmatpush.msrb.mxu1 %v5211_v2  ;;  %v5119_v25 = vld [vmem:[#allocation2 + $0x130] sm:$0xff]  ;;  %v5088_v19 = vld [vmem:[#allocation2 + $0x38] sm:$0xff]  ;;  %v5253_v61 = vld [vmem:[#allocation2 + $0x560] sm:$0xff] }
 0x689   :  { %5508 = vmatpush.msra.mxu0 %v5117_v36  ;;  %5548 = vmatpush.msra.mxu2 %v5118_v1  ;;  %v5143_v36 = vld [vmem:[#allocation2 + $0x1f0] sm:$0xff]  ;;  %v5144_v1 = vld [vmem:[#allocation2 + $0x1f8] sm:$0xff] }
 0x68a   :  { %v5056_v54 = vmul.f32 1.442695, %v5055_v37  ;;  %v5127_v37 = vld [vmem:[#allocation2 + $0x170] sm:$0xff] }
 0x68b   :  { %5509 = vmatpush.msra.mxu0 %v5109_v8  ;;  %5549 = vmatpush.msra.mxu2 %v5110_v43  ;;  %v5128_v8 = vld [vmem:[#allocation2 + $0x178] sm:$0xff]  ;;  %v5103_v40 = vld [vmem:[#allocation2 + $0xb0] sm:$0xff] }
 0x68c   :  { %6096 = vpow2.f32 %v5056_v54  ;;  %v5095_v20 = vld [vmem:[#allocation2 + $0x70] sm:$0xff] }
 0x68d   :  { %5510 = vmatpush.msra.mxu0 %v5101_v49  ;;  %5550 = vmatpush.msra.mxu2 %v5102_v60  ;;  %6098 = vtanh.f32 %v5014_v0  ;;  %v5333_v49 = vld [vmem:[#allocation2 + $0x7e0] sm:$0xff]  ;;  %v5334_v60 = vld [vmem:[#allocation2 + $0x7e8] sm:$0xff] }
 0x68f   :  { %5511 = vmatpush.msra.mxu0 %v5093_v14  ;;  %5551 = vmatpush.msra.mxu2 %v5094_v10  ;;  %v5325_v14 = vld [vmem:[#allocation2 + $0x7a0] sm:$0xff]  ;;  %v5326_v10 = vld [vmem:[#allocation2 + $0x7a8] sm:$0xff] }
 0x691   :  { %5512 = vmatpush.msra.mxu0 %v5085_v32  ;;  %5552 = vmatpush.msra.mxu2 %v5086_v58  ;;  %v5111_v32 = vld [vmem:[#allocation2 + $0xf0] sm:$0xff]  ;;  %v5112_v58 = vld [vmem:[#allocation2 + $0xf8] sm:$0xff] }
 0x692   :  { %v6097_v13 = vpop.eup %6096  ;;  %5513 = vmatmul.f32.vlgmr.msra.gmra.mxu0 %v7331_v23  ;;  %5553 = vmatmul.f32.vlgmr.msra.gmra.mxu2 %v7331_v23 }
 0x693   :  { %v5058_v15 = vadd.f32 1.0, %v6097_v13  ;;  %5577 = vmatpush.msrb.mxu0 %v5207_v21  ;;  %5617 = vmatpush.msrb.mxu2 %v5208_v26  ;;  %v6099_v6 = vpop.eup %6098  ;;  %v5309_v21 = vld [vmem:[#allocation2 + $0x720] sm:$0xff]  ;;  %v5310_v26 = vld [vmem:[#allocation2 + $0x728] sm:$0xff]  ;;  %v5096_v13 = vld [vmem:[#allocation2 + $0x78] sm:$0xff] }
 0x694   :  { %v5075_v30 = vmul.f32 %v6099_v6, %v5033_v59  ;;  %v5277_v6 = vld [vmem:[#allocation2 + $0x620] sm:$0xff]  ;;  %v5262_v59 = vld [vmem:[#allocation2 + $0x5a8] sm:$0xff] }
 0x695   :  { %6100 = vrcp.f32 %v5058_v15  ;;  %5578 = vmatpush.msrb.mxu0 %v5199_v22  ;;  %5618 = vmatpush.msrb.mxu2 %v5200_v17  ;;  %v5070_v31 = vand.u32 2147483648, %v5058_v15  ;;  %v5068_v44 = vand.u32 2147483647, %v5058_v15  ;;  %vm5064_vm5 = vweird.f32 %v5058_v15  ;;  %v5294_v22 = vld [vmem:[#allocation2 + $0x6a8] sm:$0xff]  ;;  %v5087_v17 = vld [vmem:[#allocation2 + $0x30] sm:$0xff] }
 0x696   :  { %v7394_v41 = vadd.f32 %v5075_v30, %v5074_v4  ;;  %v5246_v30 = vld [vmem:[#allocation2 + $0x528] sm:$0xff] }
 0x697   :  { %5579 = vmatpush.msrb.mxu0 %v5191_v18  ;;  %5619 = vmatpush.msrb.mxu2 %v5192_v11  ;;  %v5071_v2 = vor.u32 1.1754944e-38, %v5070_v31  ;;  %vm5069_vm7 = vcmp.eq.f32.partialorder %v5068_v44, 8.507059e+37  ;;  %v5270_v18 = vld [vmem:[#allocation2 + $0x5e8] sm:$0xff]  ;;  %v5261_v11 = vld [vmem:[#allocation2 + $0x5a0] sm:$0xff]  ;;  %v5320_v31 = vld [vmem:[#allocation2 + $0x778] sm:$0xff] }
 0x698   :  { %6102 = vtanh.f32 %v7394_v41  ;;  %v5230_v4 = vld [vmem:[#allocation2 + $0x4a8] sm:$0xff]  ;;  %v5312_v44 = vld [vmem:[#allocation2 + $0x738] sm:$0xff] }
 0x699   :  { %5580 = vmatpush.msrb.mxu0 %v5183_v46  ;;  %5620 = vmatpush.msrb.mxu2 %v5184_v16  ;;  %v5254_v46 = vld [vmem:[#allocation2 + $0x568] sm:$0xff]  ;;  %v5245_v16 = vld [vmem:[#allocation2 + $0x520] sm:$0xff] }
 0x69b   :  { %v6101_v24 = vpop.eup %6100  ;;  %5581 = vmatpush.msrb.mxu0 %v5175_v38  ;;  %5621 = vmatpush.msrb.mxu2 %v5176_v34  ;;  %v5238_v38 = vld [vmem:[#allocation2 + $0x4e8] sm:$0xff]  ;;  %v5229_v34 = vld [vmem:[#allocation2 + $0x4a0] sm:$0xff] }
 0x69c   :  { %v5060_v53 = vmul.f32 %v6101_v24, %v5058_v15  ;;  %vm5065_vm4 = vweird.f32 %v6101_v24  ;;  %v5286_v15 = vld [vmem:[#allocation2 + $0x668] sm:$0xff] }
 0x69d   :  { %5582 = vmatpush.msrb.mxu0 %v5167_v28  ;;  %5622 = vmatpush.msrb.mxu2 %v5168_v7  ;;  %vm5066_vm6 = vmor %vm5064_vm5, %vm5065_vm4  ;;  %v5221_v28 = vld [vmem:[#allocation2 + $0x460] sm:$0xff]  ;;  %v5222_v7 = vld [vmem:[#allocation2 + $0x468] sm:$0xff] }
 0x69e   :  { %v5061_v48 = vsub.f32 1.0, %v5060_v53  ;;  %v6103_v43 = vpop.eup %6102  ;;  %v5214_v53 = vld [vmem:[#allocation2 + $0x428] sm:$0xff] }
 0x69f   :  { %5583 = vmatpush.msrb.mxu0 %v5159_v52  ;;  %5623 = vmatpush.msrb.mxu2 %v5160_v27  ;;  %v5335_v52 = vld [vmem:[#allocation2 + $0x7f0] sm:$0xff]  ;;  %v5336_v27 = vld [vmem:[#allocation2 + $0x7f8] sm:$0xff] }
 0x6a0   :  { %v5062_v39 = vmul.f32 %v6101_v24, %v5061_v48  ;;  %v5327_v48 = vld [vmem:[#allocation2 + $0x7b0] sm:$0xff] }
 0x6a1   :  { %5584 = vmatpush.msrb.mxu0 %v5151_v3  ;;  %5624 = vmatpush.msrb.mxu2 %v5152_v45  ;;  %v5328_v3 = vld [vmem:[#allocation2 + $0x7b8] sm:$0xff]  ;;  %v5319_v45 = vld [vmem:[#allocation2 + $0x770] sm:$0xff] }
 0x6a2   :  { %v5063_v5 = vadd.f32 %v6101_v24, %v5062_v39  ;;  %v5311_v39 = vld [vmem:[#allocation2 + $0x730] sm:$0xff] }
 0x6a3   :  { %5585 = vmatpush.msrb.mxu0 %v5143_v36  ;;  %5625 = vmatpush.msrb.mxu2 %v5144_v1  ;;  %v5303_v36 = vld [vmem:[#allocation2 + $0x6f0] sm:$0xff]  ;;  %v5304_v1 = vld [vmem:[#allocation2 + $0x6f8] sm:$0xff] }
 0x6a4   :  { %v5067_v12 = vsel %vm5066_vm6, %v6101_v24, %v5063_v5  ;;  %v5213_v24 = vld [vmem:[#allocation2 + $0x420] sm:$0xff]  ;;  %v5295_v5 = vld [vmem:[#allocation2 + $0x6b0] sm:$0xff] }
 0x6a5   :  { %v5072_v0 = vsel %vm5069_vm7, %v5071_v2, %v5067_v12  ;;  %5586 = vmatpush.msrb.mxu0 %v5135_v51  ;;  %5626 = vmatpush.msrb.mxu2 %v5136_v56  ;;  %v5296_v51 = vld [vmem:[#allocation2 + $0x6b8] sm:$0xff]  ;;  %v5287_v56 = vld [vmem:[#allocation2 + $0x670] sm:$0xff] }
 0x6a6   :  { %v7397_v54 = vmul.f32 %v6103_v43, %v5072_v0  ;;  %v5288_v2 = vld [vmem:[#allocation2 + $0x678] sm:$0xff]  ;;  %v5279_v12 = vld [vmem:[#allocation2 + $0x630] sm:$0xff] }
 0x6a7   :  { %5587 = vmatpush.msrb.mxu0 %v5127_v37  ;;  %5627 = vmatpush.msrb.mxu2 %v5128_v8  ;;  %v5280_v37 = vld [vmem:[#allocation2 + $0x638] sm:$0xff]  ;;  %v5271_v8 = vld [vmem:[#allocation2 + $0x5f0] sm:$0xff] }
 0x6a8   :  { %5870 = vst [vmem:[%s7453_s2 + $0x18] sm:$0xff] %v7397_v54  ;;  %5373 = vmatmul.f32.vlgmr.msra.gmra.mxu1 %v7397_v54  ;;  %5413 = vmatmul.f32.vlgmr.msra.gmra.mxu3 %v7397_v54  ;;  %v5272_v43 = vld [vmem:[#allocation2 + $0x5f8] sm:$0xff]  ;;  %v5263_v0 = vld [vmem:[#allocation2 + $0x5b0] sm:$0xff] }
 0x6a9   :  { %5517 = vmatpush.msra.mxu1 %v5333_v49  ;;  %5557 = vmatpush.msra.mxu3 %v5334_v60  ;;  %v5264_v49 = vld [vmem:[#allocation2 + $0x5b8] sm:$0xff]  ;;  %v5255_v60 = vld [vmem:[#allocation2 + $0x570] sm:$0xff] }
 0x6aa   :  { %5588 = vmatpush.msrb.mxu0 %v5119_v25  ;;  %5628 = vmatpush.msrb.mxu2 %v5120_v63  ;;  %v5256_v25 = vld [vmem:[#allocation2 + $0x578] sm:$0xff]  ;;  %v5247_v63 = vld [vmem:[#allocation2 + $0x530] sm:$0xff] }
 0x6ab   :  { %5518 = vmatpush.msra.mxu1 %v5325_v14  ;;  %5558 = vmatpush.msra.mxu3 %v5326_v10  ;;  %v5248_v14 = vld [vmem:[#allocation2 + $0x538] sm:$0xff]  ;;  %v5239_v10 = vld [vmem:[#allocation2 + $0x4f0] sm:$0xff] }
 0x6ac   :  { %5589 = vmatpush.msrb.mxu0 %v5111_v32  ;;  %5629 = vmatpush.msrb.mxu2 %v5112_v58  ;;  %v5240_v32 = vld [vmem:[#allocation2 + $0x4f8] sm:$0xff]  ;;  %v5231_v58 = vld [vmem:[#allocation2 + $0x4b0] sm:$0xff] }
 0x6ad   :  { %5519 = vmatpush.msra.mxu1 %v5317_v47  ;;  %5559 = vmatpush.msra.mxu3 %v5318_v9  ;;  %v5232_v47 = vld [vmem:[#allocation2 + $0x4b8] sm:$0xff]  ;;  %v5223_v9 = vld [vmem:[#allocation2 + $0x470] sm:$0xff] }
 0x6ae   :  { %5590 = vmatpush.msrb.mxu0 %v5103_v40  ;;  %5630 = vmatpush.msrb.mxu2 %v5104_v50  ;;  %v5224_v40 = vld [vmem:[#allocation2 + $0x478] sm:$0xff]  ;;  %v5215_v50 = vld [vmem:[#allocation2 + $0x430] sm:$0xff] }
 0x6af   :  { %5520 = vmatpush.msra.mxu1 %v5309_v21  ;;  %5560 = vmatpush.msra.mxu3 %v5310_v26  ;;  %v5216_v21 = vld [vmem:[#allocation2 + $0x438] sm:$0xff] }
 0x6b0   :  { %5453 = vmatmul.f32.vlgmr.msrb.gmra.mxu1 %v7397_v54  ;;  %5493 = vmatmul.f32.vlgmr.msrb.gmra.mxu3 %v7397_v54 }
 0x6b1   :  { %5521 = vmatpush.msra.mxu1 %v5301_v29  ;;  %5561 = vmatpush.msra.mxu3 %v5302_v35  ;;  %v5871_v35 = vld [vmem:[%s7451_s0 + $0x1c0] sm:$0xff] }
 0x6b2   :  { %5591 = vmatpush.msrb.mxu0 %v5095_v20  ;;  %5631 = vmatpush.msrb.mxu2 %v5096_v13 }
 0x6b3   :  { %5522 = vmatpush.msra.mxu1 %v5293_v33  ;;  %5562 = vmatpush.msra.mxu3 %v5294_v22 }
 0x6b4   :  { %5592 = vmatpush.msrb.mxu0 %v5087_v17  ;;  %5632 = vmatpush.msrb.mxu2 %v5088_v19  ;;  %v5872_v19 = vld [vmem:[%s7451_s0 + $0x1c8] sm:$0xff] }
 0x6b5   :  { %5593 = vmatmul.f32.vlgmr.msrb.gmra.mxu0 %v7331_v23  ;;  %5633 = vmatmul.f32.vlgmr.msrb.gmra.mxu2 %v7331_v23  ;;  %v5237_v23 = vld [vmem:[#allocation2 + $0x4e0] sm:$0xff] }
 0x6b6   :  { %5523 = vmatpush.msra.mxu1 %v5285_v62  ;;  %5563 = vmatpush.msra.mxu3 %v5286_v15 }
 0x6b8   :  { %5524 = vmatpush.msra.mxu1 %v5277_v6  ;;  %5564 = vmatpush.msra.mxu3 %v5278_v42 }
 0x6ba   :  { %5525 = vmatpush.msra.mxu1 %v5269_v57  ;;  %5565 = vmatpush.msra.mxu3 %v5270_v18 }
 0x6bc   :  { %5526 = vmatpush.msra.mxu1 %v5261_v11  ;;  %5566 = vmatpush.msra.mxu3 %v5262_v59  ;;  %v5874_v11 = vld [vmem:[%s7451_s0 + $0x1d8] sm:$0xff] }
 0x6be   :  { %5527 = vmatpush.msra.mxu1 %v5253_v61  ;;  %5567 = vmatpush.msra.mxu3 %v5254_v46 }
 0x6c0   :  { %5528 = vmatpush.msra.mxu1 %v5245_v16  ;;  %5568 = vmatpush.msra.mxu3 %v5246_v30 }
 0x6c2   :  { %5529 = vmatpush.msra.mxu1 %v5237_v23  ;;  %5569 = vmatpush.msra.mxu3 %v5238_v38 }
 0x6c4   :  { %5530 = vmatpush.msra.mxu1 %v5229_v34  ;;  %5570 = vmatpush.msra.mxu3 %v5230_v4 }
 0x6c6   :  { %5531 = vmatpush.msra.mxu1 %v5221_v28  ;;  %5571 = vmatpush.msra.mxu3 %v5222_v7 }
 0x6c8   :  { %5532 = vmatpush.msra.mxu1 %v5213_v24  ;;  %5572 = vmatpush.msra.mxu3 %v5214_v53 }
 0x6c9   :  { %5533 = vmatmul.f32.vlgmr.msra.gmra.mxu1 %v7397_v54  ;;  %5573 = vmatmul.f32.vlgmr.msra.gmra.mxu3 %v7397_v54 }
 0x6ca   :  { %5597 = vmatpush.msrb.mxu1 %v5335_v52  ;;  %5637 = vmatpush.msrb.mxu3 %v5336_v27  ;;  %v5873_v27 = vld [vmem:[%s7451_s0 + $0x1d0] sm:$0xff] }
 0x6cc   :  { %5598 = vmatpush.msrb.mxu1 %v5327_v48  ;;  %5638 = vmatpush.msrb.mxu3 %v5328_v3 }
 0x6ce   :  { %5599 = vmatpush.msrb.mxu1 %v5319_v45  ;;  %5639 = vmatpush.msrb.mxu3 %v5320_v31 }
 0x6d0   :  { %5600 = vmatpush.msrb.mxu1 %v5311_v39  ;;  %5640 = vmatpush.msrb.mxu3 %v5312_v44 }
 0x6d2   :  { %5601 = vmatpush.msrb.mxu1 %v5303_v36  ;;  %5641 = vmatpush.msrb.mxu3 %v5304_v1 }
 0x6d4   :  { %5602 = vmatpush.msrb.mxu1 %v5295_v5  ;;  %5642 = vmatpush.msrb.mxu3 %v5296_v51 }
 0x6d6   :  { %5603 = vmatpush.msrb.mxu1 %v5287_v56  ;;  %5643 = vmatpush.msrb.mxu3 %v5288_v2 }
 0x6d8   :  { %5604 = vmatpush.msrb.mxu1 %v5279_v12  ;;  %5644 = vmatpush.msrb.mxu3 %v5280_v37  ;;  %v5661_v12 = vld [vmem:[%s7451_s0 + $0x20] sm:$0xff] }
 0x6da   :  { %5605 = vmatpush.msrb.mxu1 %v5271_v8  ;;  %5645 = vmatpush.msrb.mxu3 %v5272_v43 }
 0x6dc   :  { %5606 = vmatpush.msrb.mxu1 %v5263_v0  ;;  %5646 = vmatpush.msrb.mxu3 %v5264_v49 }
 0x6de   :  { %5607 = vmatpush.msrb.mxu1 %v5255_v60  ;;  %5647 = vmatpush.msrb.mxu3 %v5256_v25 }
 0x6e0   :  { %5608 = vmatpush.msrb.mxu1 %v5247_v63  ;;  %5648 = vmatpush.msrb.mxu3 %v5248_v14 }
 0x6e2   :  { %5609 = vmatpush.msrb.mxu1 %v5239_v10  ;;  %5649 = vmatpush.msrb.mxu3 %v5240_v32 }
 0x6e4   :  { %5610 = vmatpush.msrb.mxu1 %v5231_v58  ;;  %5650 = vmatpush.msrb.mxu3 %v5232_v47 }
 0x6e6   :  { %5611 = vmatpush.msrb.mxu1 %v5223_v9  ;;  %5651 = vmatpush.msrb.mxu3 %v5224_v40 }
 0x6e8   :  { %5612 = vmatpush.msrb.mxu1 %v5215_v50  ;;  %5652 = vmatpush.msrb.mxu3 %v5216_v21  ;;  %v5662_v21 = vld [vmem:[%s7451_s0 + $0x28] sm:$0xff] }
 0x6e9   :  { %5613 = vmatmul.f32.vlgmr.msrb.gmra.mxu1 %v7397_v54  ;;  %5653 = vmatmul.f32.vlgmr.msrb.gmra.mxu3 %v7397_v54 }
 0x6ef   :  { %v5354_v26 = vpop.f32.mrf.mxu0 }
 0x6f5   :  { %v5394_v33 = vpop.f32.mrf.mxu2 }
 0x6f7   :  { %v5434_v7 = vpop.f32.mrf.mxu0 }
 0x6fd   :  { %v5474_v57 = vpop.f32.mrf.mxu2 }
 0x70f   :  { %v5514_v5 = vpop.f32.mrf.mxu0 }
 0x715   :  { %v5554_v47 = vpop.f32.mrf.mxu2 }
 0x725   :  { %v5374_v29 = vpop.f32.mrf.mxu1 }
 0x726   :  { %v5375_v20 = vadd.f32 %v5374_v29, %v5354_v26 }
 0x728   :  { %v5665_v13 = vadd.f32 %v5871_v35, %v5375_v20 }
 0x72a   :  { %v5669_v22 = vsub.f32 0.0, %v5665_v13 }
 0x72b   :  { %v5414_v17 = vpop.f32.mrf.mxu3 }
 0x72c   :  { %v5670_v62 = vmul.f32 1.442695, %v5669_v22  ;;  %v5415_v15 = vadd.f32 %v5414_v17, %v5394_v33 }
 0x72d   :  { %v5454_v4 = vpop.f32.mrf.mxu1 }
 0x72e   :  { %6104 = vpow2.f32 %v5670_v62  ;;  %v5666_v6 = vadd.f32 %v5872_v19, %v5415_v15  ;;  %v5455_v53 = vadd.f32 %v5454_v4, %v5434_v7 }
 0x730   :  { %v5688_v54 = vsub.f32 0.0, %v5666_v6  ;;  %v5667_v31 = vadd.f32 %v5873_v27, %v5455_v53  ;;  %v5664_v27 = vld [vmem:[%s7451_s0 + $0x38] sm:$0xff] }
 0x732   :  { %v5689_v42 = vmul.f32 1.442695, %v5688_v54 }
 0x733   :  { %v5494_v18 = vpop.f32.mrf.mxu3 }
 0x734   :  { %v6105_v59 = vpop.eup %6104  ;;  %6106 = vpow2.f32 %v5689_v42  ;;  %v5495_v61 = vadd.f32 %v5494_v18, %v5474_v57 }
 0x735   :  { %v5672_v46 = vadd.f32 1.0, %v6105_v59 }
 0x736   :  { %v5668_v16 = vadd.f32 %v5874_v11, %v5495_v61 }
 0x737   :  { %6108 = vrcp.f32 %v5672_v46  ;;  %v5684_v1 = vand.u32 2147483648, %v5672_v46  ;;  %vm5678_vm9 = vweird.f32 %v5672_v46  ;;  %v5682_v56 = vand.u32 2147483647, %v5672_v46 }
 0x738   :  { %v5708_v30 = vsub.f32 0.0, %v5668_v16 }
 0x739   :  { %v5685_v25 = vor.u32 1.1754944e-38, %v5684_v1  ;;  %vm5683_vm13 = vcmp.eq.f32.partialorder %v5682_v56, 8.507059e+37 }
 0x73a   :  { %v6107_v23 = vpop.eup %6106  ;;  %v5709_v38 = vmul.f32 1.442695, %v5708_v30 }
 0x73b   :  { %v5691_v34 = vadd.f32 1.0, %v6107_v23 }
 0x73c   :  { %6110 = vpow2.f32 %v5709_v38 }
 0x73d   :  { %v6109_v28 = vpop.eup %6108  ;;  %6112 = vrcp.f32 %v5691_v34  ;;  %v5703_v37 = vand.u32 2147483648, %v5691_v34  ;;  %v5701_v60 = vand.u32 2147483647, %v5691_v34  ;;  %vm5697_vm12 = vweird.f32 %v5691_v34 }
 0x73e   :  { %v5674_v24 = vmul.f32 %v6109_v28, %v5672_v46  ;;  %vm5679_vm8 = vweird.f32 %v6109_v28 }
 0x73f   :  { %vm7428_vm10 = vmor %vm5678_vm9, %vm5679_vm8  ;;  %v5704_v32 = vor.u32 1.1754944e-38, %v5703_v37  ;;  %vm5702_vm15 = vcmp.eq.f32.partialorder %v5701_v60, 8.507059e+37 }
 0x740   :  { %v5675_v52 = vsub.f32 1.0, %v5674_v24 }
 0x742   :  { %v6111_v48 = vpop.eup %6110  ;;  %v5676_v3 = vmul.f32 %v6109_v28, %v5675_v52 }
 0x743   :  { %v6113_v45 = vpop.eup %6112  ;;  %v5711_v39 = vadd.f32 1.0, %v6111_v48 }
 0x744   :  { %v5693_v44 = vmul.f32 %v6113_v45, %v5691_v34  ;;  %v5677_v36 = vadd.f32 %v6109_v28, %v5676_v3  ;;  %vm5698_vm11 = vweird.f32 %v6113_v45  ;;  %v5594_v3 = vpop.f32.mrf.mxu0 }
 0x745   :  { %6114 = vrcp.f32 %v5711_v39  ;;  %vm5699_vm14 = vmor %vm5697_vm12, %vm5698_vm11  ;;  %v5723_v42 = vand.u32 2147483648, %v5711_v39  ;;  %vm5717_vm1 = vweird.f32 %v5711_v39  ;;  %v5721_v57 = vand.u32 2147483647, %v5711_v39 }
 0x746   :  { %v5694_v51 = vsub.f32 1.0, %v5693_v44  ;;  %v5534_v2 = vpop.f32.mrf.mxu1  ;;  %6116 = vtanh.f32 %v5667_v31  ;;  %v5681_v49 = vsel %vm7428_vm10, %v6109_v28, %v5677_v36  ;;  %v5634_v28 = vpop.f32.mrf.mxu2  ;;  %v5663_v36 = vld [vmem:[%s7451_s0 + $0x30] sm:$0xff] }
 0x747   :  { %v5535_v43 = vadd.f32 %v5534_v2, %v5514_v5  ;;  %v5686_v58 = vsel %vm5683_vm13, %v5685_v25, %v5681_v49  ;;  %v5724_v59 = vor.u32 1.1754944e-38, %v5723_v42  ;;  %vm5722_vm3 = vcmp.eq.f32.partialorder %v5721_v57, 8.507059e+37 }
 0x748   :  { %v5695_v0 = vmul.f32 %v6113_v45, %v5694_v51 }
 0x749   :  { %v5732_v63 = vadd.f32 %v5661_v12, %v5535_v43 }
 0x74a   :  { %v5696_v14 = vadd.f32 %v6113_v45, %v5695_v0 }
 0x74b   :  { %v6115_v10 = vpop.eup %6114  ;;  %v5736_v35 = vsub.f32 0.0, %v5732_v63 }
 0x74c   :  { %v5700_v9 = vsel %vm5699_vm14, %v6113_v45, %v5696_v14  ;;  %v5713_v40 = vmul.f32 %v6115_v10, %v5711_v39  ;;  %v5574_v50 = vpop.f32.mrf.mxu3  ;;  %v6117_v26 = vpop.eup %6116  ;;  %vm5718_vm0 = vweird.f32 %v6115_v10 }
 0x74d   :  { %v5705_v29 = vsel %vm5702_vm15, %v5704_v32, %v5700_v9  ;;  %v5575_v20 = vadd.f32 %v5574_v50, %v5554_v47  ;;  %v5728_v33 = vmul.f32 %v6117_v26, %v5686_v58  ;;  %v5737_v15 = vmul.f32 1.442695, %v5736_v35  ;;  %vm5719_vm2 = vmor %vm5717_vm1, %vm5718_vm0 }
 0x74e   :  { %v5727_v13 = vmul.f32 %v5705_v29, %v7313_v55  ;;  %v5714_v22 = vsub.f32 1.0, %v5713_v40 }
 0x74f   :  { %v5733_v17 = vadd.f32 %v5662_v21, %v5575_v20 }
 0x750   :  { %v5729_v19 = vadd.f32 %v5728_v33, %v5727_v13  ;;  %v5715_v62 = vmul.f32 %v6115_v10, %v5714_v22 }
 0x751   :  { %v5755_v6 = vsub.f32 0.0, %v5733_v17 }
 0x752   :  { %6118 = vtanh.f32 %v5729_v19  ;;  %v5716_v54 = vadd.f32 %v6115_v10, %v5715_v62 }
 0x753   :  { %v5756_v18 = vmul.f32 1.442695, %v5755_v6  ;;  %6120 = vpow2.f32 %v5737_v15 }
 0x754   :  { %v5720_v11 = vsel %vm5719_vm2, %v6115_v10, %v5716_v54 }
 0x755   :  { %6122 = vpow2.f32 %v5756_v18  ;;  %v5725_v61 = vsel %vm5722_vm3, %v5724_v59, %v5720_v11 }
 0x758   :  { %v6119_v55 = vpop.eup %6118 }
 0x759   :  { %v5731_v46 = vmul.f32 %v6119_v55, %v5725_v61  ;;  %v6121_v16 = vpop.eup %6120 }
 0x75a   :  { %v5739_v23 = vadd.f32 1.0, %v6121_v16 }
 0x75b   :  { %5875 = vst [vmem:[%s7453_s2 + $0x70] sm:$0xff] %v5731_v46  ;;  %v6123_v30 = vpop.eup %6122 }
 0x75c   :  { %v5758_v38 = vadd.f32 1.0, %v6123_v30  ;;  %6124 = vrcp.f32 %v5739_v23  ;;  %vm5745_vm6 = vweird.f32 %v5739_v23  ;;  %v5751_v43 = vand.u32 2147483648, %v5739_v23 }
 0x75d   :  { %v5749_v0 = vand.u32 2147483647, %v5739_v23 }
 0x75e   :  { %6126 = vrcp.f32 %v5758_v38  ;;  %v5770_v8 = vand.u32 2147483648, %v5758_v38  ;;  %vm5764_vm7 = vweird.f32 %v5758_v38  ;;  %v5768_v49 = vand.u32 2147483647, %v5758_v38 }
 0x75f   :  { %v5752_v58 = vor.u32 1.1754944e-38, %v5751_v43  ;;  %vm5750_vm10 = vcmp.eq.f32.partialorder %v5749_v0, 8.507059e+37 }
 0x760   :  { %v5771_v32 = vor.u32 1.1754944e-38, %v5770_v8  ;;  %vm5769_vm11 = vcmp.eq.f32.partialorder %v5768_v49, 8.507059e+37 }
 0x762   :  { %v6125_v34 = vpop.eup %6124 }
 0x763   :  { %v5741_v7 = vmul.f32 %v6125_v34, %v5739_v23  ;;  %vm5746_vm4 = vweird.f32 %v6125_v34 }
 0x764   :  { %v6127_v4 = vpop.eup %6126  ;;  %vm5747_vm8 = vmor %vm5745_vm6, %vm5746_vm4 }
 0x765   :  { %v5760_v24 = vmul.f32 %v6127_v4, %v5758_v38  ;;  %v5742_v39 = vsub.f32 1.0, %v5741_v7  ;;  %vm5765_vm5 = vweird.f32 %v6127_v4 }
 0x766   :  { %v5614_v53 = vpop.f32.mrf.mxu1  ;;  %vm5766_vm9 = vmor %vm5764_vm7, %vm5765_vm5 }
 0x767   :  { %v5615_v45 = vadd.f32 %v5614_v53, %v5594_v3  ;;  %v5761_v44 = vsub.f32 1.0, %v5760_v24  ;;  %v5743_v2 = vmul.f32 %v6125_v34, %v5742_v39 }
 0x769   :  { %v5734_v5 = vadd.f32 %v5663_v36, %v5615_v45  ;;  %v5762_v56 = vmul.f32 %v6127_v4, %v5761_v44  ;;  %v5744_v12 = vadd.f32 %v6125_v34, %v5743_v2 }
 0x76b   :  { %v5763_v37 = vadd.f32 %v6127_v4, %v5762_v56  ;;  %v5748_v25 = vsel %vm5747_vm8, %v6125_v34, %v5744_v12 }
 0x76c   :  { %v5654_v52 = vpop.f32.mrf.mxu3  ;;  %v5753_v47 = vsel %vm5750_vm10, %v5752_v58, %v5748_v25 }
 0x76d   :  { %v5655_v48 = vadd.f32 %v5654_v52, %v5634_v28  ;;  %v5767_v63 = vsel %vm5766_vm9, %v6127_v4, %v5763_v37 }
 0x76e   :  { %v5772_v9 = vsel %vm5769_vm11, %v5771_v32, %v5767_v63 }
 0x76f   :  { %v5735_v31 = vadd.f32 %v5664_v27, %v5655_v48  ;;  %v5794_v50 = vmul.f32 %v5772_v9, %v7394_v41 }
 0x771   :  { %v5775_v1 = vsub.f32 0.0, %v5735_v31 }
 0x773   :  { %v5776_v51 = vmul.f32 1.442695, %v5775_v1 }
 0x775   :  { %6128 = vpow2.f32 %v5776_v51 }
 0x776   :  { %6130 = vtanh.f32 %v5734_v5 }
 0x77b   :  { %v6129_v60 = vpop.eup %6128 }
 0x77c   :  { %v5778_v14 = vadd.f32 1.0, %v6129_v60  ;;  %v6131_v10 = vpop.eup %6130 }
 0x77d   :  { %v5795_v40 = vmul.f32 %v6131_v10, %v5753_v47 }
 0x77e   :  { %6132 = vrcp.f32 %v5778_v14  ;;  %v5790_v20 = vand.u32 2147483648, %v5778_v14  ;;  %v5788_v33 = vand.u32 2147483647, %v5778_v14  ;;  %vm5784_vm13 = vweird.f32 %v5778_v14 }
 0x77f   :  { %v5796_v26 = vadd.f32 %v5795_v40, %v5794_v50 }
 0x780   :  { %v5791_v17 = vor.u32 1.1754944e-38, %v5790_v20  ;;  %vm5789_vm15 = vcmp.eq.f32.partialorder %v5788_v33, 8.507059e+37 }
 0x781   :  { %6134 = vtanh.f32 %v5796_v26 }
 0x784   :  { %v6133_v21 = vpop.eup %6132 }
 0x785   :  { %v5780_v29 = vmul.f32 %v6133_v21, %v5778_v14  ;;  %vm5785_vm12 = vweird.f32 %v6133_v21 }
 0x786   :  { %vm5786_vm14 = vmor %vm5784_vm13, %vm5785_vm12 }
 0x787   :  { %v5781_v35 = vsub.f32 1.0, %v5780_v29  ;;  %v6135_v62 = vpop.eup %6134 }
 0x789   :  { %v5782_v13 = vmul.f32 %v6133_v21, %v5781_v35 }
 0x78b   :  { %v5783_v22 = vadd.f32 %v6133_v21, %v5782_v13 }
 0x78d   :  { %v5787_v19 = vsel %vm5786_vm14, %v6133_v21, %v5783_v22 }
 0x78e   :  { %v5792_v15 = vsel %vm5789_vm15, %v5791_v17, %v5787_v19 }
 0x78f   :  { %v5798_v6 = vmul.f32 %v6135_v62, %v5792_v15 }
 0x791   :  { %5800 = vst [vmem:[%s7453_s2 + $0x8] sm:$0xff] %v5798_v6 }
 0x792   :  { %5805 = vsyncpa [#allocation3], 1 }

</bundles_post_ra>
